<compile_context>
chip_gen: v7x
topology: tpu7x:2x2x1
jax: 0.10.0
libtpu: 0.0.40
codegen_flags: <defaults>
</compile_context>

<pallas_src>
import math
from functools import partial

import jax
import jax.numpy as jnp
from jax.experimental import pallas as pl
from jax.experimental.pallas import tpu as pltpu

# ----------------------------- configuration --------------------------------
N_BLOCK = 2
N_EMBD = 32
H_SIZE = 8                      # per-head dimension
P_SIZE = 4
IM_SIZE = 16
C_DIM = 4
N_CLASS = 10
H_DIM = 4 * N_EMBD
N_HEAD = N_EMBD // H_SIZE
N_PATCH = (IM_SIZE // P_SIZE) ** 2
PATCH_DIM = C_DIM * P_SIZE * P_SIZE
SEQ = N_PATCH + 1               # +1 for the cls token (stored at the LAST row)
LN_EPS = 1e-5
BATCH = 2
HEAD_PAD = 128                  # lane-dense padded logits width (sliced to N_CLASS)


# --------------------------- in-kernel helpers --------------------------------
def _layernorm(x, w):
    """LayerNorm (no bias, bias=False) with elementwise scale w (f32)."""
    mu = jnp.mean(x, axis=-1, keepdims=True)
    xc = x - mu
    var = jnp.mean(xc * xc, axis=-1, keepdims=True)
    return xc * jax.lax.rsqrt(var + LN_EPS) * w


def _mm(a, b):
    """MXU matmul, f32 operands, f32 accumulation (kernel is latency-bound)."""
    return jnp.dot(a, b, preferred_element_type=jnp.float32)


def _erf(x):
    """Abramowitz & Stegun 7.1.26 erf approximation, |err| < 1.5e-7."""
    sgn = jnp.where(x < 0.0, -1.0, 1.0)
    a = jnp.abs(x)
    t = 1.0 / (1.0 + 0.3275911 * a)
    poly = ((((1.061405429 * t - 1.453152027) * t + 1.421413741) * t
             - 0.284496736) * t + 0.254829592) * t
    return sgn * (1.0 - poly * jnp.exp(-a * a))


def _gelu_exact(x):
    """Exact-erf GELU (PyTorch nn.GELU default)."""
    return 0.5 * x * (1.0 + _erf(x * (1.0 / math.sqrt(2.0))))


# ------------------------------- fused kernel ---------------------------------
def vit_kernel(bb, p_ref, lnp_w_ref, w_emb_ref, lne_w_ref, cls_pos_ref,
               ln1_w_ref, w_qkv_ref, w_proj_ref,
               ln2_w_ref, w_fc_ref, w_fcp_ref,
               lnf_w_ref, w_head_ref, out_ref):
    rows = []
    for b in range(bb):                                    # unrolled; chains interleave
        # ---- patch embedding: LN -> Linear -> LN ----
        p = _layernorm(p_ref[b], lnp_w_ref[...])           # (N_PATCH, PATCH_DIM)
        emb = _layernorm(_mm(p, w_emb_ref[...]), lne_w_ref[...])   # (N_PATCH, N_EMBD)

        # ---- cls token (last row) + positional encoding; aligned zero-row append ----
        x = cls_pos_ref[...] + jnp.concatenate(
            [emb, jnp.zeros((1, N_EMBD), jnp.float32)], axis=0)    # (SEQ, N_EMBD)

        for blk in range(N_BLOCK):
            # ---- multi-head self-attention (fused QKV, batched over heads) ----
            h = _layernorm(x, ln1_w_ref[blk])                       # (SEQ, N_EMBD)
            qkv = _mm(h, w_qkv_ref[blk])                            # (SEQ, 3*N_EMBD)
            q = jnp.stack([qkv[:, i * H_SIZE:(i + 1) * H_SIZE]
                           for i in range(N_HEAD)], axis=0)         # (H, SEQ, d)
            k = jnp.stack([qkv[:, N_EMBD + i * H_SIZE:N_EMBD + (i + 1) * H_SIZE]
                           for i in range(N_HEAD)], axis=0)
            v = jnp.stack([qkv[:, 2 * N_EMBD + i * H_SIZE:2 * N_EMBD + (i + 1) * H_SIZE]
                           for i in range(N_HEAD)], axis=0)
            # softmax scale already folded into the Q columns of w_qkv host-side
            s = jnp.einsum('hqd,hkd->hqk', q, k,
                           preferred_element_type=jnp.float32)      # (H, SEQ, SEQ)
            s = s - jnp.max(s, axis=-1, keepdims=True)
            pr = jnp.exp(s)
            pr = pr / jnp.sum(pr, axis=-1, keepdims=True)           # exact softmax
            oh = jnp.einsum('hqk,hkd->hqd', pr, v,
                            preferred_element_type=jnp.float32)     # (H, SEQ, d)
            attn_cat = jnp.concatenate([oh[i] for i in range(N_HEAD)],
                                       axis=-1)                     # (SEQ, N_EMBD)
            x = x + _mm(attn_cat, w_proj_ref[blk])                  # single K=32 proj

            # ---- MLP (exact-erf GELU) ----
            h2 = _layernorm(x, ln2_w_ref[blk])
            m = _gelu_exact(_mm(h2, w_fc_ref[blk]))                 # (SEQ, H_DIM)
            x = x + _mm(m, w_fcp_ref[blk])

        # ---- final LN on the cls row (last row) + classification head ----
        cls = _layernorm(x[SEQ - 1:SEQ, :], lnf_w_ref[...])         # (1, N_EMBD)
        rows.append(_mm(cls, w_head_ref[...]))                      # (1, HEAD_PAD)

    out_ref[...] = rows[0] if bb == 1 else jnp.concatenate(rows, axis=0)


# ----------------------------- pallas wrapper ----------------------------------
def _samples_per_grid_step(batch):
    """v7x has 2 TensorCores -> one sample per core (grid=(B,) parallel);
    v5e/v6e are single-TC -> process the whole batch in one grid step."""
    try:
        kind = jax.devices()[0].device_kind.lower()
    except Exception:
        kind = ""
    return 1 if ("v7" in kind or "7x" in kind) else batch


def vit_forward(x, kp):
    B = x.shape[0]
    bb = _samples_per_grid_step(B)
    patches = patchify(x)
    logits_pad = pl.pallas_call(
        partial(vit_kernel, bb),
        out_shape=jax.ShapeDtypeStruct((B, HEAD_PAD), jnp.float32),
        grid=(B // bb,),
        in_specs=[
            pl.BlockSpec((bb, N_PATCH, PATCH_DIM), lambda i: (i, 0, 0)),
            pl.BlockSpec((1, PATCH_DIM), lambda i: (0, 0)),
            pl.BlockSpec((PATCH_DIM, N_EMBD), lambda i: (0, 0)),
            pl.BlockSpec((1, N_EMBD), lambda i: (0, 0)),
            pl.BlockSpec((SEQ, N_EMBD), lambda i: (0, 0)),
            pl.BlockSpec((N_BLOCK, 1, N_EMBD), lambda i: (0, 0, 0)),
            pl.BlockSpec((N_BLOCK, N_EMBD, 3 * N_EMBD), lambda i: (0, 0, 0)),
            pl.BlockSpec((N_BLOCK, N_EMBD, N_EMBD), lambda i: (0, 0, 0)),
            pl.BlockSpec((N_BLOCK, 1, N_EMBD), lambda i: (0, 0, 0)),
            pl.BlockSpec((N_BLOCK, N_EMBD, H_DIM), lambda i: (0, 0, 0)),
            pl.BlockSpec((N_BLOCK, H_DIM, N_EMBD), lambda i: (0, 0, 0)),
            pl.BlockSpec((1, N_EMBD), lambda i: (0, 0)),
            pl.BlockSpec((N_EMBD, HEAD_PAD), lambda i: (0, 0)),
        ],
        out_specs=pl.BlockSpec((bb, HEAD_PAD), lambda i: (i, 0)),
        compiler_params=pltpu.CompilerParams(
            dimension_semantics=("parallel",)),
    )(patches, kp["lnp_w"], kp["w_emb"], kp["lne_w"], kp["cls_pos"],
      kp["ln1_w"], kp["w_qkv"], kp["w_proj"],
      kp["ln2_w"], kp["w_fc"], kp["w_fc_proj"],
      kp["lnf_w"], kp["w_head_pad"])
    return logits_pad[:, :N_CLASS]


# ------------------------------- glue (JAX) ------------------------------------
def patchify(x):
    """NCHW -> (B, n_patch, C*p*p); patch flatten order = (C, ph, pw)."""
    B, C, H, W = x.shape
    nh, nw = H // P_SIZE, W // P_SIZE
    x = x.reshape(B, C, nh, P_SIZE, nw, P_SIZE)
    x = x.transpose(0, 2, 4, 1, 3, 5)                 # (B, nh, nw, C, p, p)
    return x.reshape(B, nh * nw, C * P_SIZE * P_SIZE)


def init_params(key):
    """Init in the original (PyTorch-like) parameterization, all float32."""
    std = 0.02
    proj_std = 0.02 / math.sqrt(2 * N_BLOCK)          # c_proj.weight special init
    keys = iter(jax.random.split(key, 8 + 6 * N_BLOCK))

    def nrm(shape, s=std):
        return jax.random.normal(next(keys), shape, jnp.float32) * s

    params = {
        "lnp_w": jnp.ones((1, PATCH_DIM), jnp.float32),
        "w_emb": nrm((PATCH_DIM, N_EMBD)),
        "lne_w": jnp.ones((1, N_EMBD), jnp.float32),
        "cls_token": nrm((1, 1, N_EMBD)),
        "pos": nrm((1, SEQ, N_EMBD)),
        "lnf_w": jnp.ones((1, N_EMBD), jnp.float32),
        "w_head": nrm((N_EMBD, N_CLASS)),
        "blocks": [],
    }
    for _ in range(N_BLOCK):
        params["blocks"].append({
            "ln1_w": jnp.ones((1, N_EMBD), jnp.float32),
            "w_qkv": nrm((N_EMBD, 3 * N_EMBD)),
            "w_proj": nrm((N_EMBD, N_EMBD), proj_std),
            "ln2_w": jnp.ones((1, N_EMBD), jnp.float32),
            "w_fc": nrm((N_EMBD, H_DIM)),
            "w_fc_proj": nrm((H_DIM, N_EMBD), proj_std),
        })
    return params


def prepare_kernel_params(params):
    """One-time host-side repack:
       * fold the 1/sqrt(h_size) softmax scale into the Q columns of w_qkv,
       * move the cls token to the LAST sequence row and permute the positional
         encoding to match (attention is permutation-equivariant),
       * lane-pad the classification head weight to 128 columns.
       All weights stay float32 (latency-bound kernel; no bf16 cast churn)."""
    scale = 1.0 / math.sqrt(H_SIZE)
    w_qkv, w_proj, ln1, ln2, wfc, wfcp = [], [], [], [], [], []
    for bw in params["blocks"]:
        wq_scaled = bw["w_qkv"][:, :N_EMBD] * scale
        w_qkv.append(jnp.concatenate([wq_scaled, bw["w_qkv"][:, N_EMBD:]], axis=1))
        w_proj.append(bw["w_proj"])
        ln1.append(bw["ln1_w"])
        ln2.append(bw["ln2_w"])
        wfc.append(bw["w_fc"])
        wfcp.append(bw["w_fc_proj"])

    pos = params["pos"][0]                                   # (SEQ, N_EMBD)
    cls_pos = jnp.concatenate(
        [pos[1:SEQ, :], params["cls_token"][0] + pos[0:1, :]], axis=0)  # cls at row SEQ-1

    w_head_pad = jnp.zeros((N_EMBD, HEAD_PAD), jnp.float32)
    w_head_pad = w_head_pad.at[:, :N_CLASS].set(params["w_head"])

    return {
        "lnp_w": params["lnp_w"],
        "w_emb": params["w_emb"],
        "lne_w": params["lne_w"],
        "cls_pos": cls_pos,                                   # (SEQ, N_EMBD)
        "ln1_w": jnp.stack(ln1, axis=0),                      # (N_BLOCK, 1, N_EMBD)
        "w_qkv": jnp.stack(w_qkv, axis=0),                    # (N_BLOCK, N_EMBD, 3*N_EMBD)
        "w_proj": jnp.stack(w_proj, axis=0),                  # (N_BLOCK, N_EMBD, N_EMBD)
        "ln2_w": jnp.stack(ln2, axis=0),
        "w_fc": jnp.stack(wfc, axis=0),                       # (N_BLOCK, N_EMBD, H_DIM)
        "w_fc_proj": jnp.stack(wfcp, axis=0),                 # (N_BLOCK, H_DIM, N_EMBD)
        "lnf_w": params["lnf_w"],
        "w_head_pad": w_head_pad,                             # (N_EMBD, HEAD_PAD)
    }


# --------------------------------- main -----------------------------------------
if __name__ == "__main__":
    key = jax.random.PRNGKey(0)
    k_x, k_p = jax.random.split(key)
    x = jax.random.normal(k_x, (BATCH, C_DIM, IM_SIZE, IM_SIZE), jnp.float32)
    params = init_params(k_p)
    kparams = prepare_kernel_params(params)

    logits = jax.jit(vit_forward)(x, kparams)
    logits = jax.block_until_ready(logits)

    assert logits.shape == (BATCH, N_CLASS), logits.shape
    assert bool(jnp.all(jnp.isfinite(logits)))
    print("KERNEL_OK")
</pallas_src>

<mosaic_0001>
module attributes {stable_mosaic.version = 11 : i64} {
  func.func @vit_kernel(%arg0: i32, %arg1: memref<2x16x64xf32, #tpu.memory_space<vmem>>, %arg2: memref<1x64xf32, #tpu.memory_space<vmem>>, %arg3: memref<64x32xf32, #tpu.memory_space<vmem>>, %arg4: memref<1x32xf32, #tpu.memory_space<vmem>>, %arg5: memref<17x32xf32, #tpu.memory_space<vmem>>, %arg6: memref<2x1x32xf32, #tpu.memory_space<vmem>>, %arg7: memref<2x32x96xf32, #tpu.memory_space<vmem>>, %arg8: memref<2x32x32xf32, #tpu.memory_space<vmem>>, %arg9: memref<2x1x32xf32, #tpu.memory_space<vmem>>, %arg10: memref<2x32x128xf32, #tpu.memory_space<vmem>>, %arg11: memref<2x128x32xf32, #tpu.memory_space<vmem>>, %arg12: memref<1x32xf32, #tpu.memory_space<vmem>>, %arg13: memref<32x128xf32, #tpu.memory_space<vmem>>, %arg14: memref<2x128xf32, #tpu.memory_space<vmem>>) attributes {dimension_semantics = [#tpu.dimension_semantics<parallel>], iteration_bounds = array<i64: 1>, scalar_prefetch = 0 : i64, scratch_operands = 0 : i64, tpu.core_type = #tpu.core_type<tc>, window_params = [{transform_indices = @transform_0, window_bounds = array<i64: 2, 16, 64>}, {pipeline_mode = #tpu.pipeline_mode<synchronous>, transform_indices = @transform_1, window_bounds = array<i64: 1, 64>}, {pipeline_mode = #tpu.pipeline_mode<synchronous>, transform_indices = @transform_2, window_bounds = array<i64: 64, 32>}, {pipeline_mode = #tpu.pipeline_mode<synchronous>, transform_indices = @transform_3, window_bounds = array<i64: 1, 32>}, {pipeline_mode = #tpu.pipeline_mode<synchronous>, transform_indices = @transform_4, window_bounds = array<i64: 17, 32>}, {pipeline_mode = #tpu.pipeline_mode<synchronous>, transform_indices = @transform_5, window_bounds = array<i64: 2, 1, 32>}, {pipeline_mode = #tpu.pipeline_mode<synchronous>, transform_indices = @transform_6, window_bounds = array<i64: 2, 32, 96>}, {pipeline_mode = #tpu.pipeline_mode<synchronous>, transform_indices = @transform_7, window_bounds = array<i64: 2, 32, 32>}, {pipeline_mode = #tpu.pipeline_mode<synchronous>, transform_indices = @transform_8, window_bounds = array<i64: 2, 1, 32>}, {pipeline_mode = #tpu.pipeline_mode<synchronous>, transform_indices = @transform_9, window_bounds = array<i64: 2, 32, 128>}, {pipeline_mode = #tpu.pipeline_mode<synchronous>, transform_indices = @transform_10, window_bounds = array<i64: 2, 128, 32>}, {pipeline_mode = #tpu.pipeline_mode<synchronous>, transform_indices = @transform_11, window_bounds = array<i64: 1, 32>}, {pipeline_mode = #tpu.pipeline_mode<synchronous>, transform_indices = @transform_12, window_bounds = array<i64: 32, 128>}, {transform_indices = @transform_13, window_bounds = array<i64: 2, 128>}]} {
    %c0 = arith.constant 0 : index
    %c0_0 = arith.constant 0 : index
    %c0_1 = arith.constant 0 : index
    %0 = vector.load %arg1[%c0, %c0_0, %c0_1] : memref<2x16x64xf32, #tpu.memory_space<vmem>>, vector<1x16x64xf32>
    %1 = vector.shape_cast %0 : vector<1x16x64xf32> to vector<16x64xf32>
    %c0_2 = arith.constant 0 : index
    %c0_3 = arith.constant 0 : index
    %2 = vector.load %arg2[%c0_2, %c0_3] : memref<1x64xf32, #tpu.memory_space<vmem>>, vector<1x64xf32>
    %cst = arith.constant dense<0.000000e+00> : vector<16xf32>
    %3 = vector.multi_reduction <add>, %1, %cst [1] : vector<16x64xf32> to vector<16xf32>
    %4 = vector.shape_cast %3 : vector<16xf32> to vector<16x1xf32>
    %cst_4 = arith.constant 6.400000e+01 : f32
    %5 = vector.broadcast %cst_4 : f32 to vector<16x1xf32>
    %6 = arith.divf %4, %5 : vector<16x1xf32>
    %7 = vector.broadcast %6 : vector<16x1xf32> to vector<16x64xf32>
    %8 = arith.subf %1, %7 : vector<16x64xf32>
    %9 = arith.mulf %8, %8 : vector<16x64xf32>
    %cst_5 = arith.constant dense<0.000000e+00> : vector<16xf32>
    %10 = vector.multi_reduction <add>, %9, %cst_5 [1] : vector<16x64xf32> to vector<16xf32>
    %11 = vector.shape_cast %10 : vector<16xf32> to vector<16x1xf32>
    %cst_6 = arith.constant 6.400000e+01 : f32
    %12 = vector.broadcast %cst_6 : f32 to vector<16x1xf32>
    %13 = arith.divf %11, %12 : vector<16x1xf32>
    %cst_7 = arith.constant 9.99999974E-6 : f32
    %14 = vector.broadcast %cst_7 : f32 to vector<16x1xf32>
    %15 = arith.addf %13, %14 : vector<16x1xf32>
    %16 = math.rsqrt %15 : vector<16x1xf32>
    %17 = vector.broadcast %16 : vector<16x1xf32> to vector<16x64xf32>
    %18 = arith.mulf %8, %17 : vector<16x64xf32>
    %19 = vector.broadcast %2 : vector<1x64xf32> to vector<16x64xf32>
    %20 = arith.mulf %18, %19 : vector<16x64xf32>
    %c0_8 = arith.constant 0 : index
    %c0_9 = arith.constant 0 : index
    %21 = vector.load %arg3[%c0_8, %c0_9] : memref<64x32xf32, #tpu.memory_space<vmem>>, vector<64x32xf32>
    %cst_10 = arith.constant dense<0.000000e+00> : vector<16x32xf32>
    %22 = tpu.matmul %20, %21, %cst_10 {dimension_numbers = #tpu.dot_dimension_numbers<[1], [0], [0], [1], [0, 0, 1, 1], [], []>} : vector<16x64xf32>, vector<64x32xf32>, vector<16x32xf32> -> vector<16x32xf32>
    %c0_11 = arith.constant 0 : index
    %c0_12 = arith.constant 0 : index
    %23 = vector.load %arg4[%c0_11, %c0_12] : memref<1x32xf32, #tpu.memory_space<vmem>>, vector<1x32xf32>
    %cst_13 = arith.constant dense<0.000000e+00> : vector<16xf32>
    %24 = vector.multi_reduction <add>, %22, %cst_13 [1] : vector<16x32xf32> to vector<16xf32>
    %25 = vector.shape_cast %24 : vector<16xf32> to vector<16x1xf32>
    %cst_14 = arith.constant 3.200000e+01 : f32
    %26 = vector.broadcast %cst_14 : f32 to vector<16x1xf32>
    %27 = arith.divf %25, %26 : vector<16x1xf32>
    %28 = vector.broadcast %27 : vector<16x1xf32> to vector<16x32xf32>
    %29 = arith.subf %22, %28 : vector<16x32xf32>
    %30 = arith.mulf %29, %29 : vector<16x32xf32>
    %cst_15 = arith.constant dense<0.000000e+00> : vector<16xf32>
    %31 = vector.multi_reduction <add>, %30, %cst_15 [1] : vector<16x32xf32> to vector<16xf32>
    %32 = vector.shape_cast %31 : vector<16xf32> to vector<16x1xf32>
    %cst_16 = arith.constant 3.200000e+01 : f32
    %33 = vector.broadcast %cst_16 : f32 to vector<16x1xf32>
    %34 = arith.divf %32, %33 : vector<16x1xf32>
    %cst_17 = arith.constant 9.99999974E-6 : f32
    %35 = vector.broadcast %cst_17 : f32 to vector<16x1xf32>
    %36 = arith.addf %34, %35 : vector<16x1xf32>
    %37 = math.rsqrt %36 : vector<16x1xf32>
    %38 = vector.broadcast %37 : vector<16x1xf32> to vector<16x32xf32>
    %39 = arith.mulf %29, %38 : vector<16x32xf32>
    %40 = vector.broadcast %23 : vector<1x32xf32> to vector<16x32xf32>
    %41 = arith.mulf %39, %40 : vector<16x32xf32>
    %c0_18 = arith.constant 0 : index
    %c0_19 = arith.constant 0 : index
    %42 = vector.load %arg5[%c0_18, %c0_19] : memref<17x32xf32, #tpu.memory_space<vmem>>, vector<17x32xf32>
    %cst_20 = arith.constant 0.000000e+00 : f32
    %43 = vector.broadcast %cst_20 : f32 to vector<1x32xf32>
    %44 = tpu.concatenate %41, %43 in 0 : vector<16x32xf32>, vector<1x32xf32> -> vector<17x32xf32>
    %45 = arith.addf %42, %44 : vector<17x32xf32>
    %c0_21 = arith.constant 0 : index
    %c0_22 = arith.constant 0 : index
    %c0_23 = arith.constant 0 : index
    %46 = vector.load %arg6[%c0_21, %c0_22, %c0_23] : memref<2x1x32xf32, #tpu.memory_space<vmem>>, vector<1x1x32xf32>
    %47 = vector.shape_cast %46 : vector<1x1x32xf32> to vector<1x32xf32>
    %cst_24 = arith.constant dense<0.000000e+00> : vector<17xf32>
    %48 = vector.multi_reduction <add>, %45, %cst_24 [1] : vector<17x32xf32> to vector<17xf32>
    %49 = vector.shape_cast %48 : vector<17xf32> to vector<17x1xf32>
    %cst_25 = arith.constant 3.200000e+01 : f32
    %50 = vector.broadcast %cst_25 : f32 to vector<17x1xf32>
    %51 = arith.divf %49, %50 : vector<17x1xf32>
    %52 = vector.broadcast %51 : vector<17x1xf32> to vector<17x32xf32>
    %53 = arith.subf %45, %52 : vector<17x32xf32>
    %54 = arith.mulf %53, %53 : vector<17x32xf32>
    %cst_26 = arith.constant dense<0.000000e+00> : vector<17xf32>
    %55 = vector.multi_reduction <add>, %54, %cst_26 [1] : vector<17x32xf32> to vector<17xf32>
    %56 = vector.shape_cast %55 : vector<17xf32> to vector<17x1xf32>
    %cst_27 = arith.constant 3.200000e+01 : f32
    %57 = vector.broadcast %cst_27 : f32 to vector<17x1xf32>
    %58 = arith.divf %56, %57 : vector<17x1xf32>
    %cst_28 = arith.constant 9.99999974E-6 : f32
    %59 = vector.broadcast %cst_28 : f32 to vector<17x1xf32>
    %60 = arith.addf %58, %59 : vector<17x1xf32>
    %61 = math.rsqrt %60 : vector<17x1xf32>
    %62 = vector.broadcast %61 : vector<17x1xf32> to vector<17x32xf32>
    %63 = arith.mulf %53, %62 : vector<17x32xf32>
    %64 = vector.broadcast %47 : vector<1x32xf32> to vector<17x32xf32>
    %65 = arith.mulf %63, %64 : vector<17x32xf32>
    %c0_29 = arith.constant 0 : index
    %c0_30 = arith.constant 0 : index
    %c0_31 = arith.constant 0 : index
    %66 = vector.load %arg7[%c0_29, %c0_30, %c0_31] : memref<2x32x96xf32, #tpu.memory_space<vmem>>, vector<1x32x96xf32>
    %67 = vector.shape_cast %66 : vector<1x32x96xf32> to vector<32x96xf32>
    %cst_32 = arith.constant dense<0.000000e+00> : vector<17x96xf32>
    %68 = tpu.matmul %65, %67, %cst_32 {dimension_numbers = #tpu.dot_dimension_numbers<[1], [0], [0], [1], [0, 0, 1, 1], [], []>} : vector<17x32xf32>, vector<32x96xf32>, vector<17x96xf32> -> vector<17x96xf32>
    %69 = vector.extract_strided_slice %68 {offsets = [0, 0], sizes = [17, 8], strides = [1, 1]} : vector<17x96xf32> to vector<17x8xf32>
    %70 = vector.extract_strided_slice %68 {offsets = [0, 8], sizes = [17, 8], strides = [1, 1]} : vector<17x96xf32> to vector<17x8xf32>
    %71 = vector.extract_strided_slice %68 {offsets = [0, 16], sizes = [17, 8], strides = [1, 1]} : vector<17x96xf32> to vector<17x8xf32>
    %72 = vector.extract_strided_slice %68 {offsets = [0, 24], sizes = [17, 8], strides = [1, 1]} : vector<17x96xf32> to vector<17x8xf32>
    %73 = vector.shape_cast %69 : vector<17x8xf32> to vector<1x17x8xf32>
    %74 = vector.shape_cast %70 : vector<17x8xf32> to vector<1x17x8xf32>
    %75 = vector.shape_cast %71 : vector<17x8xf32> to vector<1x17x8xf32>
    %76 = vector.shape_cast %72 : vector<17x8xf32> to vector<1x17x8xf32>
    %77 = tpu.concatenate %73, %74, %75, %76 in 0 : vector<1x17x8xf32>, vector<1x17x8xf32>, vector<1x17x8xf32>, vector<1x17x8xf32> -> vector<4x17x8xf32>
    %78 = vector.extract_strided_slice %68 {offsets = [0, 32], sizes = [17, 8], strides = [1, 1]} : vector<17x96xf32> to vector<17x8xf32>
    %79 = vector.extract_strided_slice %68 {offsets = [0, 40], sizes = [17, 8], strides = [1, 1]} : vector<17x96xf32> to vector<17x8xf32>
    %80 = vector.extract_strided_slice %68 {offsets = [0, 48], sizes = [17, 8], strides = [1, 1]} : vector<17x96xf32> to vector<17x8xf32>
    %81 = vector.extract_strided_slice %68 {offsets = [0, 56], sizes = [17, 8], strides = [1, 1]} : vector<17x96xf32> to vector<17x8xf32>
    %82 = vector.shape_cast %78 : vector<17x8xf32> to vector<1x17x8xf32>
    %83 = vector.shape_cast %79 : vector<17x8xf32> to vector<1x17x8xf32>
    %84 = vector.shape_cast %80 : vector<17x8xf32> to vector<1x17x8xf32>
    %85 = vector.shape_cast %81 : vector<17x8xf32> to vector<1x17x8xf32>
    %86 = tpu.concatenate %82, %83, %84, %85 in 0 : vector<1x17x8xf32>, vector<1x17x8xf32>, vector<1x17x8xf32>, vector<1x17x8xf32> -> vector<4x17x8xf32>
    %87 = vector.extract_strided_slice %68 {offsets = [0, 64], sizes = [17, 8], strides = [1, 1]} : vector<17x96xf32> to vector<17x8xf32>
    %88 = vector.extract_strided_slice %68 {offsets = [0, 72], sizes = [17, 8], strides = [1, 1]} : vector<17x96xf32> to vector<17x8xf32>
    %89 = vector.extract_strided_slice %68 {offsets = [0, 80], sizes = [17, 8], strides = [1, 1]} : vector<17x96xf32> to vector<17x8xf32>
    %90 = vector.extract_strided_slice %68 {offsets = [0, 88], sizes = [17, 8], strides = [1, 1]} : vector<17x96xf32> to vector<17x8xf32>
    %91 = vector.shape_cast %87 : vector<17x8xf32> to vector<1x17x8xf32>
    %92 = vector.shape_cast %88 : vector<17x8xf32> to vector<1x17x8xf32>
    %93 = vector.shape_cast %89 : vector<17x8xf32> to vector<1x17x8xf32>
    %94 = vector.shape_cast %90 : vector<17x8xf32> to vector<1x17x8xf32>
    %95 = tpu.concatenate %91, %92, %93, %94 in 0 : vector<1x17x8xf32>, vector<1x17x8xf32>, vector<1x17x8xf32>, vector<1x17x8xf32> -> vector<4x17x8xf32>
    "tpu.trace_start"() <{level = 10 : i32, message = "hqd,hkd->hqk"}> : () -> ()
    %cst_33 = arith.constant dense<0.000000e+00> : vector<4x17x17xf32>
    %96 = tpu.matmul %77, %86, %cst_33 {dimension_numbers = #tpu.dot_dimension_numbers<[2], [2], [1], [1], [0, 0, 0, 1, 1, 1], [0], [0]>} : vector<4x17x8xf32>, vector<4x17x8xf32>, vector<4x17x17xf32> -> vector<4x17x17xf32>
    "tpu.trace_stop"() : () -> ()
    %cst_34 = arith.constant dense<0xFF800000> : vector<4x17xf32>
    %97 = vector.multi_reduction <maximumf>, %96, %cst_34 [2] : vector<4x17x17xf32> to vector<4x17xf32>
    %98 = vector.shape_cast %97 : vector<4x17xf32> to vector<4x17x1xf32>
    %99 = vector.broadcast %98 : vector<4x17x1xf32> to vector<4x17x17xf32>
    %100 = arith.subf %96, %99 : vector<4x17x17xf32>
    %101 = math.exp %100 : vector<4x17x17xf32>
    %cst_35 = arith.constant dense<0.000000e+00> : vector<4x17xf32>
    %102 = vector.multi_reduction <add>, %101, %cst_35 [2] : vector<4x17x17xf32> to vector<4x17xf32>
    %103 = vector.shape_cast %102 : vector<4x17xf32> to vector<4x17x1xf32>
    %104 = vector.broadcast %103 : vector<4x17x1xf32> to vector<4x17x17xf32>
    %105 = arith.divf %101, %104 : vector<4x17x17xf32>
    "tpu.trace_start"() <{level = 10 : i32, message = "hqk,hkd->hqd"}> : () -> ()
    %cst_36 = arith.constant dense<0.000000e+00> : vector<4x17x8xf32>
    %106 = tpu.matmul %105, %95, %cst_36 {dimension_numbers = #tpu.dot_dimension_numbers<[2], [1], [1], [2], [0, 0, 0, 1, 1, 2], [0], [0]>} : vector<4x17x17xf32>, vector<4x17x8xf32>, vector<4x17x8xf32> -> vector<4x17x8xf32>
    "tpu.trace_stop"() : () -> ()
    %107 = vector.extract_strided_slice %106 {offsets = [0, 0, 0], sizes = [1, 17, 8], strides = [1, 1, 1]} : vector<4x17x8xf32> to vector<1x17x8xf32>
    %108 = vector.shape_cast %107 : vector<1x17x8xf32> to vector<17x8xf32>
    %109 = vector.extract_strided_slice %106 {offsets = [1, 0, 0], sizes = [1, 17, 8], strides = [1, 1, 1]} : vector<4x17x8xf32> to vector<1x17x8xf32>
    %110 = vector.shape_cast %109 : vector<1x17x8xf32> to vector<17x8xf32>
    %111 = vector.extract_strided_slice %106 {offsets = [2, 0, 0], sizes = [1, 17, 8], strides = [1, 1, 1]} : vector<4x17x8xf32> to vector<1x17x8xf32>
    %112 = vector.shape_cast %111 : vector<1x17x8xf32> to vector<17x8xf32>
    %113 = vector.extract_strided_slice %106 {offsets = [3, 0, 0], sizes = [1, 17, 8], strides = [1, 1, 1]} : vector<4x17x8xf32> to vector<1x17x8xf32>
    %114 = vector.shape_cast %113 : vector<1x17x8xf32> to vector<17x8xf32>
    %115 = tpu.concatenate %108, %110, %112, %114 in 1 : vector<17x8xf32>, vector<17x8xf32>, vector<17x8xf32>, vector<17x8xf32> -> vector<17x32xf32>
    %c0_37 = arith.constant 0 : index
    %c0_38 = arith.constant 0 : index
    %c0_39 = arith.constant 0 : index
    %116 = vector.load %arg8[%c0_37, %c0_38, %c0_39] : memref<2x32x32xf32, #tpu.memory_space<vmem>>, vector<1x32x32xf32>
    %117 = vector.shape_cast %116 : vector<1x32x32xf32> to vector<32x32xf32>
    %cst_40 = arith.constant dense<0.000000e+00> : vector<17x32xf32>
    %118 = tpu.matmul %115, %117, %cst_40 {dimension_numbers = #tpu.dot_dimension_numbers<[1], [0], [0], [1], [0, 0, 1, 1], [], []>} : vector<17x32xf32>, vector<32x32xf32>, vector<17x32xf32> -> vector<17x32xf32>
    %119 = arith.addf %45, %118 : vector<17x32xf32>
    %c0_41 = arith.constant 0 : index
    %c0_42 = arith.constant 0 : index
    %c0_43 = arith.constant 0 : index
    %120 = vector.load %arg9[%c0_41, %c0_42, %c0_43] : memref<2x1x32xf32, #tpu.memory_space<vmem>>, vector<1x1x32xf32>
    %121 = vector.shape_cast %120 : vector<1x1x32xf32> to vector<1x32xf32>
    %cst_44 = arith.constant dense<0.000000e+00> : vector<17xf32>
    %122 = vector.multi_reduction <add>, %119, %cst_44 [1] : vector<17x32xf32> to vector<17xf32>
    %123 = vector.shape_cast %122 : vector<17xf32> to vector<17x1xf32>
    %cst_45 = arith.constant 3.200000e+01 : f32
    %124 = vector.broadcast %cst_45 : f32 to vector<17x1xf32>
    %125 = arith.divf %123, %124 : vector<17x1xf32>
    %126 = vector.broadcast %125 : vector<17x1xf32> to vector<17x32xf32>
    %127 = arith.subf %119, %126 : vector<17x32xf32>
    %128 = arith.mulf %127, %127 : vector<17x32xf32>
    %cst_46 = arith.constant dense<0.000000e+00> : vector<17xf32>
    %129 = vector.multi_reduction <add>, %128, %cst_46 [1] : vector<17x32xf32> to vector<17xf32>
    %130 = vector.shape_cast %129 : vector<17xf32> to vector<17x1xf32>
    %cst_47 = arith.constant 3.200000e+01 : f32
    %131 = vector.broadcast %cst_47 : f32 to vector<17x1xf32>
    %132 = arith.divf %130, %131 : vector<17x1xf32>
    %cst_48 = arith.constant 9.99999974E-6 : f32
    %133 = vector.broadcast %cst_48 : f32 to vector<17x1xf32>
    %134 = arith.addf %132, %133 : vector<17x1xf32>
    %135 = math.rsqrt %134 : vector<17x1xf32>
    %136 = vector.broadcast %135 : vector<17x1xf32> to vector<17x32xf32>
    %137 = arith.mulf %127, %136 : vector<17x32xf32>
    %138 = vector.broadcast %121 : vector<1x32xf32> to vector<17x32xf32>
    %139 = arith.mulf %137, %138 : vector<17x32xf32>
    %c0_49 = arith.constant 0 : index
    %c0_50 = arith.constant 0 : index
    %c0_51 = arith.constant 0 : index
    %140 = vector.load %arg10[%c0_49, %c0_50, %c0_51] : memref<2x32x128xf32, #tpu.memory_space<vmem>>, vector<1x32x128xf32>
    %141 = vector.shape_cast %140 : vector<1x32x128xf32> to vector<32x128xf32>
    %cst_52 = arith.constant dense<0.000000e+00> : vector<17x128xf32>
    %142 = tpu.matmul %139, %141, %cst_52 {dimension_numbers = #tpu.dot_dimension_numbers<[1], [0], [0], [1], [0, 0, 1, 1], [], []>} : vector<17x32xf32>, vector<32x128xf32>, vector<17x128xf32> -> vector<17x128xf32>
    %cst_53 = arith.constant 5.000000e-01 : f32
    %143 = vector.broadcast %cst_53 : f32 to vector<17x128xf32>
    %144 = arith.mulf %143, %142 : vector<17x128xf32>
    %cst_54 = arith.constant 0.707106769 : f32
    %145 = vector.broadcast %cst_54 : f32 to vector<17x128xf32>
    %146 = arith.mulf %142, %145 : vector<17x128xf32>
    %cst_55 = arith.constant 0.000000e+00 : f32
    %147 = vector.broadcast %cst_55 : f32 to vector<17x128xf32>
    %148 = arith.cmpf olt, %146, %147 : vector<17x128xf32>
    %cst_56 = arith.constant -1.000000e+00 : f32
    %cst_57 = arith.constant 1.000000e+00 : f32
    %149 = vector.broadcast %cst_56 : f32 to vector<17x128xf32>
    %150 = vector.broadcast %cst_57 : f32 to vector<17x128xf32>
    %151 = arith.select %148, %149, %150 : vector<17x128xi1>, vector<17x128xf32>
    %152 = math.absf %146 : vector<17x128xf32>
    %cst_58 = arith.constant 0.327591091 : f32
    %153 = vector.broadcast %cst_58 : f32 to vector<17x128xf32>
    %154 = arith.mulf %153, %152 : vector<17x128xf32>
    %cst_59 = arith.constant 1.000000e+00 : f32
    %155 = vector.broadcast %cst_59 : f32 to vector<17x128xf32>
    %156 = arith.addf %155, %154 : vector<17x128xf32>
    %cst_60 = arith.constant 1.000000e+00 : f32
    %157 = vector.broadcast %cst_60 : f32 to vector<17x128xf32>
    %158 = arith.divf %157, %156 : vector<17x128xf32>
    %cst_61 = arith.constant 1.06140542 : f32
    %159 = vector.broadcast %cst_61 : f32 to vector<17x128xf32>
    %160 = arith.mulf %159, %158 : vector<17x128xf32>
    %cst_62 = arith.constant 1.45315206 : f32
    %161 = vector.broadcast %cst_62 : f32 to vector<17x128xf32>
    %162 = arith.subf %160, %161 : vector<17x128xf32>
    %163 = arith.mulf %162, %158 : vector<17x128xf32>
    %cst_63 = arith.constant 1.42141378 : f32
    %164 = vector.broadcast %cst_63 : f32 to vector<17x128xf32>
    %165 = arith.addf %163, %164 : vector<17x128xf32>
    %166 = arith.mulf %165, %158 : vector<17x128xf32>
    %cst_64 = arith.constant 0.284496725 : f32
    %167 = vector.broadcast %cst_64 : f32 to vector<17x128xf32>
    %168 = arith.subf %166, %167 : vector<17x128xf32>
    %169 = arith.mulf %168, %158 : vector<17x128xf32>
    %cst_65 = arith.constant 0.254829586 : f32
    %170 = vector.broadcast %cst_65 : f32 to vector<17x128xf32>
    %171 = arith.addf %169, %170 : vector<17x128xf32>
    %172 = arith.mulf %171, %158 : vector<17x128xf32>
    %cst_66 = arith.constant 0.000000e+00 : f32
    %173 = vector.broadcast %cst_66 : f32 to vector<17x128xf32>
    %174 = arith.subf %173, %152 : vector<17x128xf32>
    %175 = arith.mulf %174, %152 : vector<17x128xf32>
    %176 = math.exp %175 : vector<17x128xf32>
    %177 = arith.mulf %172, %176 : vector<17x128xf32>
    %cst_67 = arith.constant 1.000000e+00 : f32
    %178 = vector.broadcast %cst_67 : f32 to vector<17x128xf32>
    %179 = arith.subf %178, %177 : vector<17x128xf32>
    %180 = arith.mulf %151, %179 : vector<17x128xf32>
    %cst_68 = arith.constant 1.000000e+00 : f32
    %181 = vector.broadcast %cst_68 : f32 to vector<17x128xf32>
    %182 = arith.addf %181, %180 : vector<17x128xf32>
    %183 = arith.mulf %144, %182 : vector<17x128xf32>
    %c0_69 = arith.constant 0 : index
    %c0_70 = arith.constant 0 : index
    %c0_71 = arith.constant 0 : index
    %184 = vector.load %arg11[%c0_69, %c0_70, %c0_71] : memref<2x128x32xf32, #tpu.memory_space<vmem>>, vector<1x128x32xf32>
    %185 = vector.shape_cast %184 : vector<1x128x32xf32> to vector<128x32xf32>
    %cst_72 = arith.constant dense<0.000000e+00> : vector<17x32xf32>
    %186 = tpu.matmul %183, %185, %cst_72 {dimension_numbers = #tpu.dot_dimension_numbers<[1], [0], [0], [1], [0, 0, 1, 1], [], []>} : vector<17x128xf32>, vector<128x32xf32>, vector<17x32xf32> -> vector<17x32xf32>
    %187 = arith.addf %119, %186 : vector<17x32xf32>
    %c1 = arith.constant 1 : index
    %c0_73 = arith.constant 0 : index
    %c0_74 = arith.constant 0 : index
    %188 = vector.load %arg6[%c1, %c0_73, %c0_74] : memref<2x1x32xf32, #tpu.memory_space<vmem>>, vector<1x1x32xf32>
    %189 = vector.shape_cast %188 : vector<1x1x32xf32> to vector<1x32xf32>
    %cst_75 = arith.constant dense<0.000000e+00> : vector<17xf32>
    %190 = vector.multi_reduction <add>, %187, %cst_75 [1] : vector<17x32xf32> to vector<17xf32>
    %191 = vector.shape_cast %190 : vector<17xf32> to vector<17x1xf32>
    %cst_76 = arith.constant 3.200000e+01 : f32
    %192 = vector.broadcast %cst_76 : f32 to vector<17x1xf32>
    %193 = arith.divf %191, %192 : vector<17x1xf32>
    %194 = vector.broadcast %193 : vector<17x1xf32> to vector<17x32xf32>
    %195 = arith.subf %187, %194 : vector<17x32xf32>
    %196 = arith.mulf %195, %195 : vector<17x32xf32>
    %cst_77 = arith.constant dense<0.000000e+00> : vector<17xf32>
    %197 = vector.multi_reduction <add>, %196, %cst_77 [1] : vector<17x32xf32> to vector<17xf32>
    %198 = vector.shape_cast %197 : vector<17xf32> to vector<17x1xf32>
    %cst_78 = arith.constant 3.200000e+01 : f32
    %199 = vector.broadcast %cst_78 : f32 to vector<17x1xf32>
    %200 = arith.divf %198, %199 : vector<17x1xf32>
    %cst_79 = arith.constant 9.99999974E-6 : f32
    %201 = vector.broadcast %cst_79 : f32 to vector<17x1xf32>
    %202 = arith.addf %200, %201 : vector<17x1xf32>
    %203 = math.rsqrt %202 : vector<17x1xf32>
    %204 = vector.broadcast %203 : vector<17x1xf32> to vector<17x32xf32>
    %205 = arith.mulf %195, %204 : vector<17x32xf32>
    %206 = vector.broadcast %189 : vector<1x32xf32> to vector<17x32xf32>
    %207 = arith.mulf %205, %206 : vector<17x32xf32>
    %c1_80 = arith.constant 1 : index
    %c0_81 = arith.constant 0 : index
    %c0_82 = arith.constant 0 : index
    %208 = vector.load %arg7[%c1_80, %c0_81, %c0_82] : memref<2x32x96xf32, #tpu.memory_space<vmem>>, vector<1x32x96xf32>
    %209 = vector.shape_cast %208 : vector<1x32x96xf32> to vector<32x96xf32>
    %cst_83 = arith.constant dense<0.000000e+00> : vector<17x96xf32>
    %210 = tpu.matmul %207, %209, %cst_83 {dimension_numbers = #tpu.dot_dimension_numbers<[1], [0], [0], [1], [0, 0, 1, 1], [], []>} : vector<17x32xf32>, vector<32x96xf32>, vector<17x96xf32> -> vector<17x96xf32>
    %211 = vector.extract_strided_slice %210 {offsets = [0, 0], sizes = [17, 8], strides = [1, 1]} : vector<17x96xf32> to vector<17x8xf32>
    %212 = vector.extract_strided_slice %210 {offsets = [0, 8], sizes = [17, 8], strides = [1, 1]} : vector<17x96xf32> to vector<17x8xf32>
    %213 = vector.extract_strided_slice %210 {offsets = [0, 16], sizes = [17, 8], strides = [1, 1]} : vector<17x96xf32> to vector<17x8xf32>
    %214 = vector.extract_strided_slice %210 {offsets = [0, 24], sizes = [17, 8], strides = [1, 1]} : vector<17x96xf32> to vector<17x8xf32>
    %215 = vector.shape_cast %211 : vector<17x8xf32> to vector<1x17x8xf32>
    %216 = vector.shape_cast %212 : vector<17x8xf32> to vector<1x17x8xf32>
    %217 = vector.shape_cast %213 : vector<17x8xf32> to vector<1x17x8xf32>
    %218 = vector.shape_cast %214 : vector<17x8xf32> to vector<1x17x8xf32>
    %219 = tpu.concatenate %215, %216, %217, %218 in 0 : vector<1x17x8xf32>, vector<1x17x8xf32>, vector<1x17x8xf32>, vector<1x17x8xf32> -> vector<4x17x8xf32>
    %220 = vector.extract_strided_slice %210 {offsets = [0, 32], sizes = [17, 8], strides = [1, 1]} : vector<17x96xf32> to vector<17x8xf32>
    %221 = vector.extract_strided_slice %210 {offsets = [0, 40], sizes = [17, 8], strides = [1, 1]} : vector<17x96xf32> to vector<17x8xf32>
    %222 = vector.extract_strided_slice %210 {offsets = [0, 48], sizes = [17, 8], strides = [1, 1]} : vector<17x96xf32> to vector<17x8xf32>
    %223 = vector.extract_strided_slice %210 {offsets = [0, 56], sizes = [17, 8], strides = [1, 1]} : vector<17x96xf32> to vector<17x8xf32>
    %224 = vector.shape_cast %220 : vector<17x8xf32> to vector<1x17x8xf32>
    %225 = vector.shape_cast %221 : vector<17x8xf32> to vector<1x17x8xf32>
    %226 = vector.shape_cast %222 : vector<17x8xf32> to vector<1x17x8xf32>
    %227 = vector.shape_cast %223 : vector<17x8xf32> to vector<1x17x8xf32>
    %228 = tpu.concatenate %224, %225, %226, %227 in 0 : vector<1x17x8xf32>, vector<1x17x8xf32>, vector<1x17x8xf32>, vector<1x17x8xf32> -> vector<4x17x8xf32>
    %229 = vector.extract_strided_slice %210 {offsets = [0, 64], sizes = [17, 8], strides = [1, 1]} : vector<17x96xf32> to vector<17x8xf32>
    %230 = vector.extract_strided_slice %210 {offsets = [0, 72], sizes = [17, 8], strides = [1, 1]} : vector<17x96xf32> to vector<17x8xf32>
    %231 = vector.extract_strided_slice %210 {offsets = [0, 80], sizes = [17, 8], strides = [1, 1]} : vector<17x96xf32> to vector<17x8xf32>
    %232 = vector.extract_strided_slice %210 {offsets = [0, 88], sizes = [17, 8], strides = [1, 1]} : vector<17x96xf32> to vector<17x8xf32>
    %233 = vector.shape_cast %229 : vector<17x8xf32> to vector<1x17x8xf32>
    %234 = vector.shape_cast %230 : vector<17x8xf32> to vector<1x17x8xf32>
    %235 = vector.shape_cast %231 : vector<17x8xf32> to vector<1x17x8xf32>
    %236 = vector.shape_cast %232 : vector<17x8xf32> to vector<1x17x8xf32>
    %237 = tpu.concatenate %233, %234, %235, %236 in 0 : vector<1x17x8xf32>, vector<1x17x8xf32>, vector<1x17x8xf32>, vector<1x17x8xf32> -> vector<4x17x8xf32>
    "tpu.trace_start"() <{level = 10 : i32, message = "hqd,hkd->hqk"}> : () -> ()
    %cst_84 = arith.constant dense<0.000000e+00> : vector<4x17x17xf32>
    %238 = tpu.matmul %219, %228, %cst_84 {dimension_numbers = #tpu.dot_dimension_numbers<[2], [2], [1], [1], [0, 0, 0, 1, 1, 1], [0], [0]>} : vector<4x17x8xf32>, vector<4x17x8xf32>, vector<4x17x17xf32> -> vector<4x17x17xf32>
    "tpu.trace_stop"() : () -> ()
    %cst_85 = arith.constant dense<0xFF800000> : vector<4x17xf32>
    %239 = vector.multi_reduction <maximumf>, %238, %cst_85 [2] : vector<4x17x17xf32> to vector<4x17xf32>
    %240 = vector.shape_cast %239 : vector<4x17xf32> to vector<4x17x1xf32>
    %241 = vector.broadcast %240 : vector<4x17x1xf32> to vector<4x17x17xf32>
    %242 = arith.subf %238, %241 : vector<4x17x17xf32>
    %243 = math.exp %242 : vector<4x17x17xf32>
    %cst_86 = arith.constant dense<0.000000e+00> : vector<4x17xf32>
    %244 = vector.multi_reduction <add>, %243, %cst_86 [2] : vector<4x17x17xf32> to vector<4x17xf32>
    %245 = vector.shape_cast %244 : vector<4x17xf32> to vector<4x17x1xf32>
    %246 = vector.broadcast %245 : vector<4x17x1xf32> to vector<4x17x17xf32>
    %247 = arith.divf %243, %246 : vector<4x17x17xf32>
    "tpu.trace_start"() <{level = 10 : i32, message = "hqk,hkd->hqd"}> : () -> ()
    %cst_87 = arith.constant dense<0.000000e+00> : vector<4x17x8xf32>
    %248 = tpu.matmul %247, %237, %cst_87 {dimension_numbers = #tpu.dot_dimension_numbers<[2], [1], [1], [2], [0, 0, 0, 1, 1, 2], [0], [0]>} : vector<4x17x17xf32>, vector<4x17x8xf32>, vector<4x17x8xf32> -> vector<4x17x8xf32>
    "tpu.trace_stop"() : () -> ()
    %249 = vector.extract_strided_slice %248 {offsets = [0, 0, 0], sizes = [1, 17, 8], strides = [1, 1, 1]} : vector<4x17x8xf32> to vector<1x17x8xf32>
    %250 = vector.shape_cast %249 : vector<1x17x8xf32> to vector<17x8xf32>
    %251 = vector.extract_strided_slice %248 {offsets = [1, 0, 0], sizes = [1, 17, 8], strides = [1, 1, 1]} : vector<4x17x8xf32> to vector<1x17x8xf32>
    %252 = vector.shape_cast %251 : vector<1x17x8xf32> to vector<17x8xf32>
    %253 = vector.extract_strided_slice %248 {offsets = [2, 0, 0], sizes = [1, 17, 8], strides = [1, 1, 1]} : vector<4x17x8xf32> to vector<1x17x8xf32>
    %254 = vector.shape_cast %253 : vector<1x17x8xf32> to vector<17x8xf32>
    %255 = vector.extract_strided_slice %248 {offsets = [3, 0, 0], sizes = [1, 17, 8], strides = [1, 1, 1]} : vector<4x17x8xf32> to vector<1x17x8xf32>
    %256 = vector.shape_cast %255 : vector<1x17x8xf32> to vector<17x8xf32>
    %257 = tpu.concatenate %250, %252, %254, %256 in 1 : vector<17x8xf32>, vector<17x8xf32>, vector<17x8xf32>, vector<17x8xf32> -> vector<17x32xf32>
    %c1_88 = arith.constant 1 : index
    %c0_89 = arith.constant 0 : index
    %c0_90 = arith.constant 0 : index
    %258 = vector.load %arg8[%c1_88, %c0_89, %c0_90] : memref<2x32x32xf32, #tpu.memory_space<vmem>>, vector<1x32x32xf32>
    %259 = vector.shape_cast %258 : vector<1x32x32xf32> to vector<32x32xf32>
    %cst_91 = arith.constant dense<0.000000e+00> : vector<17x32xf32>
    %260 = tpu.matmul %257, %259, %cst_91 {dimension_numbers = #tpu.dot_dimension_numbers<[1], [0], [0], [1], [0, 0, 1, 1], [], []>} : vector<17x32xf32>, vector<32x32xf32>, vector<17x32xf32> -> vector<17x32xf32>
    %261 = arith.addf %187, %260 : vector<17x32xf32>
    %c1_92 = arith.constant 1 : index
    %c0_93 = arith.constant 0 : index
    %c0_94 = arith.constant 0 : index
    %262 = vector.load %arg9[%c1_92, %c0_93, %c0_94] : memref<2x1x32xf32, #tpu.memory_space<vmem>>, vector<1x1x32xf32>
    %263 = vector.shape_cast %262 : vector<1x1x32xf32> to vector<1x32xf32>
    %cst_95 = arith.constant dense<0.000000e+00> : vector<17xf32>
    %264 = vector.multi_reduction <add>, %261, %cst_95 [1] : vector<17x32xf32> to vector<17xf32>
    %265 = vector.shape_cast %264 : vector<17xf32> to vector<17x1xf32>
    %cst_96 = arith.constant 3.200000e+01 : f32
    %266 = vector.broadcast %cst_96 : f32 to vector<17x1xf32>
    %267 = arith.divf %265, %266 : vector<17x1xf32>
    %268 = vector.broadcast %267 : vector<17x1xf32> to vector<17x32xf32>
    %269 = arith.subf %261, %268 : vector<17x32xf32>
    %270 = arith.mulf %269, %269 : vector<17x32xf32>
    %cst_97 = arith.constant dense<0.000000e+00> : vector<17xf32>
    %271 = vector.multi_reduction <add>, %270, %cst_97 [1] : vector<17x32xf32> to vector<17xf32>
    %272 = vector.shape_cast %271 : vector<17xf32> to vector<17x1xf32>
    %cst_98 = arith.constant 3.200000e+01 : f32
    %273 = vector.broadcast %cst_98 : f32 to vector<17x1xf32>
    %274 = arith.divf %272, %273 : vector<17x1xf32>
    %cst_99 = arith.constant 9.99999974E-6 : f32
    %275 = vector.broadcast %cst_99 : f32 to vector<17x1xf32>
    %276 = arith.addf %274, %275 : vector<17x1xf32>
    %277 = math.rsqrt %276 : vector<17x1xf32>
    %278 = vector.broadcast %277 : vector<17x1xf32> to vector<17x32xf32>
    %279 = arith.mulf %269, %278 : vector<17x32xf32>
    %280 = vector.broadcast %263 : vector<1x32xf32> to vector<17x32xf32>
    %281 = arith.mulf %279, %280 : vector<17x32xf32>
    %c1_100 = arith.constant 1 : index
    %c0_101 = arith.constant 0 : index
    %c0_102 = arith.constant 0 : index
    %282 = vector.load %arg10[%c1_100, %c0_101, %c0_102] : memref<2x32x128xf32, #tpu.memory_space<vmem>>, vector<1x32x128xf32>
    %283 = vector.shape_cast %282 : vector<1x32x128xf32> to vector<32x128xf32>
    %cst_103 = arith.constant dense<0.000000e+00> : vector<17x128xf32>
    %284 = tpu.matmul %281, %283, %cst_103 {dimension_numbers = #tpu.dot_dimension_numbers<[1], [0], [0], [1], [0, 0, 1, 1], [], []>} : vector<17x32xf32>, vector<32x128xf32>, vector<17x128xf32> -> vector<17x128xf32>
    %cst_104 = arith.constant 5.000000e-01 : f32
    %285 = vector.broadcast %cst_104 : f32 to vector<17x128xf32>
    %286 = arith.mulf %285, %284 : vector<17x128xf32>
    %cst_105 = arith.constant 0.707106769 : f32
    %287 = vector.broadcast %cst_105 : f32 to vector<17x128xf32>
    %288 = arith.mulf %284, %287 : vector<17x128xf32>
    %cst_106 = arith.constant 0.000000e+00 : f32
    %289 = vector.broadcast %cst_106 : f32 to vector<17x128xf32>
    %290 = arith.cmpf olt, %288, %289 : vector<17x128xf32>
    %cst_107 = arith.constant -1.000000e+00 : f32
    %cst_108 = arith.constant 1.000000e+00 : f32
    %291 = vector.broadcast %cst_107 : f32 to vector<17x128xf32>
    %292 = vector.broadcast %cst_108 : f32 to vector<17x128xf32>
    %293 = arith.select %290, %291, %292 : vector<17x128xi1>, vector<17x128xf32>
    %294 = math.absf %288 : vector<17x128xf32>
    %cst_109 = arith.constant 0.327591091 : f32
    %295 = vector.broadcast %cst_109 : f32 to vector<17x128xf32>
    %296 = arith.mulf %295, %294 : vector<17x128xf32>
    %cst_110 = arith.constant 1.000000e+00 : f32
    %297 = vector.broadcast %cst_110 : f32 to vector<17x128xf32>
    %298 = arith.addf %297, %296 : vector<17x128xf32>
    %cst_111 = arith.constant 1.000000e+00 : f32
    %299 = vector.broadcast %cst_111 : f32 to vector<17x128xf32>
    %300 = arith.divf %299, %298 : vector<17x128xf32>
    %cst_112 = arith.constant 1.06140542 : f32
    %301 = vector.broadcast %cst_112 : f32 to vector<17x128xf32>
    %302 = arith.mulf %301, %300 : vector<17x128xf32>
    %cst_113 = arith.constant 1.45315206 : f32
    %303 = vector.broadcast %cst_113 : f32 to vector<17x128xf32>
    %304 = arith.subf %302, %303 : vector<17x128xf32>
    %305 = arith.mulf %304, %300 : vector<17x128xf32>
    %cst_114 = arith.constant 1.42141378 : f32
    %306 = vector.broadcast %cst_114 : f32 to vector<17x128xf32>
    %307 = arith.addf %305, %306 : vector<17x128xf32>
    %308 = arith.mulf %307, %300 : vector<17x128xf32>
    %cst_115 = arith.constant 0.284496725 : f32
    %309 = vector.broadcast %cst_115 : f32 to vector<17x128xf32>
    %310 = arith.subf %308, %309 : vector<17x128xf32>
    %311 = arith.mulf %310, %300 : vector<17x128xf32>
    %cst_116 = arith.constant 0.254829586 : f32
    %312 = vector.broadcast %cst_116 : f32 to vector<17x128xf32>
    %313 = arith.addf %311, %312 : vector<17x128xf32>
    %314 = arith.mulf %313, %300 : vector<17x128xf32>
    %cst_117 = arith.constant 0.000000e+00 : f32
    %315 = vector.broadcast %cst_117 : f32 to vector<17x128xf32>
    %316 = arith.subf %315, %294 : vector<17x128xf32>
    %317 = arith.mulf %316, %294 : vector<17x128xf32>
    %318 = math.exp %317 : vector<17x128xf32>
    %319 = arith.mulf %314, %318 : vector<17x128xf32>
    %cst_118 = arith.constant 1.000000e+00 : f32
    %320 = vector.broadcast %cst_118 : f32 to vector<17x128xf32>
    %321 = arith.subf %320, %319 : vector<17x128xf32>
    %322 = arith.mulf %293, %321 : vector<17x128xf32>
    %cst_119 = arith.constant 1.000000e+00 : f32
    %323 = vector.broadcast %cst_119 : f32 to vector<17x128xf32>
    %324 = arith.addf %323, %322 : vector<17x128xf32>
    %325 = arith.mulf %286, %324 : vector<17x128xf32>
    %c1_120 = arith.constant 1 : index
    %c0_121 = arith.constant 0 : index
    %c0_122 = arith.constant 0 : index
    %326 = vector.load %arg11[%c1_120, %c0_121, %c0_122] : memref<2x128x32xf32, #tpu.memory_space<vmem>>, vector<1x128x32xf32>
    %327 = vector.shape_cast %326 : vector<1x128x32xf32> to vector<128x32xf32>
    %cst_123 = arith.constant dense<0.000000e+00> : vector<17x32xf32>
    %328 = tpu.matmul %325, %327, %cst_123 {dimension_numbers = #tpu.dot_dimension_numbers<[1], [0], [0], [1], [0, 0, 1, 1], [], []>} : vector<17x128xf32>, vector<128x32xf32>, vector<17x32xf32> -> vector<17x32xf32>
    %329 = arith.addf %261, %328 : vector<17x32xf32>
    %330 = vector.extract_strided_slice %329 {offsets = [16, 0], sizes = [1, 32], strides = [1, 1]} : vector<17x32xf32> to vector<1x32xf32>
    %c0_124 = arith.constant 0 : index
    %c0_125 = arith.constant 0 : index
    %331 = vector.load %arg12[%c0_124, %c0_125] : memref<1x32xf32, #tpu.memory_space<vmem>>, vector<1x32xf32>
    %cst_126 = arith.constant dense<0.000000e+00> : vector<1xf32>
    %332 = vector.multi_reduction <add>, %330, %cst_126 [1] : vector<1x32xf32> to vector<1xf32>
    %333 = vector.shape_cast %332 : vector<1xf32> to vector<1x1xf32>
    %cst_127 = arith.constant 3.200000e+01 : f32
    %334 = vector.broadcast %cst_127 : f32 to vector<1x1xf32>
    %335 = arith.divf %333, %334 : vector<1x1xf32>
    %336 = vector.broadcast %335 : vector<1x1xf32> to vector<1x32xf32>
    %337 = arith.subf %330, %336 : vector<1x32xf32>
    %338 = arith.mulf %337, %337 : vector<1x32xf32>
    %cst_128 = arith.constant dense<0.000000e+00> : vector<1xf32>
    %339 = vector.multi_reduction <add>, %338, %cst_128 [1] : vector<1x32xf32> to vector<1xf32>
    %340 = vector.shape_cast %339 : vector<1xf32> to vector<1x1xf32>
    %cst_129 = arith.constant 3.200000e+01 : f32
    %341 = vector.broadcast %cst_129 : f32 to vector<1x1xf32>
    %342 = arith.divf %340, %341 : vector<1x1xf32>
    %cst_130 = arith.constant 9.99999974E-6 : f32
    %343 = vector.broadcast %cst_130 : f32 to vector<1x1xf32>
    %344 = arith.addf %342, %343 : vector<1x1xf32>
    %345 = math.rsqrt %344 : vector<1x1xf32>
    %346 = vector.broadcast %345 : vector<1x1xf32> to vector<1x32xf32>
    %347 = arith.mulf %337, %346 : vector<1x32xf32>
    %348 = arith.mulf %347, %331 : vector<1x32xf32>
    %c0_131 = arith.constant 0 : index
    %c0_132 = arith.constant 0 : index
    %349 = vector.load %arg13[%c0_131, %c0_132] : memref<32x128xf32, #tpu.memory_space<vmem>>, vector<32x128xf32>
    %cst_133 = arith.constant dense<0.000000e+00> : vector<1x128xf32>
    %350 = tpu.matmul %348, %349, %cst_133 {dimension_numbers = #tpu.dot_dimension_numbers<[1], [0], [0], [1], [0, 0, 1, 1], [], []>} : vector<1x32xf32>, vector<32x128xf32>, vector<1x128xf32> -> vector<1x128xf32>
    %c1_134 = arith.constant 1 : index
    %c0_135 = arith.constant 0 : index
    %c0_136 = arith.constant 0 : index
    %351 = vector.load %arg1[%c1_134, %c0_135, %c0_136] : memref<2x16x64xf32, #tpu.memory_space<vmem>>, vector<1x16x64xf32>
    %352 = vector.shape_cast %351 : vector<1x16x64xf32> to vector<16x64xf32>
    %c0_137 = arith.constant 0 : index
    %c0_138 = arith.constant 0 : index
    %353 = vector.load %arg2[%c0_137, %c0_138] : memref<1x64xf32, #tpu.memory_space<vmem>>, vector<1x64xf32>
    %cst_139 = arith.constant dense<0.000000e+00> : vector<16xf32>
    %354 = vector.multi_reduction <add>, %352, %cst_139 [1] : vector<16x64xf32> to vector<16xf32>
    %355 = vector.shape_cast %354 : vector<16xf32> to vector<16x1xf32>
    %cst_140 = arith.constant 6.400000e+01 : f32
    %356 = vector.broadcast %cst_140 : f32 to vector<16x1xf32>
    %357 = arith.divf %355, %356 : vector<16x1xf32>
    %358 = vector.broadcast %357 : vector<16x1xf32> to vector<16x64xf32>
    %359 = arith.subf %352, %358 : vector<16x64xf32>
    %360 = arith.mulf %359, %359 : vector<16x64xf32>
    %cst_141 = arith.constant dense<0.000000e+00> : vector<16xf32>
    %361 = vector.multi_reduction <add>, %360, %cst_141 [1] : vector<16x64xf32> to vector<16xf32>
    %362 = vector.shape_cast %361 : vector<16xf32> to vector<16x1xf32>
    %cst_142 = arith.constant 6.400000e+01 : f32
    %363 = vector.broadcast %cst_142 : f32 to vector<16x1xf32>
    %364 = arith.divf %362, %363 : vector<16x1xf32>
    %cst_143 = arith.constant 9.99999974E-6 : f32
    %365 = vector.broadcast %cst_143 : f32 to vector<16x1xf32>
    %366 = arith.addf %364, %365 : vector<16x1xf32>
    %367 = math.rsqrt %366 : vector<16x1xf32>
    %368 = vector.broadcast %367 : vector<16x1xf32> to vector<16x64xf32>
    %369 = arith.mulf %359, %368 : vector<16x64xf32>
    %370 = vector.broadcast %353 : vector<1x64xf32> to vector<16x64xf32>
    %371 = arith.mulf %369, %370 : vector<16x64xf32>
    %c0_144 = arith.constant 0 : index
    %c0_145 = arith.constant 0 : index
    %372 = vector.load %arg3[%c0_144, %c0_145] : memref<64x32xf32, #tpu.memory_space<vmem>>, vector<64x32xf32>
    %cst_146 = arith.constant dense<0.000000e+00> : vector<16x32xf32>
    %373 = tpu.matmul %371, %372, %cst_146 {dimension_numbers = #tpu.dot_dimension_numbers<[1], [0], [0], [1], [0, 0, 1, 1], [], []>} : vector<16x64xf32>, vector<64x32xf32>, vector<16x32xf32> -> vector<16x32xf32>
    %c0_147 = arith.constant 0 : index
    %c0_148 = arith.constant 0 : index
    %374 = vector.load %arg4[%c0_147, %c0_148] : memref<1x32xf32, #tpu.memory_space<vmem>>, vector<1x32xf32>
    %cst_149 = arith.constant dense<0.000000e+00> : vector<16xf32>
    %375 = vector.multi_reduction <add>, %373, %cst_149 [1] : vector<16x32xf32> to vector<16xf32>
    %376 = vector.shape_cast %375 : vector<16xf32> to vector<16x1xf32>
    %cst_150 = arith.constant 3.200000e+01 : f32
    %377 = vector.broadcast %cst_150 : f32 to vector<16x1xf32>
    %378 = arith.divf %376, %377 : vector<16x1xf32>
    %379 = vector.broadcast %378 : vector<16x1xf32> to vector<16x32xf32>
    %380 = arith.subf %373, %379 : vector<16x32xf32>
    %381 = arith.mulf %380, %380 : vector<16x32xf32>
    %cst_151 = arith.constant dense<0.000000e+00> : vector<16xf32>
    %382 = vector.multi_reduction <add>, %381, %cst_151 [1] : vector<16x32xf32> to vector<16xf32>
    %383 = vector.shape_cast %382 : vector<16xf32> to vector<16x1xf32>
    %cst_152 = arith.constant 3.200000e+01 : f32
    %384 = vector.broadcast %cst_152 : f32 to vector<16x1xf32>
    %385 = arith.divf %383, %384 : vector<16x1xf32>
    %cst_153 = arith.constant 9.99999974E-6 : f32
    %386 = vector.broadcast %cst_153 : f32 to vector<16x1xf32>
    %387 = arith.addf %385, %386 : vector<16x1xf32>
    %388 = math.rsqrt %387 : vector<16x1xf32>
    %389 = vector.broadcast %388 : vector<16x1xf32> to vector<16x32xf32>
    %390 = arith.mulf %380, %389 : vector<16x32xf32>
    %391 = vector.broadcast %374 : vector<1x32xf32> to vector<16x32xf32>
    %392 = arith.mulf %390, %391 : vector<16x32xf32>
    %c0_154 = arith.constant 0 : index
    %c0_155 = arith.constant 0 : index
    %393 = vector.load %arg5[%c0_154, %c0_155] : memref<17x32xf32, #tpu.memory_space<vmem>>, vector<17x32xf32>
    %cst_156 = arith.constant 0.000000e+00 : f32
    %394 = vector.broadcast %cst_156 : f32 to vector<1x32xf32>
    %395 = tpu.concatenate %392, %394 in 0 : vector<16x32xf32>, vector<1x32xf32> -> vector<17x32xf32>
    %396 = arith.addf %393, %395 : vector<17x32xf32>
    %c0_157 = arith.constant 0 : index
    %c0_158 = arith.constant 0 : index
    %c0_159 = arith.constant 0 : index
    %397 = vector.load %arg6[%c0_157, %c0_158, %c0_159] : memref<2x1x32xf32, #tpu.memory_space<vmem>>, vector<1x1x32xf32>
    %398 = vector.shape_cast %397 : vector<1x1x32xf32> to vector<1x32xf32>
    %cst_160 = arith.constant dense<0.000000e+00> : vector<17xf32>
    %399 = vector.multi_reduction <add>, %396, %cst_160 [1] : vector<17x32xf32> to vector<17xf32>
    %400 = vector.shape_cast %399 : vector<17xf32> to vector<17x1xf32>
    %cst_161 = arith.constant 3.200000e+01 : f32
    %401 = vector.broadcast %cst_161 : f32 to vector<17x1xf32>
    %402 = arith.divf %400, %401 : vector<17x1xf32>
    %403 = vector.broadcast %402 : vector<17x1xf32> to vector<17x32xf32>
    %404 = arith.subf %396, %403 : vector<17x32xf32>
    %405 = arith.mulf %404, %404 : vector<17x32xf32>
    %cst_162 = arith.constant dense<0.000000e+00> : vector<17xf32>
    %406 = vector.multi_reduction <add>, %405, %cst_162 [1] : vector<17x32xf32> to vector<17xf32>
    %407 = vector.shape_cast %406 : vector<17xf32> to vector<17x1xf32>
    %cst_163 = arith.constant 3.200000e+01 : f32
    %408 = vector.broadcast %cst_163 : f32 to vector<17x1xf32>
    %409 = arith.divf %407, %408 : vector<17x1xf32>
    %cst_164 = arith.constant 9.99999974E-6 : f32
    %410 = vector.broadcast %cst_164 : f32 to vector<17x1xf32>
    %411 = arith.addf %409, %410 : vector<17x1xf32>
    %412 = math.rsqrt %411 : vector<17x1xf32>
    %413 = vector.broadcast %412 : vector<17x1xf32> to vector<17x32xf32>
    %414 = arith.mulf %404, %413 : vector<17x32xf32>
    %415 = vector.broadcast %398 : vector<1x32xf32> to vector<17x32xf32>
    %416 = arith.mulf %414, %415 : vector<17x32xf32>
    %c0_165 = arith.constant 0 : index
    %c0_166 = arith.constant 0 : index
    %c0_167 = arith.constant 0 : index
    %417 = vector.load %arg7[%c0_165, %c0_166, %c0_167] : memref<2x32x96xf32, #tpu.memory_space<vmem>>, vector<1x32x96xf32>
    %418 = vector.shape_cast %417 : vector<1x32x96xf32> to vector<32x96xf32>
    %cst_168 = arith.constant dense<0.000000e+00> : vector<17x96xf32>
    %419 = tpu.matmul %416, %418, %cst_168 {dimension_numbers = #tpu.dot_dimension_numbers<[1], [0], [0], [1], [0, 0, 1, 1], [], []>} : vector<17x32xf32>, vector<32x96xf32>, vector<17x96xf32> -> vector<17x96xf32>
    %420 = vector.extract_strided_slice %419 {offsets = [0, 0], sizes = [17, 8], strides = [1, 1]} : vector<17x96xf32> to vector<17x8xf32>
    %421 = vector.extract_strided_slice %419 {offsets = [0, 8], sizes = [17, 8], strides = [1, 1]} : vector<17x96xf32> to vector<17x8xf32>
    %422 = vector.extract_strided_slice %419 {offsets = [0, 16], sizes = [17, 8], strides = [1, 1]} : vector<17x96xf32> to vector<17x8xf32>
    %423 = vector.extract_strided_slice %419 {offsets = [0, 24], sizes = [17, 8], strides = [1, 1]} : vector<17x96xf32> to vector<17x8xf32>
    %424 = vector.shape_cast %420 : vector<17x8xf32> to vector<1x17x8xf32>
    %425 = vector.shape_cast %421 : vector<17x8xf32> to vector<1x17x8xf32>
    %426 = vector.shape_cast %422 : vector<17x8xf32> to vector<1x17x8xf32>
    %427 = vector.shape_cast %423 : vector<17x8xf32> to vector<1x17x8xf32>
    %428 = tpu.concatenate %424, %425, %426, %427 in 0 : vector<1x17x8xf32>, vector<1x17x8xf32>, vector<1x17x8xf32>, vector<1x17x8xf32> -> vector<4x17x8xf32>
    %429 = vector.extract_strided_slice %419 {offsets = [0, 32], sizes = [17, 8], strides = [1, 1]} : vector<17x96xf32> to vector<17x8xf32>
    %430 = vector.extract_strided_slice %419 {offsets = [0, 40], sizes = [17, 8], strides = [1, 1]} : vector<17x96xf32> to vector<17x8xf32>
    %431 = vector.extract_strided_slice %419 {offsets = [0, 48], sizes = [17, 8], strides = [1, 1]} : vector<17x96xf32> to vector<17x8xf32>
    %432 = vector.extract_strided_slice %419 {offsets = [0, 56], sizes = [17, 8], strides = [1, 1]} : vector<17x96xf32> to vector<17x8xf32>
    %433 = vector.shape_cast %429 : vector<17x8xf32> to vector<1x17x8xf32>
    %434 = vector.shape_cast %430 : vector<17x8xf32> to vector<1x17x8xf32>
    %435 = vector.shape_cast %431 : vector<17x8xf32> to vector<1x17x8xf32>
    %436 = vector.shape_cast %432 : vector<17x8xf32> to vector<1x17x8xf32>
    %437 = tpu.concatenate %433, %434, %435, %436 in 0 : vector<1x17x8xf32>, vector<1x17x8xf32>, vector<1x17x8xf32>, vector<1x17x8xf32> -> vector<4x17x8xf32>
    %438 = vector.extract_strided_slice %419 {offsets = [0, 64], sizes = [17, 8], strides = [1, 1]} : vector<17x96xf32> to vector<17x8xf32>
    %439 = vector.extract_strided_slice %419 {offsets = [0, 72], sizes = [17, 8], strides = [1, 1]} : vector<17x96xf32> to vector<17x8xf32>
    %440 = vector.extract_strided_slice %419 {offsets = [0, 80], sizes = [17, 8], strides = [1, 1]} : vector<17x96xf32> to vector<17x8xf32>
    %441 = vector.extract_strided_slice %419 {offsets = [0, 88], sizes = [17, 8], strides = [1, 1]} : vector<17x96xf32> to vector<17x8xf32>
    %442 = vector.shape_cast %438 : vector<17x8xf32> to vector<1x17x8xf32>
    %443 = vector.shape_cast %439 : vector<17x8xf32> to vector<1x17x8xf32>
    %444 = vector.shape_cast %440 : vector<17x8xf32> to vector<1x17x8xf32>
    %445 = vector.shape_cast %441 : vector<17x8xf32> to vector<1x17x8xf32>
    %446 = tpu.concatenate %442, %443, %444, %445 in 0 : vector<1x17x8xf32>, vector<1x17x8xf32>, vector<1x17x8xf32>, vector<1x17x8xf32> -> vector<4x17x8xf32>
    "tpu.trace_start"() <{level = 10 : i32, message = "hqd,hkd->hqk"}> : () -> ()
    %cst_169 = arith.constant dense<0.000000e+00> : vector<4x17x17xf32>
    %447 = tpu.matmul %428, %437, %cst_169 {dimension_numbers = #tpu.dot_dimension_numbers<[2], [2], [1], [1], [0, 0, 0, 1, 1, 1], [0], [0]>} : vector<4x17x8xf32>, vector<4x17x8xf32>, vector<4x17x17xf32> -> vector<4x17x17xf32>
    "tpu.trace_stop"() : () -> ()
    %cst_170 = arith.constant dense<0xFF800000> : vector<4x17xf32>
    %448 = vector.multi_reduction <maximumf>, %447, %cst_170 [2] : vector<4x17x17xf32> to vector<4x17xf32>
    %449 = vector.shape_cast %448 : vector<4x17xf32> to vector<4x17x1xf32>
    %450 = vector.broadcast %449 : vector<4x17x1xf32> to vector<4x17x17xf32>
    %451 = arith.subf %447, %450 : vector<4x17x17xf32>
    %452 = math.exp %451 : vector<4x17x17xf32>
    %cst_171 = arith.constant dense<0.000000e+00> : vector<4x17xf32>
    %453 = vector.multi_reduction <add>, %452, %cst_171 [2] : vector<4x17x17xf32> to vector<4x17xf32>
    %454 = vector.shape_cast %453 : vector<4x17xf32> to vector<4x17x1xf32>
    %455 = vector.broadcast %454 : vector<4x17x1xf32> to vector<4x17x17xf32>
    %456 = arith.divf %452, %455 : vector<4x17x17xf32>
    "tpu.trace_start"() <{level = 10 : i32, message = "hqk,hkd->hqd"}> : () -> ()
    %cst_172 = arith.constant dense<0.000000e+00> : vector<4x17x8xf32>
    %457 = tpu.matmul %456, %446, %cst_172 {dimension_numbers = #tpu.dot_dimension_numbers<[2], [1], [1], [2], [0, 0, 0, 1, 1, 2], [0], [0]>} : vector<4x17x17xf32>, vector<4x17x8xf32>, vector<4x17x8xf32> -> vector<4x17x8xf32>
    "tpu.trace_stop"() : () -> ()
    %458 = vector.extract_strided_slice %457 {offsets = [0, 0, 0], sizes = [1, 17, 8], strides = [1, 1, 1]} : vector<4x17x8xf32> to vector<1x17x8xf32>
    %459 = vector.shape_cast %458 : vector<1x17x8xf32> to vector<17x8xf32>
    %460 = vector.extract_strided_slice %457 {offsets = [1, 0, 0], sizes = [1, 17, 8], strides = [1, 1, 1]} : vector<4x17x8xf32> to vector<1x17x8xf32>
    %461 = vector.shape_cast %460 : vector<1x17x8xf32> to vector<17x8xf32>
    %462 = vector.extract_strided_slice %457 {offsets = [2, 0, 0], sizes = [1, 17, 8], strides = [1, 1, 1]} : vector<4x17x8xf32> to vector<1x17x8xf32>
    %463 = vector.shape_cast %462 : vector<1x17x8xf32> to vector<17x8xf32>
    %464 = vector.extract_strided_slice %457 {offsets = [3, 0, 0], sizes = [1, 17, 8], strides = [1, 1, 1]} : vector<4x17x8xf32> to vector<1x17x8xf32>
    %465 = vector.shape_cast %464 : vector<1x17x8xf32> to vector<17x8xf32>
    %466 = tpu.concatenate %459, %461, %463, %465 in 1 : vector<17x8xf32>, vector<17x8xf32>, vector<17x8xf32>, vector<17x8xf32> -> vector<17x32xf32>
    %c0_173 = arith.constant 0 : index
    %c0_174 = arith.constant 0 : index
    %c0_175 = arith.constant 0 : index
    %467 = vector.load %arg8[%c0_173, %c0_174, %c0_175] : memref<2x32x32xf32, #tpu.memory_space<vmem>>, vector<1x32x32xf32>
    %468 = vector.shape_cast %467 : vector<1x32x32xf32> to vector<32x32xf32>
    %cst_176 = arith.constant dense<0.000000e+00> : vector<17x32xf32>
    %469 = tpu.matmul %466, %468, %cst_176 {dimension_numbers = #tpu.dot_dimension_numbers<[1], [0], [0], [1], [0, 0, 1, 1], [], []>} : vector<17x32xf32>, vector<32x32xf32>, vector<17x32xf32> -> vector<17x32xf32>
    %470 = arith.addf %396, %469 : vector<17x32xf32>
    %c0_177 = arith.constant 0 : index
    %c0_178 = arith.constant 0 : index
    %c0_179 = arith.constant 0 : index
    %471 = vector.load %arg9[%c0_177, %c0_178, %c0_179] : memref<2x1x32xf32, #tpu.memory_space<vmem>>, vector<1x1x32xf32>
    %472 = vector.shape_cast %471 : vector<1x1x32xf32> to vector<1x32xf32>
    %cst_180 = arith.constant dense<0.000000e+00> : vector<17xf32>
    %473 = vector.multi_reduction <add>, %470, %cst_180 [1] : vector<17x32xf32> to vector<17xf32>
    %474 = vector.shape_cast %473 : vector<17xf32> to vector<17x1xf32>
    %cst_181 = arith.constant 3.200000e+01 : f32
    %475 = vector.broadcast %cst_181 : f32 to vector<17x1xf32>
    %476 = arith.divf %474, %475 : vector<17x1xf32>
    %477 = vector.broadcast %476 : vector<17x1xf32> to vector<17x32xf32>
    %478 = arith.subf %470, %477 : vector<17x32xf32>
    %479 = arith.mulf %478, %478 : vector<17x32xf32>
    %cst_182 = arith.constant dense<0.000000e+00> : vector<17xf32>
    %480 = vector.multi_reduction <add>, %479, %cst_182 [1] : vector<17x32xf32> to vector<17xf32>
    %481 = vector.shape_cast %480 : vector<17xf32> to vector<17x1xf32>
    %cst_183 = arith.constant 3.200000e+01 : f32
    %482 = vector.broadcast %cst_183 : f32 to vector<17x1xf32>
    %483 = arith.divf %481, %482 : vector<17x1xf32>
    %cst_184 = arith.constant 9.99999974E-6 : f32
    %484 = vector.broadcast %cst_184 : f32 to vector<17x1xf32>
    %485 = arith.addf %483, %484 : vector<17x1xf32>
    %486 = math.rsqrt %485 : vector<17x1xf32>
    %487 = vector.broadcast %486 : vector<17x1xf32> to vector<17x32xf32>
    %488 = arith.mulf %478, %487 : vector<17x32xf32>
    %489 = vector.broadcast %472 : vector<1x32xf32> to vector<17x32xf32>
    %490 = arith.mulf %488, %489 : vector<17x32xf32>
    %c0_185 = arith.constant 0 : index
    %c0_186 = arith.constant 0 : index
    %c0_187 = arith.constant 0 : index
    %491 = vector.load %arg10[%c0_185, %c0_186, %c0_187] : memref<2x32x128xf32, #tpu.memory_space<vmem>>, vector<1x32x128xf32>
    %492 = vector.shape_cast %491 : vector<1x32x128xf32> to vector<32x128xf32>
    %cst_188 = arith.constant dense<0.000000e+00> : vector<17x128xf32>
    %493 = tpu.matmul %490, %492, %cst_188 {dimension_numbers = #tpu.dot_dimension_numbers<[1], [0], [0], [1], [0, 0, 1, 1], [], []>} : vector<17x32xf32>, vector<32x128xf32>, vector<17x128xf32> -> vector<17x128xf32>
    %cst_189 = arith.constant 5.000000e-01 : f32
    %494 = vector.broadcast %cst_189 : f32 to vector<17x128xf32>
    %495 = arith.mulf %494, %493 : vector<17x128xf32>
    %cst_190 = arith.constant 0.707106769 : f32
    %496 = vector.broadcast %cst_190 : f32 to vector<17x128xf32>
    %497 = arith.mulf %493, %496 : vector<17x128xf32>
    %cst_191 = arith.constant 0.000000e+00 : f32
    %498 = vector.broadcast %cst_191 : f32 to vector<17x128xf32>
    %499 = arith.cmpf olt, %497, %498 : vector<17x128xf32>
    %cst_192 = arith.constant -1.000000e+00 : f32
    %cst_193 = arith.constant 1.000000e+00 : f32
    %500 = vector.broadcast %cst_192 : f32 to vector<17x128xf32>
    %501 = vector.broadcast %cst_193 : f32 to vector<17x128xf32>
    %502 = arith.select %499, %500, %501 : vector<17x128xi1>, vector<17x128xf32>
    %503 = math.absf %497 : vector<17x128xf32>
    %cst_194 = arith.constant 0.327591091 : f32
    %504 = vector.broadcast %cst_194 : f32 to vector<17x128xf32>
    %505 = arith.mulf %504, %503 : vector<17x128xf32>
    %cst_195 = arith.constant 1.000000e+00 : f32
    %506 = vector.broadcast %cst_195 : f32 to vector<17x128xf32>
    %507 = arith.addf %506, %505 : vector<17x128xf32>
    %cst_196 = arith.constant 1.000000e+00 : f32
    %508 = vector.broadcast %cst_196 : f32 to vector<17x128xf32>
    %509 = arith.divf %508, %507 : vector<17x128xf32>
    %cst_197 = arith.constant 1.06140542 : f32
    %510 = vector.broadcast %cst_197 : f32 to vector<17x128xf32>
    %511 = arith.mulf %510, %509 : vector<17x128xf32>
    %cst_198 = arith.constant 1.45315206 : f32
    %512 = vector.broadcast %cst_198 : f32 to vector<17x128xf32>
    %513 = arith.subf %511, %512 : vector<17x128xf32>
    %514 = arith.mulf %513, %509 : vector<17x128xf32>
    %cst_199 = arith.constant 1.42141378 : f32
    %515 = vector.broadcast %cst_199 : f32 to vector<17x128xf32>
    %516 = arith.addf %514, %515 : vector<17x128xf32>
    %517 = arith.mulf %516, %509 : vector<17x128xf32>
    %cst_200 = arith.constant 0.284496725 : f32
    %518 = vector.broadcast %cst_200 : f32 to vector<17x128xf32>
    %519 = arith.subf %517, %518 : vector<17x128xf32>
    %520 = arith.mulf %519, %509 : vector<17x128xf32>
    %cst_201 = arith.constant 0.254829586 : f32
    %521 = vector.broadcast %cst_201 : f32 to vector<17x128xf32>
    %522 = arith.addf %520, %521 : vector<17x128xf32>
    %523 = arith.mulf %522, %509 : vector<17x128xf32>
    %cst_202 = arith.constant 0.000000e+00 : f32
    %524 = vector.broadcast %cst_202 : f32 to vector<17x128xf32>
    %525 = arith.subf %524, %503 : vector<17x128xf32>
    %526 = arith.mulf %525, %503 : vector<17x128xf32>
    %527 = math.exp %526 : vector<17x128xf32>
    %528 = arith.mulf %523, %527 : vector<17x128xf32>
    %cst_203 = arith.constant 1.000000e+00 : f32
    %529 = vector.broadcast %cst_203 : f32 to vector<17x128xf32>
    %530 = arith.subf %529, %528 : vector<17x128xf32>
    %531 = arith.mulf %502, %530 : vector<17x128xf32>
    %cst_204 = arith.constant 1.000000e+00 : f32
    %532 = vector.broadcast %cst_204 : f32 to vector<17x128xf32>
    %533 = arith.addf %532, %531 : vector<17x128xf32>
    %534 = arith.mulf %495, %533 : vector<17x128xf32>
    %c0_205 = arith.constant 0 : index
    %c0_206 = arith.constant 0 : index
    %c0_207 = arith.constant 0 : index
    %535 = vector.load %arg11[%c0_205, %c0_206, %c0_207] : memref<2x128x32xf32, #tpu.memory_space<vmem>>, vector<1x128x32xf32>
    %536 = vector.shape_cast %535 : vector<1x128x32xf32> to vector<128x32xf32>
    %cst_208 = arith.constant dense<0.000000e+00> : vector<17x32xf32>
    %537 = tpu.matmul %534, %536, %cst_208 {dimension_numbers = #tpu.dot_dimension_numbers<[1], [0], [0], [1], [0, 0, 1, 1], [], []>} : vector<17x128xf32>, vector<128x32xf32>, vector<17x32xf32> -> vector<17x32xf32>
    %538 = arith.addf %470, %537 : vector<17x32xf32>
    %c1_209 = arith.constant 1 : index
    %c0_210 = arith.constant 0 : index
    %c0_211 = arith.constant 0 : index
    %539 = vector.load %arg6[%c1_209, %c0_210, %c0_211] : memref<2x1x32xf32, #tpu.memory_space<vmem>>, vector<1x1x32xf32>
    %540 = vector.shape_cast %539 : vector<1x1x32xf32> to vector<1x32xf32>
    %cst_212 = arith.constant dense<0.000000e+00> : vector<17xf32>
    %541 = vector.multi_reduction <add>, %538, %cst_212 [1] : vector<17x32xf32> to vector<17xf32>
    %542 = vector.shape_cast %541 : vector<17xf32> to vector<17x1xf32>
    %cst_213 = arith.constant 3.200000e+01 : f32
    %543 = vector.broadcast %cst_213 : f32 to vector<17x1xf32>
    %544 = arith.divf %542, %543 : vector<17x1xf32>
    %545 = vector.broadcast %544 : vector<17x1xf32> to vector<17x32xf32>
    %546 = arith.subf %538, %545 : vector<17x32xf32>
    %547 = arith.mulf %546, %546 : vector<17x32xf32>
    %cst_214 = arith.constant dense<0.000000e+00> : vector<17xf32>
    %548 = vector.multi_reduction <add>, %547, %cst_214 [1] : vector<17x32xf32> to vector<17xf32>
    %549 = vector.shape_cast %548 : vector<17xf32> to vector<17x1xf32>
    %cst_215 = arith.constant 3.200000e+01 : f32
    %550 = vector.broadcast %cst_215 : f32 to vector<17x1xf32>
    %551 = arith.divf %549, %550 : vector<17x1xf32>
    %cst_216 = arith.constant 9.99999974E-6 : f32
    %552 = vector.broadcast %cst_216 : f32 to vector<17x1xf32>
    %553 = arith.addf %551, %552 : vector<17x1xf32>
    %554 = math.rsqrt %553 : vector<17x1xf32>
    %555 = vector.broadcast %554 : vector<17x1xf32> to vector<17x32xf32>
    %556 = arith.mulf %546, %555 : vector<17x32xf32>
    %557 = vector.broadcast %540 : vector<1x32xf32> to vector<17x32xf32>
    %558 = arith.mulf %556, %557 : vector<17x32xf32>
    %c1_217 = arith.constant 1 : index
    %c0_218 = arith.constant 0 : index
    %c0_219 = arith.constant 0 : index
    %559 = vector.load %arg7[%c1_217, %c0_218, %c0_219] : memref<2x32x96xf32, #tpu.memory_space<vmem>>, vector<1x32x96xf32>
    %560 = vector.shape_cast %559 : vector<1x32x96xf32> to vector<32x96xf32>
    %cst_220 = arith.constant dense<0.000000e+00> : vector<17x96xf32>
    %561 = tpu.matmul %558, %560, %cst_220 {dimension_numbers = #tpu.dot_dimension_numbers<[1], [0], [0], [1], [0, 0, 1, 1], [], []>} : vector<17x32xf32>, vector<32x96xf32>, vector<17x96xf32> -> vector<17x96xf32>
    %562 = vector.extract_strided_slice %561 {offsets = [0, 0], sizes = [17, 8], strides = [1, 1]} : vector<17x96xf32> to vector<17x8xf32>
    %563 = vector.extract_strided_slice %561 {offsets = [0, 8], sizes = [17, 8], strides = [1, 1]} : vector<17x96xf32> to vector<17x8xf32>
    %564 = vector.extract_strided_slice %561 {offsets = [0, 16], sizes = [17, 8], strides = [1, 1]} : vector<17x96xf32> to vector<17x8xf32>
    %565 = vector.extract_strided_slice %561 {offsets = [0, 24], sizes = [17, 8], strides = [1, 1]} : vector<17x96xf32> to vector<17x8xf32>
    %566 = vector.shape_cast %562 : vector<17x8xf32> to vector<1x17x8xf32>
    %567 = vector.shape_cast %563 : vector<17x8xf32> to vector<1x17x8xf32>
    %568 = vector.shape_cast %564 : vector<17x8xf32> to vector<1x17x8xf32>
    %569 = vector.shape_cast %565 : vector<17x8xf32> to vector<1x17x8xf32>
    %570 = tpu.concatenate %566, %567, %568, %569 in 0 : vector<1x17x8xf32>, vector<1x17x8xf32>, vector<1x17x8xf32>, vector<1x17x8xf32> -> vector<4x17x8xf32>
    %571 = vector.extract_strided_slice %561 {offsets = [0, 32], sizes = [17, 8], strides = [1, 1]} : vector<17x96xf32> to vector<17x8xf32>
    %572 = vector.extract_strided_slice %561 {offsets = [0, 40], sizes = [17, 8], strides = [1, 1]} : vector<17x96xf32> to vector<17x8xf32>
    %573 = vector.extract_strided_slice %561 {offsets = [0, 48], sizes = [17, 8], strides = [1, 1]} : vector<17x96xf32> to vector<17x8xf32>
    %574 = vector.extract_strided_slice %561 {offsets = [0, 56], sizes = [17, 8], strides = [1, 1]} : vector<17x96xf32> to vector<17x8xf32>
    %575 = vector.shape_cast %571 : vector<17x8xf32> to vector<1x17x8xf32>
    %576 = vector.shape_cast %572 : vector<17x8xf32> to vector<1x17x8xf32>
    %577 = vector.shape_cast %573 : vector<17x8xf32> to vector<1x17x8xf32>
    %578 = vector.shape_cast %574 : vector<17x8xf32> to vector<1x17x8xf32>
    %579 = tpu.concatenate %575, %576, %577, %578 in 0 : vector<1x17x8xf32>, vector<1x17x8xf32>, vector<1x17x8xf32>, vector<1x17x8xf32> -> vector<4x17x8xf32>
    %580 = vector.extract_strided_slice %561 {offsets = [0, 64], sizes = [17, 8], strides = [1, 1]} : vector<17x96xf32> to vector<17x8xf32>
    %581 = vector.extract_strided_slice %561 {offsets = [0, 72], sizes = [17, 8], strides = [1, 1]} : vector<17x96xf32> to vector<17x8xf32>
    %582 = vector.extract_strided_slice %561 {offsets = [0, 80], sizes = [17, 8], strides = [1, 1]} : vector<17x96xf32> to vector<17x8xf32>
    %583 = vector.extract_strided_slice %561 {offsets = [0, 88], sizes = [17, 8], strides = [1, 1]} : vector<17x96xf32> to vector<17x8xf32>
    %584 = vector.shape_cast %580 : vector<17x8xf32> to vector<1x17x8xf32>
    %585 = vector.shape_cast %581 : vector<17x8xf32> to vector<1x17x8xf32>
    %586 = vector.shape_cast %582 : vector<17x8xf32> to vector<1x17x8xf32>
    %587 = vector.shape_cast %583 : vector<17x8xf32> to vector<1x17x8xf32>
    %588 = tpu.concatenate %584, %585, %586, %587 in 0 : vector<1x17x8xf32>, vector<1x17x8xf32>, vector<1x17x8xf32>, vector<1x17x8xf32> -> vector<4x17x8xf32>
    "tpu.trace_start"() <{level = 10 : i32, message = "hqd,hkd->hqk"}> : () -> ()
    %cst_221 = arith.constant dense<0.000000e+00> : vector<4x17x17xf32>
    %589 = tpu.matmul %570, %579, %cst_221 {dimension_numbers = #tpu.dot_dimension_numbers<[2], [2], [1], [1], [0, 0, 0, 1, 1, 1], [0], [0]>} : vector<4x17x8xf32>, vector<4x17x8xf32>, vector<4x17x17xf32> -> vector<4x17x17xf32>
    "tpu.trace_stop"() : () -> ()
    %cst_222 = arith.constant dense<0xFF800000> : vector<4x17xf32>
    %590 = vector.multi_reduction <maximumf>, %589, %cst_222 [2] : vector<4x17x17xf32> to vector<4x17xf32>
    %591 = vector.shape_cast %590 : vector<4x17xf32> to vector<4x17x1xf32>
    %592 = vector.broadcast %591 : vector<4x17x1xf32> to vector<4x17x17xf32>
    %593 = arith.subf %589, %592 : vector<4x17x17xf32>
    %594 = math.exp %593 : vector<4x17x17xf32>
    %cst_223 = arith.constant dense<0.000000e+00> : vector<4x17xf32>
    %595 = vector.multi_reduction <add>, %594, %cst_223 [2] : vector<4x17x17xf32> to vector<4x17xf32>
    %596 = vector.shape_cast %595 : vector<4x17xf32> to vector<4x17x1xf32>
    %597 = vector.broadcast %596 : vector<4x17x1xf32> to vector<4x17x17xf32>
    %598 = arith.divf %594, %597 : vector<4x17x17xf32>
    "tpu.trace_start"() <{level = 10 : i32, message = "hqk,hkd->hqd"}> : () -> ()
    %cst_224 = arith.constant dense<0.000000e+00> : vector<4x17x8xf32>
    %599 = tpu.matmul %598, %588, %cst_224 {dimension_numbers = #tpu.dot_dimension_numbers<[2], [1], [1], [2], [0, 0, 0, 1, 1, 2], [0], [0]>} : vector<4x17x17xf32>, vector<4x17x8xf32>, vector<4x17x8xf32> -> vector<4x17x8xf32>
    "tpu.trace_stop"() : () -> ()
    %600 = vector.extract_strided_slice %599 {offsets = [0, 0, 0], sizes = [1, 17, 8], strides = [1, 1, 1]} : vector<4x17x8xf32> to vector<1x17x8xf32>
    %601 = vector.shape_cast %600 : vector<1x17x8xf32> to vector<17x8xf32>
    %602 = vector.extract_strided_slice %599 {offsets = [1, 0, 0], sizes = [1, 17, 8], strides = [1, 1, 1]} : vector<4x17x8xf32> to vector<1x17x8xf32>
    %603 = vector.shape_cast %602 : vector<1x17x8xf32> to vector<17x8xf32>
    %604 = vector.extract_strided_slice %599 {offsets = [2, 0, 0], sizes = [1, 17, 8], strides = [1, 1, 1]} : vector<4x17x8xf32> to vector<1x17x8xf32>
    %605 = vector.shape_cast %604 : vector<1x17x8xf32> to vector<17x8xf32>
    %606 = vector.extract_strided_slice %599 {offsets = [3, 0, 0], sizes = [1, 17, 8], strides = [1, 1, 1]} : vector<4x17x8xf32> to vector<1x17x8xf32>
    %607 = vector.shape_cast %606 : vector<1x17x8xf32> to vector<17x8xf32>
    %608 = tpu.concatenate %601, %603, %605, %607 in 1 : vector<17x8xf32>, vector<17x8xf32>, vector<17x8xf32>, vector<17x8xf32> -> vector<17x32xf32>
    %c1_225 = arith.constant 1 : index
    %c0_226 = arith.constant 0 : index
    %c0_227 = arith.constant 0 : index
    %609 = vector.load %arg8[%c1_225, %c0_226, %c0_227] : memref<2x32x32xf32, #tpu.memory_space<vmem>>, vector<1x32x32xf32>
    %610 = vector.shape_cast %609 : vector<1x32x32xf32> to vector<32x32xf32>
    %cst_228 = arith.constant dense<0.000000e+00> : vector<17x32xf32>
    %611 = tpu.matmul %608, %610, %cst_228 {dimension_numbers = #tpu.dot_dimension_numbers<[1], [0], [0], [1], [0, 0, 1, 1], [], []>} : vector<17x32xf32>, vector<32x32xf32>, vector<17x32xf32> -> vector<17x32xf32>
    %612 = arith.addf %538, %611 : vector<17x32xf32>
    %c1_229 = arith.constant 1 : index
    %c0_230 = arith.constant 0 : index
    %c0_231 = arith.constant 0 : index
    %613 = vector.load %arg9[%c1_229, %c0_230, %c0_231] : memref<2x1x32xf32, #tpu.memory_space<vmem>>, vector<1x1x32xf32>
    %614 = vector.shape_cast %613 : vector<1x1x32xf32> to vector<1x32xf32>
    %cst_232 = arith.constant dense<0.000000e+00> : vector<17xf32>
    %615 = vector.multi_reduction <add>, %612, %cst_232 [1] : vector<17x32xf32> to vector<17xf32>
    %616 = vector.shape_cast %615 : vector<17xf32> to vector<17x1xf32>
    %cst_233 = arith.constant 3.200000e+01 : f32
    %617 = vector.broadcast %cst_233 : f32 to vector<17x1xf32>
    %618 = arith.divf %616, %617 : vector<17x1xf32>
    %619 = vector.broadcast %618 : vector<17x1xf32> to vector<17x32xf32>
    %620 = arith.subf %612, %619 : vector<17x32xf32>
    %621 = arith.mulf %620, %620 : vector<17x32xf32>
    %cst_234 = arith.constant dense<0.000000e+00> : vector<17xf32>
    %622 = vector.multi_reduction <add>, %621, %cst_234 [1] : vector<17x32xf32> to vector<17xf32>
    %623 = vector.shape_cast %622 : vector<17xf32> to vector<17x1xf32>
    %cst_235 = arith.constant 3.200000e+01 : f32
    %624 = vector.broadcast %cst_235 : f32 to vector<17x1xf32>
    %625 = arith.divf %623, %624 : vector<17x1xf32>
    %cst_236 = arith.constant 9.99999974E-6 : f32
    %626 = vector.broadcast %cst_236 : f32 to vector<17x1xf32>
    %627 = arith.addf %625, %626 : vector<17x1xf32>
    %628 = math.rsqrt %627 : vector<17x1xf32>
    %629 = vector.broadcast %628 : vector<17x1xf32> to vector<17x32xf32>
    %630 = arith.mulf %620, %629 : vector<17x32xf32>
    %631 = vector.broadcast %614 : vector<1x32xf32> to vector<17x32xf32>
    %632 = arith.mulf %630, %631 : vector<17x32xf32>
    %c1_237 = arith.constant 1 : index
    %c0_238 = arith.constant 0 : index
    %c0_239 = arith.constant 0 : index
    %633 = vector.load %arg10[%c1_237, %c0_238, %c0_239] : memref<2x32x128xf32, #tpu.memory_space<vmem>>, vector<1x32x128xf32>
    %634 = vector.shape_cast %633 : vector<1x32x128xf32> to vector<32x128xf32>
    %cst_240 = arith.constant dense<0.000000e+00> : vector<17x128xf32>
    %635 = tpu.matmul %632, %634, %cst_240 {dimension_numbers = #tpu.dot_dimension_numbers<[1], [0], [0], [1], [0, 0, 1, 1], [], []>} : vector<17x32xf32>, vector<32x128xf32>, vector<17x128xf32> -> vector<17x128xf32>
    %cst_241 = arith.constant 5.000000e-01 : f32
    %636 = vector.broadcast %cst_241 : f32 to vector<17x128xf32>
    %637 = arith.mulf %636, %635 : vector<17x128xf32>
    %cst_242 = arith.constant 0.707106769 : f32
    %638 = vector.broadcast %cst_242 : f32 to vector<17x128xf32>
    %639 = arith.mulf %635, %638 : vector<17x128xf32>
    %cst_243 = arith.constant 0.000000e+00 : f32
    %640 = vector.broadcast %cst_243 : f32 to vector<17x128xf32>
    %641 = arith.cmpf olt, %639, %640 : vector<17x128xf32>
    %cst_244 = arith.constant -1.000000e+00 : f32
    %cst_245 = arith.constant 1.000000e+00 : f32
    %642 = vector.broadcast %cst_244 : f32 to vector<17x128xf32>
    %643 = vector.broadcast %cst_245 : f32 to vector<17x128xf32>
    %644 = arith.select %641, %642, %643 : vector<17x128xi1>, vector<17x128xf32>
    %645 = math.absf %639 : vector<17x128xf32>
    %cst_246 = arith.constant 0.327591091 : f32
    %646 = vector.broadcast %cst_246 : f32 to vector<17x128xf32>
    %647 = arith.mulf %646, %645 : vector<17x128xf32>
    %cst_247 = arith.constant 1.000000e+00 : f32
    %648 = vector.broadcast %cst_247 : f32 to vector<17x128xf32>
    %649 = arith.addf %648, %647 : vector<17x128xf32>
    %cst_248 = arith.constant 1.000000e+00 : f32
    %650 = vector.broadcast %cst_248 : f32 to vector<17x128xf32>
    %651 = arith.divf %650, %649 : vector<17x128xf32>
    %cst_249 = arith.constant 1.06140542 : f32
    %652 = vector.broadcast %cst_249 : f32 to vector<17x128xf32>
    %653 = arith.mulf %652, %651 : vector<17x128xf32>
    %cst_250 = arith.constant 1.45315206 : f32
    %654 = vector.broadcast %cst_250 : f32 to vector<17x128xf32>
    %655 = arith.subf %653, %654 : vector<17x128xf32>
    %656 = arith.mulf %655, %651 : vector<17x128xf32>
    %cst_251 = arith.constant 1.42141378 : f32
    %657 = vector.broadcast %cst_251 : f32 to vector<17x128xf32>
    %658 = arith.addf %656, %657 : vector<17x128xf32>
    %659 = arith.mulf %658, %651 : vector<17x128xf32>
    %cst_252 = arith.constant 0.284496725 : f32
    %660 = vector.broadcast %cst_252 : f32 to vector<17x128xf32>
    %661 = arith.subf %659, %660 : vector<17x128xf32>
    %662 = arith.mulf %661, %651 : vector<17x128xf32>
    %cst_253 = arith.constant 0.254829586 : f32
    %663 = vector.broadcast %cst_253 : f32 to vector<17x128xf32>
    %664 = arith.addf %662, %663 : vector<17x128xf32>
    %665 = arith.mulf %664, %651 : vector<17x128xf32>
    %cst_254 = arith.constant 0.000000e+00 : f32
    %666 = vector.broadcast %cst_254 : f32 to vector<17x128xf32>
    %667 = arith.subf %666, %645 : vector<17x128xf32>
    %668 = arith.mulf %667, %645 : vector<17x128xf32>
    %669 = math.exp %668 : vector<17x128xf32>
    %670 = arith.mulf %665, %669 : vector<17x128xf32>
    %cst_255 = arith.constant 1.000000e+00 : f32
    %671 = vector.broadcast %cst_255 : f32 to vector<17x128xf32>
    %672 = arith.subf %671, %670 : vector<17x128xf32>
    %673 = arith.mulf %644, %672 : vector<17x128xf32>
    %cst_256 = arith.constant 1.000000e+00 : f32
    %674 = vector.broadcast %cst_256 : f32 to vector<17x128xf32>
    %675 = arith.addf %674, %673 : vector<17x128xf32>
    %676 = arith.mulf %637, %675 : vector<17x128xf32>
    %c1_257 = arith.constant 1 : index
    %c0_258 = arith.constant 0 : index
    %c0_259 = arith.constant 0 : index
    %677 = vector.load %arg11[%c1_257, %c0_258, %c0_259] : memref<2x128x32xf32, #tpu.memory_space<vmem>>, vector<1x128x32xf32>
    %678 = vector.shape_cast %677 : vector<1x128x32xf32> to vector<128x32xf32>
    %cst_260 = arith.constant dense<0.000000e+00> : vector<17x32xf32>
    %679 = tpu.matmul %676, %678, %cst_260 {dimension_numbers = #tpu.dot_dimension_numbers<[1], [0], [0], [1], [0, 0, 1, 1], [], []>} : vector<17x128xf32>, vector<128x32xf32>, vector<17x32xf32> -> vector<17x32xf32>
    %680 = arith.addf %612, %679 : vector<17x32xf32>
    %681 = vector.extract_strided_slice %680 {offsets = [16, 0], sizes = [1, 32], strides = [1, 1]} : vector<17x32xf32> to vector<1x32xf32>
    %c0_261 = arith.constant 0 : index
    %c0_262 = arith.constant 0 : index
    %682 = vector.load %arg12[%c0_261, %c0_262] : memref<1x32xf32, #tpu.memory_space<vmem>>, vector<1x32xf32>
    %cst_263 = arith.constant dense<0.000000e+00> : vector<1xf32>
    %683 = vector.multi_reduction <add>, %681, %cst_263 [1] : vector<1x32xf32> to vector<1xf32>
    %684 = vector.shape_cast %683 : vector<1xf32> to vector<1x1xf32>
    %cst_264 = arith.constant 3.200000e+01 : f32
    %685 = vector.broadcast %cst_264 : f32 to vector<1x1xf32>
    %686 = arith.divf %684, %685 : vector<1x1xf32>
    %687 = vector.broadcast %686 : vector<1x1xf32> to vector<1x32xf32>
    %688 = arith.subf %681, %687 : vector<1x32xf32>
    %689 = arith.mulf %688, %688 : vector<1x32xf32>
    %cst_265 = arith.constant dense<0.000000e+00> : vector<1xf32>
    %690 = vector.multi_reduction <add>, %689, %cst_265 [1] : vector<1x32xf32> to vector<1xf32>
    %691 = vector.shape_cast %690 : vector<1xf32> to vector<1x1xf32>
    %cst_266 = arith.constant 3.200000e+01 : f32
    %692 = vector.broadcast %cst_266 : f32 to vector<1x1xf32>
    %693 = arith.divf %691, %692 : vector<1x1xf32>
    %cst_267 = arith.constant 9.99999974E-6 : f32
    %694 = vector.broadcast %cst_267 : f32 to vector<1x1xf32>
    %695 = arith.addf %693, %694 : vector<1x1xf32>
    %696 = math.rsqrt %695 : vector<1x1xf32>
    %697 = vector.broadcast %696 : vector<1x1xf32> to vector<1x32xf32>
    %698 = arith.mulf %688, %697 : vector<1x32xf32>
    %699 = arith.mulf %698, %682 : vector<1x32xf32>
    %c0_268 = arith.constant 0 : index
    %c0_269 = arith.constant 0 : index
    %700 = vector.load %arg13[%c0_268, %c0_269] : memref<32x128xf32, #tpu.memory_space<vmem>>, vector<32x128xf32>
    %cst_270 = arith.constant dense<0.000000e+00> : vector<1x128xf32>
    %701 = tpu.matmul %699, %700, %cst_270 {dimension_numbers = #tpu.dot_dimension_numbers<[1], [0], [0], [1], [0, 0, 1, 1], [], []>} : vector<1x32xf32>, vector<32x128xf32>, vector<1x128xf32> -> vector<1x128xf32>
    %702 = tpu.concatenate %350, %701 in 0 : vector<1x128xf32>, vector<1x128xf32> -> vector<2x128xf32>
    %c0_271 = arith.constant 0 : index
    %c0_272 = arith.constant 0 : index
    %703 = vector.load %arg14[%c0_271, %c0_272] : memref<2x128xf32, #tpu.memory_space<vmem>>, vector<2x128xf32>
    tpu.vector_store %arg14[%c0_271, %c0_272], %702 {strides = array<i32>} : memref<2x128xf32, #tpu.memory_space<vmem>>, vector<2x128xf32>,
    return
  }
  func.func @transform_0(%arg0: i32) -> (i32, i32, i32) {
    %c0_i32 = arith.constant 0 : i32
    %c0_i32_0 = arith.constant 0 : i32
    %c0_i32_1 = arith.constant 0 : i32
    return %arg0, %c0_i32, %c0_i32_0 : i32, i32, i32
  }
  func.func @transform_1(%arg0: i32) -> (i32, i32) {
    %c0_i32 = arith.constant 0 : i32
    %c0_i32_0 = arith.constant 0 : i32
    %c0_i32_1 = arith.constant 0 : i32
    return %c0_i32, %c0_i32_0 : i32, i32
  }
  func.func @transform_2(%arg0: i32) -> (i32, i32) {
    %c0_i32 = arith.constant 0 : i32
    %c0_i32_0 = arith.constant 0 : i32
    %c0_i32_1 = arith.constant 0 : i32
    return %c0_i32, %c0_i32_0 : i32, i32
  }
  func.func @transform_3(%arg0: i32) -> (i32, i32) {
    %c0_i32 = arith.constant 0 : i32
    %c0_i32_0 = arith.constant 0 : i32
    %c0_i32_1 = arith.constant 0 : i32
    return %c0_i32, %c0_i32_0 : i32, i32
  }
  func.func @transform_4(%arg0: i32) -> (i32, i32) {
    %c0_i32 = arith.constant 0 : i32
    %c0_i32_0 = arith.constant 0 : i32
    %c0_i32_1 = arith.constant 0 : i32
    return %c0_i32, %c0_i32_0 : i32, i32
  }
  func.func @transform_5(%arg0: i32) -> (i32, i32, i32) {
    %c0_i32 = arith.constant 0 : i32
    %c0_i32_0 = arith.constant 0 : i32
    %c0_i32_1 = arith.constant 0 : i32
    %c0_i32_2 = arith.constant 0 : i32
    return %c0_i32, %c0_i32_0, %c0_i32_1 : i32, i32, i32
  }
  func.func @transform_6(%arg0: i32) -> (i32, i32, i32) {
    %c0_i32 = arith.constant 0 : i32
    %c0_i32_0 = arith.constant 0 : i32
    %c0_i32_1 = arith.constant 0 : i32
    %c0_i32_2 = arith.constant 0 : i32
    return %c0_i32, %c0_i32_0, %c0_i32_1 : i32, i32, i32
  }
  func.func @transform_7(%arg0: i32) -> (i32, i32, i32) {
    %c0_i32 = arith.constant 0 : i32
    %c0_i32_0 = arith.constant 0 : i32
    %c0_i32_1 = arith.constant 0 : i32
    %c0_i32_2 = arith.constant 0 : i32
    return %c0_i32, %c0_i32_0, %c0_i32_1 : i32, i32, i32
  }
  func.func @transform_8(%arg0: i32) -> (i32, i32, i32) {
    %c0_i32 = arith.constant 0 : i32
    %c0_i32_0 = arith.constant 0 : i32
    %c0_i32_1 = arith.constant 0 : i32
    %c0_i32_2 = arith.constant 0 : i32
    return %c0_i32, %c0_i32_0, %c0_i32_1 : i32, i32, i32
  }
  func.func @transform_9(%arg0: i32) -> (i32, i32, i32) {
    %c0_i32 = arith.constant 0 : i32
    %c0_i32_0 = arith.constant 0 : i32
    %c0_i32_1 = arith.constant 0 : i32
    %c0_i32_2 = arith.constant 0 : i32
    return %c0_i32, %c0_i32_0, %c0_i32_1 : i32, i32, i32
  }
  func.func @transform_10(%arg0: i32) -> (i32, i32, i32) {
    %c0_i32 = arith.constant 0 : i32
    %c0_i32_0 = arith.constant 0 : i32
    %c0_i32_1 = arith.constant 0 : i32
    %c0_i32_2 = arith.constant 0 : i32
    return %c0_i32, %c0_i32_0, %c0_i32_1 : i32, i32, i32
  }
  func.func @transform_11(%arg0: i32) -> (i32, i32) {
    %c0_i32 = arith.constant 0 : i32
    %c0_i32_0 = arith.constant 0 : i32
    %c0_i32_1 = arith.constant 0 : i32
    return %c0_i32, %c0_i32_0 : i32, i32
  }
  func.func @transform_12(%arg0: i32) -> (i32, i32) {
    %c0_i32 = arith.constant 0 : i32
    %c0_i32_0 = arith.constant 0 : i32
    %c0_i32_1 = arith.constant 0 : i32
    return %c0_i32, %c0_i32_0 : i32, i32
  }
  func.func @transform_13(%arg0: i32) -> (i32, i32) {
    %c0_i32 = arith.constant 0 : i32
    %c0_i32_0 = arith.constant 0 : i32
    return %arg0, %c0_i32 : i32, i32
  }
}

</mosaic_0001>

<bundles_post_ra>
// kernel: vit_forward.1
= control target key start
LH: loop header
LB: loop body
LE: loop exit
PB: predicated region body
PF: predicated region fallthrough
CT: control target
= control target key end

     0   :  { %vm48_vm0 = vcmask 523264   ;;  %s11439_s0 = inlined_call_operand.vmem [shape: f32[2,16,64], index: 0, kind: input, shape index: {}]   ;;  %s11440_s1 = inlined_call_operand.vmem [shape: f32[1,64], index: 1, kind: input, shape index: {}]   ;;  %s11441_s2 = inlined_call_operand.vmem [shape: f32[64,32], index: 2, kind: input, shape index: {}]   ;;  %s11442_s3 = inlined_call_operand.vmem [shape: f32[1,32], index: 3, kind: input, shape index: {}]   ;;  %s11443_s4 = inlined_call_operand.vmem [shape: f32[17,32], index: 4, kind: input, shape index: {}]   ;;  %s11444_s5 = inlined_call_operand.vmem [shape: f32[2,1,32], index: 5, kind: input, shape index: {}]   ;;  %s11445_s6 = inlined_call_operand.vmem [shape: f32[2,32,96], index: 6, kind: input, shape index: {}]   ;;  %s11446_s7 = inlined_call_operand.vmem [shape: f32[2,32,32], index: 7, kind: input, shape index: {}]   ;;  %s11447_s8 = inlined_call_operand.vmem [shape: f32[2,1,32], index: 8, kind: input, shape index: {}]   ;;  %s11448_s9 = inlined_call_operand.vmem [shape: f32[2,32,128], index: 9, kind: input, shape index: {}]   ;;  %s11449_s10 = inlined_call_operand.vmem [shape: f32[2,128,32], index: 10, kind: input, shape index: {}]   ;;  %s11450_s11 = inlined_call_operand.vmem [shape: f32[1,32], index: 11, kind: input, shape index: {}]   ;;  %s11451_s12 = inlined_call_operand.vmem [shape: f32[32,128], index: 12, kind: input, shape index: {}]   ;;  %s11452_s13 = inlined_call_operand.hbm [shape: f32[2,128], index: 13, kind: output, shape index: {}]  }
   0x1   :  { %v45_v0 = vld [vmem:[%s11439_s0] sm:$0xff]  ;;  %v46_v1 = vld [vmem:[%s11439_s0 + $0x8] sm:$0xff] }
   0x2   :  { %18 = vsyncpa [#allocation3], 0  ;;  %v49_v2 = vsel %vm48_vm0, %v45_v0, 0.0  ;;  %v52_v3 = vsel %vm48_vm0, %v46_v1, 0.0  ;;  %v84_v14 = vld [vmem:[%s11441_s2] sm:$0xff]  ;;  %v85_v15 = vld [vmem:[%s11441_s2 + $0x8] sm:$0xff] }
   0x3   :  { %50 = vadd.xlane.f32.xlu0 %v49_v2  ;;  %v8366_v16 = vpack.c.bf16 %v85_v15, %v84_v14  ;;  %v86_v17 = vld [vmem:[%s11441_s2 + $0x10] sm:$0xff]  ;;  %v87_v18 = vld [vmem:[%s11441_s2 + $0x18] sm:$0xff]  ;;  %v88_v19 = vld [vmem:[%s11441_s2 + $0x20] sm:$0xff]  ;;  %vm174_vm1 = vcmask 261120   ;;  %vm223_vm2 = vcmask 253952   ;;  %vm9197_vm3 = vmmov 0  }
   0x4   :  { %v8370_v20 = vpack.c.bf16 %v87_v18, %v86_v17  ;;  %v89_v21 = vld [vmem:[%s11441_s2 + $0x28] sm:$0xff]  ;;  %v90_v23 = vld [vmem:[%s11441_s2 + $0x30] sm:$0xff]  ;;  %v91_v24 = vld [vmem:[%s11441_s2 + $0x38] sm:$0xff]  ;;  %s9199_s14 = smov 120   ;;  %s9200_s15 = smov 112   ;;  %vm386_vm4 = vcmask 64512  }
   0x5   :  { %8367 = vmatprep.subr.bf16.mxu0 %v8366_v16  ;;  %v8374_v22 = vpack.c.bf16 %v89_v21, %v88_v19  ;;  %v8378_v25 = vpack.c.bf16 %v91_v24, %v90_v23  ;;  %v6776_v33 = vld [vmem:[%s11440_s1] ss:$0 sm:$0xff]  ;;  %v211_v63 = vld [vmem:[%s11443_s4 + $0x8] sm:$0xff]  ;;  %s9201_s16 = smov 104   ;;  %s9202_s17 = smov 96   ;;  %vm9440_vm5 = vmpackc.low %vm386_vm4, %vm386_vm4  ;;  %vm773_vm6 = vcmask 138240  }
   0x6   :  { %8369 = vmatpush3.bf16.msra.mxu0 %v8366_v16  ;;  %v6779_v60 = vld [vmem:[%s11442_s3] ss:$0 sm:$0xff]  ;;  %s9203_s18 = smov 64   ;;  %vm780_vm7 = vcmask 131072   ;;  %vm924_vm8 = vcmask 1040384   ;;  %s9204_s25 = smov 8  }
   0x7   :  { %53 = vadd.xlane.f32.xlu0 %v52_v3  ;;  %8371 = vmatprep.subr.bf16.mxu0 %v8370_v20  ;;  %v210_v2 = vld [vmem:[%s11443_s4] sm:$0xff]  ;;  %s9205_s28 = smov 24   ;;  %s9206_s29 = smov 16   ;;  %vm1343_vm9 = vcmask 130048   ;;  %vm1347_vm10 = vcmask 195584  }
   0xa   :  { %8373 = vmatpush3.bf16.msra.mxu0 %v8370_v20 }
   0xb   :  { %8375 = vmatprep.subr.bf16.mxu0 %v8374_v22 }
   0xe   :  { %8377 = vmatpush3.bf16.msra.mxu0 %v8374_v22 }
   0xf   :  { %8379 = vmatprep.subr.bf16.mxu0 %v8378_v25 }
  0x12   :  { %8381 = vmatpush3.bf16.msra.mxu0 %v8378_v25  ;;  %v266_v25 = vld [vmem:[%s11445_s6] sm:$0xff] }
  0x90   :  { %v51_v4 = vpop.xlane.xlu0 %50 }
  0x91   :  { %v56_v5 = vmul.f32 0.015625, %v51_v4 }
  0x93   :  { %v58_v6 = vsub.f32 %v45_v0, %v56_v5 }
  0x94   :  { %v54_v7 = vpop.xlane.xlu0 %53 }
  0x95   :  { %v57_v8 = vmul.f32 0.015625, %v54_v7  ;;  %v60_v9 = vmul.f32 %v58_v6, %v58_v6  ;;  %v9340_v7 = vld [vmem:[%s11443_s4 + $0x10] sm:$0x1] }
  0x97   :  { %v59_v10 = vsub.f32 %v46_v1, %v57_v8  ;;  %v62_v11 = vsel %vm48_vm0, %v60_v9, 0.0  ;;  %v224_v9 = vsel %vm223_vm2, %v9340_v7, 0.0 }
  0x98   :  { %63 = vadd.xlane.f32.xlu1 %v62_v11 }
  0x99   :  { %v61_v12 = vmul.f32 %v59_v10, %v59_v10 }
  0x9b   :  { %v65_v13 = vsel %vm48_vm0, %v61_v12, 0.0 }
  0x9c   :  { %66 = vadd.xlane.f32.xlu1 %v65_v13 }
 0x125   :  { %v64_v26 = vpop.xlane.xlu1 %63 }
 0x126   :  { %v68_v27 = vmul.f32 0.015625, %v64_v26  ;;  %v267_v26 = vld [vmem:[%s11445_s6 + $0x8] sm:$0xff] }
 0x128   :  { %v70_v28 = vadd.f32 1e-05, %v68_v27  ;;  %v268_v27 = vld [vmem:[%s11445_s6 + $0x10] sm:$0xff] }
 0x129   :  { %v67_v29 = vpop.xlane.xlu1 %66 }
 0x12a   :  { %8863 = vrsqrt.f32 %v70_v28  ;;  %v69_v30 = vmul.f32 0.015625, %v67_v29  ;;  %v9196_v28 = vmov 0.0|0.0   ;;  %v8383_v29 = vpack.c.bf16 %v267_v26, %v266_v25 }
 0x12b   :  { %8382 = vmatprep.subr.bf16.mxu1 %v9196_v28  ;;  %8392 = vmatprep.subr.bf16.mxu0 %v9196_v28 }
 0x12c   :  { %v71_v31 = vadd.f32 1e-05, %v69_v30  ;;  %v269_v30 = vld [vmem:[%s11445_s6 + $0x18] sm:$0xff]  ;;  %8384 = vmatpush3.bf16.msra.mxu1 %v8383_v29 }
 0x12d   :  { %8385 = vmatprep.subr.bf16.mxu1 %v9196_v28 }
 0x12e   :  { %8865 = vrsqrt.f32 %v71_v31  ;;  %v9198_v31 = vmov 0.0  }
 0x12f   :  { %7485 = vmatprep.mubr.msk.f32.mxu1 %vm9197_vm3, %v9198_v31 }
 0x134   :  { %v8864_v32 = vpop.eup %8863 }
 0x135   :  { %v74_v34 = vmul.f32 %v8864_v32, %v58_v6  ;;  %v8386_v32 = vpack.c.bf16 %v269_v30, %v268_v27 }
 0x137   :  { %v82_v35 = vmul.f32 %v6776_v33, %v74_v34  ;;  %8387 = vmatpush3.bf16.msra.mxu1 %v8386_v32 }
 0x138   :  { %v8866_v36 = vpop.eup %8865  ;;  %8388 = vmatprep.subr.bf16.mxu1 %v9196_v28 }
 0x139   :  { %v75_v37 = vmul.f32 %v8866_v36, %v59_v10  ;;  %7474 = vmatprep.mubr.msk.f32.mxu0 %vm48_vm0, %v82_v35 }
 0x13b   :  { %v83_v38 = vmul.f32 %v6776_v33, %v75_v37 }
 0x13d   :  { %7475 = vmatmul.mubr.msk.f32.vlgmr.msra.gmra.mrb[0].mxu0 %vm48_vm0, %v83_v38 }
 0x13e   :  { %7515 = vmatprep.mubr.msk.f32.mxu0 %vm9197_vm3, %v9198_v31 }
 0x210   :  { %v7476_v39 = vpop.f32.mrb[0].mxu0 }
 0x211   :  { %v164_v40 = vpop.f32.mrb[1].mxu0  ;;  %v178_v41 = vsel %vm174_vm1, %v7476_v39, 0.0 }
 0x212   :  { %179 = vadd.xlane.f32.xlu1 %v178_v41  ;;  %v175_v42 = vsel %vm174_vm1, %v164_v40, 0.0 }
 0x213   :  { %176 = vadd.xlane.f32.xlu0 %v175_v42 }
 0x29f   :  { %v180_v43 = vpop.xlane.xlu1 %179 }
 0x2a0   :  { %v183_v44 = vmul.f32 0.03125, %v180_v43  ;;  %v177_v45 = vpop.xlane.xlu0 %176 }
 0x2a1   :  { %v182_v46 = vmul.f32 0.03125, %v177_v45 }
 0x2a2   :  { %v185_v47 = vsub.f32 %v7476_v39, %v183_v44  ;;  %v6780_v44 = vld [vmem:[%s11444_s5] ss:$0 sm:$0xff] }
 0x2a3   :  { %v184_v48 = vsub.f32 %v164_v40, %v182_v46 }
 0x2a4   :  { %v187_v49 = vmul.f32 %v185_v47, %v185_v47 }
 0x2a5   :  { %v186_v50 = vmul.f32 %v184_v48, %v184_v48 }
 0x2a6   :  { %v191_v51 = vsel %vm174_vm1, %v187_v49, 0.0 }
 0x2a7   :  { %192 = vadd.xlane.f32.xlu1 %v191_v51  ;;  %v188_v52 = vsel %vm174_vm1, %v186_v50, 0.0 }
 0x2a8   :  { %189 = vadd.xlane.f32.xlu0 %v188_v52 }
 0x334   :  { %v193_v53 = vpop.xlane.xlu1 %192 }
 0x335   :  { %v195_v54 = vmul.f32 0.03125, %v193_v53  ;;  %v190_v55 = vpop.xlane.xlu0 %189 }
 0x336   :  { %v194_v56 = vmul.f32 0.03125, %v190_v55 }
 0x337   :  { %v197_v57 = vadd.f32 1e-05, %v195_v54 }
 0x338   :  { %v196_v58 = vadd.f32 1e-05, %v194_v56 }
 0x339   :  { %8867 = vrsqrt.f32 %v197_v57 }
 0x33a   :  { %8869 = vrsqrt.f32 %v196_v58 }
 0x343   :  { %v8868_v59 = vpop.eup %8867 }
 0x344   :  { %v8870_v61 = vpop.eup %8869  ;;  %v201_v62 = vmul.f32 %v8868_v59, %v185_v47 }
 0x345   :  { %v200_v0 = vmul.f32 %v8870_v61, %v184_v48 }
 0x346   :  { %v209_v1 = vmul.f32 %v6779_v60, %v201_v62 }
 0x347   :  { %v208_v3 = vmul.f32 %v6779_v60, %v200_v0 }
 0x348   :  { %v9331_v4 = vadd.f32 %v211_v63, %v209_v1 }
 0x349   :  { %v9333_v5 = vadd.f32 %v210_v2, %v208_v3 }
 0x34a   :  { %v220_v6 = vsel %vm174_vm1, %v9331_v4, 0.0 }
 0x34b   :  { %221 = vadd.xlane.f32.xlu1 %v220_v6  ;;  %v217_v8 = vsel %vm174_vm1, %v9333_v5, 0.0 }
 0x34c   :  { %218 = vadd.xlane.f32.xlu0 %v217_v8 }
 0x350   :  { %225 = vadd.xlane.f32.xlu0 %v224_v9 }
 0x3d8   :  { %v222_v10 = vpop.xlane.xlu1 %221 }
 0x3d9   :  { %v228_v11 = vmul.f32 0.03125, %v222_v10  ;;  %v219_v12 = vpop.xlane.xlu0 %218 }
 0x3da   :  { %v227_v13 = vmul.f32 0.03125, %v219_v12 }
 0x3db   :  { %v231_v14 = vsub.f32 %v9331_v4, %v228_v11 }
 0x3dc   :  { %v230_v15 = vsub.f32 %v9333_v5, %v227_v13 }
 0x3dd   :  { %v226_v16 = vpop.xlane.xlu0 %225  ;;  %v234_v17 = vmul.f32 %v231_v14, %v231_v14 }
 0x3de   :  { %v229_v18 = vmul.f32 0.03125, %v226_v16  ;;  %v233_v19 = vmul.f32 %v230_v15, %v230_v15 }
 0x3df   :  { %v239_v20 = vsel %vm174_vm1, %v234_v17, 0.0 }
 0x3e0   :  { %v232_v21 = vsub.f32 %v9340_v7, %v229_v18  ;;  %240 = vadd.xlane.f32.xlu0 %v239_v20  ;;  %v236_v22 = vsel %vm174_vm1, %v233_v19, 0.0 }
 0x3e1   :  { %237 = vadd.xlane.f32.xlu1 %v236_v22 }
 0x3e2   :  { %v235_v23 = vmul.f32 %v232_v21, %v232_v21 }
 0x3e4   :  { %v242_v24 = vsel %vm223_vm2, %v235_v23, 0.0 }
 0x3e5   :  { %243 = vadd.xlane.f32.xlu1 %v242_v24 }
 0x46d   :  { %v241_v33 = vpop.xlane.xlu0 %240 }
 0x46e   :  { %v246_v34 = vmul.f32 0.03125, %v241_v33  ;;  %v238_v35 = vpop.xlane.xlu1 %237 }
 0x46f   :  { %v245_v36 = vmul.f32 0.03125, %v238_v35 }
 0x470   :  { %v249_v37 = vadd.f32 1e-05, %v246_v34 }
 0x471   :  { %v248_v38 = vadd.f32 1e-05, %v245_v36 }
 0x472   :  { %8871 = vrsqrt.f32 %v249_v37  ;;  %v244_v39 = vpop.xlane.xlu1 %243 }
 0x473   :  { %8873 = vrsqrt.f32 %v248_v38  ;;  %v247_v40 = vmul.f32 0.03125, %v244_v39 }
 0x475   :  { %v250_v41 = vadd.f32 1e-05, %v247_v40 }
 0x477   :  { %8875 = vrsqrt.f32 %v250_v41 }
 0x47c   :  { %v8872_v42 = vpop.eup %8871 }
 0x47d   :  { %v8874_v43 = vpop.eup %8873  ;;  %v255_v47 = vmul.f32 %v8872_v42, %v231_v14 }
 0x47e   :  { %v254_v45 = vmul.f32 %v8874_v43, %v230_v15 }
 0x47f   :  { %v264_v49 = vmul.f32 %v6780_v44, %v255_v47 }
 0x480   :  { %v263_v46 = vmul.f32 %v6780_v44, %v254_v45 }
 0x481   :  { %v8876_v48 = vpop.eup %8875 }
 0x482   :  { %7486 = vmatmul.mubr.msk.f32.vlgmr.msra.gmra.mrb[0].mxu1 %vm174_vm1, %v263_v46  ;;  %v256_v50 = vmul.f32 %v8876_v48, %v232_v21 }
 0x483   :  { %7488 = vmatprep.mubr.msk.f32.mxu1 %vm9197_vm3, %v9198_v31 }
 0x484   :  { %v265_v51 = vmul.f32 %v6780_v44, %v256_v50 }
 0x486   :  { %7489 = vmatmul.mubr.msk.f32.gmra.mrb[2].mxu1 %vm174_vm1, %v264_v49 }
 0x487   :  { %7491 = vmatprep.mubr.msk.f32.mxu1 %vm9197_vm3, %v9198_v31 }
 0x48a   :  { %7492 = vmatmul.mubr.msk.f32.gmra.mrb[4].mxu1 %vm174_vm1, %v265_v51 }
 0x48b   :  { %7500 = vmatprep.mubr.msk.f32.mxu1 %vm9197_vm3, %v9198_v31 }
 0x555   :  { %v345_v52 = vpop.f32.mrb[0].mxu1 }
 0x556   :  { %362 = vrot.lane.b32.xlu0 %v345_v52, %s9199_s14  ;;  %v7487_v53 = vpop.f32.mrb[1].mxu1 }
 0x559   :  { %v350_v54 = vpop.f32.mrb[2].mxu1 }
 0x55a   :  { %370 = vrot.lane.b32.xlu0 %v350_v54, %s9200_s15  ;;  %364 = vrot.lane.b32.xlu1 %v350_v54, %s9199_s14  ;;  %v7490_v55 = vpop.f32.mrb[3].mxu1  ;;  %v8703_v56 = vpack.i.bf16 %v350_v54, %v345_v52 }
 0x55d   :  { %v9387_v57 = vpop.f32.mrb[4].mxu1 }
 0x55e   :  { %376 = vrot.lane.b32.xlu0 %v350_v54, %s9201_s16  ;;  %368 = vrot.lane.b32.xlu1 %v345_v52, %s9200_s15  ;;  %v7493_v58 = vpop.f32.mrb[5].mxu1 }
 0x562   :  { %378 = vrot.lane.b32.xlu0 %v9387_v57, %s9201_s16  ;;  %366 = vrot.lane.b32.xlu1 %v9387_v57, %s9199_s14 }
 0x566   :  { %374 = vrot.lane.b32.xlu1 %v345_v52, %s9201_s16 }
 0x56a   :  { %372 = vrot.lane.b32.xlu1 %v9387_v57, %s9200_s15 }
 0x56e   :  { %8704 = vrot.lane.b32.xlu1 %v8703_v56, %s9202_s17 }
 0x572   :  { %384 = vrot.lane.b32.xlu1 %v9387_v57, %s9202_s17 }
 0x5c8   :  { %v363_v59 = vpop.permute.xlu0 %362 }
 0x5cc   :  { %v9401_v60 = vpop.permute.xlu1 %364  ;;  %v9405_v62 = vpop.permute.xlu0 %370 }
 0x5cd   :  { %v8708_v61 = vpack.i.bf16 %v9401_v60, %v363_v59 }
 0x5cf   :  { %8709 = vrot.lane.b32.xlu0 %v8708_v61, %s9202_s17 }
 0x5d0   :  { %v9407_v63 = vpop.permute.xlu1 %368  ;;  %v9419_v2 = vpop.permute.xlu0 %376 }
 0x5d1   :  { %v9411_v0 = vpack.i.bf16 %v9405_v62, %v9407_v63 }
 0x5d3   :  { %8714 = vrot.lane.b32.xlu1 %v9411_v0, %s9202_s17 }
 0x5d4   :  { %v9415_v1 = vpop.permute.xlu1 %366  ;;  %v9433_v9 = vpop.permute.xlu0 %378 }
 0x5d5   :  { %483 = vrot.lane.b32.xlu0 %v9415_v1, %s9202_s17 }
 0x5d8   :  { %v9421_v3 = vpop.permute.xlu1 %374 }
 0x5d9   :  { %v9425_v6 = vpack.i.bf16 %v9419_v2, %v9421_v3 }
 0x5db   :  { %8719 = vrot.lane.b32.xlu0 %v9425_v6, %s9202_s17 }
 0x5dc   :  { %v9429_v8 = vpop.permute.xlu1 %372 }
 0x5dd   :  { %581 = vrot.lane.b32.xlu1 %v9429_v8, %s9202_s17 }
 0x5df   :  { %679 = vrot.lane.b32.xlu0 %v9433_v9, %s9202_s17 }
 0x5e0   :  { %v8705_v10 = vpop.permute.xlu1 %8704 }
 0x5e1   :  { %v8707_v11 = vunpack.i.h.bf16 %v8705_v10  ;;  %v8706_v12 = vunpack.i.l.bf16 %v8705_v10  ;;  %8724 = vrot.lane.b32.xlu1 %v8703_v56, %s9203_s18 }
 0x5e3   :  { %v8389_v14 = vpack.c.bf16 %v8707_v11, %v8706_v12  ;;  %8729 = vrot.lane.b32.xlu0 %v8708_v61, %s9203_s18 }
 0x5e4   :  { %v385_v15 = vpop.permute.xlu1 %384 }
 0x5e5   :  { %8391 = vmatpush3.bf16.xpose.msk.msra.mxu1 %vm9440_vm5, %v8389_v14 }
 0x5e6   :  { %7498 = vmatprep.subr.mxu1 %v9198_v31 }
 0x5ed   :  { %7499 = vmatpush3.xpose.msk.msra.mxu1 %vm386_vm4, %v385_v15 }
 0x5ee   :  { %8396 = vmatprep.subr.bf16.mxu1 %v9196_v28 }
 0x5f0   :  { %7501 = vmatmul.mubr.msk.f32.vlgmr.msra.gmra.mrb[6].mxu1 %vm386_vm4, %v345_v52 }
 0x5f1   :  { %7503 = vmatprep.mubr.msk.f32.mxu1 %vm9197_vm3, %v9198_v31 }
 0x5f4   :  { %7504 = vmatmul.mubr.msk.f32.gmra.mrb[8].mxu1 %vm386_vm4, %v350_v54 }
 0x5f5   :  { %7506 = vmatprep.mubr.msk.f32.mxu1 %vm9197_vm3, %v9198_v31 }
 0x5f8   :  { %7507 = vmatmul.mubr.msk.f32.gmra.mrb[10].mxu1 %vm386_vm4, %v9387_v57 }
 0x5f9   :  { %7530 = vmatprep.mubr.msk.f32.mxu1 %vm9197_vm3, %v9198_v31 }
 0x641   :  { %v8710_v16 = vpop.permute.xlu0 %8709 }
 0x642   :  { %v8712_v17 = vunpack.i.h.bf16 %v8710_v16  ;;  %v8711_v18 = vunpack.i.l.bf16 %v8710_v16 }
 0x644   :  { %v8393_v19 = vpack.c.bf16 %v8712_v17, %v8711_v18 }
 0x645   :  { %v8715_v20 = vpop.permute.xlu1 %8714 }
 0x646   :  { %v8717_v21 = vunpack.i.h.bf16 %v8715_v20  ;;  %v8716_v22 = vunpack.i.l.bf16 %v8715_v20  ;;  %8395 = vmatpush3.bf16.xpose.msk.msra.mxu0 %vm9440_vm5, %v8393_v19 }
 0x647   :  { %7513 = vmatprep.subr.mxu0 %v9198_v31  ;;  %v484_v24 = vpop.permute.xlu0 %483 }
 0x648   :  { %v8397_v23 = vpack.c.bf16 %v8717_v21, %v8716_v22 }
 0x64a   :  { %8399 = vmatpush3.bf16.xpose.msk.msra.mxu1 %vm9440_vm5, %v8397_v23 }
 0x64b   :  { %7528 = vmatprep.subr.mxu1 %v9198_v31 }
 0x64d   :  { %v8720_v25 = vpop.permute.xlu0 %8719 }
 0x64e   :  { %v8722_v26 = vunpack.i.h.bf16 %v8720_v25  ;;  %v8721_v27 = vunpack.i.l.bf16 %v8720_v25  ;;  %7514 = vmatpush3.xpose.msk.msra.mxu0 %vm386_vm4, %v484_v24 }
 0x64f   :  { %v582_v29 = vpop.permute.xlu1 %581  ;;  %8400 = vmatprep.subr.bf16.mxu0 %v9196_v28 }
 0x650   :  { %v8401_v30 = vpack.c.bf16 %v8722_v26, %v8721_v27 }
 0x651   :  { %v680_v32 = vpop.permute.xlu0 %679  ;;  %7516 = vmatmul.mubr.msk.f32.vlgmr.msra.gmra.mrb[2].mxu0 %vm386_vm4, %v363_v59 }
 0x652   :  { %7529 = vmatpush3.xpose.msk.msra.mxu1 %vm386_vm4, %v582_v29  ;;  %8403 = vmatpush3.bf16.xpose.msk.msra.mxu0 %vm9440_vm5, %v8401_v30 }
 0x653   :  { %v8725_v33 = vpop.permute.xlu1 %8724  ;;  %7518 = vmatprep.mubr.msk.f32.mxu0 %vm9197_vm3, %v9198_v31  ;;  %8404 = vmatprep.subr.bf16.mxu1 %v9196_v28 }
 0x654   :  { %v8727_v34 = vunpack.i.h.bf16 %v8725_v33  ;;  %v8726_v35 = vunpack.i.l.bf16 %v8725_v33  ;;  %7543 = vmatprep.subr.mxu0 %v9198_v31 }
 0x655   :  { %7531 = vmatmul.mubr.msk.f32.vlgmr.msra.gmra.mrb[12].mxu1 %vm386_vm4, %v9407_v63  ;;  %v8730_v36 = vpop.permute.xlu0 %8729  ;;  %7519 = vmatmul.mubr.msk.f32.gmra.mrb[4].mxu0 %vm386_vm4, %v9401_v60 }
 0x656   :  { %v8405_v37 = vpack.c.bf16 %v8727_v34, %v8726_v35  ;;  %7521 = vmatprep.mubr.msk.f32.mxu0 %vm9197_vm3, %v9198_v31  ;;  %7533 = vmatprep.mubr.msk.f32.mxu1 %vm9197_vm3, %v9198_v31  ;;  %v8732_v38 = vunpack.i.h.bf16 %v8730_v36  ;;  %v8731_v39 = vunpack.i.l.bf16 %v8730_v36 }
 0x658   :  { %8406 = vmatpush3.bf16.msra.mxu1 %v8405_v37  ;;  %v8408_v40 = vpack.c.bf16 %v8732_v38, %v8731_v39 }
 0x659   :  { %7522 = vmatmul.mubr.msk.f32.gmra.mrb[6].mxu0 %vm386_vm4, %v9415_v1  ;;  %7534 = vmatmul.mubr.msk.f32.gmra.mrb[14].mxu1 %vm386_vm4, %v9405_v62 }
 0x65a   :  { %7544 = vmatpush3.xpose.msk.msra.mxu0 %vm386_vm4, %v680_v32  ;;  %7536 = vmatprep.mubr.msk.f32.mxu1 %vm9197_vm3, %v9198_v31 }
 0x65b   :  { %7545 = vmatprep.mubr.msk.f32.mxu0 %vm9197_vm3, %v9198_v31  ;;  %8407 = vmatprep.subr.bf16.mxu0 %v9196_v28 }
 0x65c   :  { %7558 = vmatprep.subr.mxu1 %v9198_v31 }
 0x65d   :  { %7537 = vmatmul.mubr.msk.f32.gmra.mrb[16].mxu1 %vm386_vm4, %v9429_v8  ;;  %7546 = vmatmul.mubr.msk.f32.vlgmr.msra.gmra.mrb[8].mxu0 %vm386_vm4, %v9421_v3 }
 0x65e   :  { %8409 = vmatpush3.bf16.msra.mxu0 %v8408_v40  ;;  %7548 = vmatprep.mubr.msk.f32.mxu0 %vm9197_vm3, %v9198_v31 }
 0x65f   :  { %7573 = vmatprep.subr.mxu0 %v9198_v31  ;;  %7560 = vmatprep.mubr.msk.f32.mxu1 %vm9197_vm3, %v9198_v31 }
 0x661   :  { %7549 = vmatmul.mubr.msk.f32.gmra.mrb[10].mxu0 %vm386_vm4, %v9419_v2 }
 0x662   :  { %7551 = vmatprep.mubr.msk.f32.mxu0 %vm9197_vm3, %v9198_v31 }
 0x665   :  { %7552 = vmatmul.mubr.msk.f32.gmra.mrb[12].mxu0 %vm386_vm4, %v9433_v9 }
 0x666   :  { %7575 = vmatprep.mubr.msk.f32.mxu0 %vm9197_vm3, %v9198_v31 }
 0x6c3   :  { %v465_v41 = vpop.f32.mrb[6].mxu1 }
 0x6c4   :  { %v7502_v42 = vpop.f32.mrb[7].mxu1  ;;  %v774_v43 = vsel %vm773_vm6, %v465_v41, -inf }
 0x6c5   :  { %775 = vmax.xlane.f32.xlu1 %v774_v43 }
 0x6c7   :  { %v470_v44 = vpop.f32.mrb[8].mxu1 }
 0x6c8   :  { %v7505_v45 = vpop.f32.mrb[9].mxu1  ;;  %v777_v46 = vsel %vm773_vm6, %v470_v44, -inf }
 0x6c9   :  { %778 = vmax.xlane.f32.xlu0 %v777_v46 }
 0x6cb   :  { %v475_v47 = vpop.f32.mrb[10].mxu1 }
 0x6cc   :  { %v7508_v48 = vpop.f32.mrb[11].mxu1  ;;  %v781_v49 = vsel %vm780_vm7, %v475_v47, -inf }
 0x6cd   :  { %782 = vmax.xlane.f32.xlu1 %v781_v49 }
 0x724   :  { %v563_v50 = vpop.f32.mrb[2].mxu0 }
 0x725   :  { %v7517_v51 = vpop.f32.mrb[3].mxu0  ;;  %v784_v52 = vsel %vm773_vm6, %v563_v50, -inf }
 0x726   :  { %785 = vmax.xlane.f32.xlu0 %v784_v52 }
 0x728   :  { %v9516_v53 = vpop.f32.mrb[4].mxu0  ;;  %v661_v54 = vpop.f32.mrb[12].mxu1 }
 0x729   :  { %v7520_v55 = vpop.f32.mrb[5].mxu0  ;;  %v7532_v56 = vpop.f32.mrb[13].mxu1  ;;  %v793_v58 = vsel %vm773_vm6, %v661_v54, -inf  ;;  %v787_v59 = vsel %vm773_vm6, %v9516_v53, -inf }
 0x72a   :  { %794 = vmax.xlane.f32.xlu1 %v793_v58  ;;  %788 = vmax.xlane.f32.xlu0 %v787_v59 }
 0x72c   :  { %v9521_v60 = vpop.f32.mrb[6].mxu0  ;;  %v666_v61 = vpop.f32.mrb[14].mxu1 }
 0x72d   :  { %v7523_v62 = vpop.f32.mrb[7].mxu0  ;;  %v7535_v63 = vpop.f32.mrb[15].mxu1  ;;  %v796_v2 = vsel %vm773_vm6, %v666_v61, -inf  ;;  %v790_v3 = vsel %vm780_vm7, %v9521_v60, -inf }
 0x72e   :  { %797 = vmax.xlane.f32.xlu1 %v796_v2  ;;  %791 = vmax.xlane.f32.xlu0 %v790_v3 }
 0x730   :  { %v9526_v10 = vpop.f32.mrb[16].mxu1  ;;  %v9528_v11 = vpop.f32.mrb[8].mxu0 }
 0x731   :  { %v7538_v12 = vpop.f32.mrb[17].mxu1  ;;  %v7547_v14 = vpop.f32.mrb[9].mxu0  ;;  %v799_v15 = vsel %vm780_vm7, %v9526_v10, -inf  ;;  %v802_v16 = vsel %vm773_vm6, %v9528_v11, -inf }
 0x732   :  { %800 = vmax.xlane.f32.xlu1 %v799_v15  ;;  %803 = vmax.xlane.f32.xlu0 %v802_v16 }
 0x734   :  { %v9534_v17 = vpop.f32.mrb[10].mxu0 }
 0x735   :  { %v7550_v18 = vpop.f32.mrb[11].mxu0  ;;  %v805_v19 = vsel %vm773_vm6, %v9534_v17, -inf }
 0x736   :  { %806 = vmax.xlane.f32.xlu0 %v805_v19 }
 0x738   :  { %v9538_v20 = vpop.f32.mrb[12].mxu0 }
 0x739   :  { %v7553_v21 = vpop.f32.mrb[13].mxu0  ;;  %v808_v22 = vsel %vm780_vm7, %v9538_v20, -inf }
 0x73a   :  { %809 = vmax.xlane.f32.xlu0 %v808_v22 }
 0x743   :  { %1011 = vrot.lane.b32.xlu1 %v9415_v1, %s9203_s18 }
 0x750   :  { %911 = vrot.lane.b32.xlu0 %v9387_v57, %s9203_s18 }
 0x752   :  { %v776_v23 = vpop.xlane.xlu1 %775 }
 0x753   :  { %v811_v24 = vsub.f32 %v465_v41, %v776_v23 }
 0x755   :  { %v823_v25 = vmul.f32 1.442695, %v811_v24 }
 0x756   :  { %v779_v26 = vpop.xlane.xlu0 %778 }
 0x757   :  { %v812_v27 = vsub.f32 %v470_v44, %v779_v26  ;;  %8877 = vpow2.f32 %v823_v25 }
 0x759   :  { %v825_v29 = vmul.f32 1.442695, %v812_v27 }
 0x75a   :  { %v783_v30 = vpop.xlane.xlu1 %782 }
 0x75b   :  { %v813_v32 = vsub.f32 %v475_v47, %v783_v30  ;;  %8879 = vpow2.f32 %v825_v29 }
 0x75d   :  { %v827_v33 = vmul.f32 1.442695, %v813_v32 }
 0x75f   :  { %8881 = vpow2.f32 %v827_v33 }
 0x761   :  { %v9546_v34 = vpop.eup %8877 }
 0x762   :  { %v847_v1 = vsel %vm773_vm6, %v9546_v34, 0.0 }
 0x765   :  { %v9550_v35 = vpop.eup %8879 }
 0x766   :  { %v850_v57 = vsel %vm773_vm6, %v9550_v35, 0.0 }
 0x767   :  { %848 = vadd.xlane.f32.xlu1 %v847_v1 }
 0x769   :  { %v9554_v36 = vpop.eup %8881 }
 0x76a   :  { %v853_v37 = vsel %vm780_vm7, %v9554_v36, 0.0 }
 0x76b   :  { %851 = vadd.xlane.f32.xlu1 %v850_v57 }
 0x76f   :  { %854 = vadd.xlane.f32.xlu1 %v853_v37 }
 0x7b3   :  { %v786_v38 = vpop.xlane.xlu0 %785 }
 0x7b4   :  { %v814_v39 = vsub.f32 %v563_v50, %v786_v38 }
 0x7b6   :  { %v829_v40 = vmul.f32 1.442695, %v814_v39 }
 0x7b7   :  { %v795_v41 = vpop.xlane.xlu1 %794  ;;  %v789_v42 = vpop.xlane.xlu0 %788 }
 0x7b8   :  { %8883 = vpow2.f32 %v829_v40  ;;  %v817_v43 = vsub.f32 %v661_v54, %v795_v41  ;;  %v815_v44 = vsub.f32 %v9516_v53, %v789_v42 }
 0x7ba   :  { %v835_v45 = vmul.f32 1.442695, %v817_v43  ;;  %v831_v46 = vmul.f32 1.442695, %v815_v44 }
 0x7bb   :  { %v798_v47 = vpop.xlane.xlu1 %797  ;;  %v792_v48 = vpop.xlane.xlu0 %791 }
 0x7bc   :  { %8885 = vpow2.f32 %v835_v45  ;;  %v818_v49 = vsub.f32 %v666_v61, %v798_v47  ;;  %v816_v51 = vsub.f32 %v9521_v60, %v792_v48 }
 0x7bd   :  { %8887 = vpow2.f32 %v831_v46 }
 0x7be   :  { %v837_v52 = vmul.f32 1.442695, %v818_v49  ;;  %v833_v55 = vmul.f32 1.442695, %v816_v51 }
 0x7bf   :  { %v801_v56 = vpop.xlane.xlu1 %800  ;;  %v804_v50 = vpop.xlane.xlu0 %803 }
 0x7c0   :  { %8889 = vpow2.f32 %v837_v52  ;;  %v819_v58 = vsub.f32 %v9526_v10, %v801_v56  ;;  %v820_v54 = vsub.f32 %v9528_v11, %v804_v50 }
 0x7c1   :  { %8891 = vpow2.f32 %v833_v55 }
 0x7c2   :  { %v9562_v53 = vpop.eup %8883  ;;  %v839_v59 = vmul.f32 1.442695, %v819_v58  ;;  %v841_v62 = vmul.f32 1.442695, %v820_v54 }
 0x7c3   :  { %v1012_v63 = vpop.permute.xlu1 %1011  ;;  %v807_v61 = vpop.xlane.xlu0 %806  ;;  %v856_v60 = vsel %vm773_vm6, %v9562_v53, 0.0 }
 0x7c4   :  { %8893 = vpow2.f32 %v839_v59  ;;  %v821_v2 = vsub.f32 %v9534_v17, %v807_v61  ;;  %7574 = vmatpush3.msk.msra.mxu0 %vm924_vm8, %v1012_v63  ;;  %857 = vadd.xlane.f32.xlu0 %v856_v60 }
 0x7c5   :  { %8895 = vpow2.f32 %v841_v62  ;;  %8413 = vmatprep.subr.bf16.mxu0 %v9196_v28 }
 0x7c6   :  { %v9569_v3 = vpop.eup %8885  ;;  %v843_v10 = vmul.f32 1.442695, %v821_v2 }
 0x7c7   :  { %v9571_v11 = vpop.eup %8887  ;;  %v810_v12 = vpop.xlane.xlu0 %809  ;;  %v865_v14 = vsel %vm773_vm6, %v9569_v3, 0.0 }
 0x7c8   :  { %8897 = vpow2.f32 %v843_v10  ;;  %v822_v15 = vsub.f32 %v9538_v20, %v810_v12  ;;  %866 = vadd.xlane.f32.xlu1 %v865_v14  ;;  %v859_v16 = vsel %vm773_vm6, %v9571_v11, 0.0 }
 0x7c9   :  { %860 = vadd.xlane.f32.xlu0 %v859_v16 }
 0x7ca   :  { %v9578_v17 = vpop.eup %8889  ;;  %v845_v18 = vmul.f32 1.442695, %v822_v15 }
 0x7cb   :  { %v9580_v19 = vpop.eup %8891  ;;  %v912_v21 = vpop.permute.xlu0 %911  ;;  %v868_v22 = vsel %vm773_vm6, %v9578_v17, 0.0 }
 0x7cc   :  { %8899 = vpow2.f32 %v845_v18  ;;  %869 = vadd.xlane.f32.xlu1 %v868_v22  ;;  %v862_v23 = vsel %vm780_vm7, %v9580_v19, 0.0  ;;  %7559 = vmatpush3.msk.msra.mxu1 %vm924_vm8, %v912_v21 }
 0x7cd   :  { %863 = vadd.xlane.f32.xlu0 %v862_v23  ;;  %8410 = vmatprep.subr.bf16.mxu1 %v9196_v28 }
 0x7ce   :  { %v9588_v20 = vpop.eup %8893 }
 0x7cf   :  { %v9590_v24 = vpop.eup %8895  ;;  %v871_v25 = vsel %vm780_vm7, %v9588_v20, 0.0 }
 0x7d0   :  { %872 = vadd.xlane.f32.xlu1 %v871_v25  ;;  %v874_v26 = vsel %vm773_vm6, %v9590_v24, 0.0 }
 0x7d1   :  { %875 = vadd.xlane.f32.xlu0 %v874_v26 }
 0x7d2   :  { %v9596_v27 = vpop.eup %8897 }
 0x7d3   :  { %v877_v29 = vsel %vm773_vm6, %v9596_v27, 0.0 }
 0x7d5   :  { %878 = vadd.xlane.f32.xlu0 %v877_v29  ;;  %v1353_v29 = vld [vmem:[%s11446_s7 + $0x10] sm:$0xff] }
 0x7d6   :  { %v9600_v30 = vpop.eup %8899 }
 0x7d7   :  { %v880_v32 = vsel %vm780_vm7, %v9600_v30, 0.0 }
 0x7d9   :  { %881 = vadd.xlane.f32.xlu0 %v880_v32 }
 0x7e1   :  { %8739 = vrot.lane.b32.xlu1 %v9425_v6, %s9203_s18 }
 0x7e5   :  { %1110 = vrot.lane.b32.xlu1 %v9429_v8, %s9203_s18 }
 0x7e9   :  { %1209 = vrot.lane.b32.xlu1 %v9433_v9, %s9203_s18 }
 0x7ef   :  { %8734 = vrot.lane.b32.xlu0 %v9411_v0, %s9203_s18 }
 0x7f4   :  { %v849_v33 = vpop.xlane.xlu1 %848 }
 0x7f5   :  { %8901 = vrcp.f32 %v849_v33  ;;  %v1354_v33 = vld [vmem:[%s11446_s7 + $0x18] sm:$0xff] }
 0x7f8   :  { %v852_v1 = vpop.xlane.xlu1 %851 }
 0x7f9   :  { %8903 = vrcp.f32 %v852_v1  ;;  %v8420_v1 = vpack.c.bf16 %v1354_v33, %v1353_v29 }
 0x7fc   :  { %v855_v57 = vpop.xlane.xlu1 %854 }
 0x7fd   :  { %8905 = vrcp.f32 %v855_v57 }
 0x7ff   :  { %v8902_v37 = vpop.eup %8901 }
 0x800   :  { %v884_v38 = vmul.f32 %v8902_v37, %v9546_v34 }
 0x802   :  { %7561 = vmatmul.mubr.msk.f32.vlgmr.msra.gmra.mrb[18].mxu1 %vm773_vm6, %v884_v38 }
 0x803   :  { %v8904_v6 = vpop.eup %8903  ;;  %7563 = vmatprep.mubr.msk.f32.mxu1 %vm9197_vm3, %v9198_v31 }
 0x804   :  { %v886_v8 = vmul.f32 %v8904_v6, %v9550_v35 }
 0x806   :  { %7564 = vmatmul.mubr.msk.f32.gmra.mrb[20].mxu1 %vm773_vm6, %v886_v8 }
 0x807   :  { %v8906_v0 = vpop.eup %8905  ;;  %7566 = vmatprep.mubr.msk.f32.mxu1 %vm9197_vm3, %v9198_v31 }
 0x808   :  { %v888_v9 = vmul.f32 %v8906_v0, %v9554_v36 }
 0x80a   :  { %7567 = vmatmul.mubr.msk.f32.gmra.mrb[22].mxu1 %vm773_vm6, %v888_v9 }
 0x80b   :  { %7590 = vmatprep.mubr.msk.f32.mxu1 %vm9197_vm3, %v9198_v31 }
 0x851   :  { %v858_v34 = vpop.xlane.xlu0 %857 }
 0x852   :  { %8907 = vrcp.f32 %v858_v34 }
 0x855   :  { %v867_v39 = vpop.xlane.xlu1 %866 }
 0x856   :  { %v861_v40 = vpop.xlane.xlu0 %860 }
 0x857   :  { %8909 = vrcp.f32 %v861_v40 }
 0x859   :  { %v870_v41 = vpop.xlane.xlu1 %869 }
 0x85a   :  { %v864_v35 = vpop.xlane.xlu0 %863 }
 0x85b   :  { %8911 = vrcp.f32 %v864_v35 }
 0x85c   :  { %v8908_v42 = vpop.eup %8907 }
 0x85d   :  { %v890_v43 = vmul.f32 %v8908_v42, %v9562_v53  ;;  %v873_v44 = vpop.xlane.xlu1 %872 }
 0x85e   :  { %v876_v45 = vpop.xlane.xlu0 %875 }
 0x85f   :  { %8913 = vrcp.f32 %v876_v45  ;;  %7576 = vmatmul.mubr.msk.f32.vlgmr.msra.gmra.mrb[14].mxu0 %vm773_vm6, %v890_v43 }
 0x860   :  { %7578 = vmatprep.mubr.msk.f32.mxu0 %vm9197_vm3, %v9198_v31 }
 0x861   :  { %v8910_v36 = vpop.eup %8909  ;;  %v8740_v46 = vpop.permute.xlu1 %8739 }
 0x862   :  { %v8742_v47 = vunpack.i.h.bf16 %v8740_v46  ;;  %v8741_v48 = vunpack.i.l.bf16 %v8740_v46  ;;  %v879_v49 = vpop.xlane.xlu0 %878  ;;  %v892_v51 = vmul.f32 %v8910_v36, %v9571_v11 }
 0x863   :  { %8915 = vrcp.f32 %v879_v49 }
 0x864   :  { %v8414_v52 = vpack.c.bf16 %v8742_v47, %v8741_v48  ;;  %7579 = vmatmul.mubr.msk.f32.gmra.mrb[16].mxu0 %vm773_vm6, %v892_v51  ;;  %8917 = vrcp.f32 %v867_v39 }
 0x865   :  { %v8912_v55 = vpop.eup %8911  ;;  %v1111_v56 = vpop.permute.xlu1 %1110  ;;  %7581 = vmatprep.mubr.msk.f32.mxu0 %vm9197_vm3, %v9198_v31 }
 0x866   :  { %v882_v50 = vpop.xlane.xlu0 %881  ;;  %8415 = vmatpush3.bf16.msra.mxu0 %v8414_v52  ;;  %v894_v58 = vmul.f32 %v8912_v55, %v9580_v19 }
 0x867   :  { %8919 = vrcp.f32 %v882_v50  ;;  %7603 = vmatprep.subr.mxu0 %v9198_v31 }
 0x868   :  { %7582 = vmatmul.mubr.msk.f32.gmra.mrb[18].mxu0 %vm773_vm6, %v894_v58  ;;  %8921 = vrcp.f32 %v870_v41 }
 0x869   :  { %v8914_v54 = vpop.eup %8913  ;;  %v1210_v53 = vpop.permute.xlu1 %1209  ;;  %7605 = vmatprep.mubr.msk.f32.mxu0 %vm9197_vm3, %v9198_v31  ;;  %8923 = vrcp.f32 %v873_v44 }
 0x86a   :  { %v902_v59 = vmul.f32 %v8914_v54, %v9590_v24  ;;  %v8735_v62 = vpop.permute.xlu0 %8734  ;;  %7604 = vmatpush3.msk.msra.mxu0 %vm924_vm8, %v1210_v53 }
 0x86b   :  { %v8737_v63 = vunpack.i.h.bf16 %v8735_v62  ;;  %v8736_v61 = vunpack.i.l.bf16 %v8735_v62  ;;  %8422 = vmatprep.subr.bf16.mxu0 %v9196_v28 }
 0x86c   :  { %7606 = vmatmul.mubr.msk.f32.vlgmr.msra.gmra.mrb[20].mxu0 %vm773_vm6, %v902_v59 }
 0x86d   :  { %v8916_v60 = vpop.eup %8915  ;;  %v8411_v2 = vpack.c.bf16 %v8737_v63, %v8736_v61  ;;  %7608 = vmatprep.mubr.msk.f32.mxu0 %vm9197_vm3, %v9198_v31 }
 0x86e   :  { %v904_v10 = vmul.f32 %v8916_v60, %v9596_v27  ;;  %v8918_v11 = vpop.eup %8917  ;;  %v1351_v27 = vld [vmem:[%s11446_s7] sm:$0xff] }
 0x86f   :  { %8412 = vmatpush3.bf16.msra.mxu1 %v8411_v2  ;;  %v896_v14 = vmul.f32 %v8918_v11, %v9569_v3 }
 0x870   :  { %7609 = vmatmul.mubr.msk.f32.gmra.mrb[22].mxu0 %vm773_vm6, %v904_v10  ;;  %7588 = vmatprep.subr.mxu1 %v9198_v31 }
 0x871   :  { %v8920_v12 = vpop.eup %8919  ;;  %7611 = vmatprep.mubr.msk.f32.mxu0 %vm9197_vm3, %v9198_v31 }
 0x872   :  { %v906_v15 = vmul.f32 %v8920_v12, %v9600_v30  ;;  %v8922_v16 = vpop.eup %8921 }
 0x873   :  { %7589 = vmatpush3.msk.msra.mxu1 %vm924_vm8, %v1111_v56  ;;  %v898_v18 = vmul.f32 %v8922_v16, %v9578_v17  ;;  %v8924_v3 = vpop.eup %8923 }
 0x874   :  { %7591 = vmatmul.mubr.msk.f32.vlgmr.msra.gmra.mrb[24].mxu1 %vm773_vm6, %v896_v14  ;;  %7612 = vmatmul.mubr.msk.f32.gmra.mrb[24].mxu0 %vm773_vm6, %v906_v15  ;;  %v900_v19 = vmul.f32 %v8924_v3, %v9588_v20  ;;  %v1352_v20 = vld [vmem:[%s11446_s7 + $0x8] sm:$0xff] }
 0x875   :  { %7593 = vmatprep.mubr.msk.f32.mxu1 %vm9197_vm3, %v9198_v31  ;;  %8416 = vmatprep.subr.bf16.mxu1 %v9196_v28  ;;  %v8417_v32 = vpack.c.bf16 %v1352_v20, %v1351_v27 }
 0x876   :  { %7639 = vmatprep.mubr.msk.f32.mxu0 %vm9197_vm3, %v9198_v31 }
 0x877   :  { %8418 = vmatpush3.bf16.msra.mxu1 %v8417_v32 }
 0x878   :  { %7594 = vmatmul.mubr.msk.f32.gmra.mrb[26].mxu1 %vm773_vm6, %v898_v18  ;;  %8419 = vmatprep.subr.bf16.mxu1 %v9196_v28 }
 0x879   :  { %7596 = vmatprep.mubr.msk.f32.mxu1 %vm9197_vm3, %v9198_v31 }
 0x87b   :  { %8421 = vmatpush3.bf16.msra.mxu1 %v8420_v1 }
 0x87c   :  { %7597 = vmatmul.mubr.msk.f32.gmra.mrb[28].mxu1 %vm773_vm6, %v900_v19  ;;  %8428 = vmatprep.subr.bf16.mxu1 %v9196_v28 }
 0x87d   :  { %7622 = vmatprep.mubr.msk.f32.mxu1 %vm9197_vm3, %v9198_v31 }
 0x8d5   :  { %v993_v21 = vpop.f32.mrb[18].mxu1 }
 0x8d6   :  { %v7562_v22 = vpop.f32.mrb[19].mxu1 }
 0x8d9   :  { %v998_v23 = vpop.f32.mrb[20].mxu1 }
 0x8da   :  { %v7565_v17 = vpop.f32.mrb[21].mxu1 }
 0x8dd   :  { %v1003_v24 = vpop.f32.mrb[22].mxu1 }
 0x8de   :  { %v7568_v25 = vpop.f32.mrb[23].mxu1 }
 0x932   :  { %v1092_v26 = vpop.f32.mrb[14].mxu0 }
 0x933   :  { %1307 = vrot.lane.b32.xlu1 %v1092_v26, %s9204_s25  ;;  %v7577_v30 = vpop.f32.mrb[15].mxu0 }
 0x937   :  { %v1097_v57 = vpop.f32.mrb[16].mxu0 }
 0x938   :  { %v7580_v37 = vpop.f32.mrb[17].mxu0 }
 0x939   :  { %v1497_v37 = vld [vmem:[%s11448_s9 + $0x8] sm:$0xff] }
 0x93b   :  { %v1102_v38 = vpop.f32.mrb[18].mxu0 }
 0x93c   :  { %v7583_v6 = vpop.f32.mrb[19].mxu0 }
 0x93d   :  { %v1498_v6 = vld [vmem:[%s11448_s9 + $0x10] sm:$0xff] }
 0x93f   :  { %v1290_v8 = vpop.f32.mrb[20].mxu0 }
 0x940   :  { %1331 = vrot.lane.b32.xlu1 %v1290_v8, %s9205_s28  ;;  %v7607_v0 = vpop.f32.mrb[21].mxu0  ;;  %v1499_v8 = vld [vmem:[%s11448_s9 + $0x18] sm:$0xff] }
 0x941   :  { %v8426_v0 = vpack.c.bf16 %v1499_v8, %v1498_v6 }
 0x943   :  { %v1295_v9 = vpop.f32.mrb[22].mxu0 }
 0x944   :  { %v7610_v34 = vpop.f32.mrb[23].mxu0 }
 0x947   :  { %v1191_v39 = vpop.f32.mrb[24].mxu1  ;;  %v1300_v40 = vpop.f32.mrb[24].mxu0 }
 0x948   :  { %1319 = vrot.lane.b32.xlu0 %v1191_v39, %s9206_s29  ;;  %v7592_v41 = vpop.f32.mrb[25].mxu1  ;;  %v7613_v35 = vpop.f32.mrb[25].mxu0 }
 0x94b   :  { %v1196_v42 = vpop.f32.mrb[26].mxu1 }
 0x94c   :  { %v7595_v43 = vpop.f32.mrb[27].mxu1  ;;  %1309 = vrot.lane.b32.xlu0 %v1097_v57, %s9204_s25  ;;  %1321 = vrot.lane.b32.xlu1 %v1196_v42, %s9206_s29  ;;  %v1496_v57 = vld [vmem:[%s11448_s9] sm:$0xff] }
 0x94f   :  { %v1201_v44 = vpop.f32.mrb[28].mxu1 }
 0x950   :  { %v7598_v45 = vpop.f32.mrb[29].mxu1  ;;  %1311 = vrot.lane.b32.xlu1 %v1102_v38, %s9204_s25  ;;  %1333 = vrot.lane.b32.xlu0 %v1295_v9, %s9205_s28  ;;  %v8423_v38 = vpack.c.bf16 %v1497_v37, %v1496_v57 }
 0x951   :  { %v6827_v45 = vld [vmem:[%s11447_s8] ss:$0 sm:$0xff] }
 0x952   :  { %8424 = vmatpush3.bf16.msra.mxu0 %v8423_v38 }
 0x953   :  { %8425 = vmatprep.subr.bf16.mxu0 %v9196_v28 }
 0x954   :  { %1323 = vrot.lane.b32.xlu0 %v1201_v44, %s9206_s29  ;;  %1335 = vrot.lane.b32.xlu1 %v1300_v40, %s9205_s28 }
 0x956   :  { %8427 = vmatpush3.bf16.msra.mxu0 %v8426_v0 }
 0x957   :  { %8452 = vmatprep.subr.bf16.mxu0 %v9196_v28 }
 0x9a5   :  { %v1308_v36 = vpop.permute.xlu1 %1307 }
 0x9a6   :  { %v1340_v46 = vsel %vm386_vm4, %v993_v21, %v1308_v36 }
 0x9b2   :  { %v1332_v47 = vpop.permute.xlu1 %1331 }
 0x9ba   :  { %v1320_v48 = vpop.permute.xlu0 %1319 }
 0x9bb   :  { %v1344_v49 = vsel %vm1343_vm9, %v1340_v46, %v1320_v48 }
 0x9bc   :  { %v1348_v51 = vsel %vm1347_vm10, %v1344_v49, %v1332_v47 }
 0x9bd   :  { %7623 = vmatmul.mubr.msk.f32.vlgmr.msra.gmra.mrb[30].mxu1 %vm174_vm1, %v1348_v51 }
 0x9be   :  { %v1310_v52 = vpop.permute.xlu0 %1309  ;;  %v1322_v55 = vpop.permute.xlu1 %1321  ;;  %7625 = vmatprep.mubr.msk.f32.mxu1 %vm9197_vm3, %v9198_v31 }
 0x9bf   :  { %v1341_v56 = vsel %vm386_vm4, %v998_v23, %v1310_v52 }
 0x9c0   :  { %v1345_v50 = vsel %vm1343_vm9, %v1341_v56, %v1322_v55 }
 0x9c2   :  { %v1312_v58 = vpop.permute.xlu1 %1311  ;;  %v1334_v54 = vpop.permute.xlu0 %1333 }
 0x9c3   :  { %v1349_v53 = vsel %vm1347_vm10, %v1345_v50, %v1334_v54  ;;  %v1342_v59 = vsel %vm386_vm4, %v1003_v24, %v1312_v58  ;;  %v1670_v50 = vld [vmem:[%s11449_s10] sm:$0xff]  ;;  %v1671_v58 = vld [vmem:[%s11449_s10 + $0x8] sm:$0xff] }
 0x9c4   :  { %7626 = vmatmul.mubr.msk.f32.gmra.mrb[32].mxu1 %vm174_vm1, %v1349_v53  ;;  %v8429_v54 = vpack.c.bf16 %v1671_v58, %v1670_v50  ;;  %v1672_v53 = vld [vmem:[%s11449_s10 + $0x10] sm:$0xff] }
 0x9c5   :  { %7628 = vmatprep.mubr.msk.f32.mxu1 %vm9197_vm3, %v9198_v31 }
 0x9c6   :  { %v1324_v62 = vpop.permute.xlu0 %1323  ;;  %v1336_v63 = vpop.permute.xlu1 %1335  ;;  %8430 = vmatpush3.bf16.msra.mxu1 %v8429_v54 }
 0x9c7   :  { %v1346_v61 = vsel %vm1343_vm9, %v1342_v59, %v1324_v62  ;;  %8431 = vmatprep.subr.bf16.mxu1 %v9196_v28  ;;  %v1673_v59 = vld [vmem:[%s11449_s10 + $0x18] sm:$0xff] }
 0x9c8   :  { %v1350_v60 = vsel %vm1347_vm10, %v1346_v61, %v1336_v63  ;;  %v8432_v62 = vpack.c.bf16 %v1673_v59, %v1672_v53  ;;  %v1674_v63 = vld [vmem:[%s11449_s10 + $0x20] sm:$0xff]  ;;  %v1675_v61 = vld [vmem:[%s11449_s10 + $0x28] sm:$0xff] }
 0x9c9   :  { %7629 = vmatmul.mubr.msk.f32.gmra.mrb[34].mxu1 %vm174_vm1, %v1350_v60  ;;  %v8435_v60 = vpack.c.bf16 %v1675_v61, %v1674_v63 }
 0x9ca   :  { %7680 = vmatprep.mubr.msk.f32.mxu1 %vm9197_vm3, %v9198_v31  ;;  %8433 = vmatpush3.bf16.msra.mxu1 %v8432_v62 }
 0x9cb   :  { %8434 = vmatprep.subr.bf16.mxu1 %v9196_v28 }
 0x9ce   :  { %8436 = vmatpush3.bf16.msra.mxu1 %v8435_v60 }
 0x9cf   :  { %8437 = vmatprep.subr.bf16.mxu1 %v9196_v28 }
 0xa90   :  { %v1430_v2 = vpop.f32.mrb[30].mxu1 }
 0xa91   :  { %v9708_v10 = vadd.f32 %v1430_v2, %v9333_v5  ;;  %v7624_v11 = vpop.f32.mrb[31].mxu1  ;;  %v1676_v2 = vld [vmem:[%s11449_s10 + $0x30] sm:$0xff] }
 0xa92   :  { %v1677_v11 = vld [vmem:[%s11449_s10 + $0x38] sm:$0xff] }
 0xa93   :  { %v1448_v12 = vsel %vm174_vm1, %v9708_v10, 0.0 }
 0xa94   :  { %1449 = vadd.xlane.f32.xlu0 %v1448_v12  ;;  %v8438_v12 = vpack.c.bf16 %v1677_v11, %v1676_v2 }
 0xa96   :  { %8439 = vmatpush3.bf16.msra.mxu1 %v8438_v12 }
 0xa97   :  { %v1435_v14 = vpop.f32.mrb[32].mxu1  ;;  %8440 = vmatprep.subr.bf16.mxu1 %v9196_v28 }
 0xa98   :  { %v9713_v15 = vadd.f32 %v1435_v14, %v9331_v4  ;;  %v7627_v16 = vpop.f32.mrb[33].mxu1  ;;  %v1678_v14 = vld [vmem:[%s11449_s10 + $0x40] sm:$0xff] }
 0xa99   :  { %v1679_v16 = vld [vmem:[%s11449_s10 + $0x48] sm:$0xff] }
 0xa9a   :  { %v1451_v18 = vsel %vm174_vm1, %v9713_v15, 0.0 }
 0xa9b   :  { %1452 = vadd.xlane.f32.xlu1 %v1451_v18  ;;  %v8441_v18 = vpack.c.bf16 %v1679_v16, %v1678_v14 }
 0xa9c   :  { %v1440_v3 = vpop.f32.mrb[34].mxu1 }
 0xa9d   :  { %v9718_v19 = vadd.f32 %v1440_v3, %v9340_v7  ;;  %v7630_v5 = vpop.f32.mrb[35].mxu1  ;;  %8442 = vmatpush3.bf16.msra.mxu1 %v8441_v18  ;;  %v1680_v3 = vld [vmem:[%s11449_s10 + $0x50] sm:$0xff] }
 0xa9e   :  { %8443 = vmatprep.subr.bf16.mxu1 %v9196_v28  ;;  %v1681_v5 = vld [vmem:[%s11449_s10 + $0x58] sm:$0xff] }
 0xa9f   :  { %v1454_v21 = vsel %vm223_vm2, %v9718_v19, 0.0 }
 0xaa0   :  { %1455 = vadd.xlane.f32.xlu0 %v1454_v21  ;;  %v8444_v21 = vpack.c.bf16 %v1681_v5, %v1680_v3 }
 0xaa2   :  { %8445 = vmatpush3.bf16.msra.mxu1 %v8444_v21 }
 0xaa3   :  { %8446 = vmatprep.subr.bf16.mxu1 %v9196_v28 }
 0xb21   :  { %v1450_v22 = vpop.xlane.xlu0 %1449 }
 0xb22   :  { %v1457_v23 = vmul.f32 0.03125, %v1450_v22  ;;  %v1682_v22 = vld [vmem:[%s11449_s10 + $0x60] sm:$0xff] }
 0xb24   :  { %v1460_v17 = vsub.f32 %v9708_v10, %v1457_v23  ;;  %v1683_v23 = vld [vmem:[%s11449_s10 + $0x68] sm:$0xff] }
 0xb26   :  { %v1463_v4 = vmul.f32 %v1460_v17, %v1460_v17 }
 0xb28   :  { %v1453_v24 = vpop.xlane.xlu1 %1452  ;;  %v1466_v25 = vsel %vm174_vm1, %v1463_v4, 0.0  ;;  %v1684_v4 = vld [vmem:[%s11449_s10 + $0x70] sm:$0xff] }
 0xb29   :  { %v1458_v26 = vmul.f32 0.03125, %v1453_v24  ;;  %1467 = vadd.xlane.f32.xlu0 %v1466_v25  ;;  %v1685_v24 = vld [vmem:[%s11449_s10 + $0x78] sm:$0xff] }
 0xb2a   :  { %v8450_v25 = vpack.c.bf16 %v1685_v24, %v1684_v4 }
 0xb2b   :  { %v1461_v27 = vsub.f32 %v9713_v15, %v1458_v26 }
 0xb2d   :  { %v1456_v20 = vpop.xlane.xlu0 %1455  ;;  %v1464_v7 = vmul.f32 %v1461_v27, %v1461_v27 }
 0xb2e   :  { %v1459_v29 = vmul.f32 0.03125, %v1456_v20 }
 0xb2f   :  { %v1469_v30 = vsel %vm174_vm1, %v1464_v7, 0.0 }
 0xb30   :  { %v1462_v32 = vsub.f32 %v9718_v19, %v1459_v29  ;;  %1470 = vadd.xlane.f32.xlu0 %v1469_v30 }
 0xb32   :  { %v1465_v33 = vmul.f32 %v1462_v32, %v1462_v32 }
 0xb34   :  { %v1472_v1 = vsel %vm223_vm2, %v1465_v33, 0.0 }
 0xb35   :  { %1473 = vadd.xlane.f32.xlu1 %v1472_v1 }
 0xbb6   :  { %v1468_v9 = vpop.xlane.xlu0 %1467 }
 0xbb7   :  { %v1475_v34 = vmul.f32 0.03125, %v1468_v9 }
 0xbb9   :  { %v1478_v39 = vadd.f32 1e-05, %v1475_v34 }
 0xbbb   :  { %8925 = vrsqrt.f32 %v1478_v39 }
 0xbbd   :  { %v1471_v40 = vpop.xlane.xlu0 %1470 }
 0xbbe   :  { %v1476_v41 = vmul.f32 0.03125, %v1471_v40 }
 0xbc0   :  { %v1479_v35 = vadd.f32 1e-05, %v1476_v41 }
 0xbc2   :  { %8927 = vrsqrt.f32 %v1479_v35  ;;  %v1474_v42 = vpop.xlane.xlu1 %1473 }
 0xbc3   :  { %v1477_v43 = vmul.f32 0.03125, %v1474_v42 }
 0xbc5   :  { %v8926_v44 = vpop.eup %8925  ;;  %v1480_v36 = vadd.f32 1e-05, %v1477_v43 }
 0xbc6   :  { %v1484_v46 = vmul.f32 %v8926_v44, %v1460_v17  ;;  %v8447_v17 = vpack.c.bf16 %v1683_v23, %v1682_v22 }
 0xbc7   :  { %8929 = vrsqrt.f32 %v1480_v36 }
 0xbc8   :  { %v1493_v47 = vmul.f32 %v6827_v45, %v1484_v46  ;;  %8448 = vmatpush3.bf16.msra.mxu1 %v8447_v17  ;;  %v9207_v17 = vmov 1.0  }
 0xbc9   :  { %8449 = vmatprep.subr.bf16.mxu1 %v9196_v28 }
 0xbca   :  { %7640 = vmatmul.mubr.msk.f32.vlgmr.msra.gmra.mrb[26].mxu0 %vm174_vm1, %v1493_v47 }
 0xbcb   :  { %7642 = vmatprep.mubr.msk.f32.mxu0 %vm9197_vm3, %v9198_v31 }
 0xbcc   :  { %v8928_v48 = vpop.eup %8927  ;;  %8451 = vmatpush3.bf16.msra.mxu1 %v8450_v25 }
 0xbcd   :  { %v1485_v49 = vmul.f32 %v8928_v48, %v1461_v27  ;;  %8466 = vmatprep.subr.bf16.mxu1 %v9196_v28 }
 0xbcf   :  { %v1494_v51 = vmul.f32 %v6827_v45, %v1485_v49 }
 0xbd1   :  { %v8930_v52 = vpop.eup %8929  ;;  %7643 = vmatmul.mubr.msk.f32.gmra.mrb[28].mxu0 %vm174_vm1, %v1494_v51 }
 0xbd2   :  { %7645 = vmatprep.mubr.msk.f32.mxu0 %vm9197_vm3, %v9198_v31  ;;  %v1486_v55 = vmul.f32 %v8930_v52, %v1462_v32 }
 0xbd4   :  { %v1495_v56 = vmul.f32 %v6827_v45, %v1486_v55 }
 0xbd6   :  { %7646 = vmatmul.mubr.msk.f32.gmra.mrb[30].mxu0 %vm174_vm1, %v1495_v56 }
 0xbd7   :  { %7697 = vmatprep.mubr.msk.f32.mxu0 %vm9197_vm3, %v9198_v31 }
 0xc9d   :  { %v9810_v26 = vpop.f32.mrb[26].mxu0 }
 0xc9e   :  { %v1592_v27 = vmul.f32 0.70710677, %v9810_v26  ;;  %v7641_v20 = vpop.f32.mrb[27].mxu0 }
 0xca0   :  { %v1601_v7 = vand.u32 2147483647, %v1592_v27  ;;  %vm1595_vm11 = vcmp.lt.f32.partialorder %v1592_v27, 0.0 }
 0xca1   :  { %v1598_v4 = vsel %vm1595_vm11, -1.0, %v9207_v17 }
 0xca2   :  { %v1604_v29 = vmul.f32 0.3275911, %v1601_v7  ;;  %v1643_v9 = vsub.f32 0.0, %v1601_v7 }
 0xca4   :  { %v1607_v30 = vadd.f32 1.0, %v1604_v29  ;;  %v9813_v32 = vpop.f32.mrb[28].mxu0  ;;  %v1646_v41 = vmul.f32 %v1643_v9, %v1601_v7 }
 0xca5   :  { %v9816_v33 = vmul.f32 0.70710677, %v9813_v32  ;;  %v7644_v1 = vpop.f32.mrb[29].mxu0 }
 0xca6   :  { %8931 = vrcp.f32 %v1607_v30  ;;  %v1649_v45 = vmul.f32 1.442695, %v1646_v41  ;;  %v1589_v30 = vmul.f32 0.5, %v9810_v26  ;;  %v1590_v41 = vmul.f32 0.5, %v9813_v32 }
 0xca7   :  { %v1602_v57 = vand.u32 2147483647, %v9816_v33  ;;  %vm1596_vm12 = vcmp.lt.f32.partialorder %v9816_v33, 0.0 }
 0xca8   :  { %v1599_v9 = vsel %vm1596_vm12, -1.0, %v9207_v17 }
 0xca9   :  { %v1605_v37 = vmul.f32 0.3275911, %v1602_v57  ;;  %v9819_v38 = vpop.f32.mrb[30].mxu0  ;;  %v1644_v44 = vsub.f32 0.0, %v1602_v57 }
 0xcaa   :  { %v9822_v6 = vmul.f32 0.70710677, %v9819_v38  ;;  %v7647_v8 = vpop.f32.mrb[31].mxu0 }
 0xcab   :  { %v1608_v0 = vadd.f32 1.0, %v1605_v37  ;;  %v1647_v48 = vmul.f32 %v1644_v44, %v1602_v57 }
 0xcac   :  { %v1603_v34 = vand.u32 2147483647, %v9822_v6  ;;  %vm1597_vm13 = vcmp.lt.f32.partialorder %v9822_v6, 0.0 }
 0xcad   :  { %8933 = vrcp.f32 %v1608_v0  ;;  %v1651_v50 = vmul.f32 1.442695, %v1647_v48 }
 0xcae   :  { %v1606_v39 = vmul.f32 0.3275911, %v1603_v34  ;;  %v1645_v51 = vsub.f32 0.0, %v1603_v34 }
 0xcb0   :  { %v8932_v40 = vpop.eup %8931  ;;  %v1609_v35 = vadd.f32 1.0, %v1606_v39  ;;  %v1648_v53 = vmul.f32 %v1645_v51, %v1603_v34 }
 0xcb1   :  { %v1616_v42 = vmul.f32 1.0614054, %v8932_v40 }
 0xcb2   :  { %8935 = vrcp.f32 %v1609_v35  ;;  %v1653_v11 = vmul.f32 1.442695, %v1648_v53 }
 0xcb3   :  { %v6831_v43 = vadd.f32 -1.4531521, %v1616_v42  ;;  %8937 = vpow2.f32 %v1649_v45  ;;  %v1591_v45 = vmul.f32 0.5, %v9819_v38 }
 0xcb4   :  { %8939 = vpow2.f32 %v1651_v50 }
 0xcb5   :  { %v1622_v36 = vmul.f32 %v8932_v40, %v6831_v43  ;;  %8941 = vpow2.f32 %v1653_v11  ;;  %v1600_v43 = vsel %vm1597_vm13, -1.0, %v9207_v17 }
 0xcb7   :  { %v8934_v46 = vpop.eup %8933  ;;  %v1625_v47 = vadd.f32 1.4214138, %v1622_v36 }
 0xcb8   :  { %v1617_v49 = vmul.f32 1.0614054, %v8934_v46 }
 0xcb9   :  { %v1628_v52 = vmul.f32 %v8932_v40, %v1625_v47 }
 0xcba   :  { %v6832_v55 = vadd.f32 -1.4531521, %v1617_v49 }
 0xcbb   :  { %v6834_v56 = vadd.f32 -0.28449672, %v1628_v52 }
 0xcbc   :  { %v8936_v58 = vpop.eup %8935  ;;  %v1623_v54 = vmul.f32 %v8934_v46, %v6832_v55 }
 0xcbd   :  { %v1634_v59 = vmul.f32 %v8932_v40, %v6834_v56  ;;  %v1618_v62 = vmul.f32 1.0614054, %v8936_v58  ;;  %v8938_v16 = vpop.eup %8937 }
 0xcbe   :  { %v1626_v63 = vadd.f32 1.4214138, %v1623_v54  ;;  %v8940_v29 = vpop.eup %8939 }
 0xcbf   :  { %v1637_v61 = vadd.f32 0.2548296, %v1634_v59  ;;  %v6833_v60 = vadd.f32 -1.4531521, %v1618_v62  ;;  %v8942_v39 = vpop.eup %8941 }
 0xcc0   :  { %v1629_v2 = vmul.f32 %v8934_v46, %v1626_v63 }
 0xcc1   :  { %v1640_v12 = vmul.f32 %v8932_v40, %v1637_v61  ;;  %v1624_v14 = vmul.f32 %v8936_v58, %v6833_v60 }
 0xcc2   :  { %v6835_v18 = vadd.f32 -0.28449672, %v1629_v2 }
 0xcc3   :  { %v1655_v3 = vmul.f32 %v8938_v16, %v1640_v12  ;;  %v1627_v5 = vadd.f32 1.4214138, %v1624_v14 }
 0xcc4   :  { %v1635_v21 = vmul.f32 %v8934_v46, %v6835_v18  ;;  %v6839_v18 = vld [vmem:[%s11445_s6 + $0x20] sm:$0xff] }
 0xcc5   :  { %v1658_v22 = vsub.f32 1.0, %v1655_v3  ;;  %v1630_v23 = vmul.f32 %v8936_v58, %v1627_v5  ;;  %v6840_v3 = vld [vmem:[%s11445_s6 + $0x28] sm:$0xff] }
 0xcc6   :  { %v1638_v24 = vadd.f32 0.2548296, %v1635_v21  ;;  %v8453_v5 = vpack.c.bf16 %v6840_v3, %v6839_v18  ;;  %v6841_v21 = vld [vmem:[%s11445_s6 + $0x30] sm:$0xff] }
 0xcc7   :  { %v1661_v25 = vmul.f32 %v1658_v22, %v1598_v4  ;;  %v6836_v20 = vadd.f32 -0.28449672, %v1630_v23  ;;  %v6842_v22 = vld [vmem:[%s11445_s6 + $0x38] sm:$0xff] }
 0xcc8   :  { %v1641_v7 = vmul.f32 %v8934_v46, %v1638_v24  ;;  %8454 = vmatpush3.bf16.msra.mxu0 %v8453_v5  ;;  %v8456_v23 = vpack.c.bf16 %v6842_v22, %v6841_v21 }
 0xcc9   :  { %v1664_v1 = vadd.f32 1.0, %v1661_v25  ;;  %v1636_v57 = vmul.f32 %v8936_v58, %v6836_v20  ;;  %8455 = vmatprep.subr.bf16.mxu0 %v9196_v28 }
 0xcca   :  { %v1656_v27 = vmul.f32 %v8940_v29, %v1641_v7 }
 0xccb   :  { %v1667_v37 = vmul.f32 %v1664_v1, %v1589_v30  ;;  %v1639_v8 = vadd.f32 0.2548296, %v1636_v57 }
 0xccc   :  { %v1659_v0 = vsub.f32 1.0, %v1656_v27  ;;  %8457 = vmatpush3.bf16.msra.mxu0 %v8456_v23  ;;  %v6838_v27 = vld [vmem:[%s11444_s5 + $0x1] ss:$0 sm:$0xff] }
 0xccd   :  { %v1642_v34 = vmul.f32 %v8936_v58, %v1639_v8  ;;  %7681 = vmatmul.mubr.f32.vlgmr.msra.gmra.mrb[36].mxu1 %v1667_v37  ;;  %8458 = vmatprep.subr.bf16.mxu0 %v9196_v28 }
 0xcce   :  { %v1662_v40 = vmul.f32 %v1659_v0, %v1599_v9  ;;  %7683 = vmatprep.mubr.msk.f32.mxu1 %vm9197_vm3, %v9198_v31 }
 0xccf   :  { %v1657_v26 = vmul.f32 %v8942_v39, %v1642_v34 }
 0xcd0   :  { %v1665_v35 = vadd.f32 1.0, %v1662_v40 }
 0xcd1   :  { %v1660_v33 = vsub.f32 1.0, %v1657_v26 }
 0xcd2   :  { %v1668_v42 = vmul.f32 %v1665_v35, %v1590_v41 }
 0xcd3   :  { %v1663_v44 = vmul.f32 %v1660_v33, %v1600_v43 }
 0xcd4   :  { %7684 = vmatmul.mubr.f32.gmra.mrb[38].mxu1 %v1668_v42 }
 0xcd5   :  { %v1666_v36 = vadd.f32 1.0, %v1663_v44  ;;  %7686 = vmatprep.mubr.msk.f32.mxu1 %vm9197_vm3, %v9198_v31 }
 0xcd7   :  { %v1669_v46 = vmul.f32 %v1666_v36, %v1591_v45 }
 0xcd9   :  { %7687 = vmatmul.mubr.f32.gmra.mrb[40].mxu1 %v1669_v46 }
 0xcda   :  { %7742 = vmatprep.mubr.msk.f32.mxu1 %vm9197_vm3, %v9198_v31 }
 0xda0   :  { %v1752_v6 = vpop.f32.mrb[36].mxu1 }
 0xda1   :  { %v9840_v32 = vadd.f32 %v1752_v6, %v9708_v10  ;;  %v7682_v47 = vpop.f32.mrb[37].mxu1 }
 0xda3   :  { %v1771_v48 = vsel %vm174_vm1, %v9840_v32, 0.0 }
 0xda4   :  { %1772 = vadd.xlane.f32.xlu0 %v1771_v48 }
 0xda7   :  { %v1757_v49 = vpop.f32.mrb[38].mxu1 }
 0xda8   :  { %v9845_v38 = vadd.f32 %v1757_v49, %v9713_v15  ;;  %v7685_v51 = vpop.f32.mrb[39].mxu1 }
 0xdaa   :  { %v1774_v52 = vsel %vm174_vm1, %v9845_v38, 0.0 }
 0xdab   :  { %1775 = vadd.xlane.f32.xlu1 %v1774_v52 }
 0xdac   :  { %v1762_v55 = vpop.f32.mrb[40].mxu1 }
 0xdad   :  { %v9850_v56 = vadd.f32 %v1762_v55, %v9718_v19  ;;  %v7688_v10 = vpop.f32.mrb[41].mxu1 }
 0xdaf   :  { %v1777_v50 = vsel %vm223_vm2, %v9850_v56, 0.0 }
 0xdb0   :  { %1778 = vadd.xlane.f32.xlu0 %v1777_v50 }
 0xe31   :  { %v1773_v58 = vpop.xlane.xlu0 %1772 }
 0xe32   :  { %v1780_v54 = vmul.f32 0.03125, %v1773_v58 }
 0xe34   :  { %v1783_v53 = vsub.f32 %v9840_v32, %v1780_v54 }
 0xe36   :  { %v1786_v15 = vmul.f32 %v1783_v53, %v1783_v53 }
 0xe38   :  { %v1776_v59 = vpop.xlane.xlu1 %1775  ;;  %v1789_v62 = vsel %vm174_vm1, %v1786_v15, 0.0 }
 0xe39   :  { %v1781_v63 = vmul.f32 0.03125, %v1776_v59  ;;  %1790 = vadd.xlane.f32.xlu1 %v1789_v62 }
 0xe3b   :  { %v1784_v61 = vsub.f32 %v9845_v38, %v1781_v63 }
 0xe3d   :  { %v1779_v60 = vpop.xlane.xlu0 %1778  ;;  %v1787_v19 = vmul.f32 %v1784_v61, %v1784_v61 }
 0xe3e   :  { %v1782_v2 = vmul.f32 0.03125, %v1779_v60 }
 0xe3f   :  { %v1792_v11 = vsel %vm174_vm1, %v1787_v19, 0.0 }
 0xe40   :  { %v1785_v12 = vsub.f32 %v9850_v56, %v1782_v2  ;;  %1793 = vadd.xlane.f32.xlu0 %v1792_v11 }
 0xe42   :  { %v1788_v14 = vmul.f32 %v1785_v12, %v1785_v12 }
 0xe44   :  { %v1795_v16 = vsel %vm223_vm2, %v1788_v14, 0.0 }
 0xe45   :  { %1796 = vadd.xlane.f32.xlu1 %v1795_v16 }
 0xec6   :  { %v1791_v4 = vpop.xlane.xlu1 %1790 }
 0xec7   :  { %v1798_v24 = vmul.f32 0.03125, %v1791_v4 }
 0xec9   :  { %v1801_v25 = vadd.f32 1e-05, %v1798_v24 }
 0xecb   :  { %8943 = vrsqrt.f32 %v1801_v25 }
 0xecd   :  { %v1794_v20 = vpop.xlane.xlu0 %1793 }
 0xece   :  { %v1799_v7 = vmul.f32 0.03125, %v1794_v20 }
 0xed0   :  { %v1802_v29 = vadd.f32 1e-05, %v1799_v7 }
 0xed2   :  { %8945 = vrsqrt.f32 %v1802_v29  ;;  %v1797_v30 = vpop.xlane.xlu1 %1796 }
 0xed3   :  { %v1800_v1 = vmul.f32 0.03125, %v1797_v30 }
 0xed5   :  { %v8944_v57 = vpop.eup %8943  ;;  %v1803_v37 = vadd.f32 1e-05, %v1800_v1 }
 0xed6   :  { %v1807_v8 = vmul.f32 %v8944_v57, %v1783_v53 }
 0xed7   :  { %8947 = vrsqrt.f32 %v1803_v37 }
 0xed8   :  { %v1816_v0 = vmul.f32 %v6838_v27, %v1807_v8 }
 0xeda   :  { %7698 = vmatmul.mubr.msk.f32.vlgmr.msra.gmra.mrb[32].mxu0 %vm174_vm1, %v1816_v0 }
 0xedb   :  { %7700 = vmatprep.mubr.msk.f32.mxu0 %vm9197_vm3, %v9198_v31 }
 0xedc   :  { %v8946_v9 = vpop.eup %8945 }
 0xedd   :  { %v1808_v34 = vmul.f32 %v8946_v9, %v1784_v61 }
 0xedf   :  { %v1817_v39 = vmul.f32 %v6838_v27, %v1808_v34 }
 0xee1   :  { %v8948_v40 = vpop.eup %8947  ;;  %7701 = vmatmul.mubr.msk.f32.gmra.mrb[34].mxu0 %vm174_vm1, %v1817_v39 }
 0xee2   :  { %7703 = vmatprep.mubr.msk.f32.mxu0 %vm9197_vm3, %v9198_v31  ;;  %v1809_v26 = vmul.f32 %v8948_v40, %v1785_v12 }
 0xee4   :  { %v1818_v41 = vmul.f32 %v6838_v27, %v1809_v26 }
 0xee6   :  { %7704 = vmatmul.mubr.msk.f32.gmra.mrb[36].mxu0 %vm174_vm1, %v1818_v41 }
 0xee7   :  { %7712 = vmatprep.mubr.msk.f32.mxu0 %vm9197_vm3, %v9198_v31 }
 0xfad   :  { %v1899_v35 = vpop.f32.mrb[32].mxu0 }
 0xfae   :  { %1916 = vrot.lane.b32.xlu0 %v1899_v35, %s9199_s14  ;;  %v7699_v33 = vpop.f32.mrb[33].mxu0 }
 0xfb4   :  { %v1904_v42 = vpop.f32.mrb[34].mxu0 }
 0xfb5   :  { %1924 = vrot.lane.b32.xlu0 %v1904_v42, %s9200_s15  ;;  %1918 = vrot.lane.b32.xlu1 %v1904_v42, %s9199_s14  ;;  %v7702_v43 = vpop.f32.mrb[35].mxu0  ;;  %v9889_v44 = vpack.i.bf16 %v1904_v42, %v1899_v35 }
 0xfb9   :  { %1930 = vrot.lane.b32.xlu0 %v1904_v42, %s9201_s16  ;;  %1922 = vrot.lane.b32.xlu1 %v1899_v35, %s9200_s15  ;;  %v9893_v45 = vpop.f32.mrb[36].mxu0 }
 0xfba   :  { %v7705_v36 = vpop.f32.mrb[37].mxu0 }
 0xfbd   :  { %1932 = vrot.lane.b32.xlu0 %v9893_v45, %s9201_s16  ;;  %1920 = vrot.lane.b32.xlu1 %v9893_v45, %s9199_s14 }
 0xfc1   :  { %1938 = vrot.lane.b32.xlu0 %v9893_v45, %s9202_s17  ;;  %1928 = vrot.lane.b32.xlu1 %v1899_v35, %s9201_s16 }
 0xfc5   :  { %1926 = vrot.lane.b32.xlu1 %v9893_v45, %s9200_s15 }
 0xfc9   :  { %8744 = vrot.lane.b32.xlu1 %v9889_v44, %s9202_s17 }
0x1020   :  { %v1917_v46 = vpop.permute.xlu0 %1916 }
0x1027   :  { %v1919_v6 = vpop.permute.xlu1 %1918  ;;  %v1925_v48 = vpop.permute.xlu0 %1924 }
0x1028   :  { %v9906_v47 = vpack.i.bf16 %v1919_v6, %v1917_v46 }
0x102a   :  { %8749 = vrot.lane.b32.xlu1 %v9906_v47, %s9202_s17 }
0x102b   :  { %v1923_v49 = vpop.permute.xlu1 %1922  ;;  %v9918_v55 = vpop.permute.xlu0 %1930 }
0x102c   :  { %v9910_v51 = vpack.i.bf16 %v1925_v48, %v1923_v49 }
0x102e   :  { %8754 = vrot.lane.b32.xlu1 %v9910_v51, %s9202_s17 }
0x102f   :  { %v9914_v52 = vpop.permute.xlu1 %1920  ;;  %v9929_v54 = vpop.permute.xlu0 %1932 }
0x1030   :  { %2036 = vrot.lane.b32.xlu0 %v9914_v52, %s9202_s17 }
0x1033   :  { %v1929_v10 = vpop.permute.xlu1 %1928  ;;  %v1939_v63 = vpop.permute.xlu0 %1938 }
0x1034   :  { %v9921_v50 = vpack.i.bf16 %v9918_v55, %v1929_v10 }
0x1036   :  { %8759 = vrot.lane.b32.xlu0 %v9921_v50, %s9202_s17 }
0x1037   :  { %v9925_v58 = vpop.permute.xlu1 %1926 }
0x1038   :  { %2134 = vrot.lane.b32.xlu1 %v9925_v58, %s9202_s17 }
0x103a   :  { %2232 = vrot.lane.b32.xlu0 %v9929_v54, %s9202_s17 }
0x103b   :  { %v8745_v53 = vpop.permute.xlu1 %8744 }
0x103c   :  { %v8747_v15 = vunpack.i.h.bf16 %v8745_v53  ;;  %v8746_v59 = vunpack.i.l.bf16 %v8745_v53 }
0x103e   :  { %v8459_v62 = vpack.c.bf16 %v8747_v15, %v8746_v59 }
0x1040   :  { %8461 = vmatpush3.bf16.xpose.msk.msra.mxu0 %vm9440_vm5, %v8459_v62 }
0x1041   :  { %7710 = vmatprep.subr.mxu0 %v9198_v31 }
0x1048   :  { %7711 = vmatpush3.xpose.msk.msra.mxu0 %vm386_vm4, %v1939_v63 }
0x1049   :  { %8462 = vmatprep.subr.bf16.mxu0 %v9196_v28 }
0x104b   :  { %7713 = vmatmul.mubr.msk.f32.vlgmr.msra.gmra.mrb[38].mxu0 %vm386_vm4, %v1899_v35 }
0x104c   :  { %7715 = vmatprep.mubr.msk.f32.mxu0 %vm9197_vm3, %v9198_v31 }
0x104f   :  { %7716 = vmatmul.mubr.msk.f32.gmra.mrb[40].mxu0 %vm386_vm4, %v1904_v42 }
0x1050   :  { %7718 = vmatprep.mubr.msk.f32.mxu0 %vm9197_vm3, %v9198_v31 }
0x1053   :  { %7719 = vmatmul.mubr.msk.f32.gmra.mrb[42].mxu0 %vm386_vm4, %v9893_v45 }
0x1054   :  { %7727 = vmatprep.mubr.msk.f32.mxu0 %vm9197_vm3, %v9198_v31 }
0x109c   :  { %v8750_v61 = vpop.permute.xlu1 %8749 }
0x109d   :  { %v8752_v60 = vunpack.i.h.bf16 %v8750_v61  ;;  %v8751_v19 = vunpack.i.l.bf16 %v8750_v61 }
0x109f   :  { %v8463_v2 = vpack.c.bf16 %v8752_v60, %v8751_v19 }
0x10a0   :  { %v8755_v11 = vpop.permute.xlu1 %8754 }
0x10a1   :  { %v8757_v12 = vunpack.i.h.bf16 %v8755_v11  ;;  %v8756_v14 = vunpack.i.l.bf16 %v8755_v11  ;;  %8465 = vmatpush3.bf16.xpose.msk.msra.mxu0 %vm9440_vm5, %v8463_v2 }
0x10a2   :  { %7725 = vmatprep.subr.mxu0 %v9198_v31  ;;  %v2037_v18 = vpop.permute.xlu0 %2036 }
0x10a3   :  { %v8467_v16 = vpack.c.bf16 %v8757_v12, %v8756_v14 }
0x10a5   :  { %8469 = vmatpush3.bf16.xpose.msk.msra.mxu1 %vm9440_vm5, %v8467_v16 }
0x10a6   :  { %7740 = vmatprep.subr.mxu1 %v9198_v31 }
0x10a8   :  { %v8760_v3 = vpop.permute.xlu0 %8759 }
0x10a9   :  { %v8762_v5 = vunpack.i.h.bf16 %v8760_v3  ;;  %v8761_v21 = vunpack.i.l.bf16 %v8760_v3  ;;  %7726 = vmatpush3.xpose.msk.msra.mxu0 %vm386_vm4, %v2037_v18 }
0x10aa   :  { %8470 = vmatprep.subr.bf16.mxu0 %v9196_v28  ;;  %v2135_v23 = vpop.permute.xlu1 %2134 }
0x10ab   :  { %v8471_v22 = vpack.c.bf16 %v8762_v5, %v8761_v21 }
0x10ac   :  { %7728 = vmatmul.mubr.msk.f32.vlgmr.msra.gmra.mrb[44].mxu0 %vm386_vm4, %v1917_v46  ;;  %v2233_v4 = vpop.permute.xlu0 %2232 }
0x10ad   :  { %7741 = vmatpush3.xpose.msk.msra.mxu1 %vm386_vm4, %v2135_v23  ;;  %8473 = vmatpush3.bf16.xpose.msk.msra.mxu0 %vm9440_vm5, %v8471_v22 }
0x10ae   :  { %7730 = vmatprep.mubr.msk.f32.mxu0 %vm9197_vm3, %v9198_v31  ;;  %7755 = vmatprep.subr.mxu0 %v9198_v31 }
0x10af   :  { %8474 = vmatprep.subr.bf16.mxu1 %v9196_v28 }
0x10b0   :  { %7731 = vmatmul.mubr.msk.f32.gmra.mrb[46].mxu0 %vm386_vm4, %v1919_v6  ;;  %7743 = vmatmul.mubr.msk.f32.vlgmr.msra.gmra.mrb[42].mxu1 %vm386_vm4, %v1923_v49 }
0x10b1   :  { %7733 = vmatprep.mubr.msk.f32.mxu0 %vm9197_vm3, %v9198_v31  ;;  %7745 = vmatprep.mubr.msk.f32.mxu1 %vm9197_vm3, %v9198_v31 }
0x10b4   :  { %7734 = vmatmul.mubr.msk.f32.gmra.mrb[48].mxu0 %vm386_vm4, %v9914_v52  ;;  %7746 = vmatmul.mubr.msk.f32.gmra.mrb[44].mxu1 %vm386_vm4, %v1925_v48 }
0x10b5   :  { %7756 = vmatpush3.xpose.msk.msra.mxu0 %vm386_vm4, %v2233_v4  ;;  %7748 = vmatprep.mubr.msk.f32.mxu1 %vm9197_vm3, %v9198_v31 }
0x10b6   :  { %7757 = vmatprep.mubr.msk.f32.mxu0 %vm9197_vm3, %v9198_v31  ;;  %8477 = vmatprep.subr.bf16.mxu0 %v9196_v28 }
0x10b8   :  { %7749 = vmatmul.mubr.msk.f32.gmra.mrb[46].mxu1 %vm386_vm4, %v9925_v58  ;;  %7758 = vmatmul.mubr.msk.f32.vlgmr.msra.gmra.mrb[50].mxu0 %vm386_vm4, %v1929_v10 }
0x10b9   :  { %7760 = vmatprep.mubr.msk.f32.mxu0 %vm9197_vm3, %v9198_v31  ;;  %7772 = vmatprep.mubr.msk.f32.mxu1 %vm9197_vm3, %v9198_v31 }
0x10bc   :  { %7761 = vmatmul.mubr.msk.f32.gmra.mrb[52].mxu0 %vm386_vm4, %v9918_v55 }
0x10bd   :  { %7763 = vmatprep.mubr.msk.f32.mxu0 %vm9197_vm3, %v9198_v31 }
0x10c0   :  { %7764 = vmatmul.mubr.msk.f32.gmra.mrb[54].mxu0 %vm386_vm4, %v9929_v54 }
0x10c1   :  { %7787 = vmatprep.mubr.msk.f32.mxu0 %vm9197_vm3, %v9198_v31 }
0x111e   :  { %v2018_v24 = vpop.f32.mrb[38].mxu0 }
0x111f   :  { %v7714_v25 = vpop.f32.mrb[39].mxu0  ;;  %v2326_v20 = vsel %vm773_vm6, %v2018_v24, -inf }
0x1120   :  { %2327 = vmax.xlane.f32.xlu1 %v2326_v20 }
0x1122   :  { %v2023_v7 = vpop.f32.mrb[40].mxu0 }
0x1123   :  { %v7717_v29 = vpop.f32.mrb[41].mxu0  ;;  %v2329_v30 = vsel %vm773_vm6, %v2023_v7, -inf }
0x1124   :  { %2330 = vmax.xlane.f32.xlu0 %v2329_v30 }
0x1126   :  { %v2028_v1 = vpop.f32.mrb[42].mxu0 }
0x1127   :  { %v7720_v57 = vpop.f32.mrb[43].mxu0  ;;  %v2332_v27 = vsel %vm780_vm7, %v2028_v1, -inf }
0x1128   :  { %2333 = vmax.xlane.f32.xlu1 %v2332_v27 }
0x117f   :  { %v9997_v37 = vpop.f32.mrb[44].mxu0 }
0x1180   :  { %v7729_v8 = vpop.f32.mrb[45].mxu0  ;;  %v2335_v0 = vsel %vm773_vm6, %v9997_v37, -inf }
0x1181   :  { %2336 = vmax.xlane.f32.xlu0 %v2335_v0 }
0x1183   :  { %v10001_v9 = vpop.f32.mrb[46].mxu0  ;;  %v10003_v34 = vpop.f32.mrb[42].mxu1 }
0x1184   :  { %v7732_v39 = vpop.f32.mrb[47].mxu0  ;;  %v7744_v40 = vpop.f32.mrb[43].mxu1  ;;  %v2344_v26 = vsel %vm773_vm6, %v10003_v34, -inf  ;;  %v2338_v41 = vsel %vm773_vm6, %v10001_v9, -inf }
0x1185   :  { %2345 = vmax.xlane.f32.xlu1 %v2344_v26  ;;  %2339 = vmax.xlane.f32.xlu0 %v2338_v41 }
0x1187   :  { %v10009_v35 = vpop.f32.mrb[48].mxu0  ;;  %v10011_v33 = vpop.f32.mrb[44].mxu1 }
0x1188   :  { %v7735_v42 = vpop.f32.mrb[49].mxu0  ;;  %v7747_v43 = vpop.f32.mrb[45].mxu1  ;;  %v2347_v36 = vsel %vm773_vm6, %v10011_v33, -inf  ;;  %v2341_v46 = vsel %vm780_vm7, %v10009_v35, -inf }
0x1189   :  { %2348 = vmax.xlane.f32.xlu1 %v2347_v36  ;;  %2342 = vmax.xlane.f32.xlu0 %v2341_v46 }
0x118b   :  { %v10017_v6 = vpop.f32.mrb[46].mxu1  ;;  %v10019_v48 = vpop.f32.mrb[50].mxu0 }
0x118c   :  { %v7750_v49 = vpop.f32.mrb[47].mxu1  ;;  %v7759_v55 = vpop.f32.mrb[51].mxu0  ;;  %v2350_v10 = vsel %vm780_vm7, %v10017_v6, -inf  ;;  %v2353_v53 = vsel %vm773_vm6, %v10019_v48, -inf }
0x118d   :  { %2351 = vmax.xlane.f32.xlu1 %v2350_v10  ;;  %2354 = vmax.xlane.f32.xlu0 %v2353_v53 }
0x118f   :  { %v10025_v15 = vpop.f32.mrb[52].mxu0 }
0x1190   :  { %v7762_v59 = vpop.f32.mrb[53].mxu0  ;;  %v2356_v62 = vsel %vm773_vm6, %v10025_v15, -inf }
0x1191   :  { %2357 = vmax.xlane.f32.xlu0 %v2356_v62 }
0x1193   :  { %v10029_v63 = vpop.f32.mrb[54].mxu0 }
0x1194   :  { %v7765_v61 = vpop.f32.mrb[55].mxu0  ;;  %v2359_v60 = vsel %vm780_vm7, %v10029_v63, -inf }
0x1195   :  { %2360 = vmax.xlane.f32.xlu0 %v2359_v60 }
0x119e   :  { %8769 = vrot.lane.b32.xlu1 %v9906_v47, %s9203_s18 }
0x11a2   :  { %2462 = vrot.lane.b32.xlu1 %v9893_v45, %s9203_s18 }
0x11a6   :  { %8774 = vrot.lane.b32.xlu1 %v9910_v51, %s9203_s18 }
0x11ab   :  { %8764 = vrot.lane.b32.xlu0 %v9889_v44, %s9203_s18 }
0x11ad   :  { %v2328_v19 = vpop.xlane.xlu1 %2327 }
0x11ae   :  { %v2362_v2 = vsub.f32 %v2018_v24, %v2328_v19 }
0x11af   :  { %2561 = vrot.lane.b32.xlu0 %v9914_v52, %s9203_s18 }
0x11b0   :  { %v2374_v12 = vmul.f32 1.442695, %v2362_v2 }
0x11b1   :  { %v2331_v11 = vpop.xlane.xlu0 %2330 }
0x11b2   :  { %v2363_v47 = vsub.f32 %v2023_v7, %v2331_v11  ;;  %8949 = vpow2.f32 %v2374_v12 }
0x11b3   :  { %8779 = vrot.lane.b32.xlu0 %v9921_v50, %s9203_s18 }
0x11b4   :  { %v2376_v45 = vmul.f32 1.442695, %v2363_v47 }
0x11b5   :  { %v2334_v14 = vpop.xlane.xlu1 %2333 }
0x11b6   :  { %v2364_v16 = vsub.f32 %v2028_v1, %v2334_v14  ;;  %8951 = vpow2.f32 %v2376_v45 }
0x11b8   :  { %v2378_v51 = vmul.f32 1.442695, %v2364_v16 }
0x11ba   :  { %8953 = vpow2.f32 %v2378_v51 }
0x11bc   :  { %v10045_v18 = vpop.eup %8949 }
0x11bd   :  { %v2398_v44 = vsel %vm773_vm6, %v10045_v18, 0.0 }
0x11c0   :  { %v10049_v52 = vpop.eup %8951 }
0x11c1   :  { %v2401_v50 = vsel %vm773_vm6, %v10049_v52, 0.0 }
0x11c4   :  { %v10053_v3 = vpop.eup %8953 }
0x11c5   :  { %v2404_v5 = vsel %vm780_vm7, %v10053_v3, 0.0 }
0x11ca   :  { %2399 = vadd.xlane.f32.xlu1 %v2398_v44 }
0x11ce   :  { %2402 = vadd.xlane.f32.xlu1 %v2401_v50 }
0x11d2   :  { %2405 = vadd.xlane.f32.xlu1 %v2404_v5 }
0x120e   :  { %v2337_v21 = vpop.xlane.xlu0 %2336 }
0x120f   :  { %v2365_v22 = vsub.f32 %v9997_v37, %v2337_v21 }
0x1211   :  { %v2380_v23 = vmul.f32 1.442695, %v2365_v22 }
0x1212   :  { %v2346_v4 = vpop.xlane.xlu1 %2345  ;;  %v2340_v24 = vpop.xlane.xlu0 %2339 }
0x1213   :  { %8955 = vpow2.f32 %v2380_v23  ;;  %v2368_v25 = vsub.f32 %v10003_v34, %v2346_v4  ;;  %v2366_v20 = vsub.f32 %v10001_v9, %v2340_v24 }
0x1215   :  { %v2386_v7 = vmul.f32 1.442695, %v2368_v25  ;;  %v2382_v29 = vmul.f32 1.442695, %v2366_v20 }
0x1216   :  { %v2349_v30 = vpop.xlane.xlu1 %2348  ;;  %v2343_v1 = vpop.xlane.xlu0 %2342 }
0x1217   :  { %8957 = vpow2.f32 %v2386_v7  ;;  %v2369_v57 = vsub.f32 %v10011_v33, %v2349_v30  ;;  %v2367_v27 = vsub.f32 %v10009_v35, %v2343_v1 }
0x1218   :  { %8959 = vpow2.f32 %v2382_v29 }
0x1219   :  { %v2388_v8 = vmul.f32 1.442695, %v2369_v57  ;;  %v2384_v37 = vmul.f32 1.442695, %v2367_v27 }
0x121a   :  { %v2352_v0 = vpop.xlane.xlu1 %2351  ;;  %v2355_v39 = vpop.xlane.xlu0 %2354 }
0x121b   :  { %8961 = vpow2.f32 %v2388_v8  ;;  %v2370_v40 = vsub.f32 %v10017_v6, %v2352_v0  ;;  %v2371_v34 = vsub.f32 %v10019_v48, %v2355_v39 }
0x121c   :  { %8963 = vpow2.f32 %v2384_v37 }
0x121d   :  { %v10064_v9 = vpop.eup %8955  ;;  %v2390_v26 = vmul.f32 1.442695, %v2370_v40  ;;  %v2392_v41 = vmul.f32 1.442695, %v2371_v34 }
0x121e   :  { %v8770_v42 = vpop.permute.xlu1 %8769  ;;  %v2358_v43 = vpop.xlane.xlu0 %2357  ;;  %v2407_v35 = vsel %vm773_vm6, %v10064_v9, 0.0 }
0x121f   :  { %8965 = vpow2.f32 %v2390_v26  ;;  %v8772_v33 = vunpack.i.h.bf16 %v8770_v42  ;;  %v8771_v36 = vunpack.i.l.bf16 %v8770_v42  ;;  %v2372_v46 = vsub.f32 %v10025_v15, %v2358_v43  ;;  %2408 = vadd.xlane.f32.xlu0 %v2407_v35 }
0x1220   :  { %8967 = vpow2.f32 %v2392_v41 }
0x1221   :  { %v10069_v6 = vpop.eup %8957  ;;  %v8478_v48 = vpack.c.bf16 %v8772_v33, %v8771_v36  ;;  %v2394_v49 = vmul.f32 1.442695, %v2372_v46 }
0x1222   :  { %v10071_v55 = vpop.eup %8959  ;;  %v2361_v10 = vpop.xlane.xlu0 %2360  ;;  %v2416_v53 = vsel %vm773_vm6, %v10069_v6, 0.0 }
0x1223   :  { %8969 = vpow2.f32 %v2394_v49  ;;  %v2373_v59 = vsub.f32 %v10029_v63, %v2361_v10  ;;  %2417 = vadd.xlane.f32.xlu1 %v2416_v53  ;;  %8479 = vmatpush3.bf16.msra.mxu0 %v8478_v48  ;;  %v2410_v15 = vsel %vm773_vm6, %v10071_v55, 0.0  ;;  %v2463_v21 = vpop.permute.xlu1 %2462 }
0x1224   :  { %2411 = vadd.xlane.f32.xlu0 %v2410_v15  ;;  %7785 = vmatprep.subr.mxu0 %v9198_v31 }
0x1225   :  { %v10079_v62 = vpop.eup %8961  ;;  %v2396_v61 = vmul.f32 1.442695, %v2373_v59 }
0x1226   :  { %v10081_v60 = vpop.eup %8963  ;;  %v8765_v19 = vpop.permute.xlu0 %8764  ;;  %v2419_v2 = vsel %vm773_vm6, %v10079_v62, 0.0 }
0x1227   :  { %8971 = vpow2.f32 %v2396_v61  ;;  %v8767_v11 = vunpack.i.h.bf16 %v8765_v19  ;;  %2420 = vadd.xlane.f32.xlu1 %v2419_v2  ;;  %v8766_v63 = vunpack.i.l.bf16 %v8765_v19  ;;  %v2413_v12 = vsel %vm780_vm7, %v10081_v60, 0.0  ;;  %v8775_v4 = vpop.permute.xlu1 %8774 }
0x1228   :  { %2414 = vadd.xlane.f32.xlu0 %v2413_v12  ;;  %v8777_v7 = vunpack.i.h.bf16 %v8775_v4  ;;  %v8776_v29 = vunpack.i.l.bf16 %v8775_v4  ;;  %v6888_v4 = vld [vmem:[%s11446_s7 + $0x30] sm:$0xff] }
0x1229   :  { %v10087_v47 = vpop.eup %8965  ;;  %v8475_v45 = vpack.c.bf16 %v8767_v11, %v8766_v63 }
0x122a   :  { %v10089_v14 = vpop.eup %8967  ;;  %v2562_v16 = vpop.permute.xlu0 %2561  ;;  %v2422_v51 = vsel %vm780_vm7, %v10087_v47, 0.0  ;;  %v8481_v57 = vpack.c.bf16 %v8777_v7, %v8776_v29 }
0x122b   :  { %2423 = vadd.xlane.f32.xlu1 %v2422_v51  ;;  %v2425_v44 = vsel %vm773_vm6, %v10089_v14, 0.0  ;;  %7786 = vmatpush3.msk.msra.mxu0 %vm924_vm8, %v2562_v16 }
0x122c   :  { %8476 = vmatpush3.bf16.msra.mxu1 %v8475_v45  ;;  %8483 = vmatprep.subr.bf16.mxu0 %v9196_v28 }
0x122d   :  { %v10097_v50 = vpop.eup %8969  ;;  %2426 = vadd.xlane.f32.xlu0 %v2425_v44  ;;  %7770 = vmatprep.subr.mxu1 %v9198_v31 }
0x122e   :  { %v2428_v5 = vsel %vm773_vm6, %v10097_v50, 0.0  ;;  %v8780_v8 = vpop.permute.xlu0 %8779 }
0x122f   :  { %v8782_v39 = vunpack.i.h.bf16 %v8780_v8  ;;  %v8781_v40 = vunpack.i.l.bf16 %v8780_v8 }
0x1230   :  { %7771 = vmatpush3.msk.msra.mxu1 %vm924_vm8, %v2463_v21  ;;  %v6887_v21 = vld [vmem:[%s11446_s7 + $0x28] sm:$0xff] }
0x1231   :  { %v10103_v22 = vpop.eup %8971  ;;  %2429 = vadd.xlane.f32.xlu0 %v2428_v5  ;;  %8480 = vmatprep.subr.bf16.mxu1 %v9196_v28  ;;  %v8484_v42 = vpack.c.bf16 %v8782_v39, %v8781_v40  ;;  %v6886_v5 = vld [vmem:[%s11446_s7 + $0x20] sm:$0xff] }
0x1232   :  { %v2431_v23 = vsel %vm780_vm7, %v10103_v22, 0.0 }
0x1233   :  { %2432 = vadd.xlane.f32.xlu1 %v2431_v23  ;;  %v8487_v23 = vpack.c.bf16 %v6887_v21, %v6886_v5 }
0x1244   :  { %2660 = vrot.lane.b32.xlu1 %v9925_v58, %s9203_s18 }
0x1247   :  { %2759 = vrot.lane.b32.xlu0 %v9929_v54, %s9203_s18 }
0x1257   :  { %v2400_v24 = vpop.xlane.xlu1 %2399 }
0x1258   :  { %8973 = vrcp.f32 %v2400_v24  ;;  %v6889_v24 = vld [vmem:[%s11446_s7 + $0x38] sm:$0xff] }
0x125b   :  { %v2403_v25 = vpop.xlane.xlu1 %2402 }
0x125c   :  { %8975 = vrcp.f32 %v2403_v25 }
0x125f   :  { %v2406_v20 = vpop.xlane.xlu1 %2405 }
0x1260   :  { %8977 = vrcp.f32 %v2406_v20  ;;  %v8490_v20 = vpack.c.bf16 %v6889_v24, %v6888_v4 }
0x1262   :  { %v8974_v30 = vpop.eup %8973 }
0x1263   :  { %v2435_v1 = vmul.f32 %v8974_v30, %v10045_v18 }
0x1265   :  { %7773 = vmatmul.mubr.msk.f32.vlgmr.msra.gmra.mrb[48].mxu1 %vm773_vm6, %v2435_v1 }
0x1266   :  { %v8976_v27 = vpop.eup %8975  ;;  %8482 = vmatpush3.bf16.msra.mxu1 %v8481_v57  ;;  %7775 = vmatprep.mubr.msk.f32.mxu1 %vm9197_vm3, %v9198_v31 }
0x1267   :  { %v2437_v58 = vmul.f32 %v8976_v27, %v10049_v52  ;;  %7800 = vmatprep.subr.mxu1 %v9198_v31 }
0x1269   :  { %7776 = vmatmul.mubr.msk.f32.gmra.mrb[50].mxu1 %vm773_vm6, %v2437_v58 }
0x126a   :  { %v8978_v54 = vpop.eup %8977  ;;  %7778 = vmatprep.mubr.msk.f32.mxu1 %vm9197_vm3, %v9198_v31 }
0x126b   :  { %v2439_v18 = vmul.f32 %v8978_v54, %v10053_v3 }
0x126d   :  { %7779 = vmatmul.mubr.msk.f32.gmra.mrb[52].mxu1 %vm773_vm6, %v2439_v18 }
0x126e   :  { %7802 = vmatprep.mubr.msk.f32.mxu1 %vm9197_vm3, %v9198_v31 }
0x12ac   :  { %v2409_v37 = vpop.xlane.xlu0 %2408 }
0x12ad   :  { %8979 = vrcp.f32 %v2409_v37 }
0x12b0   :  { %v2418_v0 = vpop.xlane.xlu1 %2417 }
0x12b1   :  { %v2412_v52 = vpop.xlane.xlu0 %2411 }
0x12b2   :  { %8981 = vrcp.f32 %v2412_v52 }
0x12b3   :  { %8983 = vrcp.f32 %v2418_v0 }
0x12b4   :  { %v2421_v34 = vpop.xlane.xlu1 %2420 }
0x12b5   :  { %v2415_v26 = vpop.xlane.xlu0 %2414 }
0x12b6   :  { %8985 = vrcp.f32 %v2415_v26 }
0x12b7   :  { %v8980_v41 = vpop.eup %8979  ;;  %8987 = vrcp.f32 %v2421_v34 }
0x12b8   :  { %v2441_v3 = vmul.f32 %v8980_v41, %v10064_v9  ;;  %v2424_v35 = vpop.xlane.xlu1 %2423 }
0x12ba   :  { %v2427_v43 = vpop.xlane.xlu0 %2426  ;;  %7788 = vmatmul.mubr.msk.f32.vlgmr.msra.gmra.mrb[56].mxu0 %vm773_vm6, %v2441_v3 }
0x12bb   :  { %8989 = vrcp.f32 %v2427_v43  ;;  %8485 = vmatpush3.bf16.msra.mxu0 %v8484_v42  ;;  %7790 = vmatprep.mubr.msk.f32.mxu0 %vm9197_vm3, %v9198_v31 }
0x12bc   :  { %v8982_v33 = vpop.eup %8981  ;;  %7815 = vmatprep.subr.mxu0 %v9198_v31  ;;  %8991 = vrcp.f32 %v2424_v35 }
0x12bd   :  { %v2443_v36 = vmul.f32 %v8982_v33, %v10071_v55  ;;  %v8984_v9 = vpop.eup %8983 }
0x12be   :  { %v2430_v46 = vpop.xlane.xlu0 %2429  ;;  %v2447_v55 = vmul.f32 %v8984_v9, %v10069_v6 }
0x12bf   :  { %8993 = vrcp.f32 %v2430_v46  ;;  %7791 = vmatmul.mubr.msk.f32.gmra.mrb[58].mxu0 %vm773_vm6, %v2443_v36 }
0x12c0   :  { %v2433_v48 = vpop.xlane.xlu1 %2432  ;;  %7793 = vmatprep.mubr.msk.f32.mxu0 %vm9197_vm3, %v9198_v31  ;;  %v8986_v49 = vpop.eup %8985 }
0x12c1   :  { %8995 = vrcp.f32 %v2433_v48  ;;  %v2445_v53 = vmul.f32 %v8986_v49, %v10081_v60  ;;  %v8988_v59 = vpop.eup %8987 }
0x12c2   :  { %v2760_v10 = vpop.permute.xlu0 %2759  ;;  %v2449_v60 = vmul.f32 %v8988_v59, %v10079_v62 }
0x12c3   :  { %7816 = vmatpush3.msk.msra.mxu0 %vm924_vm8, %v2760_v10 }
0x12c4   :  { %7794 = vmatmul.mubr.msk.f32.gmra.mrb[60].mxu0 %vm773_vm6, %v2445_v53  ;;  %v2661_v15 = vpop.permute.xlu1 %2660  ;;  %8492 = vmatprep.subr.bf16.mxu0 %v9196_v28 }
0x12c5   :  { %v8990_v61 = vpop.eup %8989  ;;  %7801 = vmatpush3.msk.msra.mxu1 %vm924_vm8, %v2661_v15  ;;  %7817 = vmatprep.mubr.msk.f32.mxu0 %vm9197_vm3, %v9198_v31 }
0x12c6   :  { %v2453_v19 = vmul.f32 %v8990_v61, %v10089_v14  ;;  %7803 = vmatmul.mubr.msk.f32.vlgmr.msra.gmra.mrb[54].mxu1 %vm773_vm6, %v2447_v55  ;;  %8486 = vmatprep.subr.bf16.mxu1 %v9196_v28  ;;  %v8992_v6 = vpop.eup %8991 }
0x12c7   :  { %7805 = vmatprep.mubr.msk.f32.mxu1 %vm9197_vm3, %v9198_v31  ;;  %v2451_v12 = vmul.f32 %v8992_v6, %v10087_v47  ;;  %8488 = vmatpush3.bf16.msra.mxu1 %v8487_v23 }
0x12c8   :  { %7818 = vmatmul.mubr.msk.f32.vlgmr.msra.gmra.mrb[62].mxu0 %vm773_vm6, %v2453_v19  ;;  %8489 = vmatprep.subr.bf16.mxu1 %v9196_v28 }
0x12c9   :  { %v8994_v2 = vpop.eup %8993  ;;  %7820 = vmatprep.mubr.msk.f32.mxu0 %vm9197_vm3, %v9198_v31 }
0x12ca   :  { %7806 = vmatmul.mubr.msk.f32.gmra.mrb[56].mxu1 %vm773_vm6, %v2449_v60  ;;  %v2455_v11 = vmul.f32 %v8994_v2, %v10097_v50 }
0x12cb   :  { %v8996_v63 = vpop.eup %8995  ;;  %7808 = vmatprep.mubr.msk.f32.mxu1 %vm9197_vm3, %v9198_v31  ;;  %8491 = vmatpush3.bf16.msra.mxu1 %v8490_v20 }
0x12cc   :  { %7821 = vmatmul.mubr.msk.f32.gmra.mrb[64].mxu0 %vm773_vm6, %v2455_v11  ;;  %v2457_v14 = vmul.f32 %v8996_v63, %v10103_v22  ;;  %8498 = vmatprep.subr.bf16.mxu1 %v9196_v28 }
0x12cd   :  { %7823 = vmatprep.mubr.msk.f32.mxu0 %vm9197_vm3, %v9198_v31 }
0x12ce   :  { %7809 = vmatmul.mubr.msk.f32.gmra.mrb[58].mxu1 %vm773_vm6, %v2451_v12 }
0x12cf   :  { %7834 = vmatprep.mubr.msk.f32.mxu1 %vm9197_vm3, %v9198_v31 }
0x12d0   :  { %7824 = vmatmul.mubr.msk.f32.gmra.mrb[66].mxu0 %vm773_vm6, %v2457_v14 }
0x12d1   :  { %7851 = vmatprep.mubr.msk.f32.mxu0 %vm9197_vm3, %v9198_v31 }
0x1338   :  { %v2543_v62 = vpop.f32.mrb[48].mxu1 }
0x1339   :  { %v7774_v45 = vpop.f32.mrb[49].mxu1 }
0x133c   :  { %v2548_v16 = vpop.f32.mrb[50].mxu1 }
0x133d   :  { %v7777_v51 = vpop.f32.mrb[51].mxu1 }
0x1340   :  { %v2553_v47 = vpop.f32.mrb[52].mxu1 }
0x1341   :  { %v7780_v44 = vpop.f32.mrb[53].mxu1 }
0x138d   :  { %v2642_v50 = vpop.f32.mrb[56].mxu0 }
0x138e   :  { %2857 = vrot.lane.b32.xlu1 %v2642_v50, %s9204_s25  ;;  %v7789_v22 = vpop.f32.mrb[57].mxu0 }
0x1392   :  { %v2647_v25 = vpop.f32.mrb[58].mxu0 }
0x1393   :  { %v7792_v7 = vpop.f32.mrb[59].mxu0 }
0x1397   :  { %v2652_v29 = vpop.f32.mrb[60].mxu0 }
0x1398   :  { %v7795_v30 = vpop.f32.mrb[61].mxu0 }
0x1399   :  { %v2741_v1 = vpop.f32.mrb[54].mxu1 }
0x139a   :  { %2869 = vrot.lane.b32.xlu0 %v2741_v1, %s9206_s29  ;;  %v7804_v57 = vpop.f32.mrb[55].mxu1 }
0x139b   :  { %v2840_v27 = vpop.f32.mrb[62].mxu0  ;;  %v6895_v57 = vld [vmem:[%s11448_s9 + $0x20] sm:$0xff] }
0x139c   :  { %v7819_v58 = vpop.f32.mrb[63].mxu0 }
0x139d   :  { %v2746_v54 = vpop.f32.mrb[56].mxu1 }
0x139e   :  { %v7807_v18 = vpop.f32.mrb[57].mxu1  ;;  %2871 = vrot.lane.b32.xlu1 %v2746_v54, %s9206_s29  ;;  %2859 = vrot.lane.b32.xlu0 %v2647_v25, %s9204_s25  ;;  %v6897_v54 = vld [vmem:[%s11448_s9 + $0x30] sm:$0xff] }
0x139f   :  { %v2845_v8 = vpop.f32.mrb[64].mxu0  ;;  %v6898_v18 = vld [vmem:[%s11448_s9 + $0x38] sm:$0xff] }
0x13a0   :  { %v7822_v37 = vpop.f32.mrb[65].mxu0 }
0x13a1   :  { %v2751_v0 = vpop.f32.mrb[58].mxu1 }
0x13a2   :  { %v7810_v52 = vpop.f32.mrb[59].mxu1  ;;  %2881 = vrot.lane.b32.xlu1 %v2840_v27, %s9205_s28  ;;  %2883 = vrot.lane.b32.xlu0 %v2845_v8, %s9205_s28  ;;  %v6896_v27 = vld [vmem:[%s11448_s9 + $0x28] sm:$0xff]  ;;  %v8496_v8 = vpack.c.bf16 %v6898_v18, %v6897_v54  ;;  %v6918_v54 = vld [vmem:[%s11449_s10 + $0xd0] sm:$0xff] }
0x13a3   :  { %v2850_v39 = vpop.f32.mrb[66].mxu0  ;;  %v8493_v58 = vpack.c.bf16 %v6896_v27, %v6895_v57  ;;  %v6916_v57 = vld [vmem:[%s11449_s10 + $0xc0] sm:$0xff]  ;;  %v6917_v27 = vld [vmem:[%s11449_s10 + $0xc8] sm:$0xff]  ;;  %v6919_v18 = vld [vmem:[%s11449_s10 + $0xd8] sm:$0xff] }
0x13a4   :  { %v7825_v40 = vpop.f32.mrb[67].mxu0 }
0x13a5   :  { %8494 = vmatpush3.bf16.msra.mxu0 %v8493_v58  ;;  %v8511_v58 = vpack.c.bf16 %v6917_v27, %v6916_v57 }
0x13a6   :  { %2861 = vrot.lane.b32.xlu1 %v2652_v29, %s9204_s25  ;;  %2873 = vrot.lane.b32.xlu0 %v2751_v0, %s9206_s29  ;;  %v6926_v29 = vld [vmem:[%s11439_s0 + $0x18] sm:$0xff] }
0x13a7   :  { %v3416_v1 = vsel %vm48_vm0, %v6926_v29, 0.0  ;;  %8495 = vmatprep.subr.bf16.mxu0 %v9196_v28 }
0x13a9   :  { %8497 = vmatpush3.bf16.msra.mxu0 %v8496_v8  ;;  %v8514_v8 = vpack.c.bf16 %v6919_v18, %v6918_v54 }
0x13aa   :  { %2885 = vrot.lane.b32.xlu1 %v2850_v39, %s9205_s28 }
0x1400   :  { %v2858_v34 = vpop.permute.xlu1 %2857 }
0x1401   :  { %v2890_v42 = vsel %vm386_vm4, %v2543_v62, %v2858_v34 }
0x140c   :  { %v2870_v26 = vpop.permute.xlu0 %2869 }
0x140d   :  { %v2893_v43 = vsel %vm1343_vm9, %v2890_v42, %v2870_v26 }
0x1410   :  { %v2872_v41 = vpop.permute.xlu1 %2871  ;;  %v2860_v3 = vpop.permute.xlu0 %2859 }
0x1411   :  { %v2891_v36 = vsel %vm386_vm4, %v2548_v16, %v2860_v3 }
0x1412   :  { %v2894_v9 = vsel %vm1343_vm9, %v2891_v36, %v2872_v41 }
0x1414   :  { %v2882_v35 = vpop.permute.xlu1 %2881  ;;  %v2884_v33 = vpop.permute.xlu0 %2883 }
0x1415   :  { %v2896_v46 = vsel %vm1347_vm10, %v2893_v43, %v2882_v35  ;;  %v2897_v49 = vsel %vm1347_vm10, %v2894_v9, %v2884_v33 }
0x1416   :  { %7835 = vmatmul.mubr.msk.f32.vlgmr.msra.gmra.mrb[60].mxu1 %vm174_vm1, %v2896_v46 }
0x1417   :  { %7837 = vmatprep.mubr.msk.f32.mxu1 %vm9197_vm3, %v9198_v31 }
0x1418   :  { %v2862_v48 = vpop.permute.xlu1 %2861  ;;  %v2874_v53 = vpop.permute.xlu0 %2873 }
0x1419   :  { %v2892_v10 = vsel %vm386_vm4, %v2553_v47, %v2862_v48  ;;  %v6894_v48 = vld [vmem:[%s11447_s8 + $0x1] ss:$0 sm:$0xff] }
0x141a   :  { %7838 = vmatmul.mubr.msk.f32.gmra.mrb[62].mxu1 %vm174_vm1, %v2897_v49  ;;  %v2895_v59 = vsel %vm1343_vm9, %v2892_v10, %v2874_v53 }
0x141b   :  { %7840 = vmatprep.mubr.msk.f32.mxu1 %vm9197_vm3, %v9198_v31 }
0x141c   :  { %v2886_v55 = vpop.permute.xlu1 %2885 }
0x141d   :  { %v2898_v15 = vsel %vm1347_vm10, %v2895_v59, %v2886_v55 }
0x141e   :  { %7841 = vmatmul.mubr.msk.f32.gmra.mrb[64].mxu1 %vm174_vm1, %v2898_v15 }
0x141f   :  { %7892 = vmatprep.mubr.msk.f32.mxu1 %vm9197_vm3, %v9198_v31 }
0x14e9   :  { %v2979_v61 = vpop.f32.mrb[60].mxu1 }
0x14ea   :  { %v2993_v19 = vadd.f32 %v2979_v61, %v9840_v32  ;;  %v7836_v6 = vpop.f32.mrb[61].mxu1 }
0x14ec   :  { %v2998_v60 = vsel %vm174_vm1, %v2993_v19, 0.0 }
0x14ed   :  { %2999 = vadd.xlane.f32.xlu0 %v2998_v60  ;;  %v2984_v2 = vpop.f32.mrb[62].mxu1 }
0x14ee   :  { %v2994_v11 = vadd.f32 %v2984_v2, %v9845_v38  ;;  %v7839_v63 = vpop.f32.mrb[63].mxu1 }
0x14ef   :  { %v3447_v63 = vld [vmem:[%s11441_s2] sm:$0xff] }
0x14f0   :  { %v3001_v12 = vsel %vm174_vm1, %v2994_v11, 0.0 }
0x14f1   :  { %3002 = vadd.xlane.f32.xlu1 %v3001_v12  ;;  %v2989_v14 = vpop.f32.mrb[64].mxu1  ;;  %v3448_v12 = vld [vmem:[%s11441_s2 + $0x8] sm:$0xff] }
0x14f2   :  { %v10212_v62 = vadd.f32 %v2989_v14, %v9850_v56  ;;  %v7842_v45 = vpop.f32.mrb[65].mxu1  ;;  %v6925_v56 = vld [vmem:[%s11439_s0 + $0x10] sm:$0xff]  ;;  %v8528_v14 = vpack.c.bf16 %v3448_v12, %v3447_v63 }
0x14f3   :  { %v3413_v7 = vsel %vm48_vm0, %v6925_v56, 0.0  ;;  %v3449_v45 = vld [vmem:[%s11441_s2 + $0x10] sm:$0xff] }
0x14f4   :  { %v3004_v16 = vsel %vm223_vm2, %v10212_v62, 0.0  ;;  %8529 = vmatprep.subr.bf16.mxu0 %v8528_v14 }
0x14f5   :  { %3005 = vadd.xlane.f32.xlu0 %v3004_v16  ;;  %v3450_v16 = vld [vmem:[%s11441_s2 + $0x18] sm:$0xff] }
0x157a   :  { %v3000_v32 = vpop.xlane.xlu0 %2999 }
0x157b   :  { %v3007_v51 = vmul.f32 0.03125, %v3000_v32  ;;  %v3451_v32 = vld [vmem:[%s11441_s2 + $0x20] sm:$0xff] }
0x157d   :  { %v3010_v47 = vsub.f32 %v2993_v19, %v3007_v51  ;;  %v8532_v51 = vpack.c.bf16 %v3450_v16, %v3449_v45 }
0x157e   :  { %v3003_v44 = vpop.xlane.xlu1 %3002 }
0x157f   :  { %v3008_v50 = vmul.f32 0.03125, %v3003_v44  ;;  %v3013_v5 = vmul.f32 %v3010_v47, %v3010_v47 }
0x1581   :  { %v3011_v38 = vsub.f32 %v2994_v11, %v3008_v50  ;;  %v3016_v21 = vsel %vm174_vm1, %v3013_v5, 0.0  ;;  %v3453_v50 = vld [vmem:[%s11441_s2 + $0x30] sm:$0xff]  ;;  %v3454_v5 = vld [vmem:[%s11441_s2 + $0x38] sm:$0xff] }
0x1582   :  { %3017 = vadd.xlane.f32.xlu0 %v3016_v21  ;;  %v3006_v22 = vpop.xlane.xlu0 %3005  ;;  %v6908_v21 = vld [vmem:[%s11449_s10 + $0x80] sm:$0xff] }
0x1583   :  { %v3009_v23 = vmul.f32 0.03125, %v3006_v22  ;;  %v3014_v4 = vmul.f32 %v3011_v38, %v3011_v38  ;;  %v6909_v22 = vld [vmem:[%s11449_s10 + $0x88] sm:$0xff] }
0x1585   :  { %v3012_v24 = vsub.f32 %v10212_v62, %v3009_v23  ;;  %v3019_v25 = vsel %vm174_vm1, %v3014_v4, 0.0  ;;  %v8499_v23 = vpack.c.bf16 %v6909_v22, %v6908_v21  ;;  %v6910_v4 = vld [vmem:[%s11449_s10 + $0x90] sm:$0xff] }
0x1586   :  { %3020 = vadd.xlane.f32.xlu0 %v3019_v25  ;;  %v6912_v25 = vld [vmem:[%s11449_s10 + $0xa0] sm:$0xff] }
0x1587   :  { %v3015_v20 = vmul.f32 %v3012_v24, %v3012_v24  ;;  %8500 = vmatpush3.bf16.msra.mxu1 %v8499_v23 }
0x1588   :  { %8501 = vmatprep.subr.bf16.mxu1 %v9196_v28 }
0x1589   :  { %v3022_v30 = vsel %vm223_vm2, %v3015_v20, 0.0  ;;  %v6913_v20 = vld [vmem:[%s11449_s10 + $0xa8] sm:$0xff] }
0x158a   :  { %3023 = vadd.xlane.f32.xlu1 %v3022_v30  ;;  %3414 = vadd.xlane.f32.xlu0 %v3413_v7  ;;  %v8505_v7 = vpack.c.bf16 %v6913_v20, %v6912_v25  ;;  %v6915_v30 = vld [vmem:[%s11449_s10 + $0xb8] sm:$0xff] }
0x158e   :  { %3417 = vadd.xlane.f32.xlu1 %v3416_v1 }
0x160f   :  { %v3018_v37 = vpop.xlane.xlu0 %3017 }
0x1610   :  { %v3025_v0 = vmul.f32 0.03125, %v3018_v37  ;;  %v6920_v37 = vld [vmem:[%s11449_s10 + $0xe0] sm:$0xff] }
0x1612   :  { %v3028_v52 = vadd.f32 1e-05, %v3025_v0  ;;  %v6921_v0 = vld [vmem:[%s11449_s10 + $0xe8] sm:$0xff] }
0x1613   :  { %v3021_v39 = vpop.xlane.xlu0 %3020 }
0x1614   :  { %8997 = vrsqrt.f32 %v3028_v52  ;;  %v3026_v40 = vmul.f32 0.03125, %v3021_v39  ;;  %v8517_v52 = vpack.c.bf16 %v6921_v0, %v6920_v37  ;;  %v6922_v39 = vld [vmem:[%s11449_s10 + $0xf0] sm:$0xff] }
0x1616   :  { %v3029_v34 = vadd.f32 1e-05, %v3026_v40  ;;  %v6923_v40 = vld [vmem:[%s11449_s10 + $0xf8] sm:$0xff] }
0x1617   :  { %v3415_v26 = vpop.xlane.xlu0 %3414  ;;  %v3024_v41 = vpop.xlane.xlu1 %3023 }
0x1618   :  { %8999 = vrsqrt.f32 %v3029_v34  ;;  %v3419_v3 = vmul.f32 0.015625, %v3415_v26  ;;  %v3027_v42 = vmul.f32 0.03125, %v3024_v41  ;;  %v8520_v34 = vpack.c.bf16 %v6923_v40, %v6922_v39 }
0x161a   :  { %v10241_v43 = vsub.f32 %v6925_v56, %v3419_v3  ;;  %v3030_v35 = vadd.f32 1e-05, %v3027_v42  ;;  %v6911_v56 = vld [vmem:[%s11449_s10 + $0x98] sm:$0xff] }
0x161b   :  { %v3418_v33 = vpop.xlane.xlu1 %3417 }
0x161c   :  { %9001 = vrsqrt.f32 %v3030_v35  ;;  %v3420_v36 = vmul.f32 0.015625, %v3418_v33  ;;  %v3423_v46 = vmul.f32 %v10241_v43, %v10241_v43 }
0x161e   :  { %v8998_v9 = vpop.eup %8997  ;;  %v10248_v49 = vsub.f32 %v6926_v29, %v3420_v36  ;;  %v3425_v10 = vsel %vm48_vm0, %v3423_v46, 0.0  ;;  %v6914_v29 = vld [vmem:[%s11449_s10 + $0xb0] sm:$0xff]  ;;  %v6927_v46 = vld [vmem:[%s11440_s1] ss:$0 sm:$0xff] }
0x161f   :  { %v3034_v53 = vmul.f32 %v8998_v9, %v3010_v47  ;;  %3426 = vadd.xlane.f32.xlu0 %v3425_v10  ;;  %v3452_v47 = vld [vmem:[%s11441_s2 + $0x28] sm:$0xff]  ;;  %v8508_v1 = vpack.c.bf16 %v6915_v30, %v6914_v29 }
0x1620   :  { %v3424_v59 = vmul.f32 %v10248_v49, %v10248_v49  ;;  %v8536_v44 = vpack.c.bf16 %v3452_v47, %v3451_v32 }
0x1621   :  { %v3043_v55 = vmul.f32 %v6894_v48, %v3034_v53 }
0x1622   :  { %v9000_v15 = vpop.eup %8999  ;;  %v3428_v61 = vsel %vm48_vm0, %v3424_v59, 0.0 }
0x1623   :  { %7852 = vmatmul.mubr.msk.f32.vlgmr.msra.gmra.mrb[68].mxu0 %vm174_vm1, %v3043_v55  ;;  %3429 = vadd.xlane.f32.xlu1 %v3428_v61  ;;  %v3035_v19 = vmul.f32 %v9000_v15, %v3011_v38  ;;  %v8540_v38 = vpack.c.bf16 %v3454_v5, %v3453_v50 }
0x1624   :  { %7854 = vmatprep.mubr.msk.f32.mxu0 %vm9197_vm3, %v9198_v31  ;;  %8531 = vmatpush3.bf16.msra.mxu0 %v8528_v14 }
0x1625   :  { %v3044_v6 = vmul.f32 %v6894_v48, %v3035_v19  ;;  %8533 = vmatprep.subr.bf16.mxu0 %v8532_v51 }
0x1626   :  { %v9002_v60 = vpop.eup %9001 }
0x1627   :  { %7855 = vmatmul.mubr.msk.f32.gmra.mrb[70].mxu0 %vm174_vm1, %v3044_v6  ;;  %v3036_v2 = vmul.f32 %v9002_v60, %v3012_v24  ;;  %v8502_v24 = vpack.c.bf16 %v6911_v56, %v6910_v4 }
0x1628   :  { %7857 = vmatprep.mubr.msk.f32.mxu0 %vm9197_vm3, %v9198_v31  ;;  %8535 = vmatpush3.bf16.msra.mxu0 %v8532_v51 }
0x1629   :  { %v3045_v11 = vmul.f32 %v6894_v48, %v3036_v2  ;;  %8537 = vmatprep.subr.bf16.mxu0 %v8536_v44  ;;  %8503 = vmatpush3.bf16.msra.mxu1 %v8502_v24 }
0x162a   :  { %8504 = vmatprep.subr.bf16.mxu1 %v9196_v28 }
0x162b   :  { %7858 = vmatmul.mubr.msk.f32.gmra.mrb[72].mxu0 %vm174_vm1, %v3045_v11 }
0x162c   :  { %8539 = vmatpush3.bf16.msra.mxu0 %v8536_v44 }
0x162d   :  { %8541 = vmatprep.subr.bf16.mxu0 %v8540_v38  ;;  %8506 = vmatpush3.bf16.msra.mxu1 %v8505_v7 }
0x162e   :  { %8507 = vmatprep.subr.bf16.mxu1 %v9196_v28 }
0x1630   :  { %8543 = vmatpush3.bf16.msra.mxu0 %v8540_v38 }
0x1631   :  { %8550 = vmatprep.subr.bf16.mxu0 %v9196_v28  ;;  %8509 = vmatpush3.bf16.msra.mxu1 %v8508_v1 }
0x1632   :  { %8510 = vmatprep.subr.bf16.mxu1 %v9196_v28 }
0x1635   :  { %8512 = vmatpush3.bf16.msra.mxu1 %v8511_v58 }
0x1636   :  { %8513 = vmatprep.subr.bf16.mxu1 %v9196_v28 }
0x1639   :  { %8515 = vmatpush3.bf16.msra.mxu1 %v8514_v8 }
0x163a   :  { %8516 = vmatprep.subr.bf16.mxu1 %v9196_v28 }
0x163d   :  { %8518 = vmatpush3.bf16.msra.mxu1 %v8517_v52 }
0x163e   :  { %8519 = vmatprep.subr.bf16.mxu1 %v9196_v28 }
0x1641   :  { %8521 = vmatpush3.bf16.msra.mxu1 %v8520_v34 }
0x1642   :  { %8522 = vmatprep.subr.bf16.mxu1 %v9196_v28 }
0x16ac   :  { %v3427_v26 = vpop.xlane.xlu0 %3426 }
0x16ad   :  { %v3431_v41 = vmul.f32 0.015625, %v3427_v26 }
0x16af   :  { %v3433_v3 = vadd.f32 1e-05, %v3431_v41 }
0x16b0   :  { %v3430_v42 = vpop.xlane.xlu1 %3429 }
0x16b1   :  { %9003 = vrsqrt.f32 %v3433_v3  ;;  %v3432_v35 = vmul.f32 0.015625, %v3430_v42 }
0x16b3   :  { %v3434_v33 = vadd.f32 1e-05, %v3432_v35 }
0x16b5   :  { %9005 = vrsqrt.f32 %v3434_v33 }
0x16bb   :  { %v9004_v36 = vpop.eup %9003 }
0x16bc   :  { %v3437_v9 = vmul.f32 %v9004_v36, %v10241_v43 }
0x16be   :  { %v3445_v48 = vmul.f32 %v6927_v46, %v3437_v9 }
0x16bf   :  { %v9006_v10 = vpop.eup %9005 }
0x16c0   :  { %v3438_v53 = vmul.f32 %v9006_v10, %v10248_v49  ;;  %7928 = vmatprep.mubr.msk.f32.mxu0 %vm48_vm0, %v3445_v48 }
0x16c2   :  { %v3446_v59 = vmul.f32 %v6927_v46, %v3438_v53 }
0x16c4   :  { %7929 = vmatmul.mubr.msk.f32.vlgmr.msra.gmra.mrb[74].mxu0 %vm48_vm0, %v3446_v59 }
0x16c5   :  { %7954 = vmatprep.mubr.msk.f32.mxu0 %vm9197_vm3, %v9198_v31 }
0x16f6   :  { %v10351_v55 = vpop.f32.mrb[68].mxu0 }
0x16f7   :  { %v10354_v15 = vmul.f32 0.70710677, %v10351_v55  ;;  %v7853_v61 = vpop.f32.mrb[69].mxu0 }
0x16f9   :  { %v3152_v43 = vand.u32 2147483647, %v10354_v15  ;;  %vm3146_vm14 = vcmp.lt.f32.partialorder %v10354_v15, 0.0 }
0x16fa   :  { %v10357_v19 = vpop.f32.mrb[70].mxu0  ;;  %v3149_v59 = vsel %vm3146_vm14, -1.0, %v9207_v17 }
0x16fb   :  { %v3155_v6 = vmul.f32 0.3275911, %v3152_v43  ;;  %v10360_v49 = vmul.f32 0.70710677, %v10357_v19  ;;  %v7856_v60 = vpop.f32.mrb[71].mxu0  ;;  %v3194_v47 = vsub.f32 0.0, %v3152_v43 }
0x16fd   :  { %v3158_v2 = vadd.f32 1.0, %v3155_v6  ;;  %v3153_v11 = vand.u32 2147483647, %v10360_v49  ;;  %v3197_v5 = vmul.f32 %v3194_v47, %v3152_v43  ;;  %vm3147_vm15 = vcmp.lt.f32.partialorder %v10360_v49, 0.0 }
0x16fe   :  { %v10363_v63 = vpop.f32.mrb[72].mxu0  ;;  %v3150_v15 = vsel %vm3147_vm15, -1.0, %v9207_v17 }
0x16ff   :  { %9007 = vrcp.f32 %v3158_v2  ;;  %v3156_v12 = vmul.f32 0.3275911, %v3153_v11  ;;  %v7859_v14 = vpop.f32.mrb[73].mxu0  ;;  %v10366_v45 = vmul.f32 0.70710677, %v10363_v63  ;;  %v3195_v38 = vsub.f32 0.0, %v3153_v11 }
0x1700   :  { %v3200_v4 = vmul.f32 1.442695, %v3197_v5  ;;  %v3140_v2 = vmul.f32 0.5, %v10351_v55 }
0x1701   :  { %v3159_v16 = vadd.f32 1.0, %v3156_v12  ;;  %v3154_v32 = vand.u32 2147483647, %v10366_v45  ;;  %v3198_v56 = vmul.f32 %v3195_v38, %v3153_v11  ;;  %vm3148_vm0 = vcmp.lt.f32.partialorder %v10366_v45, 0.0 }
0x1702   :  { %v3151_v5 = vsel %vm3148_vm0, -1.0, %v9207_v17 }
0x1703   :  { %9009 = vrcp.f32 %v3159_v16  ;;  %v3157_v51 = vmul.f32 0.3275911, %v3154_v32  ;;  %v3196_v20 = vsub.f32 0.0, %v3154_v32  ;;  %v3202_v30 = vmul.f32 1.442695, %v3198_v56 }
0x1705   :  { %v3160_v44 = vadd.f32 1.0, %v3157_v51  ;;  %v3199_v58 = vmul.f32 %v3196_v20, %v3154_v32 }
0x1707   :  { %9011 = vrcp.f32 %v3160_v44  ;;  %v3204_v39 = vmul.f32 1.442695, %v3199_v58  ;;  %v3141_v44 = vmul.f32 0.5, %v10357_v19 }
0x1708   :  { %9013 = vpow2.f32 %v3200_v4 }
0x1709   :  { %v9008_v50 = vpop.eup %9007  ;;  %9015 = vpow2.f32 %v3202_v30 }
0x170a   :  { %v3167_v21 = vmul.f32 1.0614054, %v9008_v50  ;;  %9017 = vpow2.f32 %v3204_v39 }
0x170c   :  { %v6902_v22 = vadd.f32 -1.4531521, %v3167_v21  ;;  %v3142_v21 = vmul.f32 0.5, %v10363_v63 }
0x170d   :  { %v9010_v23 = vpop.eup %9009 }
0x170e   :  { %v3173_v24 = vmul.f32 %v9008_v50, %v6902_v22  ;;  %v3168_v25 = vmul.f32 1.0614054, %v9010_v23 }
0x1710   :  { %v3176_v7 = vadd.f32 1.4214138, %v3173_v24  ;;  %v6903_v29 = vadd.f32 -1.4531521, %v3168_v25 }
0x1711   :  { %v9012_v1 = vpop.eup %9011 }
0x1712   :  { %v3179_v57 = vmul.f32 %v9008_v50, %v3176_v7  ;;  %v3174_v27 = vmul.f32 %v9010_v23, %v6903_v29  ;;  %v3169_v54 = vmul.f32 1.0614054, %v9012_v1  ;;  %v9014_v35 = vpop.eup %9013 }
0x1713   :  { %v9016_v53 = vpop.eup %9015 }
0x1714   :  { %v6905_v18 = vadd.f32 -0.28449672, %v3179_v57  ;;  %v3177_v8 = vadd.f32 1.4214138, %v3174_v27  ;;  %v6904_v37 = vadd.f32 -1.4531521, %v3169_v54  ;;  %v9018_v16 = vpop.eup %9017 }
0x1716   :  { %v3185_v0 = vmul.f32 %v9008_v50, %v6905_v18  ;;  %v3180_v52 = vmul.f32 %v9010_v23, %v3177_v8  ;;  %v3175_v40 = vmul.f32 %v9012_v1, %v6904_v37 }
0x1718   :  { %v3188_v34 = vadd.f32 0.2548296, %v3185_v0  ;;  %v6906_v26 = vadd.f32 -0.28449672, %v3180_v52  ;;  %v3178_v41 = vadd.f32 1.4214138, %v3175_v40 }
0x171a   :  { %v3191_v3 = vmul.f32 %v9008_v50, %v3188_v34  ;;  %v3186_v42 = vmul.f32 %v9010_v23, %v6906_v26  ;;  %v3181_v33 = vmul.f32 %v9012_v1, %v3178_v41 }
0x171c   :  { %v3206_v36 = vmul.f32 %v9014_v35, %v3191_v3  ;;  %v3189_v46 = vadd.f32 0.2548296, %v3186_v42  ;;  %v6907_v9 = vadd.f32 -0.28449672, %v3181_v33 }
0x171e   :  { %v3209_v48 = vsub.f32 1.0, %v3206_v36  ;;  %v3192_v10 = vmul.f32 %v9010_v23, %v3189_v46  ;;  %v3187_v61 = vmul.f32 %v9012_v1, %v6907_v9 }
0x1720   :  { %v3212_v43 = vmul.f32 %v3209_v48, %v3149_v59  ;;  %v3207_v6 = vmul.f32 %v9016_v53, %v3192_v10  ;;  %v3190_v60 = vadd.f32 0.2548296, %v3187_v61  ;;  %v3572_v48 = vld [vmem:[%s11443_s4 + $0x8] sm:$0xff]  ;;  %v3571_v61 = vld [vmem:[%s11443_s4] sm:$0xff] }
0x1722   :  { %v3215_v11 = vadd.f32 1.0, %v3212_v43  ;;  %v3210_v12 = vsub.f32 1.0, %v3207_v6  ;;  %v3193_v14 = vmul.f32 %v9012_v1, %v3190_v60 }
0x1724   :  { %v3218_v32 = vmul.f32 %v3215_v11, %v3140_v2  ;;  %v3213_v51 = vmul.f32 %v3210_v12, %v3150_v15  ;;  %v3208_v47 = vmul.f32 %v9018_v16, %v3193_v14  ;;  %v3573_v12 = vld [vmem:[%s11443_s4 + $0x10] sm:$0x1] }
0x1725   :  { %v3584_v14 = vsel %vm223_vm2, %v3573_v12, 0.0 }
0x1726   :  { %v3216_v50 = vadd.f32 1.0, %v3213_v51  ;;  %7893 = vmatmul.mubr.f32.vlgmr.msra.gmra.mrb[66].mxu1 %v3218_v32  ;;  %v3211_v49 = vsub.f32 1.0, %v3208_v47  ;;  %v3332_v32 = vld [vmem:[%s11451_s12] sm:$0xff]  ;;  %v3333_v51 = vld [vmem:[%s11451_s12 + $0x8] sm:$0xff] }
0x1727   :  { %7895 = vmatprep.mubr.msk.f32.mxu1 %vm9197_vm3, %v9198_v31  ;;  %v8523_v47 = vpack.c.bf16 %v3333_v51, %v3332_v32 }
0x1728   :  { %v3219_v55 = vmul.f32 %v3216_v50, %v3141_v44  ;;  %v3214_v38 = vmul.f32 %v3211_v49, %v3151_v5  ;;  %v3334_v44 = vld [vmem:[%s11451_s12 + $0x10] sm:$0xff]  ;;  %v3335_v50 = vld [vmem:[%s11451_s12 + $0x18] sm:$0xff] }
0x1729   :  { %8524 = vmatpush3.bf16.msra.mxu1 %v8523_v47  ;;  %v8526_v49 = vpack.c.bf16 %v3335_v50, %v3334_v44 }
0x172a   :  { %7896 = vmatmul.mubr.f32.gmra.mrb[68].mxu1 %v3219_v55  ;;  %v3217_v22 = vadd.f32 1.0, %v3214_v38  ;;  %8525 = vmatprep.subr.bf16.mxu1 %v9196_v28 }
0x172b   :  { %7898 = vmatprep.mubr.msk.f32.mxu1 %vm9197_vm3, %v9198_v31 }
0x172c   :  { %v3220_v45 = vmul.f32 %v3217_v22, %v3142_v21 }
0x172d   :  { %8527 = vmatpush3.bf16.msra.mxu1 %v8526_v49 }
0x172e   :  { %7899 = vmatmul.mubr.f32.gmra.mrb[70].mxu1 %v3220_v45  ;;  %8544 = vmatprep.subr.bf16.mxu1 %v9196_v28 }
0x172f   :  { %7909 = vmatprep.mubr.msk.f32.mxu1 %vm9197_vm3, %v9198_v31 }
0x1797   :  { %v7930_v19 = vpop.f32.mrb[74].mxu0 }
0x1798   :  { %v3527_v23 = vpop.f32.mrb[75].mxu0  ;;  %v3540_v4 = vsel %vm174_vm1, %v7930_v19, 0.0 }
0x1799   :  { %3541 = vadd.xlane.f32.xlu1 %v3540_v4  ;;  %v3537_v56 = vsel %vm174_vm1, %v3527_v23, 0.0 }
0x179a   :  { %3538 = vadd.xlane.f32.xlu0 %v3537_v56 }
0x17f9   :  { %v3304_v24 = vpop.f32.mrb[66].mxu1 }
0x17fa   :  { %v7894_v25 = vpop.f32.mrb[67].mxu1 }
0x17fd   :  { %v3308_v63 = vpop.f32.mrb[68].mxu1 }
0x17fe   :  { %v7897_v20 = vpop.f32.mrb[69].mxu1 }
0x1801   :  { %v3312_v7 = vpop.f32.mrb[70].mxu1 }
0x1802   :  { %v7900_v29 = vpop.f32.mrb[71].mxu1  ;;  %v3316_v0 = vadd.f32 %v3312_v7, %v10212_v62  ;;  %v6930_v62 = vld [vmem:[%s11442_s3] ss:$0 sm:$0xff] }
0x1804   :  { %v3318_v39 = vsel %vm223_vm2, %v3316_v0, 0.0 }
0x1826   :  { %v3542_v30 = vpop.xlane.xlu1 %3541 }
0x1827   :  { %v3544_v1 = vmul.f32 0.03125, %v3542_v30  ;;  %v3539_v57 = vpop.xlane.xlu0 %3538 }
0x1828   :  { %v3543_v27 = vmul.f32 0.03125, %v3539_v57 }
0x1829   :  { %v3546_v58 = vsub.f32 %v7930_v19, %v3544_v1 }
0x182a   :  { %v3545_v54 = vsub.f32 %v3527_v23, %v3543_v27  ;;  %v3317_v27 = vld [vmem:[%s11450_s11] sm:$0x1] }
0x182b   :  { %v3548_v18 = vmul.f32 %v3546_v58, %v3546_v58 }
0x182c   :  { %v3547_v8 = vmul.f32 %v3545_v54, %v3545_v54 }
0x182d   :  { %v3552_v37 = vsel %vm174_vm1, %v3548_v18, 0.0  ;;  %v3626_v18 = vld [vmem:[%s11445_s6] sm:$0xff] }
0x182e   :  { %3553 = vadd.xlane.f32.xlu1 %v3552_v37  ;;  %v3549_v52 = vsel %vm174_vm1, %v3547_v8, 0.0  ;;  %v3627_v8 = vld [vmem:[%s11445_s6 + $0x8] sm:$0xff] }
0x182f   :  { %3550 = vadd.xlane.f32.xlu0 %v3549_v52  ;;  %v8545_v37 = vpack.c.bf16 %v3627_v8, %v3626_v18  ;;  %v3629_v52 = vld [vmem:[%s11445_s6 + $0x18] sm:$0xff] }
0x1833   :  { %3319 = vadd.xlane.f32.xlu0 %v3318_v39 }
0x18bb   :  { %v3554_v40 = vpop.xlane.xlu1 %3553 }
0x18bc   :  { %v3556_v34 = vmul.f32 0.03125, %v3554_v40  ;;  %v3551_v26 = vpop.xlane.xlu0 %3550 }
0x18bd   :  { %v3555_v41 = vmul.f32 0.03125, %v3551_v26 }
0x18be   :  { %v3558_v3 = vadd.f32 1e-05, %v3556_v34 }
0x18bf   :  { %v3557_v42 = vadd.f32 1e-05, %v3555_v41 }
0x18c0   :  { %9019 = vrsqrt.f32 %v3558_v3  ;;  %v3320_v35 = vpop.xlane.xlu0 %3319 }
0x18c1   :  { %9021 = vrsqrt.f32 %v3557_v42  ;;  %v3321_v33 = vmul.f32 0.03125, %v3320_v35 }
0x18c3   :  { %v3322_v53 = vsub.f32 %v3316_v0, %v3321_v33  ;;  %v3628_v0 = vld [vmem:[%s11445_s6 + $0x10] sm:$0xff] }
0x18c4   :  { %v8548_v39 = vpack.c.bf16 %v3629_v52, %v3628_v0 }
0x18c5   :  { %v3323_v11 = vmul.f32 %v3322_v53, %v3322_v53 }
0x18c7   :  { %v3324_v16 = vsel %vm223_vm2, %v3323_v11, 0.0 }
0x18ca   :  { %v9020_v36 = vpop.eup %9019 }
0x18cb   :  { %v9022_v46 = vpop.eup %9021  ;;  %v3562_v9 = vmul.f32 %v9020_v36, %v3546_v58 }
0x18cc   :  { %v3561_v10 = vmul.f32 %v9022_v46, %v3545_v54 }
0x18cd   :  { %v3570_v59 = vmul.f32 %v6930_v62, %v3562_v9  ;;  %v6931_v9 = vld [vmem:[%s11444_s5] ss:$0 sm:$0xff] }
0x18ce   :  { %v3569_v43 = vmul.f32 %v6930_v62, %v3561_v10 }
0x18cf   :  { %v10399_v6 = vadd.f32 %v3572_v48, %v3570_v59 }
0x18d0   :  { %v10401_v60 = vadd.f32 %v3571_v61, %v3569_v43 }
0x18d1   :  { %v3581_v2 = vsel %vm174_vm1, %v10399_v6, 0.0 }
0x18d2   :  { %3582 = vadd.xlane.f32.xlu0 %v3581_v2  ;;  %v3578_v15 = vsel %vm174_vm1, %v10401_v60, 0.0 }
0x18d3   :  { %3579 = vadd.xlane.f32.xlu1 %v3578_v15 }
0x18d6   :  { %3325 = vadd.xlane.f32.xlu0 %v3324_v16 }
0x18d7   :  { %3585 = vadd.xlane.f32.xlu1 %v3584_v14 }
0x195f   :  { %v3583_v55 = vpop.xlane.xlu0 %3582 }
0x1960   :  { %v3588_v5 = vmul.f32 0.03125, %v3583_v55  ;;  %v3580_v38 = vpop.xlane.xlu1 %3579 }
0x1961   :  { %v3587_v21 = vmul.f32 0.03125, %v3580_v38 }
0x1962   :  { %v3591_v22 = vsub.f32 %v10399_v6, %v3588_v5 }
0x1963   :  { %v3590_v45 = vsub.f32 %v10401_v60, %v3587_v21  ;;  %v3326_v19 = vpop.xlane.xlu0 %3325 }
0x1964   :  { %v3327_v23 = vmul.f32 0.03125, %v3326_v19  ;;  %v3586_v4 = vpop.xlane.xlu1 %3585  ;;  %v3594_v56 = vmul.f32 %v3591_v22, %v3591_v22 }
0x1965   :  { %v3589_v24 = vmul.f32 0.03125, %v3586_v4  ;;  %v3593_v25 = vmul.f32 %v3590_v45, %v3590_v45 }
0x1966   :  { %v3328_v63 = vadd.f32 1e-05, %v3327_v23  ;;  %v3599_v20 = vsel %vm174_vm1, %v3594_v56, 0.0 }
0x1967   :  { %v3592_v7 = vsub.f32 %v3573_v12, %v3589_v24  ;;  %3600 = vadd.xlane.f32.xlu0 %v3599_v20  ;;  %v3596_v29 = vsel %vm174_vm1, %v3593_v25, 0.0 }
0x1968   :  { %9023 = vrsqrt.f32 %v3328_v63  ;;  %3597 = vadd.xlane.f32.xlu1 %v3596_v29 }
0x1969   :  { %v3595_v30 = vmul.f32 %v3592_v7, %v3592_v7 }
0x196b   :  { %v3602_v1 = vsel %vm223_vm2, %v3595_v30, 0.0 }
0x196c   :  { %3603 = vadd.xlane.f32.xlu1 %v3602_v1 }
0x1972   :  { %v9024_v57 = vpop.eup %9023 }
0x1973   :  { %v3330_v58 = vmul.f32 %v9024_v57, %v3322_v53 }
0x1975   :  { %v3331_v54 = vmul.f32 %v3330_v58, %v3317_v27 }
0x1977   :  { %7910 = vmatmul.mubr.msk.f32.vlgmr.msra.gmra.mrb[72].mxu1 %vm174_vm1, %v3331_v54 }
0x1978   :  { %7939 = vmatprep.mubr.msk.f32.mxu1 %vm9197_vm3, %v9198_v31  ;;  %8546 = vmatpush3.bf16.msra.mxu1 %v8545_v37 }
0x1979   :  { %8547 = vmatprep.subr.bf16.mxu1 %v9196_v28 }
0x197c   :  { %8549 = vmatpush3.bf16.msra.mxu1 %v8548_v39 }
0x197d   :  { %8554 = vmatprep.subr.bf16.mxu1 %v9196_v28 }
0x19f4   :  { %v3601_v40 = vpop.xlane.xlu0 %3600 }
0x19f5   :  { %v3606_v34 = vmul.f32 0.03125, %v3601_v40  ;;  %v3598_v26 = vpop.xlane.xlu1 %3597 }
0x19f6   :  { %v3605_v41 = vmul.f32 0.03125, %v3598_v26 }
0x19f7   :  { %v3609_v3 = vadd.f32 1e-05, %v3606_v34 }
0x19f8   :  { %v3608_v42 = vadd.f32 1e-05, %v3605_v41 }
0x19f9   :  { %9025 = vrsqrt.f32 %v3609_v3  ;;  %v3604_v35 = vpop.xlane.xlu1 %3603 }
0x19fa   :  { %9027 = vrsqrt.f32 %v3608_v42  ;;  %v3607_v33 = vmul.f32 0.03125, %v3604_v35 }
0x19fc   :  { %v3610_v36 = vadd.f32 1e-05, %v3607_v33 }
0x19fe   :  { %9029 = vrsqrt.f32 %v3610_v36 }
0x1a03   :  { %v9026_v62 = vpop.eup %9025 }
0x1a04   :  { %v9028_v46 = vpop.eup %9027  ;;  %v3615_v53 = vmul.f32 %v9026_v62, %v3591_v22 }
0x1a05   :  { %v3614_v48 = vmul.f32 %v9028_v46, %v3590_v45 }
0x1a06   :  { %v3624_v61 = vmul.f32 %v6931_v9, %v3615_v53 }
0x1a07   :  { %v3623_v10 = vmul.f32 %v6931_v9, %v3614_v48 }
0x1a08   :  { %v9030_v59 = vpop.eup %9029 }
0x1a09   :  { %7940 = vmatmul.mubr.msk.f32.vlgmr.msra.gmra.mrb[74].mxu1 %vm174_vm1, %v3623_v10  ;;  %v3616_v43 = vmul.f32 %v9030_v59, %v3592_v7 }
0x1a0a   :  { %7942 = vmatprep.mubr.msk.f32.mxu1 %vm9197_vm3, %v9198_v31 }
0x1a0b   :  { %v3625_v2 = vmul.f32 %v6931_v9, %v3616_v43 }
0x1a0d   :  { %7943 = vmatmul.mubr.msk.f32.gmra.mrb[76].mxu1 %vm174_vm1, %v3624_v61 }
0x1a0e   :  { %7945 = vmatprep.mubr.msk.f32.mxu1 %vm9197_vm3, %v9198_v31 }
0x1a11   :  { %7946 = vmatmul.mubr.msk.f32.gmra.mrb[78].mxu1 %vm174_vm1, %v3625_v2 }
0x1a12   :  { %7969 = vmatprep.mubr.msk.f32.mxu1 %vm9197_vm3, %v9198_v31 }
0x1a4a   :  { %v10463_v11 = vpop.f32.mrb[72].mxu1 }
0x1a4b   :  { %v7911_v12 = vpop.f32.mrb[73].mxu1 }
0x1adc   :  { %v3705_v15 = vpop.f32.mrb[74].mxu1 }
0x1add   :  { %3722 = vrot.lane.b32.xlu0 %v3705_v15, %s9199_s14  ;;  %v7941_v14 = vpop.f32.mrb[75].mxu1 }
0x1ae0   :  { %v3710_v16 = vpop.f32.mrb[76].mxu1 }
0x1ae1   :  { %3730 = vrot.lane.b32.xlu0 %v3710_v16, %s9200_s15  ;;  %3724 = vrot.lane.b32.xlu1 %v3710_v16, %s9199_s14  ;;  %v7944_v32 = vpop.f32.mrb[77].mxu1  ;;  %v8783_v51 = vpack.i.bf16 %v3710_v16, %v3705_v15 }
0x1ae4   :  { %v10468_v47 = vpop.f32.mrb[78].mxu1 }
0x1ae5   :  { %3736 = vrot.lane.b32.xlu0 %v3710_v16, %s9201_s16  ;;  %3728 = vrot.lane.b32.xlu1 %v3705_v15, %s9200_s15  ;;  %v7947_v44 = vpop.f32.mrb[79].mxu1 }
0x1ae9   :  { %3738 = vrot.lane.b32.xlu0 %v10468_v47, %s9201_s16  ;;  %3726 = vrot.lane.b32.xlu1 %v10468_v47, %s9199_s14 }
0x1aed   :  { %3734 = vrot.lane.b32.xlu1 %v3705_v15, %s9201_s16 }
0x1af1   :  { %3732 = vrot.lane.b32.xlu1 %v10468_v47, %s9200_s15 }
0x1af5   :  { %8784 = vrot.lane.b32.xlu1 %v8783_v51, %s9202_s17 }
0x1af9   :  { %3744 = vrot.lane.b32.xlu1 %v10468_v47, %s9202_s17 }
0x1b4f   :  { %v3723_v50 = vpop.permute.xlu0 %3722 }
0x1b53   :  { %v10482_v49 = vpop.permute.xlu1 %3724  ;;  %v10486_v5 = vpop.permute.xlu0 %3730 }
0x1b54   :  { %v8788_v55 = vpack.i.bf16 %v10482_v49, %v3723_v50 }
0x1b56   :  { %8789 = vrot.lane.b32.xlu0 %v8788_v55, %s9202_s17 }
0x1b57   :  { %v3729_v38 = vpop.permute.xlu1 %3728  ;;  %v10497_v45 = vpop.permute.xlu0 %3736 }
0x1b58   :  { %v10489_v21 = vpack.i.bf16 %v10486_v5, %v3729_v38 }
0x1b5a   :  { %8794 = vrot.lane.b32.xlu1 %v10489_v21, %s9202_s17 }
0x1b5b   :  { %v10493_v22 = vpop.permute.xlu1 %3726  ;;  %v10511_v56 = vpop.permute.xlu0 %3738 }
0x1b5c   :  { %3842 = vrot.lane.b32.xlu0 %v10493_v22, %s9202_s17 }
0x1b5f   :  { %v10499_v19 = vpop.permute.xlu1 %3734 }
0x1b60   :  { %v10503_v23 = vpack.i.bf16 %v10497_v45, %v10499_v19 }
0x1b62   :  { %8799 = vrot.lane.b32.xlu0 %v10503_v23, %s9202_s17 }
0x1b63   :  { %v10507_v4 = vpop.permute.xlu1 %3732 }
0x1b64   :  { %3940 = vrot.lane.b32.xlu1 %v10507_v4, %s9202_s17 }
0x1b66   :  { %4038 = vrot.lane.b32.xlu0 %v10511_v56, %s9202_s17 }
0x1b67   :  { %v8785_v24 = vpop.permute.xlu1 %8784 }
0x1b68   :  { %v8787_v25 = vunpack.i.h.bf16 %v8785_v24  ;;  %v8786_v63 = vunpack.i.l.bf16 %v8785_v24  ;;  %8804 = vrot.lane.b32.xlu1 %v8783_v51, %s9203_s18 }
0x1b6a   :  { %v8551_v20 = vpack.c.bf16 %v8787_v25, %v8786_v63  ;;  %8809 = vrot.lane.b32.xlu0 %v8788_v55, %s9203_s18 }
0x1b6b   :  { %v3745_v7 = vpop.permute.xlu1 %3744 }
0x1b6c   :  { %8553 = vmatpush3.bf16.xpose.msk.msra.mxu0 %vm9440_vm5, %v8551_v20 }
0x1b6d   :  { %7952 = vmatprep.subr.mxu0 %v9198_v31 }
0x1b74   :  { %7953 = vmatpush3.xpose.msk.msra.mxu0 %vm386_vm4, %v3745_v7 }
0x1b75   :  { %8558 = vmatprep.subr.bf16.mxu0 %v9196_v28 }
0x1b77   :  { %7955 = vmatmul.mubr.msk.f32.vlgmr.msra.gmra.mrb[76].mxu0 %vm386_vm4, %v3705_v15 }
0x1b78   :  { %7957 = vmatprep.mubr.msk.f32.mxu0 %vm9197_vm3, %v9198_v31 }
0x1b7b   :  { %7958 = vmatmul.mubr.msk.f32.gmra.mrb[78].mxu0 %vm386_vm4, %v3710_v16 }
0x1b7c   :  { %7960 = vmatprep.mubr.msk.f32.mxu0 %vm9197_vm3, %v9198_v31 }
0x1b7f   :  { %7961 = vmatmul.mubr.msk.f32.gmra.mrb[80].mxu0 %vm386_vm4, %v10468_v47 }
0x1b80   :  { %7984 = vmatprep.mubr.msk.f32.mxu0 %vm9197_vm3, %v9198_v31 }
0x1bc8   :  { %v8790_v29 = vpop.permute.xlu0 %8789 }
0x1bc9   :  { %v8792_v30 = vunpack.i.h.bf16 %v8790_v29  ;;  %v8791_v1 = vunpack.i.l.bf16 %v8790_v29 }
0x1bcb   :  { %v8555_v57 = vpack.c.bf16 %v8792_v30, %v8791_v1 }
0x1bcc   :  { %v8795_v27 = vpop.permute.xlu1 %8794 }
0x1bcd   :  { %v8797_v58 = vunpack.i.h.bf16 %v8795_v27  ;;  %v8796_v54 = vunpack.i.l.bf16 %v8795_v27  ;;  %8557 = vmatpush3.bf16.xpose.msk.msra.mxu1 %vm9440_vm5, %v8555_v57 }
0x1bce   :  { %7967 = vmatprep.subr.mxu1 %v9198_v31  ;;  %v3843_v8 = vpop.permute.xlu0 %3842 }
0x1bcf   :  { %v8559_v18 = vpack.c.bf16 %v8797_v58, %v8796_v54 }
0x1bd1   :  { %8561 = vmatpush3.bf16.xpose.msk.msra.mxu0 %vm9440_vm5, %v8559_v18 }
0x1bd2   :  { %7982 = vmatprep.subr.mxu0 %v9198_v31 }
0x1bd4   :  { %v8800_v37 = vpop.permute.xlu0 %8799 }
0x1bd5   :  { %v8802_v0 = vunpack.i.h.bf16 %v8800_v37  ;;  %v8801_v52 = vunpack.i.l.bf16 %v8800_v37  ;;  %7968 = vmatpush3.xpose.msk.msra.mxu1 %vm386_vm4, %v3843_v8 }
0x1bd6   :  { %v3941_v39 = vpop.permute.xlu1 %3940  ;;  %8562 = vmatprep.subr.bf16.mxu1 %v9196_v28 }
0x1bd7   :  { %v8563_v40 = vpack.c.bf16 %v8802_v0, %v8801_v52 }
0x1bd8   :  { %v4039_v34 = vpop.permute.xlu0 %4038  ;;  %7970 = vmatmul.mubr.msk.f32.vlgmr.msra.gmra.mrb[80].mxu1 %vm386_vm4, %v3723_v50 }
0x1bd9   :  { %7983 = vmatpush3.xpose.msk.msra.mxu0 %vm386_vm4, %v3941_v39  ;;  %8565 = vmatpush3.bf16.xpose.msk.msra.mxu1 %vm9440_vm5, %v8563_v40 }
0x1bda   :  { %v8805_v26 = vpop.permute.xlu1 %8804  ;;  %7972 = vmatprep.mubr.msk.f32.mxu1 %vm9197_vm3, %v9198_v31  ;;  %8566 = vmatprep.subr.bf16.mxu0 %v9196_v28 }
0x1bdb   :  { %v8807_v41 = vunpack.i.h.bf16 %v8805_v26  ;;  %v8806_v3 = vunpack.i.l.bf16 %v8805_v26  ;;  %7997 = vmatprep.subr.mxu1 %v9198_v31 }
0x1bdc   :  { %7985 = vmatmul.mubr.msk.f32.vlgmr.msra.gmra.mrb[82].mxu0 %vm386_vm4, %v3729_v38  ;;  %v8810_v42 = vpop.permute.xlu0 %8809  ;;  %7973 = vmatmul.mubr.msk.f32.gmra.mrb[82].mxu1 %vm386_vm4, %v10482_v49 }
0x1bdd   :  { %v8567_v35 = vpack.c.bf16 %v8807_v41, %v8806_v3  ;;  %7975 = vmatprep.mubr.msk.f32.mxu1 %vm9197_vm3, %v9198_v31  ;;  %7987 = vmatprep.mubr.msk.f32.mxu0 %vm9197_vm3, %v9198_v31  ;;  %v8812_v33 = vunpack.i.h.bf16 %v8810_v42  ;;  %v8811_v36 = vunpack.i.l.bf16 %v8810_v42 }
0x1bdf   :  { %8568 = vmatpush3.bf16.msra.mxu0 %v8567_v35  ;;  %v8570_v62 = vpack.c.bf16 %v8812_v33, %v8811_v36 }
0x1be0   :  { %7976 = vmatmul.mubr.msk.f32.gmra.mrb[84].mxu1 %vm386_vm4, %v10493_v22  ;;  %7988 = vmatmul.mubr.msk.f32.gmra.mrb[84].mxu0 %vm386_vm4, %v10486_v5 }
0x1be1   :  { %7998 = vmatpush3.xpose.msk.msra.mxu1 %vm386_vm4, %v4039_v34  ;;  %7990 = vmatprep.mubr.msk.f32.mxu0 %vm9197_vm3, %v9198_v31 }
0x1be2   :  { %7999 = vmatprep.mubr.msk.f32.mxu1 %vm9197_vm3, %v9198_v31  ;;  %8569 = vmatprep.subr.bf16.mxu1 %v9196_v28 }
0x1be3   :  { %8012 = vmatprep.subr.mxu0 %v9198_v31 }
0x1be4   :  { %7991 = vmatmul.mubr.msk.f32.gmra.mrb[86].mxu0 %vm386_vm4, %v10507_v4  ;;  %8000 = vmatmul.mubr.msk.f32.vlgmr.msra.gmra.mrb[86].mxu1 %vm386_vm4, %v10499_v19 }
0x1be5   :  { %8571 = vmatpush3.bf16.msra.mxu1 %v8570_v62  ;;  %8002 = vmatprep.mubr.msk.f32.mxu1 %vm9197_vm3, %v9198_v31 }
0x1be6   :  { %8027 = vmatprep.subr.mxu1 %v9198_v31  ;;  %8014 = vmatprep.mubr.msk.f32.mxu0 %vm9197_vm3, %v9198_v31 }
0x1be8   :  { %8003 = vmatmul.mubr.msk.f32.gmra.mrb[88].mxu1 %vm386_vm4, %v10497_v45 }
0x1be9   :  { %8005 = vmatprep.mubr.msk.f32.mxu1 %vm9197_vm3, %v9198_v31 }
0x1bec   :  { %8006 = vmatmul.mubr.msk.f32.gmra.mrb[90].mxu1 %vm386_vm4, %v10511_v56 }
0x1bed   :  { %8029 = vmatprep.mubr.msk.f32.mxu1 %vm9197_vm3, %v9198_v31 }
0x1c4a   :  { %v3824_v46 = vpop.f32.mrb[76].mxu0 }
0x1c4b   :  { %v7956_v9 = vpop.f32.mrb[77].mxu0  ;;  %v4132_v48 = vsel %vm773_vm6, %v3824_v46, -inf }
0x1c4c   :  { %4133 = vmax.xlane.f32.xlu1 %v4132_v48 }
0x1c4e   :  { %v3829_v10 = vpop.f32.mrb[78].mxu0 }
0x1c4f   :  { %v7959_v53 = vpop.f32.mrb[79].mxu0  ;;  %v4135_v59 = vsel %vm773_vm6, %v3829_v10, -inf }
0x1c50   :  { %4136 = vmax.xlane.f32.xlu0 %v4135_v59 }
0x1c52   :  { %v3834_v61 = vpop.f32.mrb[80].mxu0 }
0x1c53   :  { %v7962_v43 = vpop.f32.mrb[81].mxu0  ;;  %v4138_v2 = vsel %vm780_vm7, %v3834_v61, -inf }
0x1c54   :  { %4139 = vmax.xlane.f32.xlu1 %v4138_v2 }
0x1cab   :  { %v3922_v12 = vpop.f32.mrb[80].mxu1 }
0x1cac   :  { %v7971_v15 = vpop.f32.mrb[81].mxu1  ;;  %v4141_v14 = vsel %vm773_vm6, %v3922_v12, -inf }
0x1cad   :  { %4142 = vmax.xlane.f32.xlu0 %v4141_v14 }
0x1caf   :  { %v10587_v16 = vpop.f32.mrb[82].mxu1  ;;  %v4020_v32 = vpop.f32.mrb[82].mxu0 }
0x1cb0   :  { %v7974_v51 = vpop.f32.mrb[83].mxu1  ;;  %v7986_v44 = vpop.f32.mrb[83].mxu0  ;;  %v4150_v50 = vsel %vm773_vm6, %v4020_v32, -inf  ;;  %v4144_v49 = vsel %vm773_vm6, %v10587_v16, -inf }
0x1cb1   :  { %4151 = vmax.xlane.f32.xlu1 %v4150_v50  ;;  %4145 = vmax.xlane.f32.xlu0 %v4144_v49 }
0x1cb3   :  { %v10592_v55 = vpop.f32.mrb[84].mxu1  ;;  %v4025_v5 = vpop.f32.mrb[84].mxu0 }
0x1cb4   :  { %v7977_v38 = vpop.f32.mrb[85].mxu1  ;;  %v7989_v45 = vpop.f32.mrb[85].mxu0  ;;  %v4153_v19 = vsel %vm773_vm6, %v4025_v5, -inf  ;;  %v4147_v24 = vsel %vm780_vm7, %v10592_v55, -inf }
0x1cb5   :  { %4154 = vmax.xlane.f32.xlu1 %v4153_v19  ;;  %4148 = vmax.xlane.f32.xlu0 %v4147_v24 }
0x1cb7   :  { %v10597_v25 = vpop.f32.mrb[86].mxu0  ;;  %v10599_v63 = vpop.f32.mrb[86].mxu1 }
0x1cb8   :  { %v7992_v20 = vpop.f32.mrb[87].mxu0  ;;  %v8001_v7 = vpop.f32.mrb[87].mxu1  ;;  %v4156_v29 = vsel %vm780_vm7, %v10597_v25, -inf  ;;  %v4159_v30 = vsel %vm773_vm6, %v10599_v63, -inf }
0x1cb9   :  { %4157 = vmax.xlane.f32.xlu1 %v4156_v29  ;;  %4160 = vmax.xlane.f32.xlu0 %v4159_v30 }
0x1cbb   :  { %v10605_v1 = vpop.f32.mrb[88].mxu1 }
0x1cbc   :  { %v8004_v57 = vpop.f32.mrb[89].mxu1  ;;  %v4162_v27 = vsel %vm773_vm6, %v10605_v1, -inf }
0x1cbd   :  { %4163 = vmax.xlane.f32.xlu0 %v4162_v27 }
0x1cbf   :  { %v10609_v58 = vpop.f32.mrb[90].mxu1 }
0x1cc0   :  { %v8007_v54 = vpop.f32.mrb[91].mxu1  ;;  %v4165_v18 = vsel %vm780_vm7, %v10609_v58, -inf }
0x1cc1   :  { %4166 = vmax.xlane.f32.xlu0 %v4165_v18 }
0x1cca   :  { %4367 = vrot.lane.b32.xlu1 %v10493_v22, %s9203_s18 }
0x1cd7   :  { %4268 = vrot.lane.b32.xlu0 %v10468_v47, %s9203_s18 }
0x1cd9   :  { %v4134_v8 = vpop.xlane.xlu1 %4133 }
0x1cda   :  { %v4168_v37 = vsub.f32 %v3824_v46, %v4134_v8 }
0x1cdc   :  { %v4180_v0 = vmul.f32 1.442695, %v4168_v37 }
0x1cdd   :  { %v4137_v52 = vpop.xlane.xlu0 %4136 }
0x1cde   :  { %v4169_v39 = vsub.f32 %v3829_v10, %v4137_v52  ;;  %9031 = vpow2.f32 %v4180_v0 }
0x1ce0   :  { %v4182_v40 = vmul.f32 1.442695, %v4169_v39 }
0x1ce1   :  { %v4140_v34 = vpop.xlane.xlu1 %4139 }
0x1ce2   :  { %v4170_v26 = vsub.f32 %v3834_v61, %v4140_v34  ;;  %9033 = vpow2.f32 %v4182_v40 }
0x1ce4   :  { %v4184_v41 = vmul.f32 1.442695, %v4170_v26 }
0x1ce6   :  { %9035 = vpow2.f32 %v4184_v41 }
0x1ce8   :  { %v10617_v3 = vpop.eup %9031 }
0x1ce9   :  { %v4204_v22 = vsel %vm773_vm6, %v10617_v3, 0.0 }
0x1cec   :  { %v10621_v42 = vpop.eup %9033 }
0x1ced   :  { %v4207_v47 = vsel %vm773_vm6, %v10621_v42, 0.0 }
0x1cee   :  { %4205 = vadd.xlane.f32.xlu1 %v4204_v22 }
0x1cf0   :  { %v10625_v35 = vpop.eup %9035 }
0x1cf1   :  { %v4210_v33 = vsel %vm780_vm7, %v10625_v35, 0.0 }
0x1cf2   :  { %4208 = vadd.xlane.f32.xlu1 %v4207_v47 }
0x1cf6   :  { %4211 = vadd.xlane.f32.xlu1 %v4210_v33 }
0x1d3a   :  { %v4143_v36 = vpop.xlane.xlu0 %4142 }
0x1d3b   :  { %v4171_v62 = vsub.f32 %v3922_v12, %v4143_v36 }
0x1d3d   :  { %v4186_v46 = vmul.f32 1.442695, %v4171_v62 }
0x1d3e   :  { %v4152_v9 = vpop.xlane.xlu1 %4151  ;;  %v4146_v48 = vpop.xlane.xlu0 %4145 }
0x1d3f   :  { %9037 = vpow2.f32 %v4186_v46  ;;  %v4174_v10 = vsub.f32 %v4020_v32, %v4152_v9  ;;  %v4172_v53 = vsub.f32 %v10587_v16, %v4146_v48 }
0x1d41   :  { %v4192_v59 = vmul.f32 1.442695, %v4174_v10  ;;  %v4188_v61 = vmul.f32 1.442695, %v4172_v53 }
0x1d42   :  { %v4155_v43 = vpop.xlane.xlu1 %4154  ;;  %v4149_v2 = vpop.xlane.xlu0 %4148 }
0x1d43   :  { %9039 = vpow2.f32 %v4192_v59  ;;  %v4175_v15 = vsub.f32 %v4025_v5, %v4155_v43  ;;  %v4173_v14 = vsub.f32 %v10592_v55, %v4149_v2 }
0x1d44   :  { %9041 = vpow2.f32 %v4188_v61 }
0x1d45   :  { %v4194_v51 = vmul.f32 1.442695, %v4175_v15  ;;  %v4190_v44 = vmul.f32 1.442695, %v4173_v14 }
0x1d46   :  { %v4158_v50 = vpop.xlane.xlu1 %4157  ;;  %v4161_v12 = vpop.xlane.xlu0 %4160 }
0x1d47   :  { %9043 = vpow2.f32 %v4194_v51  ;;  %v4176_v49 = vsub.f32 %v10597_v25, %v4158_v50  ;;  %v4177_v32 = vsub.f32 %v10599_v63, %v4161_v12 }
0x1d48   :  { %9045 = vpow2.f32 %v4190_v44 }
0x1d49   :  { %v10633_v16 = vpop.eup %9037  ;;  %v4196_v38 = vmul.f32 1.442695, %v4176_v49  ;;  %v4198_v45 = vmul.f32 1.442695, %v4177_v32 }
0x1d4a   :  { %v4368_v19 = vpop.permute.xlu1 %4367  ;;  %v4164_v24 = vpop.xlane.xlu0 %4163  ;;  %v4213_v55 = vsel %vm773_vm6, %v10633_v16, 0.0 }
0x1d4b   :  { %9047 = vpow2.f32 %v4196_v38  ;;  %v4178_v5 = vsub.f32 %v10605_v1, %v4164_v24  ;;  %8028 = vmatpush3.msk.msra.mxu1 %vm924_vm8, %v4368_v19  ;;  %4214 = vadd.xlane.f32.xlu0 %v4213_v55 }
0x1d4c   :  { %9049 = vpow2.f32 %v4198_v45  ;;  %8575 = vmatprep.subr.bf16.mxu1 %v9196_v28 }
0x1d4d   :  { %v10640_v25 = vpop.eup %9039  ;;  %v4200_v63 = vmul.f32 1.442695, %v4178_v5 }
0x1d4e   :  { %v10642_v20 = vpop.eup %9041  ;;  %v4167_v7 = vpop.xlane.xlu0 %4166  ;;  %v4222_v29 = vsel %vm773_vm6, %v10640_v25, 0.0 }
0x1d4f   :  { %9051 = vpow2.f32 %v4200_v63  ;;  %v4179_v30 = vsub.f32 %v10609_v58, %v4167_v7  ;;  %4223 = vadd.xlane.f32.xlu1 %v4222_v29  ;;  %v4216_v1 = vsel %vm773_vm6, %v10642_v20, 0.0 }
0x1d50   :  { %4217 = vadd.xlane.f32.xlu0 %v4216_v1 }
0x1d51   :  { %v10649_v57 = vpop.eup %9043  ;;  %v4202_v27 = vmul.f32 1.442695, %v4179_v30 }
0x1d52   :  { %v10651_v54 = vpop.eup %9045  ;;  %v4269_v18 = vpop.permute.xlu0 %4268  ;;  %v4225_v8 = vsel %vm773_vm6, %v10649_v57, 0.0 }
0x1d53   :  { %9053 = vpow2.f32 %v4202_v27  ;;  %4226 = vadd.xlane.f32.xlu1 %v4225_v8  ;;  %v4219_v37 = vsel %vm780_vm7, %v10651_v54, 0.0  ;;  %8013 = vmatpush3.msk.msra.mxu0 %vm924_vm8, %v4269_v18 }
0x1d54   :  { %4220 = vadd.xlane.f32.xlu0 %v4219_v37  ;;  %8572 = vmatprep.subr.bf16.mxu0 %v9196_v28 }
0x1d55   :  { %v10659_v58 = vpop.eup %9047 }
0x1d56   :  { %v10661_v0 = vpop.eup %9049  ;;  %v4228_v52 = vsel %vm780_vm7, %v10659_v58, 0.0 }
0x1d57   :  { %4229 = vadd.xlane.f32.xlu1 %v4228_v52  ;;  %v4231_v39 = vsel %vm773_vm6, %v10661_v0, 0.0 }
0x1d58   :  { %4232 = vadd.xlane.f32.xlu0 %v4231_v39 }
0x1d59   :  { %v10667_v40 = vpop.eup %9051 }
0x1d5a   :  { %v4234_v34 = vsel %vm773_vm6, %v10667_v40, 0.0 }
0x1d5c   :  { %4235 = vadd.xlane.f32.xlu0 %v4234_v34  ;;  %v4705_v34 = vld [vmem:[%s11446_s7] sm:$0xff] }
0x1d5d   :  { %v10671_v26 = vpop.eup %9053 }
0x1d5e   :  { %v4237_v41 = vsel %vm780_vm7, %v10671_v26, 0.0 }
0x1d60   :  { %4238 = vadd.xlane.f32.xlu0 %v4237_v41 }
0x1d68   :  { %8819 = vrot.lane.b32.xlu1 %v10503_v23, %s9203_s18 }
0x1d6c   :  { %4466 = vrot.lane.b32.xlu1 %v10507_v4, %s9203_s18 }
0x1d70   :  { %4565 = vrot.lane.b32.xlu1 %v10511_v56, %s9203_s18 }
0x1d76   :  { %8814 = vrot.lane.b32.xlu0 %v10489_v21, %s9203_s18 }
0x1d7b   :  { %v4206_v22 = vpop.xlane.xlu1 %4205 }
0x1d7c   :  { %9055 = vrcp.f32 %v4206_v22 }
0x1d7f   :  { %v4209_v47 = vpop.xlane.xlu1 %4208 }
0x1d80   :  { %9057 = vrcp.f32 %v4209_v47  ;;  %v4708_v47 = vld [vmem:[%s11446_s7 + $0x18] sm:$0xff] }
0x1d83   :  { %v4212_v33 = vpop.xlane.xlu1 %4211 }
0x1d84   :  { %9059 = vrcp.f32 %v4212_v33 }
0x1d86   :  { %v9056_v36 = vpop.eup %9055 }
0x1d87   :  { %v4241_v62 = vmul.f32 %v9056_v36, %v10617_v3 }
0x1d89   :  { %8015 = vmatmul.mubr.msk.f32.vlgmr.msra.gmra.mrb[88].mxu0 %vm773_vm6, %v4241_v62 }
0x1d8a   :  { %v9058_v23 = vpop.eup %9057  ;;  %8017 = vmatprep.mubr.msk.f32.mxu0 %vm9197_vm3, %v9198_v31 }
0x1d8b   :  { %v4243_v4 = vmul.f32 %v9058_v23, %v10621_v42 }
0x1d8d   :  { %8018 = vmatmul.mubr.msk.f32.gmra.mrb[90].mxu0 %vm773_vm6, %v4243_v4 }
0x1d8e   :  { %v9060_v21 = vpop.eup %9059  ;;  %8020 = vmatprep.mubr.msk.f32.mxu0 %vm9197_vm3, %v9198_v31 }
0x1d8f   :  { %v4245_v56 = vmul.f32 %v9060_v21, %v10625_v35 }
0x1d91   :  { %8021 = vmatmul.mubr.msk.f32.gmra.mrb[92].mxu0 %vm773_vm6, %v4245_v56 }
0x1d92   :  { %8044 = vmatprep.mubr.msk.f32.mxu0 %vm9197_vm3, %v9198_v31 }
0x1dd8   :  { %v4215_v3 = vpop.xlane.xlu0 %4214 }
0x1dd9   :  { %9061 = vrcp.f32 %v4215_v3 }
0x1ddc   :  { %v4224_v46 = vpop.xlane.xlu1 %4223 }
0x1ddd   :  { %v4218_v9 = vpop.xlane.xlu0 %4217 }
0x1dde   :  { %9063 = vrcp.f32 %v4218_v9 }
0x1de0   :  { %v4227_v48 = vpop.xlane.xlu1 %4226 }
0x1de1   :  { %v4221_v42 = vpop.xlane.xlu0 %4220 }
0x1de2   :  { %9065 = vrcp.f32 %v4221_v42 }
0x1de3   :  { %v9062_v10 = vpop.eup %9061 }
0x1de4   :  { %v4247_v53 = vmul.f32 %v9062_v10, %v10633_v16  ;;  %v4230_v59 = vpop.xlane.xlu1 %4229 }
0x1de5   :  { %v4233_v61 = vpop.xlane.xlu0 %4232 }
0x1de6   :  { %9067 = vrcp.f32 %v4233_v61  ;;  %8030 = vmatmul.mubr.msk.f32.vlgmr.msra.gmra.mrb[92].mxu1 %vm773_vm6, %v4247_v53 }
0x1de7   :  { %8032 = vmatprep.mubr.msk.f32.mxu1 %vm9197_vm3, %v9198_v31 }
0x1de8   :  { %v9064_v35 = vpop.eup %9063  ;;  %v8820_v43 = vpop.permute.xlu1 %8819 }
0x1de9   :  { %v8822_v2 = vunpack.i.h.bf16 %v8820_v43  ;;  %v8821_v15 = vunpack.i.l.bf16 %v8820_v43  ;;  %v4236_v14 = vpop.xlane.xlu0 %4235  ;;  %v4249_v51 = vmul.f32 %v9064_v35, %v10642_v20 }
0x1dea   :  { %9069 = vrcp.f32 %v4236_v14 }
0x1deb   :  { %v8576_v44 = vpack.c.bf16 %v8822_v2, %v8821_v15  ;;  %8033 = vmatmul.mubr.msk.f32.gmra.mrb[94].mxu1 %vm773_vm6, %v4249_v51  ;;  %9071 = vrcp.f32 %v4224_v46 }
0x1dec   :  { %v9066_v50 = vpop.eup %9065  ;;  %v4467_v12 = vpop.permute.xlu1 %4466  ;;  %8035 = vmatprep.mubr.msk.f32.mxu1 %vm9197_vm3, %v9198_v31 }
0x1ded   :  { %v4239_v49 = vpop.xlane.xlu0 %4238  ;;  %8577 = vmatpush3.bf16.msra.mxu1 %v8576_v44  ;;  %v4251_v32 = vmul.f32 %v9066_v50, %v10651_v54 }
0x1dee   :  { %9073 = vrcp.f32 %v4239_v49  ;;  %8057 = vmatprep.subr.mxu1 %v9198_v31 }
0x1def   :  { %8036 = vmatmul.mubr.msk.f32.gmra.mrb[96].mxu1 %vm773_vm6, %v4251_v32  ;;  %9075 = vrcp.f32 %v4227_v48 }
0x1df0   :  { %v9068_v16 = vpop.eup %9067  ;;  %v4566_v38 = vpop.permute.xlu1 %4565  ;;  %8059 = vmatprep.mubr.msk.f32.mxu1 %vm9197_vm3, %v9198_v31  ;;  %9077 = vrcp.f32 %v4230_v59 }
0x1df1   :  { %v4259_v45 = vmul.f32 %v9068_v16, %v10661_v0  ;;  %v8815_v19 = vpop.permute.xlu0 %8814  ;;  %8058 = vmatpush3.msk.msra.mxu1 %vm924_vm8, %v4566_v38 }
0x1df2   :  { %v8817_v24 = vunpack.i.h.bf16 %v8815_v19  ;;  %v8816_v55 = vunpack.i.l.bf16 %v8815_v19  ;;  %8584 = vmatprep.subr.bf16.mxu1 %v9196_v28 }
0x1df3   :  { %8060 = vmatmul.mubr.msk.f32.vlgmr.msra.gmra.mrb[98].mxu1 %vm773_vm6, %v4259_v45 }
0x1df4   :  { %v9070_v5 = vpop.eup %9069  ;;  %v8573_v63 = vpack.c.bf16 %v8817_v24, %v8816_v55  ;;  %8062 = vmatprep.mubr.msk.f32.mxu1 %vm9197_vm3, %v9198_v31 }
0x1df5   :  { %v4261_v20 = vmul.f32 %v9070_v5, %v10667_v40  ;;  %v9072_v7 = vpop.eup %9071 }
0x1df6   :  { %8574 = vmatpush3.bf16.msra.mxu0 %v8573_v63  ;;  %v4253_v30 = vmul.f32 %v9072_v7, %v10640_v25 }
0x1df7   :  { %8063 = vmatmul.mubr.msk.f32.gmra.mrb[100].mxu1 %vm773_vm6, %v4261_v20  ;;  %8042 = vmatprep.subr.mxu0 %v9198_v31 }
0x1df8   :  { %v9074_v29 = vpop.eup %9073  ;;  %8065 = vmatprep.mubr.msk.f32.mxu1 %vm9197_vm3, %v9198_v31 }
0x1df9   :  { %v4263_v1 = vmul.f32 %v9074_v29, %v10671_v26  ;;  %v9076_v27 = vpop.eup %9075  ;;  %v4707_v26 = vld [vmem:[%s11446_s7 + $0x10] sm:$0xff] }
0x1dfa   :  { %8043 = vmatpush3.msk.msra.mxu0 %vm924_vm8, %v4467_v12  ;;  %v4255_v54 = vmul.f32 %v9076_v27, %v10649_v57  ;;  %v9078_v25 = vpop.eup %9077  ;;  %v8582_v33 = vpack.c.bf16 %v4708_v47, %v4707_v26 }
0x1dfb   :  { %8045 = vmatmul.mubr.msk.f32.vlgmr.msra.gmra.mrb[94].mxu0 %vm773_vm6, %v4253_v30  ;;  %8066 = vmatmul.mubr.msk.f32.gmra.mrb[102].mxu1 %vm773_vm6, %v4263_v1  ;;  %v4257_v18 = vmul.f32 %v9078_v25, %v10659_v58  ;;  %v4706_v58 = vld [vmem:[%s11446_s7 + $0x8] sm:$0xff] }
0x1dfc   :  { %8047 = vmatprep.mubr.msk.f32.mxu0 %vm9197_vm3, %v9198_v31  ;;  %8578 = vmatprep.subr.bf16.mxu0 %v9196_v28  ;;  %v8579_v22 = vpack.c.bf16 %v4706_v58, %v4705_v34 }
0x1dfd   :  { %8093 = vmatprep.mubr.msk.f32.mxu1 %vm9197_vm3, %v9198_v31 }
0x1dfe   :  { %8580 = vmatpush3.bf16.msra.mxu0 %v8579_v22 }
0x1dff   :  { %8048 = vmatmul.mubr.msk.f32.gmra.mrb[96].mxu0 %vm773_vm6, %v4255_v54  ;;  %8581 = vmatprep.subr.bf16.mxu0 %v9196_v28 }
0x1e00   :  { %8050 = vmatprep.mubr.msk.f32.mxu0 %vm9197_vm3, %v9198_v31 }
0x1e02   :  { %8583 = vmatpush3.bf16.msra.mxu0 %v8582_v33 }
0x1e03   :  { %8051 = vmatmul.mubr.msk.f32.gmra.mrb[98].mxu0 %vm773_vm6, %v4257_v18  ;;  %8590 = vmatprep.subr.bf16.mxu0 %v9196_v28 }
0x1e04   :  { %8076 = vmatprep.mubr.msk.f32.mxu0 %vm9197_vm3, %v9198_v31 }
0x1e5c   :  { %v4349_v8 = vpop.f32.mrb[88].mxu0 }
0x1e5d   :  { %v8016_v37 = vpop.f32.mrb[89].mxu0 }
0x1e60   :  { %v4354_v0 = vpop.f32.mrb[90].mxu0 }
0x1e61   :  { %v8019_v57 = vpop.f32.mrb[91].mxu0 }
0x1e64   :  { %v4359_v52 = vpop.f32.mrb[92].mxu0 }
0x1e65   :  { %v8022_v39 = vpop.f32.mrb[93].mxu0 }
0x1eb9   :  { %v4448_v40 = vpop.f32.mrb[92].mxu1 }
0x1eba   :  { %4663 = vrot.lane.b32.xlu1 %v4448_v40, %s9204_s25  ;;  %v8031_v41 = vpop.f32.mrb[93].mxu1 }
0x1ebe   :  { %v4453_v36 = vpop.f32.mrb[94].mxu1 }
0x1ebf   :  { %v8034_v62 = vpop.f32.mrb[95].mxu1 }
0x1ec2   :  { %v4458_v23 = vpop.f32.mrb[96].mxu1 }
0x1ec3   :  { %v8037_v4 = vpop.f32.mrb[97].mxu1 }
0x1ec4   :  { %v4850_v4 = vld [vmem:[%s11448_s9] sm:$0xff] }
0x1ec6   :  { %v4646_v21 = vpop.f32.mrb[98].mxu1 }
0x1ec7   :  { %4687 = vrot.lane.b32.xlu1 %v4646_v21, %s9205_s28  ;;  %v8061_v56 = vpop.f32.mrb[99].mxu1  ;;  %v4851_v21 = vld [vmem:[%s11448_s9 + $0x8] sm:$0xff] }
0x1ec8   :  { %v8585_v56 = vpack.c.bf16 %v4851_v21, %v4850_v4 }
0x1eca   :  { %v4651_v3 = vpop.f32.mrb[100].mxu1  ;;  %8586 = vmatpush3.bf16.msra.mxu1 %v8585_v56 }
0x1ecb   :  { %v8064_v46 = vpop.f32.mrb[101].mxu1  ;;  %8587 = vmatprep.subr.bf16.mxu1 %v9196_v28 }
0x1ecc   :  { %v4853_v46 = vld [vmem:[%s11448_s9 + $0x18] sm:$0xff] }
0x1ece   :  { %v4547_v9 = vpop.f32.mrb[94].mxu0  ;;  %v4656_v48 = vpop.f32.mrb[102].mxu1 }
0x1ecf   :  { %4675 = vrot.lane.b32.xlu0 %v4547_v9, %s9206_s29  ;;  %v8046_v42 = vpop.f32.mrb[95].mxu0  ;;  %v8067_v10 = vpop.f32.mrb[103].mxu1 }
0x1ed2   :  { %v4552_v53 = vpop.f32.mrb[96].mxu0 }
0x1ed3   :  { %v8049_v59 = vpop.f32.mrb[97].mxu0  ;;  %4665 = vrot.lane.b32.xlu0 %v4453_v36, %s9204_s25  ;;  %4677 = vrot.lane.b32.xlu1 %v4552_v53, %s9206_s29 }
0x1ed6   :  { %v4557_v61 = vpop.f32.mrb[98].mxu0 }
0x1ed7   :  { %v8052_v35 = vpop.f32.mrb[99].mxu0  ;;  %4667 = vrot.lane.b32.xlu1 %v4458_v23, %s9204_s25  ;;  %4689 = vrot.lane.b32.xlu0 %v4651_v3, %s9205_s28  ;;  %v4852_v3 = vld [vmem:[%s11448_s9 + $0x10] sm:$0xff] }
0x1ed8   :  { %v8588_v9 = vpack.c.bf16 %v4853_v46, %v4852_v3 }
0x1eda   :  { %8589 = vmatpush3.bf16.msra.mxu1 %v8588_v9 }
0x1edb   :  { %4679 = vrot.lane.b32.xlu0 %v4557_v61, %s9206_s29  ;;  %4691 = vrot.lane.b32.xlu1 %v4656_v48, %s9205_s28 }
0x1edc   :  { %8614 = vmatprep.subr.bf16.mxu1 %v9196_v28 }
0x1f2c   :  { %v4664_v43 = vpop.permute.xlu1 %4663 }
0x1f2d   :  { %v4696_v2 = vsel %vm386_vm4, %v4349_v8, %v4664_v43 }
0x1f39   :  { %v4688_v15 = vpop.permute.xlu1 %4687 }
0x1f41   :  { %v4676_v14 = vpop.permute.xlu0 %4675 }
0x1f42   :  { %v4699_v51 = vsel %vm1343_vm9, %v4696_v2, %v4676_v14 }
0x1f43   :  { %v4702_v44 = vsel %vm1347_vm10, %v4699_v51, %v4688_v15  ;;  %v6978_v15 = vld [vmem:[%s11447_s8] ss:$0 sm:$0xff] }
0x1f44   :  { %8077 = vmatmul.mubr.msk.f32.vlgmr.msra.gmra.mrb[100].mxu0 %vm174_vm1, %v4702_v44 }
0x1f45   :  { %v4666_v50 = vpop.permute.xlu0 %4665  ;;  %v4678_v12 = vpop.permute.xlu1 %4677  ;;  %8079 = vmatprep.mubr.msk.f32.mxu0 %vm9197_vm3, %v9198_v31 }
0x1f46   :  { %v4697_v49 = vsel %vm386_vm4, %v4354_v0, %v4666_v50 }
0x1f47   :  { %v4700_v32 = vsel %vm1343_vm9, %v4697_v49, %v4678_v12 }
0x1f49   :  { %v4668_v16 = vpop.permute.xlu1 %4667  ;;  %v4690_v38 = vpop.permute.xlu0 %4689 }
0x1f4a   :  { %v4703_v45 = vsel %vm1347_vm10, %v4700_v32, %v4690_v38  ;;  %v4698_v19 = vsel %vm386_vm4, %v4359_v52, %v4668_v16 }
0x1f4b   :  { %8080 = vmatmul.mubr.msk.f32.gmra.mrb[102].mxu0 %vm174_vm1, %v4703_v45  ;;  %v5024_v45 = vld [vmem:[%s11449_s10] sm:$0xff] }
0x1f4c   :  { %8082 = vmatprep.mubr.msk.f32.mxu0 %vm9197_vm3, %v9198_v31 }
0x1f4d   :  { %v4680_v24 = vpop.permute.xlu0 %4679  ;;  %v4692_v55 = vpop.permute.xlu1 %4691 }
0x1f4e   :  { %v4701_v5 = vsel %vm1343_vm9, %v4698_v19, %v4680_v24  ;;  %v5025_v19 = vld [vmem:[%s11449_s10 + $0x8] sm:$0xff] }
0x1f4f   :  { %v4704_v63 = vsel %vm1347_vm10, %v4701_v5, %v4692_v55  ;;  %v8591_v24 = vpack.c.bf16 %v5025_v19, %v5024_v45  ;;  %v5026_v55 = vld [vmem:[%s11449_s10 + $0x10] sm:$0xff]  ;;  %v5027_v5 = vld [vmem:[%s11449_s10 + $0x18] sm:$0xff] }
0x1f50   :  { %8083 = vmatmul.mubr.msk.f32.gmra.mrb[104].mxu0 %vm174_vm1, %v4704_v63  ;;  %v8594_v63 = vpack.c.bf16 %v5027_v5, %v5026_v55 }
0x1f51   :  { %8134 = vmatprep.mubr.msk.f32.mxu0 %vm9197_vm3, %v9198_v31  ;;  %8592 = vmatpush3.bf16.msra.mxu0 %v8591_v24 }
0x1f52   :  { %8593 = vmatprep.subr.bf16.mxu0 %v9196_v28 }
0x1f55   :  { %8595 = vmatpush3.bf16.msra.mxu0 %v8594_v63 }
0x1f56   :  { %8596 = vmatprep.subr.bf16.mxu0 %v9196_v28 }
0x2017   :  { %v4784_v20 = vpop.f32.mrb[100].mxu0 }
0x2018   :  { %v10779_v7 = vadd.f32 %v4784_v20, %v10401_v60  ;;  %v8078_v29 = vpop.f32.mrb[101].mxu0  ;;  %v9171_v60 = vld [vmem:[%s11443_s4 + $0x10] sm:$0x1]  ;;  %v5028_v20 = vld [vmem:[%s11449_s10 + $0x20] sm:$0xff] }
0x2019   :  { %v5029_v29 = vld [vmem:[%s11449_s10 + $0x28] sm:$0xff] }
0x201a   :  { %v4802_v30 = vsel %vm174_vm1, %v10779_v7, 0.0 }
0x201b   :  { %4803 = vadd.xlane.f32.xlu0 %v4802_v30  ;;  %v8597_v30 = vpack.c.bf16 %v5029_v29, %v5028_v20 }
0x201d   :  { %8598 = vmatpush3.bf16.msra.mxu0 %v8597_v30 }
0x201e   :  { %v4789_v1 = vpop.f32.mrb[102].mxu0  ;;  %8599 = vmatprep.subr.bf16.mxu0 %v9196_v28 }
0x201f   :  { %v10784_v27 = vadd.f32 %v4789_v1, %v10399_v6  ;;  %v8081_v54 = vpop.f32.mrb[103].mxu0  ;;  %v5030_v1 = vld [vmem:[%s11449_s10 + $0x30] sm:$0xff] }
0x2020   :  { %v5031_v54 = vld [vmem:[%s11449_s10 + $0x38] sm:$0xff] }
0x2021   :  { %v4805_v25 = vsel %vm174_vm1, %v10784_v27, 0.0 }
0x2022   :  { %4806 = vadd.xlane.f32.xlu1 %v4805_v25  ;;  %v8600_v25 = vpack.c.bf16 %v5031_v54, %v5030_v1 }
0x2023   :  { %v4794_v18 = vpop.f32.mrb[104].mxu0 }
0x2024   :  { %v10791_v8 = vadd.f32 %v9171_v60, %v4794_v18  ;;  %v8084_v37 = vpop.f32.mrb[105].mxu0  ;;  %8601 = vmatpush3.bf16.msra.mxu0 %v8600_v25  ;;  %v5032_v18 = vld [vmem:[%s11449_s10 + $0x40] sm:$0xff]  ;;  %v5033_v60 = vld [vmem:[%s11449_s10 + $0x48] sm:$0xff] }
0x2025   :  { %8602 = vmatprep.subr.bf16.mxu0 %v9196_v28  ;;  %v8603_v37 = vpack.c.bf16 %v5033_v60, %v5032_v18 }
0x2026   :  { %v4808_v0 = vsel %vm223_vm2, %v10791_v8, 0.0 }
0x2027   :  { %4809 = vadd.xlane.f32.xlu0 %v4808_v0  ;;  %v5034_v0 = vld [vmem:[%s11449_s10 + $0x50] sm:$0xff] }
0x2028   :  { %8604 = vmatpush3.bf16.msra.mxu0 %v8603_v37 }
0x2029   :  { %8605 = vmatprep.subr.bf16.mxu0 %v9196_v28 }
0x20a8   :  { %v4804_v57 = vpop.xlane.xlu0 %4803 }
0x20a9   :  { %v4811_v6 = vmul.f32 0.03125, %v4804_v57  ;;  %v5035_v57 = vld [vmem:[%s11449_s10 + $0x58] sm:$0xff] }
0x20ab   :  { %v4814_v52 = vsub.f32 %v10779_v7, %v4811_v6  ;;  %v8606_v6 = vpack.c.bf16 %v5035_v57, %v5034_v0 }
0x20ad   :  { %v4817_v39 = vmul.f32 %v4814_v52, %v4814_v52  ;;  %8607 = vmatpush3.bf16.msra.mxu0 %v8606_v6 }
0x20ae   :  { %8608 = vmatprep.subr.bf16.mxu0 %v9196_v28 }
0x20af   :  { %v4807_v40 = vpop.xlane.xlu1 %4806  ;;  %v4820_v34 = vsel %vm174_vm1, %v4817_v39, 0.0  ;;  %v5037_v39 = vld [vmem:[%s11449_s10 + $0x68] sm:$0xff] }
0x20b0   :  { %v4812_v58 = vmul.f32 0.03125, %v4807_v40  ;;  %4821 = vadd.xlane.f32.xlu0 %v4820_v34  ;;  %v5038_v34 = vld [vmem:[%s11449_s10 + $0x70] sm:$0xff] }
0x20b2   :  { %v4815_v26 = vsub.f32 %v10784_v27, %v4812_v58  ;;  %v5039_v58 = vld [vmem:[%s11449_s10 + $0x78] sm:$0xff] }
0x20b4   :  { %v4810_v41 = vpop.xlane.xlu0 %4809  ;;  %v4818_v22 = vmul.f32 %v4815_v26, %v4815_v26 }
0x20b5   :  { %v4813_v47 = vmul.f32 0.03125, %v4810_v41 }
0x20b6   :  { %v4823_v33 = vsel %vm174_vm1, %v4818_v22, 0.0 }
0x20b7   :  { %v4816_v36 = vsub.f32 %v10791_v8, %v4813_v47  ;;  %4824 = vadd.xlane.f32.xlu0 %v4823_v33 }
0x20b9   :  { %v4819_v62 = vmul.f32 %v4816_v36, %v4816_v36 }
0x20bb   :  { %v4826_v23 = vsel %vm223_vm2, %v4819_v62, 0.0 }
0x20bc   :  { %4827 = vadd.xlane.f32.xlu1 %v4826_v23 }
0x213d   :  { %v4822_v48 = vpop.xlane.xlu0 %4821 }
0x213e   :  { %v4829_v42 = vmul.f32 0.03125, %v4822_v48 }
0x2140   :  { %v4832_v10 = vadd.f32 1e-05, %v4829_v42 }
0x2142   :  { %9079 = vrsqrt.f32 %v4832_v10 }
0x2144   :  { %v4825_v53 = vpop.xlane.xlu0 %4824 }
0x2145   :  { %v4830_v59 = vmul.f32 0.03125, %v4825_v53 }
0x2147   :  { %v4833_v61 = vadd.f32 1e-05, %v4830_v59 }
0x2149   :  { %9081 = vrsqrt.f32 %v4833_v61  ;;  %v4828_v35 = vpop.xlane.xlu1 %4827 }
0x214a   :  { %v4831_v43 = vmul.f32 0.03125, %v4828_v35 }
0x214c   :  { %v9080_v2 = vpop.eup %9079  ;;  %v4834_v14 = vadd.f32 1e-05, %v4831_v43 }
0x214d   :  { %v4838_v51 = vmul.f32 %v9080_v2, %v4814_v52  ;;  %v5036_v52 = vld [vmem:[%s11449_s10 + $0x60] sm:$0xff] }
0x214e   :  { %9083 = vrsqrt.f32 %v4834_v14  ;;  %v8609_v40 = vpack.c.bf16 %v5037_v39, %v5036_v52 }
0x214f   :  { %v4847_v44 = vmul.f32 %v6978_v15, %v4838_v51 }
0x2150   :  { %8610 = vmatpush3.bf16.msra.mxu0 %v8609_v40 }
0x2151   :  { %8094 = vmatmul.mubr.msk.f32.vlgmr.msra.gmra.mrb[104].mxu1 %vm174_vm1, %v4847_v44  ;;  %8611 = vmatprep.subr.bf16.mxu0 %v9196_v28 }
0x2152   :  { %8096 = vmatprep.mubr.msk.f32.mxu1 %vm9197_vm3, %v9198_v31 }
0x2153   :  { %v9082_v50 = vpop.eup %9081 }
0x2154   :  { %v4839_v12 = vmul.f32 %v9082_v50, %v4815_v26  ;;  %v8612_v26 = vpack.c.bf16 %v5039_v58, %v5038_v34 }
0x2156   :  { %v4848_v49 = vmul.f32 %v6978_v15, %v4839_v12  ;;  %8613 = vmatpush3.bf16.msra.mxu0 %v8612_v26 }
0x2157   :  { %8628 = vmatprep.subr.bf16.mxu0 %v9196_v28 }
0x2158   :  { %v9084_v32 = vpop.eup %9083  ;;  %8097 = vmatmul.mubr.msk.f32.gmra.mrb[106].mxu1 %vm174_vm1, %v4848_v49 }
0x2159   :  { %8099 = vmatprep.mubr.msk.f32.mxu1 %vm9197_vm3, %v9198_v31  ;;  %v4840_v16 = vmul.f32 %v9084_v32, %v4816_v36 }
0x215b   :  { %v4849_v38 = vmul.f32 %v6978_v15, %v4840_v16 }
0x215d   :  { %8100 = vmatmul.mubr.msk.f32.gmra.mrb[108].mxu1 %vm174_vm1, %v4849_v38 }
0x215e   :  { %8151 = vmatprep.mubr.msk.f32.mxu1 %vm9197_vm3, %v9198_v31 }
0x2224   :  { %v10883_v41 = vpop.f32.mrb[104].mxu1 }
0x2225   :  { %v4946_v22 = vmul.f32 0.70710677, %v10883_v41  ;;  %v8095_v47 = vpop.f32.mrb[105].mxu1 }
0x2227   :  { %v4955_v33 = vand.u32 2147483647, %v4946_v22  ;;  %vm4949_vm11 = vcmp.lt.f32.partialorder %v4946_v22, 0.0 }
0x2228   :  { %v4952_v58 = vsel %vm4949_vm11, -1.0, %v9207_v17 }
0x2229   :  { %v4958_v36 = vmul.f32 0.3275911, %v4955_v33  ;;  %v4997_v10 = vsub.f32 0.0, %v4955_v33 }
0x222b   :  { %v4961_v62 = vadd.f32 1.0, %v4958_v36  ;;  %v10886_v23 = vpop.f32.mrb[106].mxu1  ;;  %v5000_v35 = vmul.f32 %v4997_v10, %v4955_v33 }
0x222c   :  { %v10889_v4 = vmul.f32 0.70710677, %v10886_v23  ;;  %v8098_v21 = vpop.f32.mrb[107].mxu1 }
0x222d   :  { %9085 = vrcp.f32 %v4961_v62  ;;  %v5003_v51 = vmul.f32 1.442695, %v5000_v35  ;;  %v4943_v21 = vmul.f32 0.5, %v10883_v41 }
0x222e   :  { %v4956_v56 = vand.u32 2147483647, %v10889_v4  ;;  %vm4950_vm12 = vcmp.lt.f32.partialorder %v10889_v4, 0.0 }
0x2230   :  { %v4959_v3 = vmul.f32 0.3275911, %v4956_v56  ;;  %v10892_v46 = vpop.f32.mrb[108].mxu1  ;;  %v4998_v14 = vsub.f32 0.0, %v4956_v56 }
0x2231   :  { %v10895_v9 = vmul.f32 0.70710677, %v10892_v46  ;;  %v8101_v48 = vpop.f32.mrb[109].mxu1 }
0x2232   :  { %v4962_v42 = vadd.f32 1.0, %v4959_v3  ;;  %v5001_v49 = vmul.f32 %v4998_v14, %v4956_v56 }
0x2233   :  { %v4957_v53 = vand.u32 2147483647, %v10895_v9  ;;  %vm4951_vm13 = vcmp.lt.f32.partialorder %v10895_v9, 0.0 }
0x2234   :  { %9087 = vrcp.f32 %v4962_v42  ;;  %v5005_v24 = vmul.f32 1.442695, %v5001_v49  ;;  %v4954_v14 = vsel %vm4951_vm13, -1.0, %v9207_v17 }
0x2235   :  { %v4960_v59 = vmul.f32 0.3275911, %v4957_v53  ;;  %v4999_v16 = vsub.f32 0.0, %v4957_v53 }
0x2237   :  { %v9086_v61 = vpop.eup %9085  ;;  %v4963_v43 = vadd.f32 1.0, %v4960_v59  ;;  %v5002_v63 = vmul.f32 %v4999_v16, %v4957_v53  ;;  %v4953_v53 = vsel %vm4950_vm12, -1.0, %v9207_v17 }
0x2238   :  { %v4970_v2 = vmul.f32 1.0614054, %v9086_v61 }
0x2239   :  { %9089 = vrcp.f32 %v4963_v43  ;;  %v5007_v18 = vmul.f32 1.442695, %v5002_v63  ;;  %v4944_v43 = vmul.f32 0.5, %v10886_v23 }
0x223a   :  { %v6982_v15 = vadd.f32 -1.4531521, %v4970_v2  ;;  %9091 = vpow2.f32 %v5003_v51 }
0x223b   :  { %9093 = vpow2.f32 %v5005_v24 }
0x223c   :  { %v4976_v44 = vmul.f32 %v9086_v61, %v6982_v15  ;;  %9095 = vpow2.f32 %v5007_v18 }
0x223e   :  { %v9088_v50 = vpop.eup %9087  ;;  %v4979_v12 = vadd.f32 1.4214138, %v4976_v44  ;;  %v4945_v44 = vmul.f32 0.5, %v10892_v46 }
0x223f   :  { %v4971_v32 = vmul.f32 1.0614054, %v9088_v50 }
0x2240   :  { %v4982_v38 = vmul.f32 %v9086_v61, %v4979_v12 }
0x2241   :  { %v6983_v45 = vadd.f32 -1.4531521, %v4971_v32 }
0x2242   :  { %v6985_v19 = vadd.f32 -0.28449672, %v4982_v38 }
0x2243   :  { %v9090_v55 = vpop.eup %9089  ;;  %v4977_v5 = vmul.f32 %v9088_v50, %v6983_v45 }
0x2244   :  { %v4988_v20 = vmul.f32 %v9086_v61, %v6985_v19  ;;  %v4972_v29 = vmul.f32 1.0614054, %v9090_v55  ;;  %v9092_v0 = vpop.eup %9091 }
0x2245   :  { %v4980_v30 = vadd.f32 1.4214138, %v4977_v5  ;;  %v9094_v62 = vpop.eup %9093 }
0x2246   :  { %v4991_v1 = vadd.f32 0.2548296, %v4988_v20  ;;  %v6984_v54 = vadd.f32 -1.4531521, %v4972_v29 }
0x2247   :  { %v4983_v25 = vmul.f32 %v9088_v50, %v4980_v30 }
0x2248   :  { %v4994_v60 = vmul.f32 %v9086_v61, %v4991_v1  ;;  %v4978_v37 = vmul.f32 %v9090_v55, %v6984_v54  ;;  %v9096_v61 = vpop.eup %9095 }
0x2249   :  { %v6986_v57 = vadd.f32 -0.28449672, %v4983_v25 }
0x224a   :  { %v5009_v6 = vmul.f32 %v9092_v0, %v4994_v60  ;;  %v4981_v52 = vadd.f32 1.4214138, %v4978_v37 }
0x224b   :  { %v4989_v39 = vmul.f32 %v9088_v50, %v6986_v57 }
0x224c   :  { %v5012_v40 = vsub.f32 1.0, %v5009_v6  ;;  %v4984_v34 = vmul.f32 %v9090_v55, %v4981_v52  ;;  %v6990_v6 = vld [vmem:[%s11445_s6 + $0x20] sm:$0xff]  ;;  %v6991_v52 = vld [vmem:[%s11445_s6 + $0x28] sm:$0xff] }
0x224d   :  { %v4992_v26 = vadd.f32 0.2548296, %v4989_v39  ;;  %v8615_v39 = vpack.c.bf16 %v6991_v52, %v6990_v6 }
0x224e   :  { %v5015_v47 = vmul.f32 %v5012_v40, %v4952_v58  ;;  %v6987_v33 = vadd.f32 -0.28449672, %v4984_v34  ;;  %v6992_v40 = vld [vmem:[%s11445_s6 + $0x30] sm:$0xff]  ;;  %v6993_v34 = vld [vmem:[%s11445_s6 + $0x38] sm:$0xff] }
0x224f   :  { %v4995_v36 = vmul.f32 %v9088_v50, %v4992_v26  ;;  %8616 = vmatpush3.bf16.msra.mxu1 %v8615_v39  ;;  %v8618_v58 = vpack.c.bf16 %v6993_v34, %v6992_v40 }
0x2250   :  { %v5018_v56 = vadd.f32 1.0, %v5015_v47  ;;  %v4990_v3 = vmul.f32 %v9090_v55, %v6987_v33  ;;  %8617 = vmatprep.subr.bf16.mxu1 %v9196_v28 }
0x2251   :  { %v5010_v22 = vmul.f32 %v9094_v62, %v4995_v36 }
0x2252   :  { %v5021_v48 = vmul.f32 %v5018_v56, %v4943_v21  ;;  %v4993_v42 = vadd.f32 0.2548296, %v4990_v3 }
0x2253   :  { %v5013_v10 = vsub.f32 1.0, %v5010_v22  ;;  %8619 = vmatpush3.bf16.msra.mxu1 %v8618_v58 }
0x2254   :  { %v4996_v59 = vmul.f32 %v9090_v55, %v4993_v42  ;;  %8135 = vmatmul.mubr.f32.vlgmr.msra.gmra.mrb[106].mxu0 %v5021_v48  ;;  %8620 = vmatprep.subr.bf16.mxu1 %v9196_v28  ;;  %v6989_v48 = vld [vmem:[%s11444_s5 + $0x1] ss:$0 sm:$0xff] }
0x2255   :  { %v5016_v35 = vmul.f32 %v5013_v10, %v4953_v53  ;;  %8137 = vmatprep.mubr.msk.f32.mxu0 %vm9197_vm3, %v9198_v31 }
0x2256   :  { %v5011_v41 = vmul.f32 %v9096_v61, %v4996_v59 }
0x2257   :  { %v5019_v2 = vadd.f32 1.0, %v5016_v35 }
0x2258   :  { %v5014_v4 = vsub.f32 1.0, %v5011_v41 }
0x2259   :  { %v5022_v15 = vmul.f32 %v5019_v2, %v4944_v43 }
0x225a   :  { %v5017_v51 = vmul.f32 %v5014_v4, %v4954_v14 }
0x225b   :  { %8138 = vmatmul.mubr.f32.gmra.mrb[108].mxu0 %v5022_v15 }
0x225c   :  { %v5020_v50 = vadd.f32 1.0, %v5017_v51  ;;  %8140 = vmatprep.mubr.msk.f32.mxu0 %vm9197_vm3, %v9198_v31 }
0x225e   :  { %v5023_v12 = vmul.f32 %v5020_v50, %v4945_v44 }
0x2260   :  { %8141 = vmatmul.mubr.f32.gmra.mrb[110].mxu0 %v5023_v12 }
0x2261   :  { %8196 = vmatprep.mubr.msk.f32.mxu0 %vm9197_vm3, %v9198_v31 }
0x2327   :  { %v5106_v9 = vpop.f32.mrb[106].mxu0 }
0x2328   :  { %v10913_v23 = vadd.f32 %v5106_v9, %v10779_v7  ;;  %v8136_v49 = vpop.f32.mrb[107].mxu0 }
0x232a   :  { %v5124_v32 = vsel %vm174_vm1, %v10913_v23, 0.0 }
0x232b   :  { %5125 = vadd.xlane.f32.xlu0 %v5124_v32 }
0x232e   :  { %v5111_v16 = vpop.f32.mrb[108].mxu0 }
0x232f   :  { %v10918_v46 = vadd.f32 %v5111_v16, %v10784_v27  ;;  %v8139_v38 = vpop.f32.mrb[109].mxu0 }
0x2331   :  { %v5127_v45 = vsel %vm174_vm1, %v10918_v46, 0.0 }
0x2332   :  { %5128 = vadd.xlane.f32.xlu1 %v5127_v45 }
0x2333   :  { %v5116_v19 = vpop.f32.mrb[110].mxu0 }
0x2334   :  { %v10923_v24 = vadd.f32 %v5116_v19, %v10791_v8  ;;  %v8142_v7 = vpop.f32.mrb[111].mxu0 }
0x2336   :  { %v5130_v55 = vsel %vm223_vm2, %v10923_v24, 0.0 }
0x2337   :  { %5131 = vadd.xlane.f32.xlu0 %v5130_v55 }
0x23b8   :  { %v5126_v5 = vpop.xlane.xlu0 %5125 }
0x23b9   :  { %v5133_v63 = vmul.f32 0.03125, %v5126_v5 }
0x23bb   :  { %v5136_v20 = vsub.f32 %v10913_v23, %v5133_v63 }
0x23bd   :  { %v5139_v27 = vmul.f32 %v5136_v20, %v5136_v20 }
0x23bf   :  { %v5129_v29 = vpop.xlane.xlu1 %5128  ;;  %v5142_v30 = vsel %vm174_vm1, %v5139_v27, 0.0 }
0x23c0   :  { %v5134_v1 = vmul.f32 0.03125, %v5129_v29  ;;  %5143 = vadd.xlane.f32.xlu1 %v5142_v30 }
0x23c2   :  { %v5137_v54 = vsub.f32 %v10918_v46, %v5134_v1 }
0x23c4   :  { %v5132_v25 = vpop.xlane.xlu0 %5131  ;;  %v5140_v8 = vmul.f32 %v5137_v54, %v5137_v54 }
0x23c5   :  { %v5135_v18 = vmul.f32 0.03125, %v5132_v25 }
0x23c6   :  { %v5145_v60 = vsel %vm174_vm1, %v5140_v8, 0.0 }
0x23c7   :  { %v5138_v37 = vsub.f32 %v10923_v24, %v5135_v18  ;;  %5146 = vadd.xlane.f32.xlu0 %v5145_v60 }
0x23c9   :  { %v5141_v0 = vmul.f32 %v5138_v37, %v5138_v37 }
0x23cb   :  { %v5148_v57 = vsel %vm223_vm2, %v5141_v0, 0.0 }
0x23cc   :  { %5149 = vadd.xlane.f32.xlu1 %v5148_v57 }
0x244d   :  { %v5144_v26 = vpop.xlane.xlu1 %5143 }
0x244e   :  { %v5151_v47 = vmul.f32 0.03125, %v5144_v26 }
0x2450   :  { %v5154_v33 = vadd.f32 1e-05, %v5151_v47 }
0x2452   :  { %9097 = vrsqrt.f32 %v5154_v33 }
0x2454   :  { %v5147_v36 = vpop.xlane.xlu0 %5146 }
0x2455   :  { %v5152_v62 = vmul.f32 0.03125, %v5147_v36 }
0x2457   :  { %v5155_v21 = vadd.f32 1e-05, %v5152_v62 }
0x2459   :  { %9099 = vrsqrt.f32 %v5155_v21  ;;  %v5150_v56 = vpop.xlane.xlu1 %5149 }
0x245a   :  { %v5153_v3 = vmul.f32 0.03125, %v5150_v56 }
0x245c   :  { %v9098_v22 = vpop.eup %9097  ;;  %v5156_v42 = vadd.f32 1e-05, %v5153_v3 }
0x245d   :  { %v5160_v10 = vmul.f32 %v9098_v22, %v5136_v20 }
0x245e   :  { %9101 = vrsqrt.f32 %v5156_v42 }
0x245f   :  { %v5169_v53 = vmul.f32 %v6989_v48, %v5160_v10 }
0x2461   :  { %8152 = vmatmul.mubr.msk.f32.vlgmr.msra.gmra.mrb[110].mxu1 %vm174_vm1, %v5169_v53 }
0x2462   :  { %8154 = vmatprep.mubr.msk.f32.mxu1 %vm9197_vm3, %v9198_v31 }
0x2463   :  { %v9100_v59 = vpop.eup %9099 }
0x2464   :  { %v5161_v61 = vmul.f32 %v9100_v59, %v5137_v54 }
0x2466   :  { %v5170_v35 = vmul.f32 %v6989_v48, %v5161_v61 }
0x2468   :  { %v9102_v41 = vpop.eup %9101  ;;  %8155 = vmatmul.mubr.msk.f32.gmra.mrb[112].mxu1 %vm174_vm1, %v5170_v35 }
0x2469   :  { %8157 = vmatprep.mubr.msk.f32.mxu1 %vm9197_vm3, %v9198_v31  ;;  %v5162_v43 = vmul.f32 %v9102_v41, %v5138_v37 }
0x246b   :  { %v5171_v2 = vmul.f32 %v6989_v48, %v5162_v43 }
0x246d   :  { %8158 = vmatmul.mubr.msk.f32.gmra.mrb[114].mxu1 %vm174_vm1, %v5171_v2 }
0x246e   :  { %8166 = vmatprep.mubr.msk.f32.mxu1 %vm9197_vm3, %v9198_v31 }
0x2534   :  { %v5251_v4 = vpop.f32.mrb[110].mxu1 }
0x2535   :  { %5268 = vrot.lane.b32.xlu0 %v5251_v4, %s9199_s14  ;;  %v8153_v15 = vpop.f32.mrb[111].mxu1 }
0x253b   :  { %v5256_v14 = vpop.f32.mrb[112].mxu1 }
0x253c   :  { %5276 = vrot.lane.b32.xlu0 %v5256_v14, %s9200_s15  ;;  %5270 = vrot.lane.b32.xlu1 %v5256_v14, %s9199_s14  ;;  %v8156_v51 = vpop.f32.mrb[113].mxu1  ;;  %v10962_v44 = vpack.i.bf16 %v5256_v14, %v5251_v4 }
0x2540   :  { %5282 = vrot.lane.b32.xlu0 %v5256_v14, %s9201_s16  ;;  %5274 = vrot.lane.b32.xlu1 %v5251_v4, %s9200_s15  ;;  %v10966_v50 = vpop.f32.mrb[114].mxu1 }
0x2541   :  { %v8159_v12 = vpop.f32.mrb[115].mxu1 }
0x2544   :  { %5284 = vrot.lane.b32.xlu0 %v10966_v50, %s9201_s16  ;;  %5272 = vrot.lane.b32.xlu1 %v10966_v50, %s9199_s14 }
0x2548   :  { %5290 = vrot.lane.b32.xlu0 %v10966_v50, %s9202_s17  ;;  %5280 = vrot.lane.b32.xlu1 %v5251_v4, %s9201_s16 }
0x254c   :  { %5278 = vrot.lane.b32.xlu1 %v10966_v50, %s9200_s15 }
0x2550   :  { %8824 = vrot.lane.b32.xlu1 %v10962_v44, %s9202_s17 }
0x25a7   :  { %v5269_v9 = vpop.permute.xlu0 %5268 }
0x25ae   :  { %v5271_v49 = vpop.permute.xlu1 %5270  ;;  %v5277_v16 = vpop.permute.xlu0 %5276 }
0x25af   :  { %v10979_v32 = vpack.i.bf16 %v5271_v49, %v5269_v9 }
0x25b1   :  { %8829 = vrot.lane.b32.xlu1 %v10979_v32, %s9202_s17 }
0x25b2   :  { %v5275_v38 = vpop.permute.xlu1 %5274  ;;  %v10991_v7 = vpop.permute.xlu0 %5282 }
0x25b3   :  { %v10983_v45 = vpack.i.bf16 %v5277_v16, %v5275_v38 }
0x25b5   :  { %8834 = vrot.lane.b32.xlu1 %v10983_v45, %s9202_s17 }
0x25b6   :  { %v10987_v19 = vpop.permute.xlu1 %5272  ;;  %v11002_v20 = vpop.permute.xlu0 %5284 }
0x25b7   :  { %5388 = vrot.lane.b32.xlu0 %v10987_v19, %s9202_s17 }
0x25ba   :  { %v5281_v55 = vpop.permute.xlu1 %5280  ;;  %v5291_v54 = vpop.permute.xlu0 %5290 }
0x25bb   :  { %v10994_v5 = vpack.i.bf16 %v10991_v7, %v5281_v55 }
0x25bd   :  { %8839 = vrot.lane.b32.xlu0 %v10994_v5, %s9202_s17 }
0x25be   :  { %v10998_v63 = vpop.permute.xlu1 %5278 }
0x25bf   :  { %5486 = vrot.lane.b32.xlu1 %v10998_v63, %s9202_s17 }
0x25c1   :  { %5584 = vrot.lane.b32.xlu0 %v11002_v20, %s9202_s17  ;;  %s9208_s17 = smov [#allocation2]  }
0x25c2   :  { %v8825_v27 = vpop.permute.xlu1 %8824 }
0x25c3   :  { %v8827_v29 = vunpack.i.h.bf16 %v8825_v27  ;;  %v8826_v30 = vunpack.i.l.bf16 %v8825_v27 }
0x25c5   :  { %v8621_v1 = vpack.c.bf16 %v8827_v29, %v8826_v30 }
0x25c7   :  { %8623 = vmatpush3.bf16.xpose.msk.msra.mxu1 %vm9440_vm5, %v8621_v1 }
0x25c8   :  { %8164 = vmatprep.subr.mxu1 %v9198_v31 }
0x25cf   :  { %8165 = vmatpush3.xpose.msk.msra.mxu1 %vm386_vm4, %v5291_v54 }
0x25d0   :  { %8624 = vmatprep.subr.bf16.mxu1 %v9196_v28 }
0x25d2   :  { %8167 = vmatmul.mubr.msk.f32.vlgmr.msra.gmra.mrb[116].mxu1 %vm386_vm4, %v5251_v4 }
0x25d3   :  { %8169 = vmatprep.mubr.msk.f32.mxu1 %vm9197_vm3, %v9198_v31 }
0x25d6   :  { %8170 = vmatmul.mubr.msk.f32.gmra.mrb[118].mxu1 %vm386_vm4, %v5256_v14 }
0x25d7   :  { %8172 = vmatprep.mubr.msk.f32.mxu1 %vm9197_vm3, %v9198_v31 }
0x25da   :  { %8173 = vmatmul.mubr.msk.f32.gmra.mrb[120].mxu1 %vm386_vm4, %v10966_v50 }
0x25db   :  { %8181 = vmatprep.mubr.msk.f32.mxu1 %vm9197_vm3, %v9198_v31 }
0x2623   :  { %v8830_v25 = vpop.permute.xlu1 %8829 }
0x2624   :  { %v8832_v8 = vunpack.i.h.bf16 %v8830_v25  ;;  %v8831_v18 = vunpack.i.l.bf16 %v8830_v25 }
0x2626   :  { %v8625_v60 = vpack.c.bf16 %v8832_v8, %v8831_v18 }
0x2627   :  { %v8835_v37 = vpop.permute.xlu1 %8834 }
0x2628   :  { %v8837_v0 = vunpack.i.h.bf16 %v8835_v37  ;;  %v8836_v57 = vunpack.i.l.bf16 %v8835_v37  ;;  %8627 = vmatpush3.bf16.xpose.msk.msra.mxu1 %vm9440_vm5, %v8625_v60 }
0x2629   :  { %8179 = vmatprep.subr.mxu1 %v9198_v31  ;;  %v5389_v52 = vpop.permute.xlu0 %5388 }
0x262a   :  { %v8629_v6 = vpack.c.bf16 %v8837_v0, %v8836_v57 }
0x262c   :  { %8631 = vmatpush3.bf16.xpose.msk.msra.mxu0 %vm9440_vm5, %v8629_v6 }
0x262d   :  { %8194 = vmatprep.subr.mxu0 %v9198_v31 }
0x262f   :  { %v8840_v39 = vpop.permute.xlu0 %8839 }
0x2630   :  { %v8842_v40 = vunpack.i.h.bf16 %v8840_v39  ;;  %v8841_v34 = vunpack.i.l.bf16 %v8840_v39  ;;  %8180 = vmatpush3.xpose.msk.msra.mxu1 %vm386_vm4, %v5389_v52 }
0x2631   :  { %8632 = vmatprep.subr.bf16.mxu1 %v9196_v28  ;;  %v5487_v26 = vpop.permute.xlu1 %5486 }
0x2632   :  { %v8633_v58 = vpack.c.bf16 %v8842_v40, %v8841_v34 }
0x2633   :  { %8182 = vmatmul.mubr.msk.f32.vlgmr.msra.gmra.mrb[122].mxu1 %vm386_vm4, %v5269_v9  ;;  %v5585_v47 = vpop.permute.xlu0 %5584 }
0x2634   :  { %8195 = vmatpush3.xpose.msk.msra.mxu0 %vm386_vm4, %v5487_v26  ;;  %8635 = vmatpush3.bf16.xpose.msk.msra.mxu1 %vm9440_vm5, %v8633_v58 }
0x2635   :  { %8184 = vmatprep.mubr.msk.f32.mxu1 %vm9197_vm3, %v9198_v31  ;;  %8209 = vmatprep.subr.mxu1 %v9198_v31 }
0x2636   :  { %8636 = vmatprep.subr.bf16.mxu0 %v9196_v28 }
0x2637   :  { %8185 = vmatmul.mubr.msk.f32.gmra.mrb[124].mxu1 %vm386_vm4, %v5271_v49  ;;  %8197 = vmatmul.mubr.msk.f32.vlgmr.msra.gmra.mrb[112].mxu0 %vm386_vm4, %v5275_v38 }
0x2638   :  { %8187 = vmatprep.mubr.msk.f32.mxu1 %vm9197_vm3, %v9198_v31  ;;  %8199 = vmatprep.mubr.msk.f32.mxu0 %vm9197_vm3, %v9198_v31 }
0x263b   :  { %8188 = vmatmul.mubr.msk.f32.gmra.mrb[126].mxu1 %vm386_vm4, %v10987_v19  ;;  %8200 = vmatmul.mubr.msk.f32.gmra.mrb[114].mxu0 %vm386_vm4, %v5277_v16 }
0x263c   :  { %8210 = vmatpush3.xpose.msk.msra.mxu1 %vm386_vm4, %v5585_v47  ;;  %8202 = vmatprep.mubr.msk.f32.mxu0 %vm9197_vm3, %v9198_v31 }
0x263d   :  { %8211 = vmatprep.mubr.msk.f32.mxu1 %vm9197_vm3, %v9198_v31  ;;  %8639 = vmatprep.subr.bf16.mxu1 %v9196_v28 }
0x263f   :  { %8203 = vmatmul.mubr.msk.f32.gmra.mrb[116].mxu0 %vm386_vm4, %v10998_v63  ;;  %8212 = vmatmul.mubr.msk.f32.vlgmr.msra.gmra.mrb[128].mxu1 %vm386_vm4, %v5281_v55 }
0x2640   :  { %8214 = vmatprep.mubr.msk.f32.mxu1 %vm9197_vm3, %v9198_v31  ;;  %8226 = vmatprep.mubr.msk.f32.mxu0 %vm9197_vm3, %v9198_v31 }
0x2643   :  { %8215 = vmatmul.mubr.msk.f32.gmra.mrb[130].mxu1 %vm386_vm4, %v10991_v7 }
0x2644   :  { %8217 = vmatprep.mubr.msk.f32.mxu1 %vm9197_vm3, %v9198_v31 }
0x2647   :  { %8218 = vmatmul.mubr.msk.f32.gmra.mrb[132].mxu1 %vm386_vm4, %v11002_v20 }
0x2648   :  { %8241 = vmatprep.mubr.msk.f32.mxu1 %vm9197_vm3, %v9198_v31 }
0x26a5   :  { %v5370_v13 = vpop.f32.mrb[116].mxu1 }
0x26a6   :  { %v8168_v33 = vpop.f32.mrb[117].mxu1  ;;  %v5678_v36 = vsel %vm773_vm6, %v5370_v13, -inf }
0x26a7   :  { %5679 = vmax.xlane.f32.xlu1 %v5678_v36 }
0x26a9   :  { %v5375_v62 = vpop.f32.mrb[118].mxu1 }
0x26aa   :  { %v8171_v21 = vpop.f32.mrb[119].mxu1  ;;  %v5681_v56 = vsel %vm773_vm6, %v5375_v62, -inf }
0x26ab   :  { %5682 = vmax.xlane.f32.xlu0 %v5681_v56 }
0x26ad   :  { %v5380_v3 = vpop.f32.mrb[120].mxu1 }
0x26ae   :  { %v8174_v22 = vpop.f32.mrb[121].mxu1  ;;  %v5684_v48 = vsel %vm780_vm7, %v5380_v3, -inf }
0x26af   :  { %5685 = vmax.xlane.f32.xlu1 %v5684_v48 }
0x2706   :  { %v11070_v42 = vpop.f32.mrb[122].mxu1 }
0x2707   :  { %v8183_v10 = vpop.f32.mrb[123].mxu1  ;;  %v5687_v53 = vsel %vm773_vm6, %v11070_v42, -inf }
0x2708   :  { %5688 = vmax.xlane.f32.xlu0 %v5687_v53 }
0x270a   :  { %v11074_v59 = vpop.f32.mrb[124].mxu1  ;;  %v11076_v61 = vpop.f32.mrb[112].mxu0 }
0x270b   :  { %v8186_v35 = vpop.f32.mrb[125].mxu1  ;;  %v8198_v41 = vpop.f32.mrb[113].mxu0  ;;  %v5696_v43 = vsel %vm773_vm6, %v11076_v61, -inf  ;;  %v5690_v2 = vsel %vm773_vm6, %v11074_v59, -inf }
0x270c   :  { %5697 = vmax.xlane.f32.xlu1 %v5696_v43  ;;  %5691 = vmax.xlane.f32.xlu0 %v5690_v2 }
0x270e   :  { %v11082_v4 = vpop.f32.mrb[126].mxu1  ;;  %v11084_v15 = vpop.f32.mrb[114].mxu0 }
0x270f   :  { %v8189_v14 = vpop.f32.mrb[127].mxu1  ;;  %v8201_v51 = vpop.f32.mrb[115].mxu0  ;;  %v5699_v12 = vsel %vm773_vm6, %v11084_v15, -inf  ;;  %v5693_v9 = vsel %vm780_vm7, %v11082_v4, -inf }
0x2710   :  { %5700 = vmax.xlane.f32.xlu1 %v5699_v12  ;;  %5694 = vmax.xlane.f32.xlu0 %v5693_v9 }
0x2712   :  { %v11090_v49 = vpop.f32.mrb[116].mxu0  ;;  %v11092_v16 = vpop.f32.mrb[128].mxu1 }
0x2713   :  { %v8204_v38 = vpop.f32.mrb[117].mxu0  ;;  %v8213_v7 = vpop.f32.mrb[129].mxu1  ;;  %v5702_v55 = vsel %vm780_vm7, %v11090_v49, -inf  ;;  %v5705_v27 = vsel %vm773_vm6, %v11092_v16, -inf }
0x2714   :  { %5703 = vmax.xlane.f32.xlu1 %v5702_v55  ;;  %5706 = vmax.xlane.f32.xlu0 %v5705_v27 }
0x2716   :  { %v11098_v29 = vpop.f32.mrb[130].mxu1 }
0x2717   :  { %v8216_v30 = vpop.f32.mrb[131].mxu1  ;;  %v5708_v1 = vsel %vm773_vm6, %v11098_v29, -inf }
0x2718   :  { %5709 = vmax.xlane.f32.xlu0 %v5708_v1 }
0x271a   :  { %v11102_v54 = vpop.f32.mrb[132].mxu1 }
0x271b   :  { %v8219_v25 = vpop.f32.mrb[133].mxu1  ;;  %v5711_v8 = vsel %vm780_vm7, %v11102_v54, -inf }
0x271c   :  { %5712 = vmax.xlane.f32.xlu0 %v5711_v8 }
0x2725   :  { %8849 = vrot.lane.b32.xlu1 %v10979_v32, %s9203_s18 }
0x2729   :  { %5814 = vrot.lane.b32.xlu1 %v10966_v50, %s9203_s18 }
0x272d   :  { %8854 = vrot.lane.b32.xlu1 %v10983_v45, %s9203_s18 }
0x2732   :  { %8844 = vrot.lane.b32.xlu0 %v10962_v44, %s9203_s18 }
0x2734   :  { %v5680_v18 = vpop.xlane.xlu1 %5679 }
0x2735   :  { %v5714_v60 = vsub.f32 %v5370_v13, %v5680_v18 }
0x2736   :  { %5913 = vrot.lane.b32.xlu0 %v10987_v19, %s9203_s18 }
0x2737   :  { %v5726_v0 = vmul.f32 1.442695, %v5714_v60 }
0x2738   :  { %v5683_v37 = vpop.xlane.xlu0 %5682 }
0x2739   :  { %v5715_v32 = vsub.f32 %v5375_v62, %v5683_v37  ;;  %9103 = vpow2.f32 %v5726_v0 }
0x273a   :  { %8859 = vrot.lane.b32.xlu0 %v10994_v5, %s9203_s18 }
0x273b   :  { %v5728_v50 = vmul.f32 1.442695, %v5715_v32 }
0x273c   :  { %v5686_v57 = vpop.xlane.xlu1 %5685 }
0x273d   :  { %v5716_v6 = vsub.f32 %v5380_v3, %v5686_v57  ;;  %9105 = vpow2.f32 %v5728_v50 }
0x273f   :  { %v5730_v45 = vmul.f32 1.442695, %v5716_v6 }
0x2741   :  { %9107 = vpow2.f32 %v5730_v45 }
0x2743   :  { %v11118_v52 = vpop.eup %9103 }
0x2744   :  { %v5750_v44 = vsel %vm773_vm6, %v11118_v52, 0.0 }
0x2747   :  { %v11122_v19 = vpop.eup %9105 }
0x2748   :  { %v5753_v5 = vsel %vm773_vm6, %v11122_v19, 0.0 }
0x274b   :  { %v11126_v39 = vpop.eup %9107 }
0x274c   :  { %v5756_v40 = vsel %vm780_vm7, %v11126_v39, 0.0 }
0x2751   :  { %5751 = vadd.xlane.f32.xlu1 %v5750_v44 }
0x2755   :  { %5754 = vadd.xlane.f32.xlu1 %v5753_v5 }
0x2759   :  { %5757 = vadd.xlane.f32.xlu1 %v5756_v40 }
0x2795   :  { %v5689_v34 = vpop.xlane.xlu0 %5688 }
0x2796   :  { %v5717_v58 = vsub.f32 %v11070_v42, %v5689_v34 }
0x2798   :  { %v5732_v26 = vmul.f32 1.442695, %v5717_v58 }
0x2799   :  { %v5698_v47 = vpop.xlane.xlu1 %5697  ;;  %v5692_v13 = vpop.xlane.xlu0 %5691 }
0x279a   :  { %9109 = vpow2.f32 %v5732_v26  ;;  %v5720_v33 = vsub.f32 %v11076_v61, %v5698_v47  ;;  %v5718_v36 = vsub.f32 %v11074_v59, %v5692_v13 }
0x279c   :  { %v5738_v62 = vmul.f32 1.442695, %v5720_v33  ;;  %v5734_v21 = vmul.f32 1.442695, %v5718_v36 }
0x279d   :  { %v5701_v56 = vpop.xlane.xlu1 %5700  ;;  %v5695_v3 = vpop.xlane.xlu0 %5694 }
0x279e   :  { %9111 = vpow2.f32 %v5738_v62  ;;  %v5721_v22 = vsub.f32 %v11084_v15, %v5701_v56  ;;  %v5719_v48 = vsub.f32 %v11082_v4, %v5695_v3 }
0x279f   :  { %9113 = vpow2.f32 %v5734_v21 }
0x27a0   :  { %v5740_v10 = vmul.f32 1.442695, %v5721_v22  ;;  %v5736_v42 = vmul.f32 1.442695, %v5719_v48 }
0x27a1   :  { %v5704_v53 = vpop.xlane.xlu1 %5703  ;;  %v5707_v35 = vpop.xlane.xlu0 %5706 }
0x27a2   :  { %9115 = vpow2.f32 %v5740_v10  ;;  %v5722_v41 = vsub.f32 %v11090_v49, %v5704_v53  ;;  %v5723_v61 = vsub.f32 %v11092_v16, %v5707_v35 }
0x27a3   :  { %9117 = vpow2.f32 %v5736_v42 }
0x27a4   :  { %v11137_v59 = vpop.eup %9109  ;;  %v5742_v43 = vmul.f32 1.442695, %v5722_v41  ;;  %v5744_v2 = vmul.f32 1.442695, %v5723_v61 }
0x27a5   :  { %v8850_v14 = vpop.permute.xlu1 %8849  ;;  %v5710_v51 = vpop.xlane.xlu0 %5709  ;;  %v5759_v4 = vsel %vm773_vm6, %v11137_v59, 0.0 }
0x27a6   :  { %9119 = vpow2.f32 %v5742_v43  ;;  %v8852_v15 = vunpack.i.h.bf16 %v8850_v14  ;;  %v8851_v12 = vunpack.i.l.bf16 %v8850_v14  ;;  %v5724_v9 = vsub.f32 %v11098_v29, %v5710_v51  ;;  %5760 = vadd.xlane.f32.xlu0 %v5759_v4 }
0x27a7   :  { %9121 = vpow2.f32 %v5744_v2 }
0x27a8   :  { %v11142_v49 = vpop.eup %9111  ;;  %v8640_v16 = vpack.c.bf16 %v8852_v15, %v8851_v12  ;;  %v5746_v38 = vmul.f32 1.442695, %v5724_v9 }
0x27a9   :  { %v11144_v7 = vpop.eup %9113  ;;  %v5713_v55 = vpop.xlane.xlu0 %5712  ;;  %v5768_v27 = vsel %vm773_vm6, %v11142_v49, 0.0 }
0x27aa   :  { %9123 = vpow2.f32 %v5746_v38  ;;  %v5725_v30 = vsub.f32 %v11102_v54, %v5713_v55  ;;  %5769 = vadd.xlane.f32.xlu1 %v5768_v27  ;;  %8641 = vmatpush3.bf16.msra.mxu1 %v8640_v16  ;;  %v5762_v29 = vsel %vm773_vm6, %v11144_v7, 0.0  ;;  %v5815_v34 = vpop.permute.xlu1 %5814 }
0x27ab   :  { %5763 = vadd.xlane.f32.xlu0 %v5762_v29  ;;  %8239 = vmatprep.subr.mxu1 %v9198_v31 }
0x27ac   :  { %v11152_v1 = vpop.eup %9115  ;;  %v5748_v25 = vmul.f32 1.442695, %v5725_v30 }
0x27ad   :  { %v11154_v8 = vpop.eup %9117  ;;  %v8845_v18 = vpop.permute.xlu0 %8844  ;;  %v5771_v60 = vsel %vm773_vm6, %v11152_v1, 0.0 }
0x27ae   :  { %9125 = vpow2.f32 %v5748_v25  ;;  %v8847_v37 = vunpack.i.h.bf16 %v8845_v18  ;;  %5772 = vadd.xlane.f32.xlu1 %v5771_v60  ;;  %v8846_v54 = vunpack.i.l.bf16 %v8845_v18  ;;  %v5765_v0 = vsel %vm780_vm7, %v11154_v8, 0.0  ;;  %v8855_v47 = vpop.permute.xlu1 %8854 }
0x27af   :  { %5766 = vadd.xlane.f32.xlu0 %v5765_v0  ;;  %v8857_v62 = vunpack.i.h.bf16 %v8855_v47  ;;  %v8856_v21 = vunpack.i.l.bf16 %v8855_v47  ;;  %v7039_v47 = vld [vmem:[%s11446_s7 + $0x30] sm:$0xff] }
0x27b0   :  { %v11160_v32 = vpop.eup %9119  ;;  %v8637_v50 = vpack.c.bf16 %v8847_v37, %v8846_v54 }
0x27b1   :  { %v11162_v57 = vpop.eup %9121  ;;  %v5914_v6 = vpop.permute.xlu0 %5913  ;;  %v5774_v45 = vsel %vm780_vm7, %v11160_v32, 0.0  ;;  %v8643_v22 = vpack.c.bf16 %v8857_v62, %v8856_v21 }
0x27b2   :  { %5775 = vadd.xlane.f32.xlu1 %v5774_v45  ;;  %v5777_v44 = vsel %vm773_vm6, %v11162_v57, 0.0  ;;  %8240 = vmatpush3.msk.msra.mxu1 %vm924_vm8, %v5914_v6 }
0x27b3   :  { %8638 = vmatpush3.bf16.msra.mxu0 %v8637_v50  ;;  %8645 = vmatprep.subr.bf16.mxu1 %v9196_v28 }
0x27b4   :  { %v11170_v5 = vpop.eup %9123  ;;  %5778 = vadd.xlane.f32.xlu0 %v5777_v44  ;;  %8224 = vmatprep.subr.mxu0 %v9198_v31 }
0x27b5   :  { %v5780_v40 = vsel %vm773_vm6, %v11170_v5, 0.0  ;;  %v8860_v10 = vpop.permute.xlu0 %8859 }
0x27b6   :  { %v8862_v35 = vunpack.i.h.bf16 %v8860_v10  ;;  %v8861_v41 = vunpack.i.l.bf16 %v8860_v10 }
0x27b7   :  { %8225 = vmatpush3.msk.msra.mxu0 %vm924_vm8, %v5815_v34  ;;  %v7038_v34 = vld [vmem:[%s11446_s7 + $0x28] sm:$0xff] }
0x27b8   :  { %v11176_v58 = vpop.eup %9125  ;;  %5781 = vadd.xlane.f32.xlu0 %v5780_v40  ;;  %8642 = vmatprep.subr.bf16.mxu0 %v9196_v28  ;;  %v8646_v14 = vpack.c.bf16 %v8862_v35, %v8861_v41  ;;  %v7037_v40 = vld [vmem:[%s11446_s7 + $0x20] sm:$0xff] }
0x27b9   :  { %v5783_v26 = vsel %vm780_vm7, %v11176_v58, 0.0 }
0x27ba   :  { %5784 = vadd.xlane.f32.xlu1 %v5783_v26  ;;  %v8649_v26 = vpack.c.bf16 %v7038_v34, %v7037_v40 }
0x27cb   :  { %6012 = vrot.lane.b32.xlu1 %v10998_v63, %s9203_s18 }
0x27ce   :  { %6111 = vrot.lane.b32.xlu0 %v11002_v20, %s9203_s18  ;;  %s6768_s18 = sshll.u32 %s9208_s17, 4  ;;  %s6769_s18 = int_to_ptr.vmem [resolvable:$true] %s6768_s18 }
0x27cf   :  { %p9177_p1 = scmp.lt.s32.totalorder %s6769_s18, %s6769_s18 }
0x27de   :  { %v5752_v13 = vpop.xlane.xlu1 %5751 }
0x27df   :  { %9127 = vrcp.f32 %v5752_v13  ;;  %v7040_v13 = vld [vmem:[%s11446_s7 + $0x38] sm:$0xff] }
0x27e2   :  { %v5755_v33 = vpop.xlane.xlu1 %5754 }
0x27e3   :  { %9129 = vrcp.f32 %v5755_v33 }
0x27e6   :  { %v5758_v36 = vpop.xlane.xlu1 %5757 }
0x27e7   :  { %9131 = vrcp.f32 %v5758_v36  ;;  %v8652_v36 = vpack.c.bf16 %v7040_v13, %v7039_v47 }
0x27e9   :  { %v9128_v56 = vpop.eup %9127 }
0x27ea   :  { %v5787_v3 = vmul.f32 %v9128_v56, %v11118_v52 }
0x27ec   :  { %8227 = vmatmul.mubr.msk.f32.vlgmr.msra.gmra.mrb[118].mxu0 %vm773_vm6, %v5787_v3 }
0x27ed   :  { %v9130_v48 = vpop.eup %9129  ;;  %8644 = vmatpush3.bf16.msra.mxu0 %v8643_v22  ;;  %8229 = vmatprep.mubr.msk.f32.mxu0 %vm9197_vm3, %v9198_v31 }
0x27ee   :  { %v5789_v63 = vmul.f32 %v9130_v48, %v11122_v19  ;;  %8254 = vmatprep.subr.mxu0 %v9198_v31 }
0x27f0   :  { %8230 = vmatmul.mubr.msk.f32.gmra.mrb[120].mxu0 %vm773_vm6, %v5789_v63 }
0x27f1   :  { %v9132_v20 = vpop.eup %9131  ;;  %8232 = vmatprep.mubr.msk.f32.mxu0 %vm9197_vm3, %v9198_v31 }
0x27f2   :  { %v5791_v52 = vmul.f32 %v9132_v20, %v11126_v39 }
0x27f4   :  { %8233 = vmatmul.mubr.msk.f32.gmra.mrb[122].mxu0 %vm773_vm6, %v5791_v52 }
0x27f5   :  { %8256 = vmatprep.mubr.msk.f32.mxu0 %vm9197_vm3, %v9198_v31 }
0x2833   :  { %v5761_v42 = vpop.xlane.xlu0 %5760 }
0x2834   :  { %9133 = vrcp.f32 %v5761_v42 }
0x2837   :  { %v5770_v53 = vpop.xlane.xlu1 %5769 }
0x2838   :  { %v5764_v19 = vpop.xlane.xlu0 %5763 }
0x2839   :  { %9135 = vrcp.f32 %v5764_v19 }
0x283a   :  { %9137 = vrcp.f32 %v5770_v53 }
0x283b   :  { %v5773_v61 = vpop.xlane.xlu1 %5772 }
0x283c   :  { %v5767_v43 = vpop.xlane.xlu0 %5766 }
0x283d   :  { %9139 = vrcp.f32 %v5767_v43 }
0x283e   :  { %v9134_v2 = vpop.eup %9133  ;;  %9141 = vrcp.f32 %v5773_v61 }
0x283f   :  { %v5793_v39 = vmul.f32 %v9134_v2, %v11137_v59  ;;  %v5776_v4 = vpop.xlane.xlu1 %5775 }
0x2841   :  { %v5779_v51 = vpop.xlane.xlu0 %5778  ;;  %8242 = vmatmul.mubr.msk.f32.vlgmr.msra.gmra.mrb[134].mxu1 %vm773_vm6, %v5793_v39 }
0x2842   :  { %9143 = vrcp.f32 %v5779_v51  ;;  %8647 = vmatpush3.bf16.msra.mxu1 %v8646_v14  ;;  %8244 = vmatprep.mubr.msk.f32.mxu1 %vm9197_vm3, %v9198_v31 }
0x2843   :  { %v9136_v15 = vpop.eup %9135  ;;  %8269 = vmatprep.subr.mxu1 %v9198_v31  ;;  %9145 = vrcp.f32 %v5776_v4 }
0x2844   :  { %v5795_v12 = vmul.f32 %v9136_v15, %v11144_v7  ;;  %v9138_v59 = vpop.eup %9137 }
0x2845   :  { %v5782_v9 = vpop.xlane.xlu0 %5781  ;;  %v5799_v7 = vmul.f32 %v9138_v59, %v11142_v49 }
0x2846   :  { %9147 = vrcp.f32 %v5782_v9  ;;  %8245 = vmatmul.mubr.msk.f32.gmra.mrb[136].mxu1 %vm773_vm6, %v5795_v12 }
0x2847   :  { %v5785_v16 = vpop.xlane.xlu1 %5784  ;;  %8247 = vmatprep.mubr.msk.f32.mxu1 %vm9197_vm3, %v9198_v31  ;;  %v9140_v38 = vpop.eup %9139 }
0x2848   :  { %9149 = vrcp.f32 %v5785_v16  ;;  %v5797_v27 = vmul.f32 %v9140_v38, %v11154_v8  ;;  %v9142_v30 = vpop.eup %9141 }
0x2849   :  { %v6112_v55 = vpop.permute.xlu0 %6111  ;;  %v5801_v8 = vmul.f32 %v9142_v30, %v11152_v1 }
0x284a   :  { %8270 = vmatpush3.msk.msra.mxu1 %vm924_vm8, %v6112_v55 }
0x284b   :  { %8248 = vmatmul.mubr.msk.f32.gmra.mrb[138].mxu1 %vm773_vm6, %v5797_v27  ;;  %v6013_v29 = vpop.permute.xlu1 %6012  ;;  %8654 = vmatprep.subr.bf16.mxu1 %v9196_v28 }
0x284c   :  { %v9144_v25 = vpop.eup %9143  ;;  %8255 = vmatpush3.msk.msra.mxu0 %vm924_vm8, %v6013_v29  ;;  %8271 = vmatprep.mubr.msk.f32.mxu1 %vm9197_vm3, %v9198_v31 }
0x284d   :  { %v5805_v18 = vmul.f32 %v9144_v25, %v11162_v57  ;;  %8257 = vmatmul.mubr.msk.f32.vlgmr.msra.gmra.mrb[124].mxu0 %vm773_vm6, %v5799_v7  ;;  %8648 = vmatprep.subr.bf16.mxu0 %v9196_v28  ;;  %v9146_v49 = vpop.eup %9145 }
0x284e   :  { %8259 = vmatprep.mubr.msk.f32.mxu0 %vm9197_vm3, %v9198_v31  ;;  %v5803_v0 = vmul.f32 %v9146_v49, %v11160_v32  ;;  %8650 = vmatpush3.bf16.msra.mxu0 %v8649_v26 }
0x284f   :  { %8272 = vmatmul.mubr.msk.f32.vlgmr.msra.gmra.mrb[140].mxu1 %vm773_vm6, %v5805_v18  ;;  %8651 = vmatprep.subr.bf16.mxu0 %v9196_v28 }
0x2850   :  { %v9148_v60 = vpop.eup %9147  ;;  %8274 = vmatprep.mubr.msk.f32.mxu1 %vm9197_vm3, %v9198_v31 }
0x2851   :  { %8260 = vmatmul.mubr.msk.f32.gmra.mrb[126].mxu0 %vm773_vm6, %v5801_v8  ;;  %v5807_v37 = vmul.f32 %v9148_v60, %v11170_v5 }
0x2852   :  { %v9150_v54 = vpop.eup %9149  ;;  %8262 = vmatprep.mubr.msk.f32.mxu0 %vm9197_vm3, %v9198_v31  ;;  %8653 = vmatpush3.bf16.msra.mxu0 %v8652_v36 }
0x2853   :  { %8275 = vmatmul.mubr.msk.f32.gmra.mrb[142].mxu1 %vm773_vm6, %v5807_v37  ;;  %v5809_v57 = vmul.f32 %v9150_v54, %v11176_v58  ;;  %8660 = vmatprep.subr.bf16.mxu0 %v9196_v28 }
0x2854   :  { %8277 = vmatprep.mubr.msk.f32.mxu1 %vm9197_vm3, %v9198_v31 }
0x2855   :  { %8263 = vmatmul.mubr.msk.f32.gmra.mrb[128].mxu0 %vm773_vm6, %v5803_v0 }
0x2856   :  { %8288 = vmatprep.mubr.msk.f32.mxu0 %vm9197_vm3, %v9198_v31 }
0x2857   :  { %8278 = vmatmul.mubr.msk.f32.gmra.mrb[144].mxu1 %vm773_vm6, %v5809_v57 }
0x2858   :  { %8305 = vmatprep.mubr.msk.f32.mxu1 %vm9197_vm3, %v9198_v31 }
0x28bf   :  { %v5895_v1 = vpop.f32.mrb[118].mxu0 }
0x28c0   :  { %v8228_v50 = vpop.f32.mrb[119].mxu0 }
0x28c3   :  { %v5900_v6 = vpop.f32.mrb[120].mxu0 }
0x28c4   :  { %v8231_v45 = vpop.f32.mrb[121].mxu0 }
0x28c7   :  { %v5905_v32 = vpop.f32.mrb[122].mxu0 }
0x28c8   :  { %v8234_v44 = vpop.f32.mrb[123].mxu0 }
0x2914   :  { %v5994_v5 = vpop.f32.mrb[134].mxu1 }
0x2915   :  { %6209 = vrot.lane.b32.xlu1 %v5994_v5, %s9204_s25  ;;  %v8243_v58 = vpop.f32.mrb[135].mxu1 }
0x2919   :  { %v5999_v33 = vpop.f32.mrb[136].mxu1 }
0x291a   :  { %v8246_v62 = vpop.f32.mrb[137].mxu1 }
0x291b   :  { %v7046_v62 = vld [vmem:[%s11448_s9 + $0x20] sm:$0xff] }
0x291e   :  { %v6004_v21 = vpop.f32.mrb[138].mxu1 }
0x291f   :  { %v8249_v56 = vpop.f32.mrb[139].mxu1 }
0x2920   :  { %v6093_v3 = vpop.f32.mrb[124].mxu0 }
0x2921   :  { %6221 = vrot.lane.b32.xlu0 %v6093_v3, %s9206_s29  ;;  %v8258_v22 = vpop.f32.mrb[125].mxu0  ;;  %v7048_v3 = vld [vmem:[%s11448_s9 + $0x30] sm:$0xff] }
0x2922   :  { %v6192_v48 = vpop.f32.mrb[140].mxu1  ;;  %v7049_v22 = vld [vmem:[%s11448_s9 + $0x38] sm:$0xff] }
0x2923   :  { %v8273_v63 = vpop.f32.mrb[141].mxu1 }
0x2924   :  { %v6098_v20 = vpop.f32.mrb[126].mxu0 }
0x2925   :  { %v8261_v52 = vpop.f32.mrb[127].mxu0  ;;  %6223 = vrot.lane.b32.xlu1 %v6098_v20, %s9206_s29  ;;  %6211 = vrot.lane.b32.xlu0 %v5999_v33, %s9204_s25 }
0x2926   :  { %v6197_v10 = vpop.f32.mrb[142].mxu1 }
0x2927   :  { %v8276_v42 = vpop.f32.mrb[143].mxu1 }
0x2928   :  { %v6103_v53 = vpop.f32.mrb[128].mxu0 }
0x2929   :  { %v8264_v19 = vpop.f32.mrb[129].mxu0  ;;  %6233 = vrot.lane.b32.xlu1 %v6192_v48, %s9205_s28  ;;  %6235 = vrot.lane.b32.xlu0 %v6197_v10, %s9205_s28  ;;  %v8658_v48 = vpack.c.bf16 %v7049_v22, %v7048_v3 }
0x292a   :  { %v6202_v35 = vpop.f32.mrb[144].mxu1 }
0x292b   :  { %v8279_v41 = vpop.f32.mrb[145].mxu1 }
0x292d   :  { %6213 = vrot.lane.b32.xlu1 %v6004_v21, %s9204_s25  ;;  %6225 = vrot.lane.b32.xlu0 %v6103_v53, %s9206_s29  ;;  %v7047_v21 = vld [vmem:[%s11448_s9 + $0x28] sm:$0xff] }
0x292e   :  { %v8655_v56 = vpack.c.bf16 %v7047_v21, %v7046_v62 }
0x2930   :  { %8656 = vmatpush3.bf16.msra.mxu1 %v8655_v56 }
0x2931   :  { %6237 = vrot.lane.b32.xlu1 %v6202_v35, %s9205_s28  ;;  %8657 = vmatprep.subr.bf16.mxu1 %v9196_v28 }
0x2934   :  { %8659 = vmatpush3.bf16.msra.mxu1 %v8658_v48 }
0x2935   :  { %8684 = vmatprep.subr.bf16.mxu1 %v9196_v28 }
0x2987   :  { %v6210_v61 = vpop.permute.xlu1 %6209 }
0x2988   :  { %v6242_v14 = vsel %vm386_vm4, %v5895_v1, %v6210_v61 }
0x2993   :  { %v6222_v43 = vpop.permute.xlu0 %6221 }
0x2994   :  { %v6245_v51 = vsel %vm1343_vm9, %v6242_v14, %v6222_v43  ;;  %v7045_v43 = vld [vmem:[%s11447_s8 + $0x1] ss:$0 sm:$0xff] }
0x2997   :  { %v6224_v2 = vpop.permute.xlu1 %6223  ;;  %v6212_v39 = vpop.permute.xlu0 %6211 }
0x2998   :  { %v6243_v12 = vsel %vm386_vm4, %v5900_v6, %v6212_v39 }
0x2999   :  { %v6246_v59 = vsel %vm1343_vm9, %v6243_v12, %v6224_v2 }
0x299b   :  { %v6234_v4 = vpop.permute.xlu1 %6233  ;;  %v6236_v15 = vpop.permute.xlu0 %6235 }
0x299c   :  { %v6248_v9 = vsel %vm1347_vm10, %v6245_v51, %v6234_v4  ;;  %v6249_v38 = vsel %vm1347_vm10, %v6246_v59, %v6236_v15  ;;  %v7059_v59 = vld [vmem:[%s11449_s10 + $0x80] sm:$0xff] }
0x299d   :  { %8289 = vmatmul.mubr.msk.f32.vlgmr.msra.gmra.mrb[130].mxu0 %vm174_vm1, %v6248_v9 }
0x299e   :  { %8291 = vmatprep.mubr.msk.f32.mxu0 %vm9197_vm3, %v9198_v31 }
0x299f   :  { %v6214_v16 = vpop.permute.xlu1 %6213  ;;  %v6226_v27 = vpop.permute.xlu0 %6225 }
0x29a0   :  { %v6244_v55 = vsel %vm386_vm4, %v5905_v32, %v6214_v16  ;;  %v7060_v16 = vld [vmem:[%s11449_s10 + $0x88] sm:$0xff] }
0x29a1   :  { %8292 = vmatmul.mubr.msk.f32.gmra.mrb[132].mxu0 %vm174_vm1, %v6249_v38  ;;  %v6247_v30 = vsel %vm1343_vm9, %v6244_v55, %v6226_v27  ;;  %v8661_v38 = vpack.c.bf16 %v7060_v16, %v7059_v59  ;;  %v7061_v55 = vld [vmem:[%s11449_s10 + $0x90] sm:$0xff]  ;;  %v7062_v27 = vld [vmem:[%s11449_s10 + $0x98] sm:$0xff] }
0x29a2   :  { %8294 = vmatprep.mubr.msk.f32.mxu0 %vm9197_vm3, %v9198_v31 }
0x29a3   :  { %v6238_v7 = vpop.permute.xlu1 %6237  ;;  %8662 = vmatpush3.bf16.msra.mxu0 %v8661_v38 }
0x29a4   :  { %v6250_v29 = vsel %vm1347_vm10, %v6247_v30, %v6238_v7  ;;  %8663 = vmatprep.subr.bf16.mxu0 %v9196_v28  ;;  %v8664_v30 = vpack.c.bf16 %v7062_v27, %v7061_v55  ;;  %v7063_v7 = vld [vmem:[%s11449_s10 + $0xa0] sm:$0xff] }
0x29a5   :  { %8295 = vmatmul.mubr.msk.f32.gmra.mrb[134].mxu0 %vm174_vm1, %v6250_v29  ;;  %v7064_v29 = vld [vmem:[%s11449_s10 + $0xa8] sm:$0xff] }
0x29a6   :  { %8346 = vmatprep.mubr.msk.f32.mxu0 %vm9197_vm3, %v9198_v31 }
0x29a7   :  { %8665 = vmatpush3.bf16.msra.mxu0 %v8664_v30 }
0x29a8   :  { %8666 = vmatprep.subr.bf16.mxu0 %v9196_v28 }
0x2a70   :  { %v6330_v25 = vpop.f32.mrb[130].mxu0 }
0x2a71   :  { %v6344_v18 = vadd.f32 %v6330_v25, %v10913_v23  ;;  %v8290_v49 = vpop.f32.mrb[131].mxu0  ;;  %v8667_v25 = vpack.c.bf16 %v7064_v29, %v7063_v7 }
0x2a72   :  { %v7066_v49 = vld [vmem:[%s11449_s10 + $0xb8] sm:$0xff] }
0x2a73   :  { %v6348_v8 = vsel %vm174_vm1, %v6344_v18, 0.0  ;;  %8668 = vmatpush3.bf16.msra.mxu0 %v8667_v25 }
0x2a74   :  { %6349 = vadd.xlane.f32.xlu0 %v6348_v8  ;;  %v6335_v60 = vpop.f32.mrb[132].mxu0  ;;  %8669 = vmatprep.subr.bf16.mxu0 %v9196_v28 }
0x2a75   :  { %v6345_v37 = vadd.f32 %v6335_v60, %v10918_v46  ;;  %v8293_v54 = vpop.f32.mrb[133].mxu0  ;;  %v7067_v60 = vld [vmem:[%s11449_s10 + $0xc0] sm:$0xff] }
0x2a77   :  { %v6351_v0 = vsel %vm174_vm1, %v6345_v37, 0.0 }
0x2a78   :  { %6352 = vadd.xlane.f32.xlu1 %v6351_v0  ;;  %v6340_v57 = vpop.f32.mrb[134].mxu0  ;;  %v7069_v0 = vld [vmem:[%s11449_s10 + $0xd0] sm:$0xff] }
0x2a79   :  { %v11285_v1 = vadd.f32 %v6340_v57, %v10923_v24  ;;  %v8296_v50 = vpop.f32.mrb[135].mxu0  ;;  %v7070_v57 = vld [vmem:[%s11449_s10 + $0xd8] sm:$0xff] }
0x2a7a   :  { %v8676_v50 = vpack.c.bf16 %v7070_v57, %v7069_v0 }
0x2a7b   :  { %v6354_v6 = vsel %vm223_vm2, %v11285_v1, 0.0 }
0x2a7c   :  { %6355 = vadd.xlane.f32.xlu0 %v6354_v6  ;;  %v7071_v6 = vld [vmem:[%s11449_s10 + $0xe0] sm:$0xff] }
0x2b01   :  { %v6350_v23 = vpop.xlane.xlu0 %6349 }
0x2b02   :  { %v6357_v45 = vmul.f32 0.03125, %v6350_v23  ;;  %v7072_v23 = vld [vmem:[%s11449_s10 + $0xe8] sm:$0xff] }
0x2b04   :  { %v6360_v32 = vsub.f32 %v6344_v18, %v6357_v45  ;;  %v7065_v18 = vld [vmem:[%s11449_s10 + $0xb0] sm:$0xff]  ;;  %v8679_v45 = vpack.c.bf16 %v7072_v23, %v7071_v6 }
0x2b05   :  { %v6353_v44 = vpop.xlane.xlu1 %6352  ;;  %v8670_v8 = vpack.c.bf16 %v7066_v49, %v7065_v18 }
0x2b06   :  { %v6358_v5 = vmul.f32 0.03125, %v6353_v44  ;;  %v6363_v40 = vmul.f32 %v6360_v32, %v6360_v32  ;;  %v7074_v44 = vld [vmem:[%s11449_s10 + $0xf8] sm:$0xff] }
0x2b07   :  { %8671 = vmatpush3.bf16.msra.mxu0 %v8670_v8 }
0x2b08   :  { %v6361_v46 = vsub.f32 %v6345_v37, %v6358_v5  ;;  %v6366_v34 = vsel %vm174_vm1, %v6363_v40, 0.0  ;;  %8672 = vmatprep.subr.bf16.mxu0 %v9196_v28  ;;  %v7068_v37 = vld [vmem:[%s11449_s10 + $0xc8] sm:$0xff] }
0x2b09   :  { %6367 = vadd.xlane.f32.xlu0 %v6366_v34  ;;  %v6356_v58 = vpop.xlane.xlu0 %6355  ;;  %v8673_v54 = vpack.c.bf16 %v7068_v37, %v7067_v60 }
0x2b0a   :  { %v6359_v26 = vmul.f32 0.03125, %v6356_v58  ;;  %v6364_v47 = vmul.f32 %v6361_v46, %v6361_v46 }
0x2b0b   :  { %8674 = vmatpush3.bf16.msra.mxu0 %v8673_v54 }
0x2b0c   :  { %v6362_v24 = vsub.f32 %v11285_v1, %v6359_v26  ;;  %v6369_v13 = vsel %vm174_vm1, %v6364_v47, 0.0  ;;  %8675 = vmatprep.subr.bf16.mxu0 %v9196_v28 }
0x2b0d   :  { %6370 = vadd.xlane.f32.xlu0 %v6369_v13 }
0x2b0e   :  { %v6365_v33 = vmul.f32 %v6362_v24, %v6362_v24 }
0x2b0f   :  { %8677 = vmatpush3.bf16.msra.mxu0 %v8676_v50 }
0x2b10   :  { %v6372_v36 = vsel %vm223_vm2, %v6365_v33, 0.0  ;;  %8678 = vmatprep.subr.bf16.mxu0 %v9196_v28 }
0x2b11   :  { %6373 = vadd.xlane.f32.xlu1 %v6372_v36 }
0x2b13   :  { %8680 = vmatpush3.bf16.msra.mxu0 %v8679_v45 }
0x2b14   :  { %8681 = vmatprep.subr.bf16.mxu0 %v9196_v28 }
0x2b96   :  { %v6368_v63 = vpop.xlane.xlu0 %6367 }
0x2b97   :  { %v6375_v20 = vmul.f32 0.03125, %v6368_v63 }
0x2b99   :  { %v6378_v52 = vadd.f32 1e-05, %v6375_v20 }
0x2b9a   :  { %v6371_v10 = vpop.xlane.xlu0 %6370 }
0x2b9b   :  { %9151 = vrsqrt.f32 %v6378_v52  ;;  %v6376_v42 = vmul.f32 0.03125, %v6371_v10 }
0x2b9d   :  { %v6379_v53 = vadd.f32 1e-05, %v6376_v42 }
0x2b9e   :  { %v6374_v19 = vpop.xlane.xlu1 %6373 }
0x2b9f   :  { %9153 = vrsqrt.f32 %v6379_v53  ;;  %v6377_v35 = vmul.f32 0.03125, %v6374_v19 }
0x2ba1   :  { %v6380_v41 = vadd.f32 1e-05, %v6377_v35 }
0x2ba3   :  { %9155 = vrsqrt.f32 %v6380_v41 }
0x2ba5   :  { %v9152_v61 = vpop.eup %9151 }
0x2ba6   :  { %v6384_v2 = vmul.f32 %v9152_v61, %v6360_v32  ;;  %v7073_v32 = vld [vmem:[%s11449_s10 + $0xf0] sm:$0xff] }
0x2ba7   :  { %v8682_v5 = vpack.c.bf16 %v7074_v44, %v7073_v32 }
0x2ba8   :  { %v6393_v39 = vmul.f32 %v7045_v43, %v6384_v2 }
0x2ba9   :  { %v9154_v14 = vpop.eup %9153  ;;  %8683 = vmatpush3.bf16.msra.mxu0 %v8682_v5 }
0x2baa   :  { %8306 = vmatmul.mubr.msk.f32.vlgmr.msra.gmra.mrb[146].mxu1 %vm174_vm1, %v6393_v39  ;;  %v6385_v51 = vmul.f32 %v9154_v14, %v6361_v46 }
0x2bab   :  { %8308 = vmatprep.mubr.msk.f32.mxu1 %vm9197_vm3, %v9198_v31 }
0x2bac   :  { %v6394_v4 = vmul.f32 %v7045_v43, %v6385_v51 }
0x2bad   :  { %v9156_v15 = vpop.eup %9155 }
0x2bae   :  { %8309 = vmatmul.mubr.msk.f32.gmra.mrb[148].mxu1 %vm174_vm1, %v6394_v4  ;;  %v6386_v12 = vmul.f32 %v9156_v15, %v6362_v24 }
0x2baf   :  { %8311 = vmatprep.mubr.msk.f32.mxu1 %vm9197_vm3, %v9198_v31 }
0x2bb0   :  { %v6395_v9 = vmul.f32 %v7045_v43, %v6386_v12 }
0x2bb2   :  { %8312 = vmatmul.mubr.msk.f32.gmra.mrb[150].mxu1 %vm174_vm1, %v6395_v9 }
0x2bb3   :  { %8363 = vmatprep.mubr.msk.f32.mxu1 %vm9197_vm3, %v9198_v31 }
0x2c7d   :  { %v11374_v40 = vpop.f32.mrb[146].mxu1 }
0x2c7e   :  { %v11377_v46 = vmul.f32 0.70710677, %v11374_v40  ;;  %v8307_v34 = vpop.f32.mrb[147].mxu1 }
0x2c80   :  { %v6501_v58 = vand.u32 2147483647, %v11377_v46  ;;  %vm6495_vm4 = vcmp.lt.f32.partialorder %v11377_v46, 0.0 }
0x2c81   :  { %v11380_v26 = vpop.f32.mrb[148].mxu1  ;;  %v6498_v5 = vsel %vm6495_vm4, -1.0, %v9207_v17 }
0x2c82   :  { %v6504_v47 = vmul.f32 0.3275911, %v6501_v58  ;;  %v11383_v24 = vmul.f32 0.70710677, %v11380_v26  ;;  %v8310_v13 = vpop.f32.mrb[149].mxu1  ;;  %v6543_v20 = vsub.f32 0.0, %v6501_v58 }
0x2c84   :  { %v6507_v33 = vadd.f32 1.0, %v6504_v47  ;;  %v6502_v36 = vand.u32 2147483647, %v11383_v24  ;;  %v6546_v42 = vmul.f32 %v6543_v20, %v6501_v58  ;;  %vm6496_vm5 = vcmp.lt.f32.partialorder %v11383_v24, 0.0 }
0x2c85   :  { %v11386_v62 = vpop.f32.mrb[150].mxu1  ;;  %v6499_v46 = vsel %vm6496_vm5, -1.0, %v9207_v17 }
0x2c86   :  { %9157 = vrcp.f32 %v6507_v33  ;;  %v6505_v21 = vmul.f32 0.3275911, %v6502_v36  ;;  %v8313_v56 = vpop.f32.mrb[151].mxu1  ;;  %v11389_v3 = vmul.f32 0.70710677, %v11386_v62  ;;  %v6544_v53 = vsub.f32 0.0, %v6502_v36 }
0x2c87   :  { %v6549_v61 = vmul.f32 1.442695, %v6546_v42  ;;  %v6489_v33 = vmul.f32 0.5, %v11374_v40 }
0x2c88   :  { %v6508_v22 = vadd.f32 1.0, %v6505_v21  ;;  %v6503_v48 = vand.u32 2147483647, %v11389_v3  ;;  %v6547_v43 = vmul.f32 %v6544_v53, %v6502_v36  ;;  %vm6497_vm6 = vcmp.lt.f32.partialorder %v11389_v3, 0.0 }
0x2c89   :  { %v6500_v42 = vsel %vm6497_vm6, -1.0, %v9207_v17 }
0x2c8a   :  { %9159 = vrcp.f32 %v6508_v22  ;;  %v6506_v63 = vmul.f32 0.3275911, %v6503_v48  ;;  %v6545_v14 = vsub.f32 0.0, %v6503_v48  ;;  %v6551_v15 = vmul.f32 1.442695, %v6547_v43 }
0x2c8c   :  { %v6509_v52 = vadd.f32 1.0, %v6506_v63  ;;  %v6548_v16 = vmul.f32 %v6545_v14, %v6503_v48 }
0x2c8e   :  { %9161 = vrcp.f32 %v6509_v52  ;;  %v6553_v25 = vmul.f32 1.442695, %v6548_v16  ;;  %v6490_v52 = vmul.f32 0.5, %v11380_v26  ;;  %v6683_v16 = vld [vmem:[%s11451_s12 + $0x18] sm:$0xff] }
0x2c8f   :  { %9163 = vpow2.f32 %v6549_v61 }
0x2c90   :  { %v9158_v10 = vpop.eup %9157  ;;  %9165 = vpow2.f32 %v6551_v15 }
0x2c91   :  { %v6516_v19 = vmul.f32 1.0614054, %v9158_v10  ;;  %9167 = vpow2.f32 %v6553_v25 }
0x2c93   :  { %v7053_v35 = vadd.f32 -1.4531521, %v6516_v19  ;;  %v6491_v19 = vmul.f32 0.5, %v11386_v62 }
0x2c94   :  { %v9160_v41 = vpop.eup %9159 }
0x2c95   :  { %v6522_v2 = vmul.f32 %v9158_v10, %v7053_v35  ;;  %v6517_v39 = vmul.f32 1.0614054, %v9160_v41 }
0x2c97   :  { %v6525_v51 = vadd.f32 1.4214138, %v6522_v2  ;;  %v7054_v4 = vadd.f32 -1.4531521, %v6517_v39 }
0x2c98   :  { %v9162_v12 = vpop.eup %9161 }
0x2c99   :  { %v6528_v9 = vmul.f32 %v9158_v10, %v6525_v51  ;;  %v6523_v59 = vmul.f32 %v9160_v41, %v7054_v4  ;;  %v6518_v38 = vmul.f32 1.0614054, %v9162_v12  ;;  %v9164_v0 = vpop.eup %9163 }
0x2c9a   :  { %v9166_v44 = vpop.eup %9165 }
0x2c9b   :  { %v7056_v55 = vadd.f32 -0.28449672, %v6528_v9  ;;  %v6526_v27 = vadd.f32 1.4214138, %v6523_v59  ;;  %v7055_v30 = vadd.f32 -1.4531521, %v6518_v38  ;;  %v9168_v22 = vpop.eup %9167 }
0x2c9c   :  { %v6681_v9 = vld [vmem:[%s11451_s12 + $0x8] sm:$0xff]  ;;  %v6682_v59 = vld [vmem:[%s11451_s12 + $0x10] sm:$0xff] }
0x2c9d   :  { %v6534_v7 = vmul.f32 %v9158_v10, %v7056_v55  ;;  %v6529_v29 = vmul.f32 %v9160_v41, %v6526_v27  ;;  %v6524_v18 = vmul.f32 %v9162_v12, %v7055_v30  ;;  %v8688_v38 = vpack.c.bf16 %v6683_v16, %v6682_v59 }
0x2c9f   :  { %v6537_v49 = vadd.f32 0.2548296, %v6534_v7  ;;  %v7057_v8 = vadd.f32 -0.28449672, %v6529_v29  ;;  %v6527_v60 = vadd.f32 1.4214138, %v6524_v18 }
0x2ca0   :  { %v6665_v29 = vld [vmem:[%s11450_s11] sm:$0x1] }
0x2ca1   :  { %v6540_v37 = vmul.f32 %v9158_v10, %v6537_v49  ;;  %v6535_v54 = vmul.f32 %v9160_v41, %v7057_v8  ;;  %v6530_v57 = vmul.f32 %v9162_v12, %v6527_v60 }
0x2ca3   :  { %v6555_v50 = vmul.f32 %v9164_v0, %v6540_v37  ;;  %v6538_v6 = vadd.f32 0.2548296, %v6535_v54  ;;  %v7058_v23 = vadd.f32 -0.28449672, %v6530_v57 }
0x2ca5   :  { %v6558_v45 = vsub.f32 1.0, %v6555_v50  ;;  %v6541_v32 = vmul.f32 %v9160_v41, %v6538_v6  ;;  %v6536_v34 = vmul.f32 %v9162_v12, %v7058_v23 }
0x2ca7   :  { %v6561_v58 = vmul.f32 %v6558_v45, %v6498_v5  ;;  %v6556_v47 = vmul.f32 %v9166_v44, %v6541_v32  ;;  %v6539_v13 = vadd.f32 0.2548296, %v6536_v34 }
0x2ca9   :  { %v6564_v36 = vadd.f32 1.0, %v6561_v58  ;;  %v6559_v21 = vsub.f32 1.0, %v6556_v47  ;;  %v6542_v56 = vmul.f32 %v9162_v12, %v6539_v13 }
0x2cab   :  { %v6567_v48 = vmul.f32 %v6564_v36, %v6489_v33  ;;  %v6562_v63 = vmul.f32 %v6559_v21, %v6499_v46  ;;  %v6557_v20 = vmul.f32 %v9168_v22, %v6542_v56 }
0x2cad   :  { %v6565_v10 = vadd.f32 1.0, %v6562_v63  ;;  %8347 = vmatmul.mubr.f32.vlgmr.msra.gmra.mrb[136].mxu0 %v6567_v48  ;;  %v6560_v24 = vsub.f32 1.0, %v6557_v20 }
0x2cae   :  { %8349 = vmatprep.mubr.msk.f32.mxu0 %vm9197_vm3, %v9198_v31 }
0x2caf   :  { %v6568_v40 = vmul.f32 %v6565_v10, %v6490_v52  ;;  %v6563_v53 = vmul.f32 %v6560_v24, %v6500_v42 }
0x2cb1   :  { %8350 = vmatmul.mubr.f32.gmra.mrb[138].mxu0 %v6568_v40  ;;  %v6566_v35 = vadd.f32 1.0, %v6563_v53 }
0x2cb2   :  { %8352 = vmatprep.mubr.msk.f32.mxu0 %vm9197_vm3, %v9198_v31  ;;  %v6680_v31 = vld [vmem:[%s11451_s12] sm:$0xff]  ;;  %s9172_s12 = scalar_lea.vmem %s6769_s18, 32 }
0x2cb3   :  { %v6569_v3 = vmul.f32 %v6566_v35, %v6491_v19  ;;  %p9173_p0 = scmp.ne.s32.totalorder %s6769_s18, %s9172_s12  ;;  %p9178_p2 = scmp.lt.s32.totalorder %s9172_s12, %s9172_s12 }
0x2cb5   :  { %8353 = vmatmul.mubr.f32.gmra.mrb[140].mxu0 %v6569_v3  ;;  %p9179_p3 = por %p9178_p2, %p9177_p1 }
0x2cb7   :  { %p9180_p4 = pnand %p9179_p3, %p9173_p0 }
0x2d80   :  { %v6652_v26 = vpop.f32.mrb[136].mxu0 }
0x2d81   :  { %v8348_v41 = vpop.f32.mrb[137].mxu0 }
0x2d84   :  { %v6656_v61 = vpop.f32.mrb[138].mxu0 }
0x2d85   :  { %v8351_v43 = vpop.f32.mrb[139].mxu0 }
0x2d88   :  { %v6660_v2 = vpop.f32.mrb[140].mxu0 }
0x2d89   :  { %v6664_v39 = vadd.f32 %v6660_v2, %v11285_v1  ;;  %v8354_v14 = vpop.f32.mrb[141].mxu0  ;;  %v8685_v1 = vpack.c.bf16 %v6681_v9, %v6680_v31 }
0x2d8b   :  { %v6666_v17 = vsel %vm223_vm2, %v6664_v39, 0.0  ;;  %8686 = vmatpush3.bf16.msra.mxu1 %v8685_v1 }
0x2d8c   :  { %6667 = vadd.xlane.f32.xlu0 %v6666_v17  ;;  %8687 = vmatprep.subr.bf16.mxu1 %v9196_v28 }
0x2d8f   :  { %8689 = vmatpush3.bf16.msra.mxu1 %v8688_v38 }
0x2e19   :  { %v6668_v51 = vpop.xlane.xlu0 %6667 }
0x2e1a   :  { %v6669_v4 = vmul.f32 0.03125, %v6668_v51 }
0x2e1c   :  { %v6670_v62 = vsub.f32 %v6664_v39, %v6669_v4 }
0x2e1e   :  { %v6671_v15 = vmul.f32 %v6670_v62, %v6670_v62 }
0x2e20   :  { %v6672_v12 = vsel %vm223_vm2, %v6671_v15, 0.0 }
0x2e21   :  { %6673 = vadd.xlane.f32.xlu1 %v6672_v12 }
0x2eae   :  { %v6674_v55 = vpop.xlane.xlu1 %6673 }
0x2eaf   :  { %v6675_v27 = vmul.f32 0.03125, %v6674_v55 }
0x2eb1   :  { %v6676_v30 = vadd.f32 1e-05, %v6675_v27 }
0x2eb3   :  { %9169 = vrsqrt.f32 %v6676_v30 }
0x2ebd   :  { %v9170_v7 = vpop.eup %9169 }
0x2ebe   :  { %v6678_v28 = vmul.f32 %v9170_v7, %v6670_v62 }
0x2ec0   :  { %v6679_v25 = vmul.f32 %v6678_v28, %v6665_v29 }
0x2ec2   :  { %8364 = vmatmul.mubr.msk.f32.vlgmr.msra.gmra.mrb[152].mxu1 %vm174_vm1, %v6679_v25 }
0x2f95   :  { %v6753_v18 = vpop.f32.mrb[152].mxu1 }
0x2f96   :  { %v6758_v49 = vrot.slane %v6753_v18, 7  ;;  %v8365_v8 = vpop.f32.mrb[153].mxu1 }
0x2f98   :  { %v6760_v60 = vsel %vm924_vm8, %v10463_v11, %v6758_v49 }
0x2f99   :  { %6761 = vst [vmem:[#allocation2] sm:$0x3] %v6760_v60 }
0x2f9a   :  { %9183 = shalt.err (!%p9180_p4)
}
0x2f9b   :  { %s9184_s7 = scalar_lea.hbm %s11452_s13, 32 }
0x2f9c   :  { %p9185_p5 = scmp.ne.s32.totalorder %s11452_s13, %s9184_s7  ;;  %p9188_p6 = scmp.lt.u32.totalorder %s9184_s7, %s11452_s13 }
0x2f9e   :  { %p9190_p7 = pnand %p9188_p6, %p9185_p5 }
0x2fa0   :  { %9193 = shalt.err (!%p9190_p7)
}
0x2fa1   :  { %6771 = dma.vmem_to_hbm [thread:$0]  %s6769_s18, 32, %s11452_s13, [#allocation3]  }
0x2fa2   :  { %9194 = dma.done.wait [#allocation3], 32  }
0x2fa3   :  { %9195 = vsyncadd [#allocation3], 4294967264 }
0x2fa4   :  { %6775 = vsyncpa [#allocation3], 1 }

</bundles_post_ra>
